<compile_context>
chip_gen: v5e
topology: v5e:2x2
jax: 0.10.0
libtpu: 0.0.40
codegen_flags: <defaults>
</compile_context>

<pallas_src>
import jax
import jax.numpy as jnp
from jax.experimental import pallas as pl
from jax.experimental.pallas import tpu as pltpu


# ---------------------------------------------------------------------------
# helpers
# ---------------------------------------------------------------------------
def _round_up(x, m):
    return ((x + m - 1) // m) * m


def _pad2(a, rows, cols):
    return jnp.pad(a, ((0, rows - a.shape[0]), (0, cols - a.shape[1])))


def _fold_bn(w, b, bn, eps=1e-5):
    """Fold eval-mode BatchNorm (running stats) into conv weight / bias."""
    scale = bn["gamma"] / jnp.sqrt(bn["var"] + eps)
    return w * scale[:, None, None, None], (b - bn["mean"]) * scale + bn["beta"]


# ---------------------------------------------------------------------------
# fused, tiled matmul kernel:  Y = act(X @ W + b [+ residual])
# ---------------------------------------------------------------------------
def _make_matmul_kernel(activation, has_residual):
    def kernel(x_ref, w_ref, b_ref, *rest):
        if has_residual:
            r_ref, o_ref, acc_ref = rest
        else:
            o_ref, acc_ref = rest
        k_idx = pl.program_id(2)

        @pl.when(k_idx == 0)
        def _():
            acc_ref[...] = jnp.zeros_like(acc_ref)

        acc_ref[...] += jnp.dot(x_ref[...], w_ref[...],
                                preferred_element_type=jnp.float32)

        @pl.when(k_idx == pl.num_programs(2) - 1)
        def _():
            y = acc_ref[...] + b_ref[...]          # f32 epilogue (v5e-friendly)
            if has_residual:
                y = y + r_ref[...]
            if activation == "relu":
                y = jnp.maximum(y, 0.0)
            elif activation == "sigmoid":
                y = pl.reciprocal(1.0 + jnp.exp(-y), approx=True)
            o_ref[...] = y.astype(o_ref.dtype)
    return kernel


def pallas_matmul(x, w, b, residual=None, activation="none"):
    """act(x @ w + b [+ residual]) with bf16 MXU operands and f32 accumulation."""
    m, k = x.shape
    _, n = w.shape
    tm = min(_round_up(m, 8), 256)
    tn = min(_round_up(n, 128), 128)
    tk = min(_round_up(k, 128), 512)
    mp, kp, np_ = _round_up(m, tm), _round_up(k, tk), _round_up(n, tn)

    xp = _pad2(x.astype(jnp.float32), mp, kp).astype(jnp.bfloat16)
    wp = _pad2(w.astype(jnp.float32), kp, np_).astype(jnp.bfloat16)
    bp = jnp.pad(b.astype(jnp.float32), (0, np_ - n)).reshape(1, np_)

    args = [xp, wp, bp]
    in_specs = [
        pl.BlockSpec((tm, tk), lambda i, j, kk: (i, kk)),
        pl.BlockSpec((tk, tn), lambda i, j, kk: (kk, j)),
        pl.BlockSpec((1, tn), lambda i, j, kk: (0, j)),
    ]
    has_residual = residual is not None
    if has_residual:
        args.append(_pad2(residual.astype(jnp.float32), mp, np_))
        in_specs.append(pl.BlockSpec((tm, tn), lambda i, j, kk: (i, j)))

    cost = pl.CostEstimate(
        flops=2 * mp * np_ * kp,
        transcendentals=mp * np_ if activation == "sigmoid" else 0,
        bytes_accessed=(mp * kp + kp * np_) * 2
        + mp * np_ * 4 * (2 if has_residual else 1) + np_ * 4,
    )

    out = pl.pallas_call(
        _make_matmul_kernel(activation, has_residual),
        out_shape=jax.ShapeDtypeStruct((mp, np_), jnp.float32),
        grid_spec=pltpu.PrefetchScalarGridSpec(
            num_scalar_prefetch=0,
            grid=(mp // tm, np_ // tn, kp // tk),   # K innermost (reduction)
            in_specs=in_specs,
            out_specs=pl.BlockSpec((tm, tn), lambda i, j, kk: (i, j)),
            scratch_shapes=[pltpu.VMEM((tm, tn), jnp.float32)],
        ),
        compiler_params=pltpu.CompilerParams(
            dimension_semantics=("parallel", "parallel", "arbitrary")),
        cost_estimate=cost,
    )(*args)
    return out[:m, :n]


# ---------------------------------------------------------------------------
# attention core: softmax(Q K^T) V + x, gridded over batch
# ---------------------------------------------------------------------------
def _attention_kernel(qkv_ref, x_ref, o_ref):
    c = x_ref.shape[-1]
    slot = (qkv_ref.shape[-1] - c) // 2          # 128-aligned q/k slots
    qkv = qkv_ref[0]                             # (HW, 2*slot + C) f32
    q = qkv[:, :slot].astype(jnp.bfloat16)       # padded q cols are exactly 0
    k = qkv[:, slot:2 * slot].astype(jnp.bfloat16)
    v = qkv[:, 2 * slot:].astype(jnp.bfloat16)
    x = x_ref[0]                                 # (HW, C) f32 residual

    s = jax.lax.dot_general(q, k, (((1,), (1,)), ((), ())),
                            preferred_element_type=jnp.float32)   # (HW, HW)
    s = s - jnp.max(s, axis=-1, keepdims=True)
    p = jnp.exp(s)
    p = p * pl.reciprocal(jnp.sum(p, axis=-1, keepdims=True), approx=True)
    o = jnp.dot(p.astype(jnp.bfloat16), v, preferred_element_type=jnp.float32) + x
    o_ref[0] = o.astype(o_ref.dtype)


def pallas_attention(x_nhwc, wq, bq, wk, bk, wv, bv):
    n, h, w, c = x_nhwc.shape
    hw = h * w
    c8 = wq.shape[0]
    slot = _round_up(c8, 128)
    x2 = x_nhwc.reshape(n * hw, c)

    # fused QKV projection, lane-dense output layout [q|0][k|0][v]
    w_qkv = jnp.zeros((c, 2 * slot + c), jnp.float32)
    w_qkv = w_qkv.at[:, :c8].set(wq.reshape(c8, c).T)
    w_qkv = w_qkv.at[:, slot:slot + c8].set(wk.reshape(c8, c).T)
    w_qkv = w_qkv.at[:, 2 * slot:].set(wv.reshape(c, c).T)
    b_qkv = jnp.zeros((2 * slot + c,), jnp.float32)
    b_qkv = b_qkv.at[:c8].set(bq).at[slot:slot + c8].set(bk).at[2 * slot:].set(bv)

    qkv = pallas_matmul(x2, w_qkv, b_qkv)                 # (N*HW, 2*slot + C)
    qkv = qkv.reshape(n, hw, 2 * slot + c)
    x3 = x2.reshape(n, hw, c)

    out = pl.pallas_call(
        _attention_kernel,
        out_shape=jax.ShapeDtypeStruct((n, hw, c), jnp.float32),
        grid_spec=pltpu.PrefetchScalarGridSpec(
            num_scalar_prefetch=0,
            grid=(n,),
            in_specs=[
                pl.BlockSpec((1, hw, 2 * slot + c), lambda b: (b, 0, 0)),
                pl.BlockSpec((1, hw, c), lambda b: (b, 0, 0)),
            ],
            out_specs=pl.BlockSpec((1, hw, c), lambda b: (b, 0, 0)),
        ),
        compiler_params=pltpu.CompilerParams(dimension_semantics=("parallel",)),
    )(qkv, x3)
    return out.reshape(n, h, w, c)


# ---------------------------------------------------------------------------
# layer wrappers (NHWC end-to-end)
# ---------------------------------------------------------------------------
def _im2col_nhwc(x, ksize, stride, padding):
    n, h, w, c = x.shape
    xp = jnp.pad(x, ((0, 0), (padding, padding), (padding, padding), (0, 0)))
    oh = (h + 2 * padding - ksize) // stride + 1
    ow = (w + 2 * padding - ksize) // stride + 1
    cols = []
    for kh in range(ksize):
        for kw in range(ksize):
            cols.append(xp[:, kh:kh + (oh - 1) * stride + 1:stride,
                           kw:kw + (ow - 1) * stride + 1:stride, :])
    patches = jnp.stack(cols, axis=3)                     # (N, OH, OW, k*k, C)
    return patches.reshape(n * oh * ow, ksize * ksize * c), oh, ow


def pallas_conv2d(x_nhwc, w, b, stride=1, padding=1, activation="none",
                  residual=None):
    n = x_nhwc.shape[0]
    c_out, c_in, k, _ = w.shape
    patches, oh, ow = _im2col_nhwc(x_nhwc, k, stride, padding)
    w2 = w.transpose(2, 3, 1, 0).reshape(k * k * c_in, c_out)   # (kh,kw,ci) rows
    res2 = None if residual is None else residual.reshape(n * oh * ow, c_out)
    y = pallas_matmul(patches, w2, b, residual=res2, activation=activation)
    return y.reshape(n, oh, ow, c_out)


# phase p: (input row offsets in 1-padded coords, matching kernel kh taps)
_PHASE_TAPS = {0: ((0, 1), (3, 1)), 1: ((1, 2), (2, 0))}


def pallas_conv_transpose2d(x_nhwc, w_t, b, activation="none"):
    """ConvTranspose2d(k=4, stride=2, padding=1) via sub-pixel phase decomposition:
    each of the 4 output phases is a 2x2 conv of the *undilated* input."""
    n, h, w, c_in = x_nhwc.shape
    c_out = w_t.shape[1]
    xp = jnp.pad(x_nhwc, ((0, 0), (1, 1), (1, 1), (0, 0)))
    phase_rows = []
    for p in (0, 1):
        r_off, r_k = _PHASE_TAPS[p]
        phase_cols = []
        for q in (0, 1):
            c_off, c_k = _PHASE_TAPS[q]
            taps = []
            for i in range(2):
                for j in range(2):
                    taps.append(xp[:, r_off[i]:r_off[i] + h,
                                   c_off[j]:c_off[j] + w, :])
            pm = jnp.stack(taps, axis=3).reshape(n * h * w, 4 * c_in)
            wk = jnp.stack(
                [jnp.stack([w_t[:, :, r_k[i], c_k[j]] for j in range(2)], axis=0)
                 for i in range(2)], axis=0).reshape(4 * c_in, c_out)
            y = pallas_matmul(pm, wk, b, activation=activation)
            phase_cols.append(y.reshape(n, h, w, c_out))
        phase_rows.append(jnp.stack(phase_cols, axis=0))
    out = jnp.stack(phase_rows, axis=0)                   # (2p, 2q, N, H, W, C)
    out = out.transpose(2, 3, 0, 4, 1, 5).reshape(n, 2 * h, 2 * w, c_out)
    return out


def improved_ffdnet_forward(x_nchw, p):
    x = x_nchw.transpose(0, 2, 3, 1)                      # NCHW -> NHWC once
    h = pallas_conv2d(x, p["enc1_w"], p["enc1_b"], 1, 1, "relu")
    h = pallas_conv2d(h, p["enc2_w"], p["enc2_b"], 2, 1, "relu")
    h = pallas_conv2d(h, p["enc3_w"], p["enc3_b"], 2, 1, "relu")
    for blk in p["res"]:
        # TODO(synk): fuse each res block (2 convs + residual) into one kernel.
        w1, b1 = _fold_bn(blk["conv1_w"], blk["conv1_b"], blk["bn1"])
        w2, b2 = _fold_bn(blk["conv2_w"], blk["conv2_b"], blk["bn2"])
        t = pallas_conv2d(h, w1, b1, 1, 1, "relu")
        h = pallas_conv2d(t, w2, b2, 1, 1, "relu", residual=h)
    h = pallas_attention(h, p["att_q_w"], p["att_q_b"],
                         p["att_k_w"], p["att_k_b"],
                         p["att_v_w"], p["att_v_b"])
    h = pallas_conv_transpose2d(h, p["dec1_w"], p["dec1_b"], "relu")
    h = pallas_conv_transpose2d(h, p["dec2_w"], p["dec2_b"], "relu")
    h = pallas_conv2d(h, p["dec3_w"], p["dec3_b"], 1, 1, "sigmoid")
    return h.transpose(0, 3, 1, 2)                        # NHWC -> NCHW once


# ---------------------------------------------------------------------------
# pure-JAX f32 reference (XLA convs) for correctness check
# ---------------------------------------------------------------------------
_REF_PREC = jax.lax.Precision.HIGHEST


def _ref_conv(x, w, b, stride=1, padding=0, lhs_dilation=1):
    out = jax.lax.conv_general_dilated(
        x, w, window_strides=(stride, stride),
        padding=((padding, padding), (padding, padding)),
        lhs_dilation=(lhs_dilation, lhs_dilation),
        dimension_numbers=("NCHW", "OIHW", "NCHW"),
        precision=_REF_PREC)
    return out + b[None, :, None, None]


def ref_forward(x, p):
    h = jax.nn.relu(_ref_conv(x, p["enc1_w"], p["enc1_b"], 1, 1))
    h = jax.nn.relu(_ref_conv(h, p["enc2_w"], p["enc2_b"], 2, 1))
    h = jax.nn.relu(_ref_conv(h, p["enc3_w"], p["enc3_b"], 2, 1))
    for blk in p["res"]:
        w1, b1 = _fold_bn(blk["conv1_w"], blk["conv1_b"], blk["bn1"])
        w2, b2 = _fold_bn(blk["conv2_w"], blk["conv2_b"], blk["bn2"])
        t = jax.nn.relu(_ref_conv(h, w1, b1, 1, 1))
        h = jax.nn.relu(_ref_conv(t, w2, b2, 1, 1) + h)
    n, c, hh, ww = h.shape
    hw = hh * ww
    q = _ref_conv(h, p["att_q_w"], p["att_q_b"]).reshape(n, -1, hw)
    k = _ref_conv(h, p["att_k_w"], p["att_k_b"]).reshape(n, -1, hw)
    v = _ref_conv(h, p["att_v_w"], p["att_v_b"]).reshape(n, -1, hw)
    attn = jax.nn.softmax(
        jnp.einsum("bdi,bdj->bij", q, k, precision=_REF_PREC), axis=-1)
    out = jnp.einsum("bcj,bij->bci", v, attn, precision=_REF_PREC)
    h = out.reshape(n, c, hh, ww) + h
    w1 = jnp.flip(p["dec1_w"], axis=(2, 3)).transpose(1, 0, 2, 3)
    h = jax.nn.relu(_ref_conv(h, w1, p["dec1_b"], 1, 2, lhs_dilation=2))
    w2 = jnp.flip(p["dec2_w"], axis=(2, 3)).transpose(1, 0, 2, 3)
    h = jax.nn.relu(_ref_conv(h, w2, p["dec2_b"], 1, 2, lhs_dilation=2))
    h = jax.nn.sigmoid(_ref_conv(h, p["dec3_w"], p["dec3_b"], 1, 1))
    return h


# ---------------------------------------------------------------------------
# deterministic parameter construction
# ---------------------------------------------------------------------------
def _conv_init(key, c_out, c_in, k):
    k1, k2 = jax.random.split(key)
    fan_in = c_in * k * k
    w = jax.random.normal(k1, (c_out, c_in, k, k), jnp.float32) * (0.5 / fan_in ** 0.5)
    b = jax.random.normal(k2, (c_out,), jnp.float32) * 0.01
    return w, b


def _convT_init(key, c_in, c_out, k):
    k1, k2 = jax.random.split(key)
    fan_in = c_in * k * k
    w = jax.random.normal(k1, (c_in, c_out, k, k), jnp.float32) * (0.5 / fan_in ** 0.5)
    b = jax.random.normal(k2, (c_out,), jnp.float32) * 0.01
    return w, b


def _bn_init(key, c):
    k1, k2, k3, k4 = jax.random.split(key, 4)
    return {"gamma": 1.0 + 0.1 * jax.random.normal(k1, (c,), jnp.float32),
            "beta": 0.1 * jax.random.normal(k2, (c,), jnp.float32),
            "mean": 0.1 * jax.random.normal(k3, (c,), jnp.float32),
            "var": 0.5 + jax.random.uniform(k4, (c,), jnp.float32)}


def init_params(key):
    keys = iter(jax.random.split(key, 64))
    p = {}
    p["enc1_w"], p["enc1_b"] = _conv_init(next(keys), 64, 3, 3)
    p["enc2_w"], p["enc2_b"] = _conv_init(next(keys), 128, 64, 3)
    p["enc3_w"], p["enc3_b"] = _conv_init(next(keys), 256, 128, 3)
    res = []
    for _ in range(6):
        blk = {}
        blk["conv1_w"], blk["conv1_b"] = _conv_init(next(keys), 256, 256, 3)
        blk["bn1"] = _bn_init(next(keys), 256)
        blk["conv2_w"], blk["conv2_b"] = _conv_init(next(keys), 256, 256, 3)
        blk["bn2"] = _bn_init(next(keys), 256)
        res.append(blk)
    p["res"] = res
    p["att_q_w"], p["att_q_b"] = _conv_init(next(keys), 32, 256, 1)
    p["att_k_w"], p["att_k_b"] = _conv_init(next(keys), 32, 256, 1)
    p["att_v_w"], p["att_v_b"] = _conv_init(next(keys), 256, 256, 1)
    p["dec1_w"], p["dec1_b"] = _convT_init(next(keys), 256, 128, 4)
    p["dec2_w"], p["dec2_b"] = _convT_init(next(keys), 128, 64, 4)
    p["dec3_w"], p["dec3_b"] = _conv_init(next(keys), 3, 64, 3)
    return p


# ---------------------------------------------------------------------------
if __name__ == "__main__":
    key = jax.random.PRNGKey(0)
    k_params, k_x = jax.random.split(key)
    params = init_params(k_params)
    x = jax.random.uniform(k_x, (2, 3, 16, 16), dtype=jnp.float32)

    out = jax.block_until_ready(jax.jit(improved_ffdnet_forward)(x, params))
    ref = jax.block_until_ready(jax.jit(ref_forward)(x, params))

    assert out.shape == (2, 3, 16, 16), out.shape
    max_err = float(jnp.max(jnp.abs(out - ref)))
    # bf16 MXU operands vs. f32-HIGHEST reference: tolerance retuned accordingly.
    assert jnp.allclose(out, ref, rtol=2e-2, atol=2e-2), ("max_err", max_err)

    print("KERNEL_OK")
</pallas_src>

<mosaic_0001>
module attributes {stable_mosaic.version = 11 : i64} {
  func.func @kernel(%arg0: i32, %arg1: i32, %arg2: i32, %arg3: memref<256x128xbf16, #tpu.memory_space<vmem>>, %arg4: memref<128x128xbf16, #tpu.memory_space<vmem>>, %arg5: memref<1x128xf32, #tpu.memory_space<vmem>>, %arg6: memref<256x128xf32, #tpu.memory_space<vmem>>, %arg7: memref<256x128xf32, #tpu.memory_space<vmem>>) attributes {dimension_semantics = [#tpu.dimension_semantics<parallel>, #tpu.dimension_semantics<parallel>, #tpu.dimension_semantics<arbitrary>], iteration_bounds = array<i64: 2, 1, 1>, scalar_prefetch = 0 : i64, scratch_operands = 1 : i64, tpu.core_type = #tpu.core_type<tc>, window_params = [{transform_indices = @transform_0, window_bounds = array<i64: 256, 128>}, {transform_indices = @transform_1, window_bounds = array<i64: 128, 128>}, {transform_indices = @transform_2, window_bounds = array<i64: 1, 128>}, {transform_indices = @transform_3, window_bounds = array<i64: 256, 128>}]} {
    %c0_i32 = arith.constant 0 : i32
    %0 = arith.cmpi eq, %arg2, %c0_i32 : i32
    %1 = arith.extui %0 : i1 to i32
    %c0_i32_0 = arith.constant 0 : i32
    %2 = arith.cmpi ne, %1, %c0_i32_0 : i32
    scf.if %2 {
      %cst_10 = arith.constant 0.000000e+00 : f32
      %12 = vector.broadcast %cst_10 : f32 to vector<256x128xf32>
      %c0_11 = arith.constant 0 : index
      %c0_12 = arith.constant 0 : index
      %13 = vector.load %arg7[%c0_11, %c0_12] : memref<256x128xf32, #tpu.memory_space<vmem>>, vector<256x128xf32>
      tpu.vector_store %arg7[%c0_11, %c0_12], %12 {strides = array<i32>} : memref<256x128xf32, #tpu.memory_space<vmem>>, vector<256x128xf32>,
    } else {
    }
    %c0 = arith.constant 0 : index
    %c0_1 = arith.constant 0 : index
    %3 = vector.load %arg7[%c0, %c0_1] : memref<256x128xf32, #tpu.memory_space<vmem>>, vector<256x128xf32>
    %c0_2 = arith.constant 0 : index
    %c0_3 = arith.constant 0 : index
    %4 = vector.load %arg3[%c0_2, %c0_3] : memref<256x128xbf16, #tpu.memory_space<vmem>>, vector<256x128xbf16>
    %c0_4 = arith.constant 0 : index
    %c0_5 = arith.constant 0 : index
    %5 = vector.load %arg4[%c0_4, %c0_5] : memref<128x128xbf16, #tpu.memory_space<vmem>>, vector<128x128xbf16>
    %cst = arith.constant dense<0.000000e+00> : vector<256x128xf32>
    %6 = tpu.matmul %4, %5, %cst {dimension_numbers = #tpu.dot_dimension_numbers<[1], [0], [0], [1], [0, 0, 1, 1], [], []>} : vector<256x128xbf16>, vector<128x128xbf16>, vector<256x128xf32> -> vector<256x128xf32>
    %7 = arith.addf %3, %6 : vector<256x128xf32>
    %c0_6 = arith.constant 0 : index
    %c0_7 = arith.constant 0 : index
    %8 = vector.load %arg7[%c0_6, %c0_7] : memref<256x128xf32, #tpu.memory_space<vmem>>, vector<256x128xf32>
    tpu.vector_store %arg7[%c0_6, %c0_7], %7 {strides = array<i32>} : memref<256x128xf32, #tpu.memory_space<vmem>>, vector<256x128xf32>,
    %c0_i32_8 = arith.constant 0 : i32
    %9 = arith.cmpi eq, %arg2, %c0_i32_8 : i32
    %10 = arith.extui %9 : i1 to i32
    %c0_i32_9 = arith.constant 0 : i32
    %11 = arith.cmpi ne, %10, %c0_i32_9 : i32
    scf.if %11 {
      %c0_10 = arith.constant 0 : index
      %c0_11 = arith.constant 0 : index
      %12 = vector.load %arg7[%c0_10, %c0_11] : memref<256x128xf32, #tpu.memory_space<vmem>>, vector<256x128xf32>
      %c0_12 = arith.constant 0 : index
      %c0_13 = arith.constant 0 : index
      %13 = vector.load %arg5[%c0_12, %c0_13] : memref<1x128xf32, #tpu.memory_space<vmem>>, vector<1x128xf32>
      %14 = vector.broadcast %13 : vector<1x128xf32> to vector<256x128xf32>
      %15 = arith.addf %12, %14 : vector<256x128xf32>
      %cst_14 = arith.constant 0.000000e+00 : f32
      %16 = vector.broadcast %cst_14 : f32 to vector<256x128xf32>
      %17 = arith.maximumf %15, %16 : vector<256x128xf32>
      %c0_15 = arith.constant 0 : index
      %c0_16 = arith.constant 0 : index
      %18 = vector.load %arg6[%c0_15, %c0_16] : memref<256x128xf32, #tpu.memory_space<vmem>>, vector<256x128xf32>
      tpu.vector_store %arg6[%c0_15, %c0_16], %17 {strides = array<i32>} : memref<256x128xf32, #tpu.memory_space<vmem>>, vector<256x128xf32>,
    } else {
    }
    return
  }
  func.func @transform_0(%arg0: i32, %arg1: i32, %arg2: i32) -> (i32, i32) {
    %c0_i32 = arith.constant 0 : i32
    return %arg0, %arg2 : i32, i32
  }
  func.func @transform_1(%arg0: i32, %arg1: i32, %arg2: i32) -> (i32, i32) {
    %c0_i32 = arith.constant 0 : i32
    return %arg2, %arg1 : i32, i32
  }
  func.func @transform_2(%arg0: i32, %arg1: i32, %arg2: i32) -> (i32, i32) {
    %c0_i32 = arith.constant 0 : i32
    %c0_i32_0 = arith.constant 0 : i32
    return %c0_i32, %arg1 : i32, i32
  }
  func.func @transform_3(%arg0: i32, %arg1: i32, %arg2: i32) -> (i32, i32) {
    %c0_i32 = arith.constant 0 : i32
    return %arg0, %arg1 : i32, i32
  }
}

module attributes {stable_mosaic.version = 11 : i64} {
  func.func @kernel(%arg0: i32, %arg1: i32, %arg2: i32, %arg3: memref<128x512xbf16, #tpu.memory_space<vmem>>, %arg4: memref<512x128xbf16, #tpu.memory_space<vmem>>, %arg5: memref<1x128xf32, #tpu.memory_space<vmem>>, %arg6: memref<128x128xf32, #tpu.memory_space<vmem>>, %arg7: memref<128x128xf32, #tpu.memory_space<vmem>>) attributes {dimension_semantics = [#tpu.dimension_semantics<parallel>, #tpu.dimension_semantics<parallel>, #tpu.dimension_semantics<arbitrary>], iteration_bounds = array<i64: 1, 1, 2>, scalar_prefetch = 0 : i64, scratch_operands = 1 : i64, tpu.core_type = #tpu.core_type<tc>, window_params = [{transform_indices = @transform_0, window_bounds = array<i64: 128, 512>}, {transform_indices = @transform_1, window_bounds = array<i64: 512, 128>}, {transform_indices = @transform_2, window_bounds = array<i64: 1, 128>}, {transform_indices = @transform_3, window_bounds = array<i64: 128, 128>}]} {
    %c0_i32 = arith.constant 0 : i32
    %0 = arith.cmpi eq, %arg2, %c0_i32 : i32
    %1 = arith.extui %0 : i1 to i32
    %c0_i32_0 = arith.constant 0 : i32
    %2 = arith.cmpi ne, %1, %c0_i32_0 : i32
    scf.if %2 {
      %cst_9 = arith.constant 0.000000e+00 : f32
      %12 = vector.broadcast %cst_9 : f32 to vector<128x128xf32>
      %c0_10 = arith.constant 0 : index
      %c0_11 = arith.constant 0 : index
      %13 = vector.load %arg7[%c0_10, %c0_11] : memref<128x128xf32, #tpu.memory_space<vmem>>, vector<128x128xf32>
      tpu.vector_store %arg7[%c0_10, %c0_11], %12 {strides = array<i32>} : memref<128x128xf32, #tpu.memory_space<vmem>>, vector<128x128xf32>,
    } else {
    }
    %c0 = arith.constant 0 : index
    %c0_1 = arith.constant 0 : index
    %3 = vector.load %arg7[%c0, %c0_1] : memref<128x128xf32, #tpu.memory_space<vmem>>, vector<128x128xf32>
    %c0_2 = arith.constant 0 : index
    %c0_3 = arith.constant 0 : index
    %4 = vector.load %arg3[%c0_2, %c0_3] : memref<128x512xbf16, #tpu.memory_space<vmem>>, vector<128x512xbf16>
    %c0_4 = arith.constant 0 : index
    %c0_5 = arith.constant 0 : index
    %5 = vector.load %arg4[%c0_4, %c0_5] : memref<512x128xbf16, #tpu.memory_space<vmem>>, vector<512x128xbf16>
    %cst = arith.constant dense<0.000000e+00> : vector<128x128xf32>
    %6 = tpu.matmul %4, %5, %cst {dimension_numbers = #tpu.dot_dimension_numbers<[1], [0], [0], [1], [0, 0, 1, 1], [], []>} : vector<128x512xbf16>, vector<512x128xbf16>, vector<128x128xf32> -> vector<128x128xf32>
    %7 = arith.addf %3, %6 : vector<128x128xf32>
    %c0_6 = arith.constant 0 : index
    %c0_7 = arith.constant 0 : index
    %8 = vector.load %arg7[%c0_6, %c0_7] : memref<128x128xf32, #tpu.memory_space<vmem>>, vector<128x128xf32>
    tpu.vector_store %arg7[%c0_6, %c0_7], %7 {strides = array<i32>} : memref<128x128xf32, #tpu.memory_space<vmem>>, vector<128x128xf32>,
    %c1_i32 = arith.constant 1 : i32
    %9 = arith.cmpi eq, %arg2, %c1_i32 : i32
    %10 = arith.extui %9 : i1 to i32
    %c0_i32_8 = arith.constant 0 : i32
    %11 = arith.cmpi ne, %10, %c0_i32_8 : i32
    scf.if %11 {
      %c0_9 = arith.constant 0 : index
      %c0_10 = arith.constant 0 : index
      %12 = vector.load %arg7[%c0_9, %c0_10] : memref<128x128xf32, #tpu.memory_space<vmem>>, vector<128x128xf32>
      %c0_11 = arith.constant 0 : index
      %c0_12 = arith.constant 0 : index
      %13 = vector.load %arg5[%c0_11, %c0_12] : memref<1x128xf32, #tpu.memory_space<vmem>>, vector<1x128xf32>
      %14 = vector.broadcast %13 : vector<1x128xf32> to vector<128x128xf32>
      %15 = arith.addf %12, %14 : vector<128x128xf32>
      %cst_13 = arith.constant 0.000000e+00 : f32
      %16 = vector.broadcast %cst_13 : f32 to vector<128x128xf32>
      %17 = arith.maximumf %15, %16 : vector<128x128xf32>
      %c0_14 = arith.constant 0 : index
      %c0_15 = arith.constant 0 : index
      %18 = vector.load %arg6[%c0_14, %c0_15] : memref<128x128xf32, #tpu.memory_space<vmem>>, vector<128x128xf32>
      tpu.vector_store %arg6[%c0_14, %c0_15], %17 {strides = array<i32>} : memref<128x128xf32, #tpu.memory_space<vmem>>, vector<128x128xf32>,
    } else {
    }
    return
  }
  func.func @transform_0(%arg0: i32, %arg1: i32, %arg2: i32) -> (i32, i32) {
    %c0_i32 = arith.constant 0 : i32
    return %arg0, %arg2 : i32, i32
  }
  func.func @transform_1(%arg0: i32, %arg1: i32, %arg2: i32) -> (i32, i32) {
    %c0_i32 = arith.constant 0 : i32
    return %arg2, %arg1 : i32, i32
  }
  func.func @transform_2(%arg0: i32, %arg1: i32, %arg2: i32) -> (i32, i32) {
    %c0_i32 = arith.constant 0 : i32
    %c0_i32_0 = arith.constant 0 : i32
    return %c0_i32, %arg1 : i32, i32
  }
  func.func @transform_3(%arg0: i32, %arg1: i32, %arg2: i32) -> (i32, i32) {
    %c0_i32 = arith.constant 0 : i32
    return %arg0, %arg1 : i32, i32
  }
}

module attributes {stable_mosaic.version = 11 : i64} {
  func.func @kernel(%arg0: i32, %arg1: i32, %arg2: i32, %arg3: memref<32x512xbf16, #tpu.memory_space<vmem>>, %arg4: memref<512x128xbf16, #tpu.memory_space<vmem>>, %arg5: memref<1x128xf32, #tpu.memory_space<vmem>>, %arg6: memref<32x128xf32, #tpu.memory_space<vmem>>, %arg7: memref<32x128xf32, #tpu.memory_space<vmem>>) attributes {dimension_semantics = [#tpu.dimension_semantics<parallel>, #tpu.dimension_semantics<parallel>, #tpu.dimension_semantics<arbitrary>], iteration_bounds = array<i64: 1, 2, 3>, scalar_prefetch = 0 : i64, scratch_operands = 1 : i64, tpu.core_type = #tpu.core_type<tc>, window_params = [{transform_indices = @transform_0, window_bounds = array<i64: 32, 512>}, {transform_indices = @transform_1, window_bounds = array<i64: 512, 128>}, {transform_indices = @transform_2, window_bounds = array<i64: 1, 128>}, {transform_indices = @transform_3, window_bounds = array<i64: 32, 128>}]} {
    %c0_i32 = arith.constant 0 : i32
    %0 = arith.cmpi eq, %arg2, %c0_i32 : i32
    %1 = arith.extui %0 : i1 to i32
    %c0_i32_0 = arith.constant 0 : i32
    %2 = arith.cmpi ne, %1, %c0_i32_0 : i32
    scf.if %2 {
      %cst_9 = arith.constant 0.000000e+00 : f32
      %12 = vector.broadcast %cst_9 : f32 to vector<32x128xf32>
      %c0_10 = arith.constant 0 : index
      %c0_11 = arith.constant 0 : index
      %13 = vector.load %arg7[%c0_10, %c0_11] : memref<32x128xf32, #tpu.memory_space<vmem>>, vector<32x128xf32>
      tpu.vector_store %arg7[%c0_10, %c0_11], %12 {strides = array<i32>} : memref<32x128xf32, #tpu.memory_space<vmem>>, vector<32x128xf32>,
    } else {
    }
    %c0 = arith.constant 0 : index
    %c0_1 = arith.constant 0 : index
    %3 = vector.load %arg7[%c0, %c0_1] : memref<32x128xf32, #tpu.memory_space<vmem>>, vector<32x128xf32>
    %c0_2 = arith.constant 0 : index
    %c0_3 = arith.constant 0 : index
    %4 = vector.load %arg3[%c0_2, %c0_3] : memref<32x512xbf16, #tpu.memory_space<vmem>>, vector<32x512xbf16>
    %c0_4 = arith.constant 0 : index
    %c0_5 = arith.constant 0 : index
    %5 = vector.load %arg4[%c0_4, %c0_5] : memref<512x128xbf16, #tpu.memory_space<vmem>>, vector<512x128xbf16>
    %cst = arith.constant dense<0.000000e+00> : vector<32x128xf32>
    %6 = tpu.matmul %4, %5, %cst {dimension_numbers = #tpu.dot_dimension_numbers<[1], [0], [0], [1], [0, 0, 1, 1], [], []>} : vector<32x512xbf16>, vector<512x128xbf16>, vector<32x128xf32> -> vector<32x128xf32>
    %7 = arith.addf %3, %6 : vector<32x128xf32>
    %c0_6 = arith.constant 0 : index
    %c0_7 = arith.constant 0 : index
    %8 = vector.load %arg7[%c0_6, %c0_7] : memref<32x128xf32, #tpu.memory_space<vmem>>, vector<32x128xf32>
    tpu.vector_store %arg7[%c0_6, %c0_7], %7 {strides = array<i32>} : memref<32x128xf32, #tpu.memory_space<vmem>>, vector<32x128xf32>,
    %c2_i32 = arith.constant 2 : i32
    %9 = arith.cmpi eq, %arg2, %c2_i32 : i32
    %10 = arith.extui %9 : i1 to i32
    %c0_i32_8 = arith.constant 0 : i32
    %11 = arith.cmpi ne, %10, %c0_i32_8 : i32
    scf.if %11 {
      %c0_9 = arith.constant 0 : index
      %c0_10 = arith.constant 0 : index
      %12 = vector.load %arg7[%c0_9, %c0_10] : memref<32x128xf32, #tpu.memory_space<vmem>>, vector<32x128xf32>
      %c0_11 = arith.constant 0 : index
      %c0_12 = arith.constant 0 : index
      %13 = vector.load %arg5[%c0_11, %c0_12] : memref<1x128xf32, #tpu.memory_space<vmem>>, vector<1x128xf32>
      %14 = vector.broadcast %13 : vector<1x128xf32> to vector<32x128xf32>
      %15 = arith.addf %12, %14 : vector<32x128xf32>
      %cst_13 = arith.constant 0.000000e+00 : f32
      %16 = vector.broadcast %cst_13 : f32 to vector<32x128xf32>
      %17 = arith.maximumf %15, %16 : vector<32x128xf32>
      %c0_14 = arith.constant 0 : index
      %c0_15 = arith.constant 0 : index
      %18 = vector.load %arg6[%c0_14, %c0_15] : memref<32x128xf32, #tpu.memory_space<vmem>>, vector<32x128xf32>
      tpu.vector_store %arg6[%c0_14, %c0_15], %17 {strides = array<i32>} : memref<32x128xf32, #tpu.memory_space<vmem>>, vector<32x128xf32>,
    } else {
    }
    return
  }
  func.func @transform_0(%arg0: i32, %arg1: i32, %arg2: i32) -> (i32, i32) {
    %c0_i32 = arith.constant 0 : i32
    return %arg0, %arg2 : i32, i32
  }
  func.func @transform_1(%arg0: i32, %arg1: i32, %arg2: i32) -> (i32, i32) {
    %c0_i32 = arith.constant 0 : i32
    return %arg2, %arg1 : i32, i32
  }
  func.func @transform_2(%arg0: i32, %arg1: i32, %arg2: i32) -> (i32, i32) {
    %c0_i32 = arith.constant 0 : i32
    %c0_i32_0 = arith.constant 0 : i32
    return %c0_i32, %arg1 : i32, i32
  }
  func.func @transform_3(%arg0: i32, %arg1: i32, %arg2: i32) -> (i32, i32) {
    %c0_i32 = arith.constant 0 : i32
    return %arg0, %arg1 : i32, i32
  }
}

module attributes {stable_mosaic.version = 11 : i64} {
  func.func @kernel(%arg0: i32, %arg1: i32, %arg2: i32, %arg3: memref<32x512xbf16, #tpu.memory_space<vmem>>, %arg4: memref<512x128xbf16, #tpu.memory_space<vmem>>, %arg5: memref<1x128xf32, #tpu.memory_space<vmem>>, %arg6: memref<32x128xf32, #tpu.memory_space<vmem>>, %arg7: memref<32x128xf32, #tpu.memory_space<vmem>>) attributes {dimension_semantics = [#tpu.dimension_semantics<parallel>, #tpu.dimension_semantics<parallel>, #tpu.dimension_semantics<arbitrary>], iteration_bounds = array<i64: 1, 2, 5>, scalar_prefetch = 0 : i64, scratch_operands = 1 : i64, tpu.core_type = #tpu.core_type<tc>, window_params = [{transform_indices = @transform_0, window_bounds = array<i64: 32, 512>}, {transform_indices = @transform_1, window_bounds = array<i64: 512, 128>}, {transform_indices = @transform_2, window_bounds = array<i64: 1, 128>}, {transform_indices = @transform_3, window_bounds = array<i64: 32, 128>}]} {
    %c0_i32 = arith.constant 0 : i32
    %0 = arith.cmpi eq, %arg2, %c0_i32 : i32
    %1 = arith.extui %0 : i1 to i32
    %c0_i32_0 = arith.constant 0 : i32
    %2 = arith.cmpi ne, %1, %c0_i32_0 : i32
    scf.if %2 {
      %cst_9 = arith.constant 0.000000e+00 : f32
      %12 = vector.broadcast %cst_9 : f32 to vector<32x128xf32>
      %c0_10 = arith.constant 0 : index
      %c0_11 = arith.constant 0 : index
      %13 = vector.load %arg7[%c0_10, %c0_11] : memref<32x128xf32, #tpu.memory_space<vmem>>, vector<32x128xf32>
      tpu.vector_store %arg7[%c0_10, %c0_11], %12 {strides = array<i32>} : memref<32x128xf32, #tpu.memory_space<vmem>>, vector<32x128xf32>,
    } else {
    }
    %c0 = arith.constant 0 : index
    %c0_1 = arith.constant 0 : index
    %3 = vector.load %arg7[%c0, %c0_1] : memref<32x128xf32, #tpu.memory_space<vmem>>, vector<32x128xf32>
    %c0_2 = arith.constant 0 : index
    %c0_3 = arith.constant 0 : index
    %4 = vector.load %arg3[%c0_2, %c0_3] : memref<32x512xbf16, #tpu.memory_space<vmem>>, vector<32x512xbf16>
    %c0_4 = arith.constant 0 : index
    %c0_5 = arith.constant 0 : index
    %5 = vector.load %arg4[%c0_4, %c0_5] : memref<512x128xbf16, #tpu.memory_space<vmem>>, vector<512x128xbf16>
    %cst = arith.constant dense<0.000000e+00> : vector<32x128xf32>
    %6 = tpu.matmul %4, %5, %cst {dimension_numbers = #tpu.dot_dimension_numbers<[1], [0], [0], [1], [0, 0, 1, 1], [], []>} : vector<32x512xbf16>, vector<512x128xbf16>, vector<32x128xf32> -> vector<32x128xf32>
    %7 = arith.addf %3, %6 : vector<32x128xf32>
    %c0_6 = arith.constant 0 : index
    %c0_7 = arith.constant 0 : index
    %8 = vector.load %arg7[%c0_6, %c0_7] : memref<32x128xf32, #tpu.memory_space<vmem>>, vector<32x128xf32>
    tpu.vector_store %arg7[%c0_6, %c0_7], %7 {strides = array<i32>} : memref<32x128xf32, #tpu.memory_space<vmem>>, vector<32x128xf32>,
    %c4_i32 = arith.constant 4 : i32
    %9 = arith.cmpi eq, %arg2, %c4_i32 : i32
    %10 = arith.extui %9 : i1 to i32
    %c0_i32_8 = arith.constant 0 : i32
    %11 = arith.cmpi ne, %10, %c0_i32_8 : i32
    scf.if %11 {
      %c0_9 = arith.constant 0 : index
      %c0_10 = arith.constant 0 : index
      %12 = vector.load %arg7[%c0_9, %c0_10] : memref<32x128xf32, #tpu.memory_space<vmem>>, vector<32x128xf32>
      %c0_11 = arith.constant 0 : index
      %c0_12 = arith.constant 0 : index
      %13 = vector.load %arg5[%c0_11, %c0_12] : memref<1x128xf32, #tpu.memory_space<vmem>>, vector<1x128xf32>
      %14 = vector.broadcast %13 : vector<1x128xf32> to vector<32x128xf32>
      %15 = arith.addf %12, %14 : vector<32x128xf32>
      %cst_13 = arith.constant 0.000000e+00 : f32
      %16 = vector.broadcast %cst_13 : f32 to vector<32x128xf32>
      %17 = arith.maximumf %15, %16 : vector<32x128xf32>
      %c0_14 = arith.constant 0 : index
      %c0_15 = arith.constant 0 : index
      %18 = vector.load %arg6[%c0_14, %c0_15] : memref<32x128xf32, #tpu.memory_space<vmem>>, vector<32x128xf32>
      tpu.vector_store %arg6[%c0_14, %c0_15], %17 {strides = array<i32>} : memref<32x128xf32, #tpu.memory_space<vmem>>, vector<32x128xf32>,
    } else {
    }
    return
  }
  func.func @transform_0(%arg0: i32, %arg1: i32, %arg2: i32) -> (i32, i32) {
    %c0_i32 = arith.constant 0 : i32
    return %arg0, %arg2 : i32, i32
  }
  func.func @transform_1(%arg0: i32, %arg1: i32, %arg2: i32) -> (i32, i32) {
    %c0_i32 = arith.constant 0 : i32
    return %arg2, %arg1 : i32, i32
  }
  func.func @transform_2(%arg0: i32, %arg1: i32, %arg2: i32) -> (i32, i32) {
    %c0_i32 = arith.constant 0 : i32
    %c0_i32_0 = arith.constant 0 : i32
    return %c0_i32, %arg1 : i32, i32
  }
  func.func @transform_3(%arg0: i32, %arg1: i32, %arg2: i32) -> (i32, i32) {
    %c0_i32 = arith.constant 0 : i32
    return %arg0, %arg1 : i32, i32
  }
}

module attributes {stable_mosaic.version = 11 : i64} {
  func.func @kernel(%arg0: i32, %arg1: i32, %arg2: i32, %arg3: memref<32x512xbf16, #tpu.memory_space<vmem>>, %arg4: memref<512x128xbf16, #tpu.memory_space<vmem>>, %arg5: memref<1x128xf32, #tpu.memory_space<vmem>>, %arg6: memref<32x128xf32, #tpu.memory_space<vmem>>, %arg7: memref<32x128xf32, #tpu.memory_space<vmem>>, %arg8: memref<32x128xf32, #tpu.memory_space<vmem>>) attributes {dimension_semantics = [#tpu.dimension_semantics<parallel>, #tpu.dimension_semantics<parallel>, #tpu.dimension_semantics<arbitrary>], iteration_bounds = array<i64: 1, 2, 5>, scalar_prefetch = 0 : i64, scratch_operands = 1 : i64, tpu.core_type = #tpu.core_type<tc>, window_params = [{transform_indices = @transform_0, window_bounds = array<i64: 32, 512>}, {transform_indices = @transform_1, window_bounds = array<i64: 512, 128>}, {transform_indices = @transform_2, window_bounds = array<i64: 1, 128>}, {transform_indices = @transform_3, window_bounds = array<i64: 32, 128>}, {transform_indices = @transform_4, window_bounds = array<i64: 32, 128>}]} {
    %c0_i32 = arith.constant 0 : i32
    %0 = arith.cmpi eq, %arg2, %c0_i32 : i32
    %1 = arith.extui %0 : i1 to i32
    %c0_i32_0 = arith.constant 0 : i32
    %2 = arith.cmpi ne, %1, %c0_i32_0 : i32
    scf.if %2 {
      %cst_9 = arith.constant 0.000000e+00 : f32
      %12 = vector.broadcast %cst_9 : f32 to vector<32x128xf32>
      %c0_10 = arith.constant 0 : index
      %c0_11 = arith.constant 0 : index
      %13 = vector.load %arg8[%c0_10, %c0_11] : memref<32x128xf32, #tpu.memory_space<vmem>>, vector<32x128xf32>
      tpu.vector_store %arg8[%c0_10, %c0_11], %12 {strides = array<i32>} : memref<32x128xf32, #tpu.memory_space<vmem>>, vector<32x128xf32>,
    } else {
    }
    %c0 = arith.constant 0 : index
    %c0_1 = arith.constant 0 : index
    %3 = vector.load %arg8[%c0, %c0_1] : memref<32x128xf32, #tpu.memory_space<vmem>>, vector<32x128xf32>
    %c0_2 = arith.constant 0 : index
    %c0_3 = arith.constant 0 : index
    %4 = vector.load %arg3[%c0_2, %c0_3] : memref<32x512xbf16, #tpu.memory_space<vmem>>, vector<32x512xbf16>
    %c0_4 = arith.constant 0 : index
    %c0_5 = arith.constant 0 : index
    %5 = vector.load %arg4[%c0_4, %c0_5] : memref<512x128xbf16, #tpu.memory_space<vmem>>, vector<512x128xbf16>
    %cst = arith.constant dense<0.000000e+00> : vector<32x128xf32>
    %6 = tpu.matmul %4, %5, %cst {dimension_numbers = #tpu.dot_dimension_numbers<[1], [0], [0], [1], [0, 0, 1, 1], [], []>} : vector<32x512xbf16>, vector<512x128xbf16>, vector<32x128xf32> -> vector<32x128xf32>
    %7 = arith.addf %3, %6 : vector<32x128xf32>
    %c0_6 = arith.constant 0 : index
    %c0_7 = arith.constant 0 : index
    %8 = vector.load %arg8[%c0_6, %c0_7] : memref<32x128xf32, #tpu.memory_space<vmem>>, vector<32x128xf32>
    tpu.vector_store %arg8[%c0_6, %c0_7], %7 {strides = array<i32>} : memref<32x128xf32, #tpu.memory_space<vmem>>, vector<32x128xf32>,
    %c4_i32 = arith.constant 4 : i32
    %9 = arith.cmpi eq, %arg2, %c4_i32 : i32
    %10 = arith.extui %9 : i1 to i32
    %c0_i32_8 = arith.constant 0 : i32
    %11 = arith.cmpi ne, %10, %c0_i32_8 : i32
    scf.if %11 {
      %c0_9 = arith.constant 0 : index
      %c0_10 = arith.constant 0 : index
      %12 = vector.load %arg8[%c0_9, %c0_10] : memref<32x128xf32, #tpu.memory_space<vmem>>, vector<32x128xf32>
      %c0_11 = arith.constant 0 : index
      %c0_12 = arith.constant 0 : index
      %13 = vector.load %arg5[%c0_11, %c0_12] : memref<1x128xf32, #tpu.memory_space<vmem>>, vector<1x128xf32>
      %14 = vector.broadcast %13 : vector<1x128xf32> to vector<32x128xf32>
      %15 = arith.addf %12, %14 : vector<32x128xf32>
      %c0_13 = arith.constant 0 : index
      %c0_14 = arith.constant 0 : index
      %16 = vector.load %arg6[%c0_13, %c0_14] : memref<32x128xf32, #tpu.memory_space<vmem>>, vector<32x128xf32>
      %17 = arith.addf %15, %16 : vector<32x128xf32>
      %cst_15 = arith.constant 0.000000e+00 : f32
      %18 = vector.broadcast %cst_15 : f32 to vector<32x128xf32>
      %19 = arith.maximumf %17, %18 : vector<32x128xf32>
      %c0_16 = arith.constant 0 : index
      %c0_17 = arith.constant 0 : index
      %20 = vector.load %arg7[%c0_16, %c0_17] : memref<32x128xf32, #tpu.memory_space<vmem>>, vector<32x128xf32>
      tpu.vector_store %arg7[%c0_16, %c0_17], %19 {strides = array<i32>} : memref<32x128xf32, #tpu.memory_space<vmem>>, vector<32x128xf32>,
    } else {
    }
    return
  }
  func.func @transform_0(%arg0: i32, %arg1: i32, %arg2: i32) -> (i32, i32) {
    %c0_i32 = arith.constant 0 : i32
    return %arg0, %arg2 : i32, i32
  }
  func.func @transform_1(%arg0: i32, %arg1: i32, %arg2: i32) -> (i32, i32) {
    %c0_i32 = arith.constant 0 : i32
    return %arg2, %arg1 : i32, i32
  }
  func.func @transform_2(%arg0: i32, %arg1: i32, %arg2: i32) -> (i32, i32) {
    %c0_i32 = arith.constant 0 : i32
    %c0_i32_0 = arith.constant 0 : i32
    return %c0_i32, %arg1 : i32, i32
  }
  func.func @transform_3(%arg0: i32, %arg1: i32, %arg2: i32) -> (i32, i32) {
    %c0_i32 = arith.constant 0 : i32
    return %arg0, %arg1 : i32, i32
  }
  func.func @transform_4(%arg0: i32, %arg1: i32, %arg2: i32) -> (i32, i32) {
    %c0_i32 = arith.constant 0 : i32
    return %arg0, %arg1 : i32, i32
  }
}

module attributes {stable_mosaic.version = 11 : i64} {
  func.func @kernel(%arg0: i32, %arg1: i32, %arg2: i32, %arg3: memref<32x256xbf16, #tpu.memory_space<vmem>>, %arg4: memref<256x128xbf16, #tpu.memory_space<vmem>>, %arg5: memref<1x128xf32, #tpu.memory_space<vmem>>, %arg6: memref<32x128xf32, #tpu.memory_space<vmem>>, %arg7: memref<32x128xf32, #tpu.memory_space<vmem>>) attributes {dimension_semantics = [#tpu.dimension_semantics<parallel>, #tpu.dimension_semantics<parallel>, #tpu.dimension_semantics<arbitrary>], iteration_bounds = array<i64: 1, 4, 1>, scalar_prefetch = 0 : i64, scratch_operands = 1 : i64, tpu.core_type = #tpu.core_type<tc>, window_params = [{transform_indices = @transform_0, window_bounds = array<i64: 32, 256>}, {transform_indices = @transform_1, window_bounds = array<i64: 256, 128>}, {transform_indices = @transform_2, window_bounds = array<i64: 1, 128>}, {transform_indices = @transform_3, window_bounds = array<i64: 32, 128>}]} {
    %c0_i32 = arith.constant 0 : i32
    %0 = arith.cmpi eq, %arg2, %c0_i32 : i32
    %1 = arith.extui %0 : i1 to i32
    %c0_i32_0 = arith.constant 0 : i32
    %2 = arith.cmpi ne, %1, %c0_i32_0 : i32
    scf.if %2 {
      %cst_10 = arith.constant 0.000000e+00 : f32
      %12 = vector.broadcast %cst_10 : f32 to vector<32x128xf32>
      %c0_11 = arith.constant 0 : index
      %c0_12 = arith.constant 0 : index
      %13 = vector.load %arg7[%c0_11, %c0_12] : memref<32x128xf32, #tpu.memory_space<vmem>>, vector<32x128xf32>
      tpu.vector_store %arg7[%c0_11, %c0_12], %12 {strides = array<i32>} : memref<32x128xf32, #tpu.memory_space<vmem>>, vector<32x128xf32>,
    } else {
    }
    %c0 = arith.constant 0 : index
    %c0_1 = arith.constant 0 : index
    %3 = vector.load %arg7[%c0, %c0_1] : memref<32x128xf32, #tpu.memory_space<vmem>>, vector<32x128xf32>
    %c0_2 = arith.constant 0 : index
    %c0_3 = arith.constant 0 : index
    %4 = vector.load %arg3[%c0_2, %c0_3] : memref<32x256xbf16, #tpu.memory_space<vmem>>, vector<32x256xbf16>
    %c0_4 = arith.constant 0 : index
    %c0_5 = arith.constant 0 : index
    %5 = vector.load %arg4[%c0_4, %c0_5] : memref<256x128xbf16, #tpu.memory_space<vmem>>, vector<256x128xbf16>
    %cst = arith.constant dense<0.000000e+00> : vector<32x128xf32>
    %6 = tpu.matmul %4, %5, %cst {dimension_numbers = #tpu.dot_dimension_numbers<[1], [0], [0], [1], [0, 0, 1, 1], [], []>} : vector<32x256xbf16>, vector<256x128xbf16>, vector<32x128xf32> -> vector<32x128xf32>
    %7 = arith.addf %3, %6 : vector<32x128xf32>
    %c0_6 = arith.constant 0 : index
    %c0_7 = arith.constant 0 : index
    %8 = vector.load %arg7[%c0_6, %c0_7] : memref<32x128xf32, #tpu.memory_space<vmem>>, vector<32x128xf32>
    tpu.vector_store %arg7[%c0_6, %c0_7], %7 {strides = array<i32>} : memref<32x128xf32, #tpu.memory_space<vmem>>, vector<32x128xf32>,
    %c0_i32_8 = arith.constant 0 : i32
    %9 = arith.cmpi eq, %arg2, %c0_i32_8 : i32
    %10 = arith.extui %9 : i1 to i32
    %c0_i32_9 = arith.constant 0 : i32
    %11 = arith.cmpi ne, %10, %c0_i32_9 : i32
    scf.if %11 {
      %c0_10 = arith.constant 0 : index
      %c0_11 = arith.constant 0 : index
      %12 = vector.load %arg7[%c0_10, %c0_11] : memref<32x128xf32, #tpu.memory_space<vmem>>, vector<32x128xf32>
      %c0_12 = arith.constant 0 : index
      %c0_13 = arith.constant 0 : index
      %13 = vector.load %arg5[%c0_12, %c0_13] : memref<1x128xf32, #tpu.memory_space<vmem>>, vector<1x128xf32>
      %14 = vector.broadcast %13 : vector<1x128xf32> to vector<32x128xf32>
      %15 = arith.addf %12, %14 : vector<32x128xf32>
      %c0_14 = arith.constant 0 : index
      %c0_15 = arith.constant 0 : index
      %16 = vector.load %arg6[%c0_14, %c0_15] : memref<32x128xf32, #tpu.memory_space<vmem>>, vector<32x128xf32>
      tpu.vector_store %arg6[%c0_14, %c0_15], %15 {strides = array<i32>} : memref<32x128xf32, #tpu.memory_space<vmem>>, vector<32x128xf32>,
    } else {
    }
    return
  }
  func.func @transform_0(%arg0: i32, %arg1: i32, %arg2: i32) -> (i32, i32) {
    %c0_i32 = arith.constant 0 : i32
    return %arg0, %arg2 : i32, i32
  }
  func.func @transform_1(%arg0: i32, %arg1: i32, %arg2: i32) -> (i32, i32) {
    %c0_i32 = arith.constant 0 : i32
    return %arg2, %arg1 : i32, i32
  }
  func.func @transform_2(%arg0: i32, %arg1: i32, %arg2: i32) -> (i32, i32) {
    %c0_i32 = arith.constant 0 : i32
    %c0_i32_0 = arith.constant 0 : i32
    return %c0_i32, %arg1 : i32, i32
  }
  func.func @transform_3(%arg0: i32, %arg1: i32, %arg2: i32) -> (i32, i32) {
    %c0_i32 = arith.constant 0 : i32
    return %arg0, %arg1 : i32, i32
  }
}

module attributes {stable_mosaic.version = 11 : i64} {
  func.func @_attention_kernel(%arg0: i32, %arg1: memref<1x16x512xf32, #tpu.memory_space<vmem>>, %arg2: memref<1x16x256xf32, #tpu.memory_space<vmem>>, %arg3: memref<1x16x256xf32, #tpu.memory_space<vmem>>) attributes {dimension_semantics = [#tpu.dimension_semantics<parallel>], iteration_bounds = array<i64: 2>, scalar_prefetch = 0 : i64, scratch_operands = 0 : i64, tpu.core_type = #tpu.core_type<tc>, window_params = [{transform_indices = @transform_0, window_bounds = array<i64: 1, 16, 512>}, {transform_indices = @transform_1, window_bounds = array<i64: 1, 16, 256>}, {transform_indices = @transform_2, window_bounds = array<i64: 1, 16, 256>}]} {
    %c0 = arith.constant 0 : index
    %c0_0 = arith.constant 0 : index
    %c0_1 = arith.constant 0 : index
    %0 = vector.load %arg1[%c0, %c0_0, %c0_1] : memref<1x16x512xf32, #tpu.memory_space<vmem>>, vector<1x16x512xf32>
    %1 = vector.shape_cast %0 : vector<1x16x512xf32> to vector<16x512xf32>
    %2 = vector.extract_strided_slice %1 {offsets = [0, 0], sizes = [16, 128], strides = [1, 1]} : vector<16x512xf32> to vector<16x128xf32>
    %3 = arith.truncf %2 : vector<16x128xf32> to vector<16x128xbf16>
    %4 = vector.extract_strided_slice %1 {offsets = [0, 128], sizes = [16, 128], strides = [1, 1]} : vector<16x512xf32> to vector<16x128xf32>
    %5 = arith.truncf %4 : vector<16x128xf32> to vector<16x128xbf16>
    %6 = vector.extract_strided_slice %1 {offsets = [0, 256], sizes = [16, 256], strides = [1, 1]} : vector<16x512xf32> to vector<16x256xf32>
    %7 = arith.truncf %6 : vector<16x256xf32> to vector<16x256xbf16>
    %c0_2 = arith.constant 0 : index
    %c0_3 = arith.constant 0 : index
    %c0_4 = arith.constant 0 : index
    %8 = vector.load %arg2[%c0_2, %c0_3, %c0_4] : memref<1x16x256xf32, #tpu.memory_space<vmem>>, vector<1x16x256xf32>
    %9 = vector.shape_cast %8 : vector<1x16x256xf32> to vector<16x256xf32>
    %cst = arith.constant dense<0.000000e+00> : vector<16x16xf32>
    %10 = tpu.matmul %3, %5, %cst {dimension_numbers = #tpu.dot_dimension_numbers<[1], [1], [0], [0], [0, 0, 1, 0], [], []>} : vector<16x128xbf16>, vector<16x128xbf16>, vector<16x16xf32> -> vector<16x16xf32>
    %cst_5 = arith.constant dense<0xFF800000> : vector<16xf32>
    %11 = vector.multi_reduction <maximumf>, %10, %cst_5 [1] : vector<16x16xf32> to vector<16xf32>
    %12 = vector.shape_cast %11 : vector<16xf32> to vector<16x1xf32>
    %13 = vector.broadcast %12 : vector<16x1xf32> to vector<16x16xf32>
    %14 = arith.subf %10, %13 : vector<16x16xf32>
    %15 = math.exp %14 : vector<16x16xf32>
    %cst_6 = arith.constant dense<0.000000e+00> : vector<16xf32>
    %16 = vector.multi_reduction <add>, %15, %cst_6 [1] : vector<16x16xf32> to vector<16xf32>
    %17 = vector.shape_cast %16 : vector<16xf32> to vector<16x1xf32>
    %18 = tpu.reciprocal %17 {approx = true} : vector<16x1xf32> -> vector<16x1xf32>
    %19 = vector.broadcast %18 : vector<16x1xf32> to vector<16x16xf32>
    %20 = arith.mulf %15, %19 : vector<16x16xf32>
    %21 = arith.truncf %20 : vector<16x16xf32> to vector<16x16xbf16>
    %cst_7 = arith.constant dense<0.000000e+00> : vector<16x256xf32>
    %22 = tpu.matmul %21, %7, %cst_7 {dimension_numbers = #tpu.dot_dimension_numbers<[1], [0], [0], [1], [0, 0, 1, 1], [], []>} : vector<16x16xbf16>, vector<16x256xbf16>, vector<16x256xf32> -> vector<16x256xf32>
    %23 = arith.addf %22, %9 : vector<16x256xf32>
    %c0_8 = arith.constant 0 : index
    %c0_9 = arith.constant 0 : index
    %c0_10 = arith.constant 0 : index
    %24 = vector.load %arg3[%c0_8, %c0_9, %c0_10] : memref<1x16x256xf32, #tpu.memory_space<vmem>>, vector<1x16x256xf32>
    %25 = vector.shape_cast %24 : vector<1x16x256xf32> to vector<16x256xf32>
    %26 = vector.shape_cast %23 : vector<16x256xf32> to vector<1x16x256xf32>
    tpu.vector_store %arg3[%c0_8, %c0_9, %c0_10], %26 {strides = array<i32>} : memref<1x16x256xf32, #tpu.memory_space<vmem>>, vector<1x16x256xf32>,
    return
  }
  func.func @transform_0(%arg0: i32) -> (i32, i32, i32) {
    %c0_i32 = arith.constant 0 : i32
    %c0_i32_0 = arith.constant 0 : i32
    %c0_i32_1 = arith.constant 0 : i32
    return %arg0, %c0_i32, %c0_i32_0 : i32, i32, i32
  }
  func.func @transform_1(%arg0: i32) -> (i32, i32, i32) {
    %c0_i32 = arith.constant 0 : i32
    %c0_i32_0 = arith.constant 0 : i32
    %c0_i32_1 = arith.constant 0 : i32
    return %arg0, %c0_i32, %c0_i32_0 : i32, i32, i32
  }
  func.func @transform_2(%arg0: i32) -> (i32, i32, i32) {
    %c0_i32 = arith.constant 0 : i32
    %c0_i32_0 = arith.constant 0 : i32
    %c0_i32_1 = arith.constant 0 : i32
    return %arg0, %c0_i32, %c0_i32_0 : i32, i32, i32
  }
}

module attributes {stable_mosaic.version = 11 : i64} {
  func.func @kernel(%arg0: i32, %arg1: i32, %arg2: i32, %arg3: memref<32x512xbf16, #tpu.memory_space<vmem>>, %arg4: memref<512x128xbf16, #tpu.memory_space<vmem>>, %arg5: memref<1x128xf32, #tpu.memory_space<vmem>>, %arg6: memref<32x128xf32, #tpu.memory_space<vmem>>, %arg7: memref<32x128xf32, #tpu.memory_space<vmem>>) attributes {dimension_semantics = [#tpu.dimension_semantics<parallel>, #tpu.dimension_semantics<parallel>, #tpu.dimension_semantics<arbitrary>], iteration_bounds = array<i64: 1, 1, 2>, scalar_prefetch = 0 : i64, scratch_operands = 1 : i64, tpu.core_type = #tpu.core_type<tc>, window_params = [{transform_indices = @transform_0, window_bounds = array<i64: 32, 512>}, {transform_indices = @transform_1, window_bounds = array<i64: 512, 128>}, {transform_indices = @transform_2, window_bounds = array<i64: 1, 128>}, {transform_indices = @transform_3, window_bounds = array<i64: 32, 128>}]} {
    %c0_i32 = arith.constant 0 : i32
    %0 = arith.cmpi eq, %arg2, %c0_i32 : i32
    %1 = arith.extui %0 : i1 to i32
    %c0_i32_0 = arith.constant 0 : i32
    %2 = arith.cmpi ne, %1, %c0_i32_0 : i32
    scf.if %2 {
      %cst_9 = arith.constant 0.000000e+00 : f32
      %12 = vector.broadcast %cst_9 : f32 to vector<32x128xf32>
      %c0_10 = arith.constant 0 : index
      %c0_11 = arith.constant 0 : index
      %13 = vector.load %arg7[%c0_10, %c0_11] : memref<32x128xf32, #tpu.memory_space<vmem>>, vector<32x128xf32>
      tpu.vector_store %arg7[%c0_10, %c0_11], %12 {strides = array<i32>} : memref<32x128xf32, #tpu.memory_space<vmem>>, vector<32x128xf32>,
    } else {
    }
    %c0 = arith.constant 0 : index
    %c0_1 = arith.constant 0 : index
    %3 = vector.load %arg7[%c0, %c0_1] : memref<32x128xf32, #tpu.memory_space<vmem>>, vector<32x128xf32>
    %c0_2 = arith.constant 0 : index
    %c0_3 = arith.constant 0 : index
    %4 = vector.load %arg3[%c0_2, %c0_3] : memref<32x512xbf16, #tpu.memory_space<vmem>>, vector<32x512xbf16>
    %c0_4 = arith.constant 0 : index
    %c0_5 = arith.constant 0 : index
    %5 = vector.load %arg4[%c0_4, %c0_5] : memref<512x128xbf16, #tpu.memory_space<vmem>>, vector<512x128xbf16>
    %cst = arith.constant dense<0.000000e+00> : vector<32x128xf32>
    %6 = tpu.matmul %4, %5, %cst {dimension_numbers = #tpu.dot_dimension_numbers<[1], [0], [0], [1], [0, 0, 1, 1], [], []>} : vector<32x512xbf16>, vector<512x128xbf16>, vector<32x128xf32> -> vector<32x128xf32>
    %7 = arith.addf %3, %6 : vector<32x128xf32>
    %c0_6 = arith.constant 0 : index
    %c0_7 = arith.constant 0 : index
    %8 = vector.load %arg7[%c0_6, %c0_7] : memref<32x128xf32, #tpu.memory_space<vmem>>, vector<32x128xf32>
    tpu.vector_store %arg7[%c0_6, %c0_7], %7 {strides = array<i32>} : memref<32x128xf32, #tpu.memory_space<vmem>>, vector<32x128xf32>,
    %c1_i32 = arith.constant 1 : i32
    %9 = arith.cmpi eq, %arg2, %c1_i32 : i32
    %10 = arith.extui %9 : i1 to i32
    %c0_i32_8 = arith.constant 0 : i32
    %11 = arith.cmpi ne, %10, %c0_i32_8 : i32
    scf.if %11 {
      %c0_9 = arith.constant 0 : index
      %c0_10 = arith.constant 0 : index
      %12 = vector.load %arg7[%c0_9, %c0_10] : memref<32x128xf32, #tpu.memory_space<vmem>>, vector<32x128xf32>
      %c0_11 = arith.constant 0 : index
      %c0_12 = arith.constant 0 : index
      %13 = vector.load %arg5[%c0_11, %c0_12] : memref<1x128xf32, #tpu.memory_space<vmem>>, vector<1x128xf32>
      %14 = vector.broadcast %13 : vector<1x128xf32> to vector<32x128xf32>
      %15 = arith.addf %12, %14 : vector<32x128xf32>
      %cst_13 = arith.constant 0.000000e+00 : f32
      %16 = vector.broadcast %cst_13 : f32 to vector<32x128xf32>
      %17 = arith.maximumf %15, %16 : vector<32x128xf32>
      %c0_14 = arith.constant 0 : index
      %c0_15 = arith.constant 0 : index
      %18 = vector.load %arg6[%c0_14, %c0_15] : memref<32x128xf32, #tpu.memory_space<vmem>>, vector<32x128xf32>
      tpu.vector_store %arg6[%c0_14, %c0_15], %17 {strides = array<i32>} : memref<32x128xf32, #tpu.memory_space<vmem>>, vector<32x128xf32>,
    } else {
    }
    return
  }
  func.func @transform_0(%arg0: i32, %arg1: i32, %arg2: i32) -> (i32, i32) {
    %c0_i32 = arith.constant 0 : i32
    return %arg0, %arg2 : i32, i32
  }
  func.func @transform_1(%arg0: i32, %arg1: i32, %arg2: i32) -> (i32, i32) {
    %c0_i32 = arith.constant 0 : i32
    return %arg2, %arg1 : i32, i32
  }
  func.func @transform_2(%arg0: i32, %arg1: i32, %arg2: i32) -> (i32, i32) {
    %c0_i32 = arith.constant 0 : i32
    %c0_i32_0 = arith.constant 0 : i32
    return %c0_i32, %arg1 : i32, i32
  }
  func.func @transform_3(%arg0: i32, %arg1: i32, %arg2: i32) -> (i32, i32) {
    %c0_i32 = arith.constant 0 : i32
    return %arg0, %arg1 : i32, i32
  }
}

module attributes {stable_mosaic.version = 11 : i64} {
  func.func @kernel(%arg0: i32, %arg1: i32, %arg2: i32, %arg3: memref<128x512xbf16, #tpu.memory_space<vmem>>, %arg4: memref<512x128xbf16, #tpu.memory_space<vmem>>, %arg5: memref<1x128xf32, #tpu.memory_space<vmem>>, %arg6: memref<128x128xf32, #tpu.memory_space<vmem>>, %arg7: memref<128x128xf32, #tpu.memory_space<vmem>>) attributes {dimension_semantics = [#tpu.dimension_semantics<parallel>, #tpu.dimension_semantics<parallel>, #tpu.dimension_semantics<arbitrary>], iteration_bounds = array<i64: 1, 1, 1>, scalar_prefetch = 0 : i64, scratch_operands = 1 : i64, tpu.core_type = #tpu.core_type<tc>, window_params = [{transform_indices = @transform_0, window_bounds = array<i64: 128, 512>}, {transform_indices = @transform_1, window_bounds = array<i64: 512, 128>}, {transform_indices = @transform_2, window_bounds = array<i64: 1, 128>}, {transform_indices = @transform_3, window_bounds = array<i64: 128, 128>}]} {
    %c0_i32 = arith.constant 0 : i32
    %0 = arith.cmpi eq, %arg2, %c0_i32 : i32
    %1 = arith.extui %0 : i1 to i32
    %c0_i32_0 = arith.constant 0 : i32
    %2 = arith.cmpi ne, %1, %c0_i32_0 : i32
    scf.if %2 {
      %cst_10 = arith.constant 0.000000e+00 : f32
      %12 = vector.broadcast %cst_10 : f32 to vector<128x128xf32>
      %c0_11 = arith.constant 0 : index
      %c0_12 = arith.constant 0 : index
      %13 = vector.load %arg7[%c0_11, %c0_12] : memref<128x128xf32, #tpu.memory_space<vmem>>, vector<128x128xf32>
      tpu.vector_store %arg7[%c0_11, %c0_12], %12 {strides = array<i32>} : memref<128x128xf32, #tpu.memory_space<vmem>>, vector<128x128xf32>,
    } else {
    }
    %c0 = arith.constant 0 : index
    %c0_1 = arith.constant 0 : index
    %3 = vector.load %arg7[%c0, %c0_1] : memref<128x128xf32, #tpu.memory_space<vmem>>, vector<128x128xf32>
    %c0_2 = arith.constant 0 : index
    %c0_3 = arith.constant 0 : index
    %4 = vector.load %arg3[%c0_2, %c0_3] : memref<128x512xbf16, #tpu.memory_space<vmem>>, vector<128x512xbf16>
    %c0_4 = arith.constant 0 : index
    %c0_5 = arith.constant 0 : index
    %5 = vector.load %arg4[%c0_4, %c0_5] : memref<512x128xbf16, #tpu.memory_space<vmem>>, vector<512x128xbf16>
    %cst = arith.constant dense<0.000000e+00> : vector<128x128xf32>
    %6 = tpu.matmul %4, %5, %cst {dimension_numbers = #tpu.dot_dimension_numbers<[1], [0], [0], [1], [0, 0, 1, 1], [], []>} : vector<128x512xbf16>, vector<512x128xbf16>, vector<128x128xf32> -> vector<128x128xf32>
    %7 = arith.addf %3, %6 : vector<128x128xf32>
    %c0_6 = arith.constant 0 : index
    %c0_7 = arith.constant 0 : index
    %8 = vector.load %arg7[%c0_6, %c0_7] : memref<128x128xf32, #tpu.memory_space<vmem>>, vector<128x128xf32>
    tpu.vector_store %arg7[%c0_6, %c0_7], %7 {strides = array<i32>} : memref<128x128xf32, #tpu.memory_space<vmem>>, vector<128x128xf32>,
    %c0_i32_8 = arith.constant 0 : i32
    %9 = arith.cmpi eq, %arg2, %c0_i32_8 : i32
    %10 = arith.extui %9 : i1 to i32
    %c0_i32_9 = arith.constant 0 : i32
    %11 = arith.cmpi ne, %10, %c0_i32_9 : i32
    scf.if %11 {
      %c0_10 = arith.constant 0 : index
      %c0_11 = arith.constant 0 : index
      %12 = vector.load %arg7[%c0_10, %c0_11] : memref<128x128xf32, #tpu.memory_space<vmem>>, vector<128x128xf32>
      %c0_12 = arith.constant 0 : index
      %c0_13 = arith.constant 0 : index
      %13 = vector.load %arg5[%c0_12, %c0_13] : memref<1x128xf32, #tpu.memory_space<vmem>>, vector<1x128xf32>
      %14 = vector.broadcast %13 : vector<1x128xf32> to vector<128x128xf32>
      %15 = arith.addf %12, %14 : vector<128x128xf32>
      %cst_14 = arith.constant 0.000000e+00 : f32
      %16 = vector.broadcast %cst_14 : f32 to vector<128x128xf32>
      %17 = arith.maximumf %15, %16 : vector<128x128xf32>
      %c0_15 = arith.constant 0 : index
      %c0_16 = arith.constant 0 : index
      %18 = vector.load %arg6[%c0_15, %c0_16] : memref<128x128xf32, #tpu.memory_space<vmem>>, vector<128x128xf32>
      tpu.vector_store %arg6[%c0_15, %c0_16], %17 {strides = array<i32>} : memref<128x128xf32, #tpu.memory_space<vmem>>, vector<128x128xf32>,
    } else {
    }
    return
  }
  func.func @transform_0(%arg0: i32, %arg1: i32, %arg2: i32) -> (i32, i32) {
    %c0_i32 = arith.constant 0 : i32
    return %arg0, %arg2 : i32, i32
  }
  func.func @transform_1(%arg0: i32, %arg1: i32, %arg2: i32) -> (i32, i32) {
    %c0_i32 = arith.constant 0 : i32
    return %arg2, %arg1 : i32, i32
  }
  func.func @transform_2(%arg0: i32, %arg1: i32, %arg2: i32) -> (i32, i32) {
    %c0_i32 = arith.constant 0 : i32
    %c0_i32_0 = arith.constant 0 : i32
    return %c0_i32, %arg1 : i32, i32
  }
  func.func @transform_3(%arg0: i32, %arg1: i32, %arg2: i32) -> (i32, i32) {
    %c0_i32 = arith.constant 0 : i32
    return %arg0, %arg1 : i32, i32
  }
}

module attributes {stable_mosaic.version = 11 : i64} {
  func.func @kernel(%arg0: i32, %arg1: i32, %arg2: i32, %arg3: memref<256x512xbf16, #tpu.memory_space<vmem>>, %arg4: memref<512x128xbf16, #tpu.memory_space<vmem>>, %arg5: memref<1x128xf32, #tpu.memory_space<vmem>>, %arg6: memref<256x128xf32, #tpu.memory_space<vmem>>, %arg7: memref<256x128xf32, #tpu.memory_space<vmem>>) attributes {dimension_semantics = [#tpu.dimension_semantics<parallel>, #tpu.dimension_semantics<parallel>, #tpu.dimension_semantics<arbitrary>], iteration_bounds = array<i64: 2, 1, 2>, scalar_prefetch = 0 : i64, scratch_operands = 1 : i64, tpu.core_type = #tpu.core_type<tc>, window_params = [{transform_indices = @transform_0, window_bounds = array<i64: 256, 512>}, {transform_indices = @transform_1, window_bounds = array<i64: 512, 128>}, {transform_indices = @transform_2, window_bounds = array<i64: 1, 128>}, {transform_indices = @transform_3, window_bounds = array<i64: 256, 128>}]} {
    %c0_i32 = arith.constant 0 : i32
    %0 = arith.cmpi eq, %arg2, %c0_i32 : i32
    %1 = arith.extui %0 : i1 to i32
    %c0_i32_0 = arith.constant 0 : i32
    %2 = arith.cmpi ne, %1, %c0_i32_0 : i32
    scf.if %2 {
      %cst_9 = arith.constant 0.000000e+00 : f32
      %12 = vector.broadcast %cst_9 : f32 to vector<256x128xf32>
      %c0_10 = arith.constant 0 : index
      %c0_11 = arith.constant 0 : index
      %13 = vector.load %arg7[%c0_10, %c0_11] : memref<256x128xf32, #tpu.memory_space<vmem>>, vector<256x128xf32>
      tpu.vector_store %arg7[%c0_10, %c0_11], %12 {strides = array<i32>} : memref<256x128xf32, #tpu.memory_space<vmem>>, vector<256x128xf32>,
    } else {
    }
    %c0 = arith.constant 0 : index
    %c0_1 = arith.constant 0 : index
    %3 = vector.load %arg7[%c0, %c0_1] : memref<256x128xf32, #tpu.memory_space<vmem>>, vector<256x128xf32>
    %c0_2 = arith.constant 0 : index
    %c0_3 = arith.constant 0 : index
    %4 = vector.load %arg3[%c0_2, %c0_3] : memref<256x512xbf16, #tpu.memory_space<vmem>>, vector<256x512xbf16>
    %c0_4 = arith.constant 0 : index
    %c0_5 = arith.constant 0 : index
    %5 = vector.load %arg4[%c0_4, %c0_5] : memref<512x128xbf16, #tpu.memory_space<vmem>>, vector<512x128xbf16>
    %cst = arith.constant dense<0.000000e+00> : vector<256x128xf32>
    %6 = tpu.matmul %4, %5, %cst {dimension_numbers = #tpu.dot_dimension_numbers<[1], [0], [0], [1], [0, 0, 1, 1], [], []>} : vector<256x512xbf16>, vector<512x128xbf16>, vector<256x128xf32> -> vector<256x128xf32>
    %7 = arith.addf %3, %6 : vector<256x128xf32>
    %c0_6 = arith.constant 0 : index
    %c0_7 = arith.constant 0 : index
    %8 = vector.load %arg7[%c0_6, %c0_7] : memref<256x128xf32, #tpu.memory_space<vmem>>, vector<256x128xf32>
    tpu.vector_store %arg7[%c0_6, %c0_7], %7 {strides = array<i32>} : memref<256x128xf32, #tpu.memory_space<vmem>>, vector<256x128xf32>,
    %c1_i32 = arith.constant 1 : i32
    %9 = arith.cmpi eq, %arg2, %c1_i32 : i32
    %10 = arith.extui %9 : i1 to i32
    %c0_i32_8 = arith.constant 0 : i32
    %11 = arith.cmpi ne, %10, %c0_i32_8 : i32
    scf.if %11 {
      %c0_9 = arith.constant 0 : index
      %c0_10 = arith.constant 0 : index
      %12 = vector.load %arg7[%c0_9, %c0_10] : memref<256x128xf32, #tpu.memory_space<vmem>>, vector<256x128xf32>
      %c0_11 = arith.constant 0 : index
      %c0_12 = arith.constant 0 : index
      %13 = vector.load %arg5[%c0_11, %c0_12] : memref<1x128xf32, #tpu.memory_space<vmem>>, vector<1x128xf32>
      %14 = vector.broadcast %13 : vector<1x128xf32> to vector<256x128xf32>
      %15 = arith.addf %12, %14 : vector<256x128xf32>
      %cst_13 = arith.constant 0.000000e+00 : f32
      %16 = vector.broadcast %cst_13 : f32 to vector<256x128xf32>
      %17 = arith.subf %16, %15 : vector<256x128xf32>
      %18 = math.exp %17 : vector<256x128xf32>
      %cst_14 = arith.constant 1.000000e+00 : f32
      %19 = vector.broadcast %cst_14 : f32 to vector<256x128xf32>
      %20 = arith.addf %19, %18 : vector<256x128xf32>
      %21 = tpu.reciprocal %20 {approx = true} : vector<256x128xf32> -> vector<256x128xf32>
      %c0_15 = arith.constant 0 : index
      %c0_16 = arith.constant 0 : index
      %22 = vector.load %arg6[%c0_15, %c0_16] : memref<256x128xf32, #tpu.memory_space<vmem>>, vector<256x128xf32>
      tpu.vector_store %arg6[%c0_15, %c0_16], %21 {strides = array<i32>} : memref<256x128xf32, #tpu.memory_space<vmem>>, vector<256x128xf32>,
    } else {
    }
    return
  }
  func.func @transform_0(%arg0: i32, %arg1: i32, %arg2: i32) -> (i32, i32) {
    %c0_i32 = arith.constant 0 : i32
    return %arg0, %arg2 : i32, i32
  }
  func.func @transform_1(%arg0: i32, %arg1: i32, %arg2: i32) -> (i32, i32) {
    %c0_i32 = arith.constant 0 : i32
    return %arg2, %arg1 : i32, i32
  }
  func.func @transform_2(%arg0: i32, %arg1: i32, %arg2: i32) -> (i32, i32) {
    %c0_i32 = arith.constant 0 : i32
    %c0_i32_0 = arith.constant 0 : i32
    return %c0_i32, %arg1 : i32, i32
  }
  func.func @transform_3(%arg0: i32, %arg1: i32, %arg2: i32) -> (i32, i32) {
    %c0_i32 = arith.constant 0 : i32
    return %arg0, %arg1 : i32, i32
  }
}

</mosaic_0001>

<bundles_post_ra>
// kernel: improved_ffdnet_forward.26
= control target key start
LH: loop header
LB: loop body
LE: loop exit
PB: predicated region body
PF: predicated region fallthrough
CT: control target
= control target key end

     0   :  { %s1144_s12 = smov 0   ;;  %s1146_s13 = smov 0   ;;  %s1297_s0 = inlined_call_operand.vmem [shape: bf16[512,128], index: 0, kind: input, shape index: {}]   ;;  %s1298_s1 = inlined_call_operand.vmem [shape: bf16[128,128], index: 1, kind: input, shape index: {}]   ;;  %s1299_s2 = inlined_call_operand.vmem [shape: f32[1,128], index: 2, kind: input, shape index: {}]   ;;  %s1300_s3 = inlined_call_operand.vmem [shape: f32[512,128], index: 3, kind: output, shape index: {}]  }
   0x1   :  { %s1148_s14 = smov 0  }
   0x2 LB: > { %s32_s15 = sadd.s32 1, %s1118_s13  ;;  %p924_p0 = scmp.ge.s32.totalorder %s1122_s14, 1  ;;  %s1122_s14 = sphi %s1148_s14, %s13_s14   ;;  %s1118_s13 = sphi %s1146_s13, %s1302_s13   ;;  %s1114_s12 = sphi %s1144_s12, %s1301_s12  }
   0x3   : > { %p34_p1 = scmp.ge.s32.totalorder %s32_s15, 2  ;;  %p188_p2 = scmp.lt.s32.totalorder %s1122_s14, 3 }
   0x5   : > { %s1304_s15 = smov (%p34_p1, %s32_s15), 0  ;;  %p189_p3 = pnand %p924_p0, %p188_p2 }
   0x6   : > { %s925_s24 = sshll.u32 (!%p189_p3), %s1114_s12, 5 }
   0x7   : > { %192 = sbr.rel (%p189_p3) target bundleno = 239 (0xef), region = 32  ;;  %p230_p4 = scmp.lt.s32.totalorder (!%p189_p3), %s925_s24, 63 }
   0xc   : > { %v1050_v0 = vld [vmem:[%s1298_s1 + $0x38] sm:$0xff]  ;;  %v1049_v1 = vld [vmem:[%s1298_s1 + $0x30] sm:$0xff]  ;;  %v1048_v2 = vld [vmem:[%s1298_s1 + $0x28] sm:$0xff]  ;;  %s1306_s24 = smov (!%p230_p4, %s925_s24), 63 }
   0xd   : > { %519 = vmatpush.bf16.msra.mxu0 %v1050_v0  ;;  %1051 = vmatpush.bf16.msra.mxu1 %v1050_v0  ;;  %v1047_v3 = vld [vmem:[%s1298_s1 + $0x20] sm:$0xff]  ;;  %v1046_v4 = vld [vmem:[%s1298_s1 + $0x18] sm:$0xff]  ;;  %v1045_v5 = vld [vmem:[%s1298_s1 + $0x10] sm:$0xff]  ;;  %s926_s4 = sshll.u32 %s1306_s24, 2  ;;  %s928_s12 = sshll.u32 %s1306_s24, 3 }
   0xe   : > { %1052 = vmatpush.bf16.msra.mxu2 %v1050_v0  ;;  %1053 = vmatpush.bf16.msra.mxu3 %v1050_v0  ;;  %v1044_v6 = vld [vmem:[%s1298_s1 + $0x8] sm:$0xff]  ;;  %v1043_v7 = vld [vmem:[%s1298_s1] sm:$0xff]  ;;  %s1195_s9 = scalar_lea.vmem %s1297_s0, %s926_s4  ;;  %s1224_s18 = scalar_lea.vmem %s1300_s3, %s928_s12 }
   0xf   : > { %v1027_v8 = vld [vmem:[%s1195_s9] sm:$0xff]  ;;  %v1028_v12 = vld [vmem:[%s1195_s9 + $0x8] sm:$0xff]  ;;  %v1029_v16 = vld [vmem:[%s1195_s9 + $0x10] sm:$0xff] }
  0x10   : > { %v1031_v9 = vld [vmem:[%s1195_s9 + $0x20] sm:$0xff]  ;;  %v1032_v13 = vld [vmem:[%s1195_s9 + $0x28] sm:$0xff]  ;;  %v1033_v17 = vld [vmem:[%s1195_s9 + $0x30] sm:$0xff] }
  0x11   : > { %520 = vmatpush.bf16.msra.mxu0 %v1049_v1  ;;  %1054 = vmatpush.bf16.msra.mxu1 %v1049_v1  ;;  %v1035_v10 = vld [vmem:[%s1195_s9 + $0x40] sm:$0xff]  ;;  %v1036_v14 = vld [vmem:[%s1195_s9 + $0x48] sm:$0xff]  ;;  %v1037_v18 = vld [vmem:[%s1195_s9 + $0x50] sm:$0xff] }
  0x12   : > { %1055 = vmatpush.bf16.msra.mxu2 %v1049_v1  ;;  %1056 = vmatpush.bf16.msra.mxu3 %v1049_v1  ;;  %v1039_v11 = vld [vmem:[%s1195_s9 + $0x60] sm:$0xff]  ;;  %v1040_v15 = vld [vmem:[%s1195_s9 + $0x68] sm:$0xff]  ;;  %v1041_v19 = vld [vmem:[%s1195_s9 + $0x70] sm:$0xff] }
  0x13   : > { %v1030_v20 = vld [vmem:[%s1195_s9 + $0x18] sm:$0xff]  ;;  %v1216_v24 = vld [vmem:[%s1299_s2] ss:$0 sm:$0xff] }
  0x14   : > { %v1034_v21 = vld [vmem:[%s1195_s9 + $0x38] sm:$0xff] }
  0x15   : > { %521 = vmatpush.bf16.msra.mxu0 %v1048_v2  ;;  %1057 = vmatpush.bf16.msra.mxu1 %v1048_v2  ;;  %v1038_v22 = vld [vmem:[%s1195_s9 + $0x58] sm:$0xff] }
  0x16   : > { %1058 = vmatpush.bf16.msra.mxu2 %v1048_v2  ;;  %1059 = vmatpush.bf16.msra.mxu3 %v1048_v2  ;;  %v1042_v23 = vld [vmem:[%s1195_s9 + $0x78] sm:$0xff] }
  0x19   : > { %522 = vmatpush.bf16.msra.mxu0 %v1047_v3  ;;  %1060 = vmatpush.bf16.msra.mxu1 %v1047_v3 }
  0x1a   : > { %1061 = vmatpush.bf16.msra.mxu2 %v1047_v3  ;;  %1062 = vmatpush.bf16.msra.mxu3 %v1047_v3 }
  0x1d   : > { %523 = vmatpush.bf16.msra.mxu0 %v1046_v4  ;;  %1063 = vmatpush.bf16.msra.mxu1 %v1046_v4 }
  0x1e   : > { %1064 = vmatpush.bf16.msra.mxu2 %v1046_v4  ;;  %1065 = vmatpush.bf16.msra.mxu3 %v1046_v4 }
  0x21   : > { %524 = vmatpush.bf16.msra.mxu0 %v1045_v5  ;;  %1066 = vmatpush.bf16.msra.mxu1 %v1045_v5 }
  0x22   : > { %1067 = vmatpush.bf16.msra.mxu2 %v1045_v5  ;;  %1068 = vmatpush.bf16.msra.mxu3 %v1045_v5 }
  0x25   : > { %525 = vmatpush.bf16.msra.mxu0 %v1044_v6  ;;  %1069 = vmatpush.bf16.msra.mxu1 %v1044_v6 }
  0x26   : > { %1070 = vmatpush.bf16.msra.mxu2 %v1044_v6  ;;  %1071 = vmatpush.bf16.msra.mxu3 %v1044_v6 }
  0x29   : > { %526 = vmatpush.bf16.msra.mxu0 %v1043_v7  ;;  %1072 = vmatpush.bf16.msra.mxu1 %v1043_v7 }
  0x2a   : > { %1073 = vmatpush.bf16.msra.mxu2 %v1043_v7  ;;  %1074 = vmatpush.bf16.msra.mxu3 %v1043_v7 }
  0x2c   : > { %527 = vmatmul.bf16.vlgmr.msra.gmra.mxu0 %v1027_v8  ;;  %547 = vmatmul.bf16.vlgmr.msra.gmra.mxu1 %v1031_v9 }
  0x2d   : > { %567 = vmatmul.bf16.vlgmr.msra.gmra.mxu2 %v1035_v10  ;;  %587 = vmatmul.bf16.vlgmr.msra.gmra.mxu3 %v1039_v11 }
  0x3c   : > { %532 = vmatmul.bf16.gmra.mxu0 %v1028_v12  ;;  %552 = vmatmul.bf16.gmra.mxu1 %v1032_v13 }
  0x3d   : > { %572 = vmatmul.bf16.gmra.mxu2 %v1036_v14  ;;  %592 = vmatmul.bf16.gmra.mxu3 %v1040_v15 }
  0x4c   : > { %537 = vmatmul.bf16.gmra.mxu0 %v1029_v16  ;;  %557 = vmatmul.bf16.gmra.mxu1 %v1033_v17 }
  0x4d   : > { %577 = vmatmul.bf16.gmra.mxu2 %v1037_v18  ;;  %597 = vmatmul.bf16.gmra.mxu3 %v1041_v19 }
  0x5c   : > { %542 = vmatmul.bf16.gmra.mxu0 %v1030_v20  ;;  %562 = vmatmul.bf16.gmra.mxu1 %v1034_v21 }
  0x5d   : > { %582 = vmatmul.bf16.gmra.mxu2 %v1038_v22  ;;  %602 = vmatmul.bf16.gmra.mxu3 %v1042_v23 }
  0xa9   : > { %v528_v25 = vpop.f32.mrf.mxu0  ;;  %v548_v26 = vpop.f32.mrf.mxu1 }
  0xaa   : > { %v711_v27 = vadd.f32 %v1216_v24, %v528_v25  ;;  %v719_v28 = vadd.f32 %v1216_v24, %v548_v26 }
  0xac   : > { %v743_v29 = vmax.f32 %v711_v27, 0.0  ;;  %v751_v30 = vmax.f32 %v719_v28, 0.0 }
  0xae   : > { %775 = vst [vmem:[%s1224_s18] sm:$0xff] %v743_v29 }
  0xaf   : > { %783 = vst [vmem:[%s1224_s18 + $0x40] sm:$0xff] %v751_v30 }
  0xb0   : > { %v568_v31 = vpop.f32.mrf.mxu2  ;;  %v588_v32 = vpop.f32.mrf.mxu3 }
  0xb1   : > { %v727_v33 = vadd.f32 %v1216_v24, %v568_v31  ;;  %v735_v34 = vadd.f32 %v1216_v24, %v588_v32  ;;  %v530_v35 = vpop.f32.mrf.mxu0  ;;  %v550_v36 = vpop.f32.mrf.mxu1 }
  0xb2   : > { %v712_v37 = vadd.f32 %v1216_v24, %v530_v35  ;;  %v720_v38 = vadd.f32 %v1216_v24, %v550_v36 }
  0xb3   : > { %v759_v39 = vmax.f32 %v727_v33, 0.0  ;;  %v767_v40 = vmax.f32 %v735_v34, 0.0 }
  0xb4   : > { %v744_v41 = vmax.f32 %v712_v37, 0.0  ;;  %v752_v42 = vmax.f32 %v720_v38, 0.0 }
  0xb5   : > { %791 = vst [vmem:[%s1224_s18 + $0x80] sm:$0xff] %v759_v39 }
  0xb6   : > { %799 = vst [vmem:[%s1224_s18 + $0xc0] sm:$0xff] %v767_v40 }
  0xb7   : > { %776 = vst [vmem:[%s1224_s18 + $0x8] sm:$0xff] %v744_v41 }
  0xb8   : > { %784 = vst [vmem:[%s1224_s18 + $0x48] sm:$0xff] %v752_v42  ;;  %v570_v43 = vpop.f32.mrf.mxu2  ;;  %v590_v44 = vpop.f32.mrf.mxu3 }
  0xb9   : > { %v728_v45 = vadd.f32 %v1216_v24, %v570_v43  ;;  %v736_v46 = vadd.f32 %v1216_v24, %v590_v44  ;;  %v533_v47 = vpop.f32.mrf.mxu0  ;;  %v553_v48 = vpop.f32.mrf.mxu1 }
  0xba   : > { %v713_v49 = vadd.f32 %v1216_v24, %v533_v47  ;;  %v721_v50 = vadd.f32 %v1216_v24, %v553_v48 }
  0xbb   : > { %v760_v51 = vmax.f32 %v728_v45, 0.0  ;;  %v768_v52 = vmax.f32 %v736_v46, 0.0 }
  0xbc   : > { %v745_v53 = vmax.f32 %v713_v49, 0.0  ;;  %v753_v54 = vmax.f32 %v721_v50, 0.0 }
  0xbd   : > { %792 = vst [vmem:[%s1224_s18 + $0x88] sm:$0xff] %v760_v51 }
  0xbe   : > { %800 = vst [vmem:[%s1224_s18 + $0xc8] sm:$0xff] %v768_v52 }
  0xbf   : > { %777 = vst [vmem:[%s1224_s18 + $0x10] sm:$0xff] %v745_v53 }
  0xc0   : > { %785 = vst [vmem:[%s1224_s18 + $0x50] sm:$0xff] %v753_v54  ;;  %v573_v55 = vpop.f32.mrf.mxu2  ;;  %v593_v56 = vpop.f32.mrf.mxu3 }
  0xc1   : > { %v729_v57 = vadd.f32 %v1216_v24, %v573_v55  ;;  %v737_v58 = vadd.f32 %v1216_v24, %v593_v56  ;;  %v535_v59 = vpop.f32.mrf.mxu0  ;;  %v555_v60 = vpop.f32.mrf.mxu1 }
  0xc2   : > { %v714_v61 = vadd.f32 %v1216_v24, %v535_v59  ;;  %v722_v62 = vadd.f32 %v1216_v24, %v555_v60 }
  0xc3   : > { %v761_v63 = vmax.f32 %v729_v57, 0.0  ;;  %v769_v0 = vmax.f32 %v737_v58, 0.0 }
  0xc4   : > { %v746_v1 = vmax.f32 %v714_v61, 0.0  ;;  %v754_v2 = vmax.f32 %v722_v62, 0.0 }
  0xc5   : > { %793 = vst [vmem:[%s1224_s18 + $0x90] sm:$0xff] %v761_v63 }
  0xc6   : > { %801 = vst [vmem:[%s1224_s18 + $0xd0] sm:$0xff] %v769_v0 }
  0xc7   : > { %778 = vst [vmem:[%s1224_s18 + $0x18] sm:$0xff] %v746_v1 }
  0xc8   : > { %786 = vst [vmem:[%s1224_s18 + $0x58] sm:$0xff] %v754_v2  ;;  %v575_v3 = vpop.f32.mrf.mxu2  ;;  %v595_v4 = vpop.f32.mrf.mxu3 }
  0xc9   : > { %v730_v5 = vadd.f32 %v1216_v24, %v575_v3  ;;  %v738_v6 = vadd.f32 %v1216_v24, %v595_v4  ;;  %v538_v7 = vpop.f32.mrf.mxu0  ;;  %v558_v8 = vpop.f32.mrf.mxu1 }
  0xca   : > { %v715_v9 = vadd.f32 %v1216_v24, %v538_v7  ;;  %v723_v10 = vadd.f32 %v1216_v24, %v558_v8 }
  0xcb   : > { %v762_v11 = vmax.f32 %v730_v5, 0.0  ;;  %v770_v12 = vmax.f32 %v738_v6, 0.0 }
  0xcc   : > { %v747_v13 = vmax.f32 %v715_v9, 0.0  ;;  %v755_v14 = vmax.f32 %v723_v10, 0.0 }
  0xcd   : > { %794 = vst [vmem:[%s1224_s18 + $0x98] sm:$0xff] %v762_v11 }
  0xce   : > { %802 = vst [vmem:[%s1224_s18 + $0xd8] sm:$0xff] %v770_v12 }
  0xcf   : > { %779 = vst [vmem:[%s1224_s18 + $0x20] sm:$0xff] %v747_v13 }
  0xd0   : > { %787 = vst [vmem:[%s1224_s18 + $0x60] sm:$0xff] %v755_v14  ;;  %v578_v15 = vpop.f32.mrf.mxu2  ;;  %v598_v16 = vpop.f32.mrf.mxu3 }
  0xd1   : > { %v731_v17 = vadd.f32 %v1216_v24, %v578_v15  ;;  %v739_v18 = vadd.f32 %v1216_v24, %v598_v16  ;;  %v540_v19 = vpop.f32.mrf.mxu0  ;;  %v560_v20 = vpop.f32.mrf.mxu1 }
  0xd2   : > { %v716_v21 = vadd.f32 %v1216_v24, %v540_v19  ;;  %v724_v22 = vadd.f32 %v1216_v24, %v560_v20 }
  0xd3   : > { %v763_v23 = vmax.f32 %v731_v17, 0.0  ;;  %v771_v25 = vmax.f32 %v739_v18, 0.0 }
  0xd4   : > { %v748_v26 = vmax.f32 %v716_v21, 0.0  ;;  %v756_v27 = vmax.f32 %v724_v22, 0.0 }
  0xd5   : > { %795 = vst [vmem:[%s1224_s18 + $0xa0] sm:$0xff] %v763_v23 }
  0xd6   : > { %803 = vst [vmem:[%s1224_s18 + $0xe0] sm:$0xff] %v771_v25 }
  0xd7   : > { %780 = vst [vmem:[%s1224_s18 + $0x28] sm:$0xff] %v748_v26 }
  0xd8   : > { %788 = vst [vmem:[%s1224_s18 + $0x68] sm:$0xff] %v756_v27  ;;  %v580_v28 = vpop.f32.mrf.mxu2  ;;  %v600_v29 = vpop.f32.mrf.mxu3 }
  0xd9   : > { %v732_v30 = vadd.f32 %v1216_v24, %v580_v28  ;;  %v740_v31 = vadd.f32 %v1216_v24, %v600_v29  ;;  %v543_v32 = vpop.f32.mrf.mxu0  ;;  %v563_v33 = vpop.f32.mrf.mxu1 }
  0xda   : > { %v717_v34 = vadd.f32 %v1216_v24, %v543_v32  ;;  %v725_v35 = vadd.f32 %v1216_v24, %v563_v33 }
  0xdb   : > { %v764_v36 = vmax.f32 %v732_v30, 0.0  ;;  %v772_v37 = vmax.f32 %v740_v31, 0.0 }
  0xdc   : > { %v749_v38 = vmax.f32 %v717_v34, 0.0  ;;  %v757_v39 = vmax.f32 %v725_v35, 0.0 }
  0xdd   : > { %796 = vst [vmem:[%s1224_s18 + $0xa8] sm:$0xff] %v764_v36 }
  0xde   : > { %804 = vst [vmem:[%s1224_s18 + $0xe8] sm:$0xff] %v772_v37 }
  0xdf   : > { %781 = vst [vmem:[%s1224_s18 + $0x30] sm:$0xff] %v749_v38 }
  0xe0   : > { %789 = vst [vmem:[%s1224_s18 + $0x70] sm:$0xff] %v757_v39  ;;  %v583_v40 = vpop.f32.mrf.mxu2  ;;  %v603_v41 = vpop.f32.mrf.mxu3 }
  0xe1   : > { %v733_v42 = vadd.f32 %v1216_v24, %v583_v40  ;;  %v741_v43 = vadd.f32 %v1216_v24, %v603_v41  ;;  %v545_v44 = vpop.f32.mrf.mxu0  ;;  %v565_v45 = vpop.f32.mrf.mxu1 }
  0xe2   : > { %v718_v46 = vadd.f32 %v1216_v24, %v545_v44  ;;  %v726_v47 = vadd.f32 %v1216_v24, %v565_v45 }
  0xe3   : > { %v765_v48 = vmax.f32 %v733_v42, 0.0  ;;  %v773_v49 = vmax.f32 %v741_v43, 0.0 }
  0xe4   : > { %v750_v50 = vmax.f32 %v718_v46, 0.0  ;;  %v758_v51 = vmax.f32 %v726_v47, 0.0 }
  0xe5   : > { %797 = vst [vmem:[%s1224_s18 + $0xb0] sm:$0xff] %v765_v48 }
  0xe6   : > { %805 = vst [vmem:[%s1224_s18 + $0xf0] sm:$0xff] %v773_v49 }
  0xe7   : > { %782 = vst [vmem:[%s1224_s18 + $0x38] sm:$0xff] %v750_v50 }
  0xe8   : > { %790 = vst [vmem:[%s1224_s18 + $0x78] sm:$0xff] %v758_v51  ;;  %v585_v52 = vpop.f32.mrf.mxu2  ;;  %v605_v53 = vpop.f32.mrf.mxu3 }
  0xe9   : > { %v734_v54 = vadd.f32 %v1216_v24, %v585_v52  ;;  %v742_v55 = vadd.f32 %v1216_v24, %v605_v53 }
  0xeb   : > { %v766_v56 = vmax.f32 %v734_v54, 0.0  ;;  %v774_v57 = vmax.f32 %v742_v55, 0.0 }
  0xed   : > { %798 = vst [vmem:[%s1224_s18 + $0xb8] sm:$0xff] %v766_v56 }
  0xee   : > { %806 = vst [vmem:[%s1224_s18 + $0xf8] sm:$0xff] %v774_v57 }
  0xef PF: > { %s13_s14 = sadd.s32 1, %s1122_s14   ;;  %s1301_s12 = smov %s1118_s13 }
  0xf0   : > { %p10_p5 = scmp.ge.s32.totalorder %s13_s14, 4   ;;  %s1302_s13 = smov %s1304_s15 }
  0xf2   :  { %12 = sbr.rel (!%p10_p5) target bundleno = 2 (0x2), region = 76 }

// kernel: improved_ffdnet_forward.27
= control target key start
LH: loop header
LB: loop body
LE: loop exit
PB: predicated region body
PF: predicated region fallthrough
CT: control target
= control target key end

     0   :  { %s1671_s12 = smov 0   ;;  %s1673_s13 = smov 0   ;;  %s1957_s0 = inlined_call_operand.vmem [shape: bf16[128,1024], index: 0, kind: input, shape index: {}]   ;;  %s1958_s1 = inlined_call_operand.vmem [shape: bf16[1024,128], index: 1, kind: input, shape index: {}]   ;;  %s1959_s2 = inlined_call_operand.vmem [shape: f32[1,128], index: 2, kind: input, shape index: {}]   ;;  %s1960_s3 = inlined_call_operand.vmem [shape: f32[128,128], index: 3, kind: output, shape index: {}]  }
   0x1   :  { %s1675_s14 = smov 0   ;;  %s1677_s15 = smov 0  }
   0x2   :  { %s1679_s16 = smov 0  }
   0x3 LB: > { %s25_s17 = sadd.s32 1, %s1644_s15  ;;  %p48_p1 = scmp.ne.s32.totalorder %s1636_s13, %s1632_s12  ;;  %s1648_s16 = sphi %s1679_s16, %s13_s16   ;;  %s1644_s15 = sphi %s1677_s15, %s1964_s15   ;;  %s1640_s14 = sphi %s1675_s14, %s1963_s14   ;;  %s1636_s13 = sphi %s1673_s13, %s1962_s13   ;;  %s1632_s12 = sphi %s1671_s12, %s1961_s12  }
   0x4   : > { %p26_p0 = scmp.ge.s32.totalorder %s25_s17, 2  ;;  %p49_p2 = scmp.eq.s32.totalorder %s1648_s16, 0 }
   0x5   : > { %s41_s19 = sadd.s32 1, %s1636_s13  ;;  %p1233_p5 = scmp.ge.s32.totalorder %s1648_s16, 2 }
   0x6   : > { %s1966_s17 = smov (%p26_p0, %s25_s17), 0  ;;  %p50_p3 = por %p49_p2, %p48_p1 }
   0x7   : > { %s37_s18 = ssub.s32 %s1644_s15, %s1966_s17  ;;  %162 = sbr.rel (%p1233_p5) target bundleno = 48 (0x30), region = 20 }
   0x8   : > { %p39_p4 = scmp.eq.s32.totalorder %s37_s18, 0 }
   0xa   : > { %s1706_s20 = scalar_select %p39_p4, %s1636_s13, %s41_s19  }
   0xc   : > { %165 = sbr.rel (!%p50_p3) target bundleno = 48 (0x30), region = 24  ;;  %s167_s21 = sand.u32 (%p50_p3), 1, %s1636_s13  }
   0xd   : > { %s1503_s22 = sshll.u32 (%p50_p3), %s1644_s15, 4  ;;  %s1234_s23 = sshll.u32 (%p50_p3), %s167_s21, 8 }
   0xe   : > { %s1714_s26 = scalar_lea.vmem (%p50_p3), %s1957_s0, %s1503_s22  ;;  %s1719_s27 = scalar_lea.vmem (%p50_p3), [#allocation3], %s1234_s23 }
   0xf   : > { %v188_v0 = vld [vmem:[%s1714_s26] sm:$0xff] (%p50_p3)  ;;  %v190_v1 = vld [vmem:[%s1714_s26 + $0x8] sm:$0xff] (%p50_p3) }
  0x10   : > { %v192_v2 = vld [vmem:[%s1714_s26 + $0x20] sm:$0xff] (%p50_p3)  ;;  %189 = vst [vmem:[%s1719_s27] sm:$0xff] (%p50_p3), %v188_v0  ;;  %v194_v3 = vld [vmem:[%s1714_s26 + $0x28] sm:$0xff] (%p50_p3) }
  0x11   : > { %191 = vst [vmem:[%s1719_s27 + $0x8] sm:$0xff] %v190_v1  ;;  %v196_v4 = vld [vmem:[%s1714_s26 + $0x40] sm:$0xff]  ;;  %v198_v5 = vld [vmem:[%s1714_s26 + $0x48] sm:$0xff] }
  0x12   : > { %193 = vst [vmem:[%s1719_s27 + $0x10] sm:$0xff] %v192_v2  ;;  %v200_v6 = vld [vmem:[%s1714_s26 + $0x60] sm:$0xff]  ;;  %v202_v7 = vld [vmem:[%s1714_s26 + $0x68] sm:$0xff] }
  0x13   : > { %195 = vst [vmem:[%s1719_s27 + $0x18] sm:$0xff] %v194_v3  ;;  %v204_v8 = vld [vmem:[%s1714_s26 + $0x80] sm:$0xff]  ;;  %v206_v9 = vld [vmem:[%s1714_s26 + $0x88] sm:$0xff] }
  0x14   : > { %197 = vst [vmem:[%s1719_s27 + $0x20] sm:$0xff] %v196_v4  ;;  %v208_v10 = vld [vmem:[%s1714_s26 + $0xa0] sm:$0xff]  ;;  %v210_v11 = vld [vmem:[%s1714_s26 + $0xa8] sm:$0xff] }
  0x15   : > { %199 = vst [vmem:[%s1719_s27 + $0x28] sm:$0xff] %v198_v5  ;;  %v212_v12 = vld [vmem:[%s1714_s26 + $0xc0] sm:$0xff]  ;;  %v214_v13 = vld [vmem:[%s1714_s26 + $0xc8] sm:$0xff] }
  0x16   : > { %201 = vst [vmem:[%s1719_s27 + $0x30] sm:$0xff] %v200_v6  ;;  %v216_v14 = vld [vmem:[%s1714_s26 + $0xe0] sm:$0xff]  ;;  %v218_v15 = vld [vmem:[%s1714_s26 + $0xe8] sm:$0xff] }
  0x17   : > { %203 = vst [vmem:[%s1719_s27 + $0x38] sm:$0xff] %v202_v7  ;;  %v220_v16 = vld [vmem:[%s1714_s26 + $0x100] sm:$0xff]  ;;  %v222_v17 = vld [vmem:[%s1714_s26 + $0x108] sm:$0xff] }
  0x18   : > { %205 = vst [vmem:[%s1719_s27 + $0x40] sm:$0xff] %v204_v8  ;;  %v224_v18 = vld [vmem:[%s1714_s26 + $0x120] sm:$0xff]  ;;  %v226_v19 = vld [vmem:[%s1714_s26 + $0x128] sm:$0xff] }
  0x19   : > { %207 = vst [vmem:[%s1719_s27 + $0x48] sm:$0xff] %v206_v9  ;;  %v228_v20 = vld [vmem:[%s1714_s26 + $0x140] sm:$0xff]  ;;  %v230_v21 = vld [vmem:[%s1714_s26 + $0x148] sm:$0xff] }
  0x1a   : > { %209 = vst [vmem:[%s1719_s27 + $0x50] sm:$0xff] %v208_v10  ;;  %v232_v22 = vld [vmem:[%s1714_s26 + $0x160] sm:$0xff]  ;;  %v234_v23 = vld [vmem:[%s1714_s26 + $0x168] sm:$0xff] }
  0x1b   : > { %211 = vst [vmem:[%s1719_s27 + $0x58] sm:$0xff] %v210_v11  ;;  %v236_v24 = vld [vmem:[%s1714_s26 + $0x180] sm:$0xff]  ;;  %v238_v25 = vld [vmem:[%s1714_s26 + $0x188] sm:$0xff] }
  0x1c   : > { %213 = vst [vmem:[%s1719_s27 + $0x60] sm:$0xff] %v212_v12  ;;  %v240_v26 = vld [vmem:[%s1714_s26 + $0x1a0] sm:$0xff]  ;;  %v242_v27 = vld [vmem:[%s1714_s26 + $0x1a8] sm:$0xff] }
  0x1d   : > { %215 = vst [vmem:[%s1719_s27 + $0x68] sm:$0xff] %v214_v13  ;;  %v244_v28 = vld [vmem:[%s1714_s26 + $0x1c0] sm:$0xff]  ;;  %v246_v29 = vld [vmem:[%s1714_s26 + $0x1c8] sm:$0xff] }
  0x1e   : > { %217 = vst [vmem:[%s1719_s27 + $0x70] sm:$0xff] %v216_v14  ;;  %v248_v30 = vld [vmem:[%s1714_s26 + $0x1e0] sm:$0xff]  ;;  %v250_v31 = vld [vmem:[%s1714_s26 + $0x1e8] sm:$0xff] }
  0x1f   : > { %219 = vst [vmem:[%s1719_s27 + $0x78] sm:$0xff] %v218_v15 }
  0x20   : > { %221 = vst [vmem:[%s1719_s27 + $0x80] sm:$0xff] %v220_v16 }
  0x21   : > { %223 = vst [vmem:[%s1719_s27 + $0x88] sm:$0xff] %v222_v17 }
  0x22   : > { %225 = vst [vmem:[%s1719_s27 + $0x90] sm:$0xff] %v224_v18 }
  0x23   : > { %227 = vst [vmem:[%s1719_s27 + $0x98] sm:$0xff] %v226_v19 }
  0x24   : > { %229 = vst [vmem:[%s1719_s27 + $0xa0] sm:$0xff] %v228_v20 }
  0x25   : > { %231 = vst [vmem:[%s1719_s27 + $0xa8] sm:$0xff] %v230_v21 }
  0x26   : > { %233 = vst [vmem:[%s1719_s27 + $0xb0] sm:$0xff] %v232_v22 }
  0x27   : > { %235 = vst [vmem:[%s1719_s27 + $0xb8] sm:$0xff] %v234_v23 }
  0x28   : > { %237 = vst [vmem:[%s1719_s27 + $0xc0] sm:$0xff] %v236_v24 }
  0x29   : > { %239 = vst [vmem:[%s1719_s27 + $0xc8] sm:$0xff] %v238_v25 }
  0x2a   : > { %241 = vst [vmem:[%s1719_s27 + $0xd0] sm:$0xff] %v240_v26 }
  0x2b   : > { %243 = vst [vmem:[%s1719_s27 + $0xd8] sm:$0xff] %v242_v27 }
  0x2c   : > { %245 = vst [vmem:[%s1719_s27 + $0xe0] sm:$0xff] %v244_v28 }
  0x2d   : > { %247 = vst [vmem:[%s1719_s27 + $0xe8] sm:$0xff] %v246_v29 }
  0x2e   : > { %249 = vst [vmem:[%s1719_s27 + $0xf0] sm:$0xff] %v248_v30 }
  0x2f   : > { %251 = vst [vmem:[%s1719_s27 + $0xf8] sm:$0xff] %v250_v31 }
  0x30 PF: > { %p1237_p6 = scmp.ge.s32.totalorder %s1648_s16, 1  ;;  %p268_p7 = scmp.lt.s32.totalorder %s1648_s16, 3 }
  0x32   : > { %p269_p8 = pnand %p1237_p6, %p268_p7 }
  0x33   : > { %s275_s28 = sand.u32 (!%p269_p8), 1, %s1632_s12   ;;  %s1239_s29 = sshll.u32 (!%p269_p8), %s1640_s14, 6 }
  0x34   : > { %272 = sbr.rel (%p269_p8) target bundleno = 393 (0x189), region = 51  ;;  %s1238_s30 = sshll.u32 (!%p269_p8), %s275_s28, 8 }
  0x35   : > { %p315_p9 = scmp.lt.s32.totalorder (!%p269_p8), %s1239_s29, 127  ;;  %s1791_s8 = scalar_lea.vmem (!%p269_p8), [#allocation3], %s1238_s30 }
  0x36   : > { %p1241_p10 = scmp.ne.s32.totalorder (!%p269_p8), %s1640_s14, 0 }
  0x39   : > { %s1968_s29 = smov (!%p315_p9, %s1239_s29), 127  ;;  %338 = sbr.rel (%p1241_p10) target bundleno = 79 (0x4f), region = 59 }
  0x3a   : > { %s1240_s4 = sshll.u32 %s1968_s29, 2 }
  0x3b   : > { %s1789_s7 = scalar_lea.vmem %s1958_s1, %s1240_s4 }
  0x3e   : > { %v1650_v32 = vmov 0.0  }
  0x3f   : > { %339 = vst [vmem:[#allocation2 + $0x30] sm:$0xff] %v1650_v32 }
  0x40   : > { %340 = vst [vmem:[#allocation2] sm:$0xff] %v1650_v32 }
  0x41   : > { %341 = vst [vmem:[#allocation2 + $0x58] sm:$0xff] %v1650_v32 }
  0x42   : > { %342 = vst [vmem:[#allocation2 + $0x18] sm:$0xff] %v1650_v32 }
  0x43   : > { %343 = vst [vmem:[#allocation2 + $0x50] sm:$0xff] %v1650_v32 }
  0x44   : > { %344 = vst [vmem:[#allocation2 + $0x68] sm:$0xff] %v1650_v32 }
  0x45   : > { %345 = vst [vmem:[#allocation2 + $0x8] sm:$0xff] %v1650_v32 }
  0x46   : > { %346 = vst [vmem:[#allocation2 + $0x48] sm:$0xff] %v1650_v32 }
  0x47   : > { %347 = vst [vmem:[#allocation2 + $0x40] sm:$0xff] %v1650_v32 }
  0x48   : > { %348 = vst [vmem:[#allocation2 + $0x20] sm:$0xff] %v1650_v32 }
  0x49   : > { %349 = vst [vmem:[#allocation2 + $0x10] sm:$0xff] %v1650_v32 }
  0x4a   : > { %350 = vst [vmem:[#allocation2 + $0x38] sm:$0xff] %v1650_v32 }
  0x4b   : > { %351 = vst [vmem:[#allocation2 + $0x60] sm:$0xff] %v1650_v32 }
  0x4c   : > { %352 = vst [vmem:[#allocation2 + $0x70] sm:$0xff] %v1650_v32 }
  0x4d   : > { %353 = vst [vmem:[#allocation2 + $0x78] sm:$0xff] %v1650_v32 }
  0x4e   : > { %354 = vst [vmem:[#allocation2 + $0x28] sm:$0xff] %v1650_v32 }
  0x4f PF: > { %v1543_v33 = vld [vmem:[%s1789_s7 + $0x38] sm:$0xff]  ;;  %v1542_v37 = vld [vmem:[%s1789_s7 + $0x30] sm:$0xff]  ;;  %v1541_v41 = vld [vmem:[%s1789_s7 + $0x28] sm:$0xff]  ;;  %p1498_p11 = scmp.ne.s32.totalorder %s1640_s14, 1 }
  0x50   : > { %v1551_v34 = vld [vmem:[%s1789_s7 + $0x78] sm:$0xff]  ;;  %819 = vmatpush.bf16.msra.mxu0 %v1543_v33  ;;  %v1550_v38 = vld [vmem:[%s1789_s7 + $0x70] sm:$0xff]  ;;  %v1549_v42 = vld [vmem:[%s1789_s7 + $0x68] sm:$0xff] }
  0x51   : > { %v1559_v35 = vld [vmem:[%s1789_s7 + $0xb8] sm:$0xff]  ;;  %868 = vmatpush.bf16.msra.mxu1 %v1551_v34  ;;  %v1558_v39 = vld [vmem:[%s1789_s7 + $0xb0] sm:$0xff]  ;;  %v1557_v43 = vld [vmem:[%s1789_s7 + $0xa8] sm:$0xff] }
  0x52   : > { %v1567_v36 = vld [vmem:[%s1789_s7 + $0xf8] sm:$0xff]  ;;  %917 = vmatpush.bf16.msra.mxu2 %v1559_v35  ;;  %v1566_v40 = vld [vmem:[%s1789_s7 + $0xf0] sm:$0xff]  ;;  %v1565_v44 = vld [vmem:[%s1789_s7 + $0xe8] sm:$0xff] }
  0x53   : > { %966 = vmatpush.bf16.msra.mxu3 %v1567_v36  ;;  %v1540_v45 = vld [vmem:[%s1789_s7 + $0x20] sm:$0xff]  ;;  %v1539_v49 = vld [vmem:[%s1789_s7 + $0x18] sm:$0xff]  ;;  %v1538_v53 = vld [vmem:[%s1789_s7 + $0x10] sm:$0xff] }
  0x54   : > { %820 = vmatpush.bf16.msra.mxu0 %v1542_v37  ;;  %v1548_v46 = vld [vmem:[%s1789_s7 + $0x60] sm:$0xff]  ;;  %v1547_v50 = vld [vmem:[%s1789_s7 + $0x58] sm:$0xff]  ;;  %v1546_v54 = vld [vmem:[%s1789_s7 + $0x50] sm:$0xff] }
  0x55   : > { %869 = vmatpush.bf16.msra.mxu1 %v1550_v38  ;;  %v1556_v47 = vld [vmem:[%s1789_s7 + $0xa0] sm:$0xff]  ;;  %v1555_v51 = vld [vmem:[%s1789_s7 + $0x98] sm:$0xff]  ;;  %v1554_v55 = vld [vmem:[%s1789_s7 + $0x90] sm:$0xff] }
  0x56   : > { %918 = vmatpush.bf16.msra.mxu2 %v1558_v39  ;;  %v1564_v48 = vld [vmem:[%s1789_s7 + $0xe0] sm:$0xff]  ;;  %v1563_v52 = vld [vmem:[%s1789_s7 + $0xd8] sm:$0xff]  ;;  %v1562_v56 = vld [vmem:[%s1789_s7 + $0xd0] sm:$0xff] }
  0x57   : > { %967 = vmatpush.bf16.msra.mxu3 %v1566_v40  ;;  %v1537_v57 = vld [vmem:[%s1789_s7 + $0x8] sm:$0xff]  ;;  %v1536_v61 = vld [vmem:[%s1789_s7] sm:$0xff]  ;;  %v1506_v2 = vld [vmem:[%s1791_s8 + $0xc] sm:$0xf0] }
  0x58   : > { %821 = vmatpush.bf16.msra.mxu0 %v1541_v41  ;;  %v1545_v58 = vld [vmem:[%s1789_s7 + $0x48] sm:$0xff]  ;;  %v1544_v62 = vld [vmem:[%s1789_s7 + $0x40] sm:$0xff]  ;;  %v1246_v4 = vld [vmem:[%s1791_s8 + $0x10] sm:$0xf0] }
  0x59   : > { %870 = vmatpush.bf16.msra.mxu1 %v1549_v42  ;;  %v1553_v59 = vld [vmem:[%s1789_s7 + $0x88] sm:$0xff]  ;;  %v1552_v63 = vld [vmem:[%s1789_s7 + $0x80] sm:$0xff]  ;;  %v1507_v6 = vld [vmem:[%s1791_s8 + $0x14] sm:$0xf0] }
  0x5a   : > { %919 = vmatpush.bf16.msra.mxu2 %v1557_v43  ;;  %v1561_v60 = vld [vmem:[%s1789_s7 + $0xc8] sm:$0xff]  ;;  %v1560_v0 = vld [vmem:[%s1789_s7 + $0xc0] sm:$0xff]  ;;  %v1254_v8 = vld [vmem:[%s1791_s8 + $0x18] sm:$0xf0] }
  0x5b   : > { %968 = vmatpush.bf16.msra.mxu3 %v1565_v44  ;;  %v1244_v1 = vld [vmem:[%s1791_s8] sm:$0xf]  ;;  %v1504_v3 = vld [vmem:[%s1791_s8 + $0x4] sm:$0xf]  ;;  %v1252_v5 = vld [vmem:[%s1791_s8 + $0x8] sm:$0xf] }
  0x5c   : > { %822 = vmatpush.bf16.msra.mxu0 %v1540_v45  ;;  %v1505_v7 = vld [vmem:[%s1791_s8 + $0xc] sm:$0xf]  ;;  %v1245_v9 = vor.u32 %v1506_v2, %v1244_v1  ;;  %v1249_v10 = vor.u32 %v1504_v3, %v1246_v4  ;;  %v1253_v11 = vor.u32 %v1507_v6, %v1252_v5  ;;  %v1260_v13 = vld [vmem:[%s1791_s8 + $0x20] sm:$0xf]  ;;  %v1510_v14 = vld [vmem:[%s1791_s8 + $0x2c] sm:$0xf0] }
  0x5d   : > { %871 = vmatpush.bf16.msra.mxu1 %v1548_v46  ;;  %v1257_v12 = vor.u32 %v1505_v7, %v1254_v8  ;;  %v1508_v15 = vld [vmem:[%s1791_s8 + $0x24] sm:$0xf]  ;;  %v1262_v16 = vld [vmem:[%s1791_s8 + $0x30] sm:$0xf0]  ;;  %v1268_v17 = vld [vmem:[%s1791_s8 + $0x28] sm:$0xf]  ;;  %v1261_v21 = vor.u32 %v1510_v14, %v1260_v13 }
  0x5e   : > { %920 = vmatpush.bf16.msra.mxu2 %v1556_v47  ;;  %v1511_v18 = vld [vmem:[%s1791_s8 + $0x34] sm:$0xf0]  ;;  %v1509_v19 = vld [vmem:[%s1791_s8 + $0x2c] sm:$0xf]  ;;  %v1270_v20 = vld [vmem:[%s1791_s8 + $0x38] sm:$0xf0]  ;;  %v1265_v22 = vor.u32 %v1508_v15, %v1262_v16 }
  0x5f   : > { %969 = vmatpush.bf16.msra.mxu3 %v1564_v48  ;;  %v1269_v23 = vor.u32 %v1511_v18, %v1268_v17  ;;  %v1273_v24 = vor.u32 %v1509_v19, %v1270_v20  ;;  %v1276_v25 = vld [vmem:[%s1791_s8 + $0x40] sm:$0xf]  ;;  %v1514_v26 = vld [vmem:[%s1791_s8 + $0x4c] sm:$0xf0]  ;;  %v1512_v27 = vld [vmem:[%s1791_s8 + $0x44] sm:$0xf] }
  0x60   : > { %823 = vmatpush.bf16.msra.mxu0 %v1539_v49  ;;  %v1278_v28 = vld [vmem:[%s1791_s8 + $0x50] sm:$0xf0]  ;;  %v1284_v29 = vld [vmem:[%s1791_s8 + $0x48] sm:$0xf]  ;;  %v1515_v30 = vld [vmem:[%s1791_s8 + $0x54] sm:$0xf0]  ;;  %v1277_v33 = vor.u32 %v1514_v26, %v1276_v25 }
  0x61   : > { %872 = vmatpush.bf16.msra.mxu1 %v1547_v50  ;;  %v1513_v31 = vld [vmem:[%s1791_s8 + $0x4c] sm:$0xf]  ;;  %v1286_v32 = vld [vmem:[%s1791_s8 + $0x58] sm:$0xf0]  ;;  %v1281_v34 = vor.u32 %v1512_v27, %v1278_v28  ;;  %v1285_v35 = vor.u32 %v1515_v30, %v1284_v29  ;;  %v1292_v37 = vld [vmem:[%s1791_s8 + $0x60] sm:$0xf] }
  0x62   : > { %921 = vmatpush.bf16.msra.mxu2 %v1555_v51  ;;  %v1289_v36 = vor.u32 %v1513_v31, %v1286_v32  ;;  %v1518_v38 = vld [vmem:[%s1791_s8 + $0x6c] sm:$0xf0]  ;;  %v1516_v39 = vld [vmem:[%s1791_s8 + $0x64] sm:$0xf]  ;;  %v1294_v40 = vld [vmem:[%s1791_s8 + $0x70] sm:$0xf0] }
  0x63   : > { %970 = vmatpush.bf16.msra.mxu3 %v1563_v52  ;;  %v1300_v41 = vld [vmem:[%s1791_s8 + $0x68] sm:$0xf]  ;;  %v1519_v42 = vld [vmem:[%s1791_s8 + $0x74] sm:$0xf0]  ;;  %v1517_v43 = vld [vmem:[%s1791_s8 + $0x6c] sm:$0xf]  ;;  %v1293_v45 = vor.u32 %v1518_v38, %v1292_v37  ;;  %v1297_v46 = vor.u32 %v1516_v39, %v1294_v40 }
  0x64   : > { %824 = vmatpush.bf16.msra.mxu0 %v1538_v53  ;;  %v1302_v44 = vld [vmem:[%s1791_s8 + $0x78] sm:$0xf0]  ;;  %v1301_v47 = vor.u32 %v1519_v42, %v1300_v41  ;;  %v1308_v49 = vld [vmem:[%s1791_s8 + $0x80] sm:$0xf]  ;;  %v1522_v50 = vld [vmem:[%s1791_s8 + $0x8c] sm:$0xf0] }
  0x65   : > { %873 = vmatpush.bf16.msra.mxu1 %v1546_v54  ;;  %v1305_v48 = vor.u32 %v1517_v43, %v1302_v44  ;;  %v1520_v51 = vld [vmem:[%s1791_s8 + $0x84] sm:$0xf]  ;;  %v1310_v52 = vld [vmem:[%s1791_s8 + $0x90] sm:$0xf0]  ;;  %v1316_v53 = vld [vmem:[%s1791_s8 + $0x88] sm:$0xf] }
  0x66   : > { %922 = vmatpush.bf16.msra.mxu2 %v1554_v55  ;;  %v1523_v54 = vld [vmem:[%s1791_s8 + $0x94] sm:$0xf0]  ;;  %v1521_v55 = vld [vmem:[%s1791_s8 + $0x8c] sm:$0xf]  ;;  %v1332_v1 = vld [vmem:[%s1791_s8 + $0xa8] sm:$0xf] }
  0x67   : > { %971 = vmatpush.bf16.msra.mxu3 %v1562_v56  ;;  %v1318_v56 = vld [vmem:[%s1791_s8 + $0x98] sm:$0xf0]  ;;  %v1527_v2 = vld [vmem:[%s1791_s8 + $0xb4] sm:$0xf0]  ;;  %v1525_v3 = vld [vmem:[%s1791_s8 + $0xac] sm:$0xf] }
  0x68   : > { %825 = vmatpush.bf16.msra.mxu0 %v1537_v57  ;;  %v1309_v57 = vor.u32 %v1522_v50, %v1308_v49  ;;  %v1334_v4 = vld [vmem:[%s1791_s8 + $0xb8] sm:$0xf0]  ;;  %v1333_v7 = vor.u32 %v1527_v2, %v1332_v1  ;;  %v1348_v13 = vld [vmem:[%s1791_s8 + $0xc8] sm:$0xf]  ;;  %v1531_v14 = vld [vmem:[%s1791_s8 + $0xd4] sm:$0xf0] }
  0x69   : > { %874 = vmatpush.bf16.msra.mxu1 %v1545_v58  ;;  %v1313_v58 = vor.u32 %v1520_v51, %v1310_v52  ;;  %v1337_v8 = vor.u32 %v1525_v3, %v1334_v4  ;;  %v1529_v15 = vld [vmem:[%s1791_s8 + $0xcc] sm:$0xf]  ;;  %v1350_v16 = vld [vmem:[%s1791_s8 + $0xd8] sm:$0xf0]  ;;  %v1349_v19 = vor.u32 %v1531_v14, %v1348_v13  ;;  %v1364_v25 = vld [vmem:[%s1791_s8 + $0xe8] sm:$0xf] }
  0x6a   : > { %923 = vmatpush.bf16.msra.mxu2 %v1553_v59  ;;  %v1317_v59 = vor.u32 %v1523_v54, %v1316_v53  ;;  %v1353_v20 = vor.u32 %v1529_v15, %v1350_v16  ;;  %v1535_v26 = vld [vmem:[%s1791_s8 + $0xf4] sm:$0xf0]  ;;  %v1533_v27 = vld [vmem:[%s1791_s8 + $0xec] sm:$0xf]  ;;  %v1366_v28 = vld [vmem:[%s1791_s8 + $0xf8] sm:$0xf0] }
  0x6b   : > { %972 = vmatpush.bf16.msra.mxu3 %v1561_v60  ;;  %v1321_v60 = vor.u32 %v1521_v55, %v1318_v56  ;;  %v1365_v31 = vor.u32 %v1535_v26, %v1364_v25  ;;  %v1369_v32 = vor.u32 %v1533_v27, %v1366_v28  ;;  %v355_v41 = vld [vmem:[#allocation2 + $0x30] sm:$0xff]  ;;  %v356_v50 = vld [vmem:[#allocation2] sm:$0xff]  ;;  %v358_v4 = vld [vmem:[#allocation2 + $0x18] sm:$0xff] }
  0x6c   : > { %826 = vmatpush.bf16.msra.mxu0 %v1536_v61  ;;  %v1324_v61 = vld [vmem:[%s1791_s8 + $0xa0] sm:$0xf]  ;;  %v359_v13 = vld [vmem:[#allocation2 + $0x50] sm:$0xff] }
  0x6d   : > { %875 = vmatpush.bf16.msra.mxu1 %v1544_v62  ;;  %v1526_v62 = vld [vmem:[%s1791_s8 + $0xac] sm:$0xf0] }
  0x6e   : > { %924 = vmatpush.bf16.msra.mxu2 %v1552_v63  ;;  %v1524_v63 = vld [vmem:[%s1791_s8 + $0xa4] sm:$0xf]  ;;  %v1325_v5 = vor.u32 %v1526_v62, %v1324_v61 }
  0x6f   : > { %973 = vmatpush.bf16.msra.mxu3 %v1560_v0  ;;  %827 = vmatmul.bf16.vlgmr.msra.gmra.mxu0 %v1245_v9  ;;  %v1326_v0 = vld [vmem:[%s1791_s8 + $0xb0] sm:$0xf0]  ;;  %v1340_v9 = vld [vmem:[%s1791_s8 + $0xc0] sm:$0xf] }
  0x70   : > { %876 = vmatmul.bf16.vlgmr.msra.gmra.mxu1 %v1249_v10  ;;  %v1329_v6 = vor.u32 %v1524_v63, %v1326_v0  ;;  %v1530_v10 = vld [vmem:[%s1791_s8 + $0xcc] sm:$0xf0] }
  0x71   : > { %925 = vmatmul.bf16.vlgmr.msra.gmra.mxu2 %v1253_v11  ;;  %v1528_v11 = vld [vmem:[%s1791_s8 + $0xc4] sm:$0xf]  ;;  %v1341_v17 = vor.u32 %v1530_v10, %v1340_v9 }
  0x72   : > { %974 = vmatmul.bf16.vlgmr.msra.gmra.mxu3 %v1257_v12  ;;  %v1342_v12 = vld [vmem:[%s1791_s8 + $0xd0] sm:$0xf0] }
  0x73   : > { %v1345_v18 = vor.u32 %v1528_v11, %v1342_v12 }
  0x7f   : > { %832 = vmatmul.bf16.gmra.mxu0 %v1261_v21  ;;  %v1356_v21 = vld [vmem:[%s1791_s8 + $0xe0] sm:$0xf] }
  0x80   : > { %881 = vmatmul.bf16.gmra.mxu1 %v1265_v22  ;;  %v1534_v22 = vld [vmem:[%s1791_s8 + $0xec] sm:$0xf0] }
  0x81   : > { %930 = vmatmul.bf16.gmra.mxu2 %v1269_v23  ;;  %v1532_v23 = vld [vmem:[%s1791_s8 + $0xe4] sm:$0xf]  ;;  %v1357_v29 = vor.u32 %v1534_v22, %v1356_v21  ;;  %v360_v22 = vld [vmem:[#allocation2 + $0x68] sm:$0xff] }
  0x82   : > { %979 = vmatmul.bf16.gmra.mxu3 %v1273_v24  ;;  %v1358_v24 = vld [vmem:[%s1791_s8 + $0xf0] sm:$0xf0] }
  0x83   : > { %v1361_v30 = vor.u32 %v1532_v23, %v1358_v24 }
  0x8f   : > { %837 = vmatmul.bf16.gmra.mxu0 %v1277_v33 }
  0x90   : > { %886 = vmatmul.bf16.gmra.mxu1 %v1281_v34 }
  0x91   : > { %935 = vmatmul.bf16.gmra.mxu2 %v1285_v35 }
  0x92   : > { %984 = vmatmul.bf16.gmra.mxu3 %v1289_v36 }
  0x9f   : > { %842 = vmatmul.bf16.gmra.mxu0 %v1293_v45 }
  0xa0   : > { %891 = vmatmul.bf16.gmra.mxu1 %v1297_v46 }
  0xa1   : > { %940 = vmatmul.bf16.gmra.mxu2 %v1301_v47 }
  0xa2   : > { %989 = vmatmul.bf16.gmra.mxu3 %v1305_v48 }
  0xaf   : > { %847 = vmatmul.bf16.gmra.mxu0 %v1309_v57 }
  0xb0   : > { %896 = vmatmul.bf16.gmra.mxu1 %v1313_v58 }
  0xb1   : > { %945 = vmatmul.bf16.gmra.mxu2 %v1317_v59  ;;  %v357_v59 = vld [vmem:[#allocation2 + $0x58] sm:$0xff] }
  0xb2   : > { %994 = vmatmul.bf16.gmra.mxu3 %v1321_v60 }
  0xbf   : > { %852 = vmatmul.bf16.gmra.mxu0 %v1325_v5 }
  0xc0   : > { %901 = vmatmul.bf16.gmra.mxu1 %v1329_v6 }
  0xc1   : > { %950 = vmatmul.bf16.gmra.mxu2 %v1333_v7 }
  0xc2   : > { %999 = vmatmul.bf16.gmra.mxu3 %v1337_v8 }
  0xcf   : > { %857 = vmatmul.bf16.gmra.mxu0 %v1341_v17 }
  0xd0   : > { %906 = vmatmul.bf16.gmra.mxu1 %v1345_v18 }
  0xd1   : > { %955 = vmatmul.bf16.gmra.mxu2 %v1349_v19 }
  0xd2   : > { %1004 = vmatmul.bf16.gmra.mxu3 %v1353_v20 }
  0xdf   : > { %862 = vmatmul.bf16.gmra.mxu0 %v1357_v29 }
  0xe0   : > { %911 = vmatmul.bf16.gmra.mxu1 %v1361_v30 }
  0xe1   : > { %960 = vmatmul.bf16.gmra.mxu2 %v1365_v31  ;;  %v361_v31 = vld [vmem:[#allocation2 + $0x8] sm:$0xff] }
  0xe2   : > { %1009 = vmatmul.bf16.gmra.mxu3 %v1369_v32 }
  0xec   : > { %v828_v33 = vpop.f32.mrf.mxu0 }
  0xed   : > { %v877_v34 = vpop.f32.mrf.mxu1 }
  0xee   : > { %v878_v35 = vadd.f32 %v877_v34, %v828_v33 }
  0xf4   : > { %v926_v36 = vpop.f32.mrf.mxu2  ;;  %v830_v39 = vpop.f32.mrf.mxu0 }
  0xf5   : > { %v975_v37 = vpop.f32.mrf.mxu3  ;;  %v927_v38 = vadd.f32 %v926_v36, %v878_v35  ;;  %v879_v40 = vpop.f32.mrf.mxu1 }
  0xf6   : > { %v880_v44 = vadd.f32 %v879_v40, %v830_v39  ;;  %v362_v40 = vld [vmem:[#allocation2 + $0x48] sm:$0xff] }
  0xf7   : > { %v976_v42 = vadd.f32 %v975_v37, %v927_v38 }
  0xf9   : > { %v1015_v43 = vadd.f32 %v976_v42, %v355_v41 }
  0xfb   : > { %1031 = vst [vmem:[#allocation2 + $0x30] sm:$0xff] %v1015_v43 }
  0xfc   : > { %v928_v45 = vpop.f32.mrf.mxu2  ;;  %v833_v48 = vpop.f32.mrf.mxu0 }
  0xfd   : > { %v977_v46 = vpop.f32.mrf.mxu3  ;;  %v929_v47 = vadd.f32 %v928_v45, %v880_v44  ;;  %v882_v49 = vpop.f32.mrf.mxu1 }
  0xfe   : > { %v883_v53 = vadd.f32 %v882_v49, %v833_v48  ;;  %v363_v49 = vld [vmem:[#allocation2 + $0x40] sm:$0xff] }
  0xff   : > { %v978_v51 = vadd.f32 %v977_v46, %v929_v47 }
 0x101   : > { %v1016_v52 = vadd.f32 %v978_v51, %v356_v50 }
 0x103   : > { %1032 = vst [vmem:[#allocation2] sm:$0xff] %v1016_v52 }
 0x104   : > { %v931_v54 = vpop.f32.mrf.mxu2  ;;  %v835_v57 = vpop.f32.mrf.mxu0 }
 0x105   : > { %v980_v55 = vpop.f32.mrf.mxu3  ;;  %v932_v56 = vadd.f32 %v931_v54, %v883_v53  ;;  %v884_v58 = vpop.f32.mrf.mxu1 }
 0x106   : > { %v885_v62 = vadd.f32 %v884_v58, %v835_v57  ;;  %v364_v58 = vld [vmem:[#allocation2 + $0x20] sm:$0xff] }
 0x107   : > { %v981_v60 = vadd.f32 %v980_v55, %v932_v56 }
 0x109   : > { %v1017_v61 = vadd.f32 %v981_v60, %v357_v59 }
 0x10b   : > { %1033 = vst [vmem:[#allocation2 + $0x58] sm:$0xff] %v1017_v61 }
 0x10c   : > { %v933_v63 = vpop.f32.mrf.mxu2  ;;  %v838_v2 = vpop.f32.mrf.mxu0 }
 0x10d   : > { %v982_v0 = vpop.f32.mrf.mxu3  ;;  %v934_v1 = vadd.f32 %v933_v63, %v885_v62  ;;  %v887_v3 = vpop.f32.mrf.mxu1 }
 0x10e   : > { %v888_v7 = vadd.f32 %v887_v3, %v838_v2  ;;  %v365_v3 = vld [vmem:[#allocation2 + $0x10] sm:$0xff] }
 0x10f   : > { %v983_v5 = vadd.f32 %v982_v0, %v934_v1 }
 0x111   : > { %v1018_v6 = vadd.f32 %v983_v5, %v358_v4 }
 0x113   : > { %1034 = vst [vmem:[#allocation2 + $0x18] sm:$0xff] %v1018_v6 }
 0x114   : > { %v936_v8 = vpop.f32.mrf.mxu2  ;;  %v840_v11 = vpop.f32.mrf.mxu0 }
 0x115   : > { %v985_v9 = vpop.f32.mrf.mxu3  ;;  %v937_v10 = vadd.f32 %v936_v8, %v888_v7  ;;  %v889_v12 = vpop.f32.mrf.mxu1 }
 0x116   : > { %v890_v16 = vadd.f32 %v889_v12, %v840_v11  ;;  %v366_v12 = vld [vmem:[#allocation2 + $0x38] sm:$0xff] }
 0x117   : > { %v986_v14 = vadd.f32 %v985_v9, %v937_v10 }
 0x119   : > { %v1019_v15 = vadd.f32 %v986_v14, %v359_v13 }
 0x11b   : > { %1035 = vst [vmem:[#allocation2 + $0x50] sm:$0xff] %v1019_v15 }
 0x11c   : > { %v938_v17 = vpop.f32.mrf.mxu2  ;;  %v843_v20 = vpop.f32.mrf.mxu0 }
 0x11d   : > { %v987_v18 = vpop.f32.mrf.mxu3  ;;  %v939_v19 = vadd.f32 %v938_v17, %v890_v16  ;;  %v892_v21 = vpop.f32.mrf.mxu1 }
 0x11e   : > { %v893_v25 = vadd.f32 %v892_v21, %v843_v20  ;;  %v367_v21 = vld [vmem:[#allocation2 + $0x60] sm:$0xff] }
 0x11f   : > { %v988_v23 = vadd.f32 %v987_v18, %v939_v19 }
 0x121   : > { %v1020_v24 = vadd.f32 %v988_v23, %v360_v22 }
 0x123   : > { %1036 = vst [vmem:[#allocation2 + $0x68] sm:$0xff] %v1020_v24 }
 0x124   : > { %v941_v26 = vpop.f32.mrf.mxu2  ;;  %v845_v29 = vpop.f32.mrf.mxu0 }
 0x125   : > { %v990_v27 = vpop.f32.mrf.mxu3  ;;  %v942_v28 = vadd.f32 %v941_v26, %v893_v25  ;;  %v894_v30 = vpop.f32.mrf.mxu1 }
 0x126   : > { %v895_v34 = vadd.f32 %v894_v30, %v845_v29 }
 0x127   : > { %v991_v32 = vadd.f32 %v990_v27, %v942_v28  ;;  %v368_v28 = vld [vmem:[#allocation2 + $0x70] sm:$0xff] }
 0x129   : > { %v1021_v33 = vadd.f32 %v991_v32, %v361_v31 }
 0x12b   : > { %1037 = vst [vmem:[#allocation2 + $0x8] sm:$0xff] %v1021_v33 }
 0x12c   : > { %v943_v35 = vpop.f32.mrf.mxu2  ;;  %v848_v38 = vpop.f32.mrf.mxu0 }
 0x12d   : > { %v992_v36 = vpop.f32.mrf.mxu3  ;;  %v944_v37 = vadd.f32 %v943_v35, %v895_v34  ;;  %v897_v39 = vpop.f32.mrf.mxu1 }
 0x12e   : > { %v898_v43 = vadd.f32 %v897_v39, %v848_v38 }
 0x12f   : > { %v993_v41 = vadd.f32 %v992_v36, %v944_v37  ;;  %v369_v37 = vld [vmem:[#allocation2 + $0x78] sm:$0xff] }
 0x131   : > { %v1022_v42 = vadd.f32 %v993_v41, %v362_v40 }
 0x133   : > { %1038 = vst [vmem:[#allocation2 + $0x48] sm:$0xff] %v1022_v42 }
 0x134   : > { %v946_v44 = vpop.f32.mrf.mxu2  ;;  %v850_v47 = vpop.f32.mrf.mxu0 }
 0x135   : > { %v995_v45 = vpop.f32.mrf.mxu3  ;;  %v947_v46 = vadd.f32 %v946_v44, %v898_v43  ;;  %v899_v48 = vpop.f32.mrf.mxu1 }
 0x136   : > { %v900_v52 = vadd.f32 %v899_v48, %v850_v47 }
 0x137   : > { %v996_v50 = vadd.f32 %v995_v45, %v947_v46  ;;  %v370_v45 = vld [vmem:[#allocation2 + $0x28] sm:$0xff] }
 0x139   : > { %v1023_v51 = vadd.f32 %v996_v50, %v363_v49 }
 0x13b   : > { %1039 = vst [vmem:[#allocation2 + $0x40] sm:$0xff] %v1023_v51 }
 0x13c   : > { %v948_v53 = vpop.f32.mrf.mxu2  ;;  %v853_v56 = vpop.f32.mrf.mxu0 }
 0x13d   : > { %v997_v54 = vpop.f32.mrf.mxu3  ;;  %v949_v55 = vadd.f32 %v948_v53, %v900_v52  ;;  %v902_v57 = vpop.f32.mrf.mxu1 }
 0x13e   : > { %v903_v61 = vadd.f32 %v902_v57, %v853_v56 }
 0x13f   : > { %v998_v59 = vadd.f32 %v997_v54, %v949_v55 }
 0x141   : > { %v1024_v60 = vadd.f32 %v998_v59, %v364_v58 }
 0x143   : > { %1040 = vst [vmem:[#allocation2 + $0x20] sm:$0xff] %v1024_v60 }
 0x144   : > { %v951_v62 = vpop.f32.mrf.mxu2  ;;  %v855_v1 = vpop.f32.mrf.mxu0 }
 0x145   : > { %v1000_v63 = vpop.f32.mrf.mxu3  ;;  %v952_v0 = vadd.f32 %v951_v62, %v903_v61  ;;  %v904_v2 = vpop.f32.mrf.mxu1 }
 0x146   : > { %v905_v6 = vadd.f32 %v904_v2, %v855_v1 }
 0x147   : > { %v1001_v4 = vadd.f32 %v1000_v63, %v952_v0 }
 0x149   : > { %v1025_v5 = vadd.f32 %v1001_v4, %v365_v3 }
 0x14b   : > { %1041 = vst [vmem:[#allocation2 + $0x10] sm:$0xff] %v1025_v5 }
 0x14c   : > { %v953_v7 = vpop.f32.mrf.mxu2  ;;  %v858_v10 = vpop.f32.mrf.mxu0 }
 0x14d   : > { %v1002_v8 = vpop.f32.mrf.mxu3  ;;  %v954_v9 = vadd.f32 %v953_v7, %v905_v6  ;;  %v907_v11 = vpop.f32.mrf.mxu1 }
 0x14e   : > { %v908_v15 = vadd.f32 %v907_v11, %v858_v10 }
 0x14f   : > { %v1003_v13 = vadd.f32 %v1002_v8, %v954_v9 }
 0x151   : > { %v1026_v14 = vadd.f32 %v1003_v13, %v366_v12 }
 0x153   : > { %1042 = vst [vmem:[#allocation2 + $0x38] sm:$0xff] %v1026_v14 }
 0x154   : > { %v956_v16 = vpop.f32.mrf.mxu2  ;;  %v860_v19 = vpop.f32.mrf.mxu0 }
 0x155   : > { %v1005_v17 = vpop.f32.mrf.mxu3  ;;  %v957_v18 = vadd.f32 %v956_v16, %v908_v15  ;;  %v909_v20 = vpop.f32.mrf.mxu1 }
 0x156   : > { %v910_v24 = vadd.f32 %v909_v20, %v860_v19 }
 0x157   : > { %v1006_v22 = vadd.f32 %v1005_v17, %v957_v18 }
 0x159   : > { %v1027_v23 = vadd.f32 %v1006_v22, %v367_v21 }
 0x15b   : > { %1043 = vst [vmem:[#allocation2 + $0x60] sm:$0xff] %v1027_v23 }
 0x15c   : > { %v958_v25 = vpop.f32.mrf.mxu2  ;;  %v863_v29 = vpop.f32.mrf.mxu0 }
 0x15d   : > { %v1007_v26 = vpop.f32.mrf.mxu3  ;;  %v959_v27 = vadd.f32 %v958_v25, %v910_v24  ;;  %v912_v30 = vpop.f32.mrf.mxu1 }
 0x15e   : > { %v913_v33 = vadd.f32 %v912_v30, %v863_v29 }
 0x15f   : > { %v1008_v31 = vadd.f32 %v1007_v26, %v959_v27 }
 0x161   : > { %v1028_v32 = vadd.f32 %v1008_v31, %v368_v28 }
 0x163   : > { %1044 = vst [vmem:[#allocation2 + $0x70] sm:$0xff] %v1028_v32 }
 0x164   : > { %v961_v34 = vpop.f32.mrf.mxu2  ;;  %v865_v39 = vpop.f32.mrf.mxu0 }
 0x165   : > { %v1010_v35 = vpop.f32.mrf.mxu3  ;;  %v962_v36 = vadd.f32 %v961_v34, %v913_v33  ;;  %v914_v40 = vpop.f32.mrf.mxu1 }
 0x166   : > { %v915_v42 = vadd.f32 %v914_v40, %v865_v39 }
 0x167   : > { %v1011_v38 = vadd.f32 %v1010_v35, %v962_v36 }
 0x169   : > { %v1029_v41 = vadd.f32 %v1011_v38, %v369_v37 }
 0x16b   : > { %1045 = vst [vmem:[#allocation2 + $0x78] sm:$0xff] %v1029_v41 }
 0x16c   : > { %v963_v43 = vpop.f32.mrf.mxu2 }
 0x16d   : > { %v964_v44 = vadd.f32 %v963_v43, %v915_v42  ;;  %v1012_v46 = vpop.f32.mrf.mxu3 }
 0x16f   : > { %v1013_v47 = vadd.f32 %v1012_v46, %v964_v44  ;;  %1050 = sbr.rel (%p1498_p11) target bundleno = 393 (0x189), region = 63 }
 0x171   : > { %v1030_v48 = vadd.f32 %v1013_v47, %v370_v45 }
 0x173   : > { %1046 = vst [vmem:[#allocation2 + $0x28] sm:$0xff] %v1030_v48 }
 0x174   : > { %v1051_v49 = vld [vmem:[#allocation2 + $0x30] sm:$0xff]  ;;  %v1609_v50 = vld [vmem:[%s1959_s2] ss:$0 sm:$0xff]  ;;  %v1053_v52 = vld [vmem:[#allocation2 + $0x58] sm:$0xff] }
 0x175   : > { %v1052_v51 = vld [vmem:[#allocation2] sm:$0xff]  ;;  %v1054_v53 = vld [vmem:[#allocation2 + $0x18] sm:$0xff]  ;;  %v1071_v54 = vadd.f32 %v1609_v50, %v1051_v49  ;;  %v1073_v56 = vadd.f32 %v1609_v50, %v1053_v52  ;;  %v1055_v58 = vld [vmem:[#allocation2 + $0x50] sm:$0xff] }
 0x176   : > { %v1072_v55 = vadd.f32 %v1609_v50, %v1052_v51  ;;  %v1074_v57 = vadd.f32 %v1609_v50, %v1054_v53  ;;  %v1056_v59 = vld [vmem:[#allocation2 + $0x68] sm:$0xff]  ;;  %v1075_v61 = vadd.f32 %v1609_v50, %v1055_v58  ;;  %v1059_v0 = vld [vmem:[#allocation2 + $0x40] sm:$0xff]  ;;  %v1061_v8 = vld [vmem:[#allocation2 + $0x10] sm:$0xff] }
 0x177   : > { %v1057_v60 = vld [vmem:[#allocation2 + $0x8] sm:$0xff]  ;;  %v1076_v62 = vadd.f32 %v1609_v50, %v1056_v59  ;;  %v1087_v1 = vmax.f32 %v1071_v54, 0.0  ;;  %v1089_v3 = vmax.f32 %v1073_v56, 0.0  ;;  %v1060_v5 = vld [vmem:[#allocation2 + $0x20] sm:$0xff]  ;;  %v1079_v10 = vadd.f32 %v1609_v50, %v1059_v0  ;;  %v1062_v11 = vld [vmem:[#allocation2 + $0x38] sm:$0xff] }
 0x178   : > { %v1058_v63 = vld [vmem:[#allocation2 + $0x48] sm:$0xff]  ;;  %v1088_v2 = vmax.f32 %v1072_v55, 0.0  ;;  %v1077_v4 = vadd.f32 %v1609_v50, %v1057_v60  ;;  %v1090_v6 = vmax.f32 %v1074_v57, 0.0  ;;  %v1091_v9 = vmax.f32 %v1075_v61, 0.0  ;;  %v1063_v14 = vld [vmem:[#allocation2 + $0x60] sm:$0xff]  ;;  %v1064_v17 = vld [vmem:[#allocation2 + $0x70] sm:$0xff] }
 0x179   : > { %v1078_v7 = vadd.f32 %v1609_v50, %v1058_v63  ;;  %1103 = vst [vmem:[%s1960_s3] sm:$0xff] %v1087_v1  ;;  %v1092_v12 = vmax.f32 %v1076_v62, 0.0  ;;  %v1080_v13 = vadd.f32 %v1609_v50, %v1060_v5  ;;  %v1081_v16 = vadd.f32 %v1609_v50, %v1061_v8  ;;  %v1065_v20 = vld [vmem:[#allocation2 + $0x78] sm:$0xff] }
 0x17a   : > { %1104 = vst [vmem:[%s1960_s3 + $0x8] sm:$0xff] %v1088_v2  ;;  %v1093_v15 = vmax.f32 %v1077_v4, 0.0  ;;  %v1082_v19 = vadd.f32 %v1609_v50, %v1062_v11  ;;  %v1095_v21 = vmax.f32 %v1079_v10, 0.0  ;;  %v1083_v22 = vadd.f32 %v1609_v50, %v1063_v14  ;;  %v1066_v23 = vld [vmem:[#allocation2 + $0x28] sm:$0xff] }
 0x17b   : > { %1105 = vst [vmem:[%s1960_s3 + $0x10] sm:$0xff] %v1089_v3  ;;  %v1094_v18 = vmax.f32 %v1078_v7, 0.0  ;;  %v1096_v24 = vmax.f32 %v1080_v13, 0.0  ;;  %v1084_v25 = vadd.f32 %v1609_v50, %v1064_v17  ;;  %v1097_v26 = vmax.f32 %v1081_v16, 0.0 }
 0x17c   : > { %1106 = vst [vmem:[%s1960_s3 + $0x18] sm:$0xff] %v1090_v6  ;;  %v1085_v27 = vadd.f32 %v1609_v50, %v1065_v20  ;;  %v1098_v28 = vmax.f32 %v1082_v19, 0.0  ;;  %v1086_v29 = vadd.f32 %v1609_v50, %v1066_v23  ;;  %v1099_v30 = vmax.f32 %v1083_v22, 0.0 }
 0x17d   : > { %1107 = vst [vmem:[%s1960_s3 + $0x20] sm:$0xff] %v1091_v9  ;;  %v1100_v31 = vmax.f32 %v1084_v25, 0.0 }
 0x17e   : > { %1108 = vst [vmem:[%s1960_s3 + $0x28] sm:$0xff] %v1092_v12  ;;  %v1101_v32 = vmax.f32 %v1085_v27, 0.0  ;;  %v1102_v33 = vmax.f32 %v1086_v29, 0.0 }
 0x17f   : > { %1109 = vst [vmem:[%s1960_s3 + $0x30] sm:$0xff] %v1093_v15 }
 0x180   : > { %1110 = vst [vmem:[%s1960_s3 + $0x38] sm:$0xff] %v1094_v18 }
 0x181   : > { %1111 = vst [vmem:[%s1960_s3 + $0x40] sm:$0xff] %v1095_v21 }
 0x182   : > { %1112 = vst [vmem:[%s1960_s3 + $0x48] sm:$0xff] %v1096_v24 }
 0x183   : > { %1113 = vst [vmem:[%s1960_s3 + $0x50] sm:$0xff] %v1097_v26 }
 0x184   : > { %1114 = vst [vmem:[%s1960_s3 + $0x58] sm:$0xff] %v1098_v28 }
 0x185   : > { %1115 = vst [vmem:[%s1960_s3 + $0x60] sm:$0xff] %v1099_v30 }
 0x186   : > { %1116 = vst [vmem:[%s1960_s3 + $0x68] sm:$0xff] %v1100_v31 }
 0x187   : > { %1117 = vst [vmem:[%s1960_s3 + $0x70] sm:$0xff] %v1101_v32 }
 0x188   : > { %1118 = vst [vmem:[%s1960_s3 + $0x78] sm:$0xff] %v1102_v33 }
 0x189 PF: > { %s13_s16 = sadd.s32 1, %s1648_s16   ;;  %s1961_s12 = smov %s1636_s13 }
 0x18a   : > { %p10_p12 = scmp.ge.s32.totalorder %s13_s16, 4   ;;  %s1962_s13 = smov %s1706_s20 }
 0x18b   : > { %s1963_s14 = smov %s1644_s15  ;;  %s1964_s15 = smov %s1966_s17 }
 0x18c   :  { %12 = sbr.rel (!%p10_p12) target bundleno = 3 (0x3), region = 104 }

// kernel: improved_ffdnet_forward.28
= control target key start
LH: loop header
LB: loop body
LE: loop exit
PB: predicated region body
PF: predicated region fallthrough
CT: control target
= control target key end

     0   :  { %s1938_s0 = inlined_call_operand.vmem [shape: bf16[32,1536], index: 0, kind: input, shape index: {}]   ;;  %s1939_s1 = inlined_call_operand.vmem [shape: bf16[1536,256], index: 1, kind: input, shape index: {}]   ;;  %s1940_s2 = inlined_call_operand.vmem [shape: f32[1,256], index: 2, kind: input, shape index: {}]   ;;  %s1941_s3 = inlined_call_operand.vmem [shape: f32[32,256], index: 3, kind: output, shape index: {}]  }
   0x1   :  { %1943 = sst [smem:[#allocation7_spill]] %s1938_s0 }
   0x2   :  { %1944 = sst [smem:[#allocation8_spill]] %s1939_s1 }
   0x3   :  { %s1571_s12 = smov 0   ;;  %s1573_s13 = smov 0  }
   0x4   :  { %s1575_s14 = smov 0   ;;  %s1577_s15 = smov 0  }
   0x5   :  { %s1579_s16 = smov 0   ;;  %s1581_s17 = smov 0  }
   0x6   :  { %s1583_s18 = smov 0   ;;  %s1585_s19 = smov 0  }
   0x7   :  { %s1587_s20 = smov 0   ;;  %s1589_s21 = smov 0  }
   0x8   :  { %s1591_s22 = smov 0  }
   0x9 LB: > { %s1149_s23 = sadd.s32 4294967295, %s1548_s22   ;;  %s25_s24 = sadd.s32 1, %s1540_s20  ;;  %s1548_s22 = sphi %s1591_s22, %s13_s22   ;;  %s1544_s21 = sphi %s1589_s21, %s1961_s21   ;;  %s1540_s20 = sphi %s1587_s20, %s1960_s20   ;;  %s1536_s19 = sphi %s1585_s19, %s1959_s19   ;;  %s1532_s18 = sphi %s1583_s18, %s1958_s18   ;;  %s1528_s17 = sphi %s1581_s17, %s1957_s17   ;;  %s1524_s16 = sphi %s1579_s16, %s1956_s16   ;;  %s1520_s15 = sphi %s1577_s15, %s1955_s15   ;;  %s1516_s14 = sphi %s1575_s14, %s1954_s14   ;;  %s1512_s13 = sphi %s1573_s13, %s1953_s13   ;;  %s1508_s12 = sphi %s1571_s12, %s1952_s12  }
   0xa   : > { %p26_p0 = scmp.ge.s32.totalorder %s25_s24, 3  ;;  %s28_s25 = sadd.s32 1, %s1544_s21 }
   0xb   : > { %s41_s26 = sadd.s32 1, %s1528_s17  ;;  %p48_p1 = scmp.ne.s32.totalorder %s1528_s17, %s1524_s16 }
   0xc   : > { %s1963_s24 = smov (%p26_p0, %s25_s24), 0  ;;  %s1965_s25 = smov (!%p26_p0, %s28_s25), %s1544_s21 }
   0xd   : > { %s37_s27 = ssub.s32 %s1540_s20, %s1963_s24  ;;  %p49_p2 = scmp.eq.s32.totalorder %s1548_s22, 0 }
   0xe   : > { %p30_p3 = scmp.ge.s32.totalorder %s1965_s25, 2  ;;  %p39_p4 = scmp.eq.s32.totalorder %s37_s27, 0 }
   0xf   : > { %p1638_p5 = por %p49_p2, %p48_p1  ;;  %s69_s29 = sadd.s32 1, %s1520_s15 }
  0x10   : > { %s1967_s25 = smov (%p30_p3, %s1965_s25), 0  ;;  %p76_p6 = scmp.ne.s32.totalorder %s1520_s15, %s1516_s14 }
  0x11   : > { %1946 = sst [smem:[#allocation6_spill]] %s1967_s25  ;;  %s65_s4 = ssub.s32 %s1544_s21, %s1967_s25 }
  0x12   : > { %s1646_s30 = scalar_select %p39_p4, %s1528_s17, %s41_s26  }
  0x13   : > { %s66_s5 = sor.u32 %s65_s4, %s37_s27  ;;  %p121_p7 = scmp.eq.s32.totalorder %s65_s4, 0 }
  0x14   : > { %p67_p8 = scmp.eq.s32.totalorder %s66_s5, 0  ;;  %p1652_p9 = por %p76_p6, %p49_p2 }
  0x15   : > { %s123_s7 = sadd.s32 1, %s1512_s13  ;;  %p133_p10 = scmp.ne.s32.totalorder %s1512_s13, %s1508_s12 }
  0x16   : > { %s1660_s8 = scalar_select %p67_p8, %s1520_s15, %s69_s29  }
  0x17   : > { %s1663_s9 = scalar_select %p121_p7, %s1512_s13, %s123_s7  }
  0x18   : > { %p134_p11 = scmp.eq.s32.totalorder %s1149_s23, 5  ;;  %p1152_p13 = scmp.ge.s32.totalorder %s1548_s22, 6 }
  0x1a   : > { %p1665_p12 = por %p134_p11, %p133_p10  ;;  %156 = sbr.rel (%p1152_p13) target bundleno = 123 (0x7b), region = 16 }
  0x1f   : > { %159 = sbr.rel (!%p1638_p5) target bundleno = 49 (0x31), region = 20  ;;  %s161_s11 = sand.u32 (%p1638_p5), 1, %s1528_s17  }
  0x20   : > { %s1330_s26 = sshll.u32 (%p1638_p5), %s1540_s20, 4  ;;  %s1153_s27 = sshll.u32 (%p1638_p5), %s161_s11, 6 }
  0x21   : > { %s1949_s0 = sld [smem:[#allocation7_spill]] (%p1638_p5)  ;;  %s163_s23 = scalar_lea.vmem (%p1638_p5), [#allocation3], %s1153_s27 }
  0x27   : > { %s169_s5 = scalar_lea.vmem %s1949_s0, %s1330_s26 }
  0x28   : > { %v182_v0 = vld [vmem:[%s169_s5] sm:$0xff]  ;;  %v184_v1 = vld [vmem:[%s169_s5 + $0x8] sm:$0xff]  ;;  %v186_v2 = vld [vmem:[%s169_s5 + $0x30] sm:$0xff] }
  0x29   : > { %183 = vst [vmem:[%s163_s23] sm:$0xff] %v182_v0  ;;  %v188_v3 = vld [vmem:[%s169_s5 + $0x38] sm:$0xff]  ;;  %v190_v4 = vld [vmem:[%s169_s5 + $0x60] sm:$0xff]  ;;  %v192_v5 = vld [vmem:[%s169_s5 + $0x68] sm:$0xff] }
  0x2a   : > { %185 = vst [vmem:[%s163_s23 + $0x8] sm:$0xff] %v184_v1  ;;  %v194_v6 = vld [vmem:[%s169_s5 + $0x90] sm:$0xff]  ;;  %v196_v7 = vld [vmem:[%s169_s5 + $0x98] sm:$0xff] }
  0x2b   : > { %187 = vst [vmem:[%s163_s23 + $0x10] sm:$0xff] %v186_v2 }
  0x2c   : > { %189 = vst [vmem:[%s163_s23 + $0x18] sm:$0xff] %v188_v3 }
  0x2d   : > { %191 = vst [vmem:[%s163_s23 + $0x20] sm:$0xff] %v190_v4 }
  0x2e   : > { %193 = vst [vmem:[%s163_s23 + $0x28] sm:$0xff] %v192_v5 }
  0x2f   : > { %195 = vst [vmem:[%s163_s23 + $0x30] sm:$0xff] %v194_v6 }
  0x30   : > { %197 = vst [vmem:[%s163_s23 + $0x38] sm:$0xff] %v196_v7 }
  0x31 PF: > { %203 = sbr.rel (!%p1652_p9) target bundleno = 123 (0x7b), region = 43  ;;  %s205_s28 = sand.u32 (%p1652_p9), 1, %s1520_s15  }
  0x32   : > { %s1331_s7 = sshll.u32 (%p1652_p9), %s1540_s20, 7  ;;  %s1156_s11 = sshll.u32 (%p1652_p9), %s205_s28, 8 }
  0x33   : > { %s210_s26 = sadd.s32 (%p1652_p9), %s1544_s21, %s1331_s7  ;;  %s1950_s1 = sld [smem:[#allocation8_spill]] (%p1652_p9) }
  0x34   : > { %s1159_s27 = sshll.u32 (%p1652_p9), %s210_s26, 2  ;;  %s1690_s6 = scalar_lea.vmem (%p1652_p9), [#allocation4], %s1156_s11 }
  0x39   : > { %s1685_s0 = scalar_lea.vmem %s1950_s1, %s1159_s27 }
  0x3a   : > { %v229_v8 = vld [vmem:[%s1685_s0] sm:$0xf]  ;;  %v231_v9 = vld [vmem:[%s1685_s0 + $0x8] sm:$0xf]  ;;  %v233_v10 = vld [vmem:[%s1685_s0 + $0x10] sm:$0xf] }
  0x3b   : > { %230 = vst [vmem:[%s1690_s6] sm:$0xf] %v229_v8  ;;  %v235_v11 = vld [vmem:[%s1685_s0 + $0x18] sm:$0xf]  ;;  %v237_v12 = vld [vmem:[%s1685_s0 + $0x20] sm:$0xf] }
  0x3c   : > { %232 = vst [vmem:[%s1690_s6 + $0x4] sm:$0xf] %v231_v9  ;;  %v239_v13 = vld [vmem:[%s1685_s0 + $0x28] sm:$0xf]  ;;  %v241_v14 = vld [vmem:[%s1685_s0 + $0x30] sm:$0xf] }
  0x3d   : > { %234 = vst [vmem:[%s1690_s6 + $0x8] sm:$0xf] %v233_v10  ;;  %v243_v15 = vld [vmem:[%s1685_s0 + $0x38] sm:$0xf]  ;;  %v245_v16 = vld [vmem:[%s1685_s0 + $0x40] sm:$0xf] }
  0x3e   : > { %236 = vst [vmem:[%s1690_s6 + $0xc] sm:$0xf] %v235_v11  ;;  %v247_v17 = vld [vmem:[%s1685_s0 + $0x48] sm:$0xf]  ;;  %v249_v18 = vld [vmem:[%s1685_s0 + $0x50] sm:$0xf] }
  0x3f   : > { %238 = vst [vmem:[%s1690_s6 + $0x10] sm:$0xf] %v237_v12  ;;  %v251_v19 = vld [vmem:[%s1685_s0 + $0x58] sm:$0xf]  ;;  %v253_v20 = vld [vmem:[%s1685_s0 + $0x60] sm:$0xf] }
  0x40   : > { %240 = vst [vmem:[%s1690_s6 + $0x14] sm:$0xf] %v239_v13  ;;  %v255_v21 = vld [vmem:[%s1685_s0 + $0x68] sm:$0xf]  ;;  %v257_v22 = vld [vmem:[%s1685_s0 + $0x70] sm:$0xf] }
  0x41   : > { %242 = vst [vmem:[%s1690_s6 + $0x18] sm:$0xf] %v241_v14  ;;  %v259_v23 = vld [vmem:[%s1685_s0 + $0x78] sm:$0xf]  ;;  %v261_v24 = vld [vmem:[%s1685_s0 + $0x80] sm:$0xf] }
  0x42   : > { %244 = vst [vmem:[%s1690_s6 + $0x1c] sm:$0xf] %v243_v15  ;;  %v263_v25 = vld [vmem:[%s1685_s0 + $0x88] sm:$0xf]  ;;  %v265_v26 = vld [vmem:[%s1685_s0 + $0x90] sm:$0xf] }
  0x43   : > { %246 = vst [vmem:[%s1690_s6 + $0x20] sm:$0xf] %v245_v16  ;;  %v267_v27 = vld [vmem:[%s1685_s0 + $0x98] sm:$0xf]  ;;  %v269_v28 = vld [vmem:[%s1685_s0 + $0xa0] sm:$0xf] }
  0x44   : > { %248 = vst [vmem:[%s1690_s6 + $0x24] sm:$0xf] %v247_v17  ;;  %v271_v29 = vld [vmem:[%s1685_s0 + $0xa8] sm:$0xf]  ;;  %v273_v30 = vld [vmem:[%s1685_s0 + $0xb0] sm:$0xf] }
  0x45   : > { %250 = vst [vmem:[%s1690_s6 + $0x28] sm:$0xf] %v249_v18  ;;  %v275_v31 = vld [vmem:[%s1685_s0 + $0xb8] sm:$0xf]  ;;  %v277_v32 = vld [vmem:[%s1685_s0 + $0xc0] sm:$0xf] }
  0x46   : > { %252 = vst [vmem:[%s1690_s6 + $0x2c] sm:$0xf] %v251_v19  ;;  %v279_v33 = vld [vmem:[%s1685_s0 + $0xc8] sm:$0xf]  ;;  %v281_v34 = vld [vmem:[%s1685_s0 + $0xd0] sm:$0xf] }
  0x47   : > { %254 = vst [vmem:[%s1690_s6 + $0x30] sm:$0xf] %v253_v20  ;;  %v283_v35 = vld [vmem:[%s1685_s0 + $0xd8] sm:$0xf]  ;;  %v285_v36 = vld [vmem:[%s1685_s0 + $0xe0] sm:$0xf] }
  0x48   : > { %256 = vst [vmem:[%s1690_s6 + $0x34] sm:$0xf] %v255_v21  ;;  %v287_v37 = vld [vmem:[%s1685_s0 + $0xe8] sm:$0xf]  ;;  %v289_v38 = vld [vmem:[%s1685_s0 + $0xf0] sm:$0xf] }
  0x49   : > { %258 = vst [vmem:[%s1690_s6 + $0x38] sm:$0xf] %v257_v22  ;;  %v291_v39 = vld [vmem:[%s1685_s0 + $0xf8] sm:$0xf]  ;;  %v293_v40 = vld [vmem:[%s1685_s0 + $0x100] sm:$0xf] }
  0x4a   : > { %260 = vst [vmem:[%s1690_s6 + $0x3c] sm:$0xf] %v259_v23  ;;  %v295_v41 = vld [vmem:[%s1685_s0 + $0x108] sm:$0xf]  ;;  %v297_v42 = vld [vmem:[%s1685_s0 + $0x110] sm:$0xf] }
  0x4b   : > { %262 = vst [vmem:[%s1690_s6 + $0x40] sm:$0xf] %v261_v24  ;;  %v299_v43 = vld [vmem:[%s1685_s0 + $0x118] sm:$0xf]  ;;  %v301_v44 = vld [vmem:[%s1685_s0 + $0x120] sm:$0xf] }
  0x4c   : > { %264 = vst [vmem:[%s1690_s6 + $0x44] sm:$0xf] %v263_v25  ;;  %v303_v45 = vld [vmem:[%s1685_s0 + $0x128] sm:$0xf]  ;;  %v305_v46 = vld [vmem:[%s1685_s0 + $0x130] sm:$0xf] }
  0x4d   : > { %266 = vst [vmem:[%s1690_s6 + $0x48] sm:$0xf] %v265_v26  ;;  %v307_v47 = vld [vmem:[%s1685_s0 + $0x138] sm:$0xf]  ;;  %v309_v48 = vld [vmem:[%s1685_s0 + $0x140] sm:$0xf] }
  0x4e   : > { %268 = vst [vmem:[%s1690_s6 + $0x4c] sm:$0xf] %v267_v27  ;;  %v311_v49 = vld [vmem:[%s1685_s0 + $0x148] sm:$0xf]  ;;  %v313_v50 = vld [vmem:[%s1685_s0 + $0x150] sm:$0xf] }
  0x4f   : > { %270 = vst [vmem:[%s1690_s6 + $0x50] sm:$0xf] %v269_v28  ;;  %v315_v51 = vld [vmem:[%s1685_s0 + $0x158] sm:$0xf]  ;;  %v317_v52 = vld [vmem:[%s1685_s0 + $0x160] sm:$0xf] }
  0x50   : > { %272 = vst [vmem:[%s1690_s6 + $0x54] sm:$0xf] %v271_v29  ;;  %v319_v53 = vld [vmem:[%s1685_s0 + $0x168] sm:$0xf]  ;;  %v321_v54 = vld [vmem:[%s1685_s0 + $0x170] sm:$0xf] }
  0x51   : > { %274 = vst [vmem:[%s1690_s6 + $0x58] sm:$0xf] %v273_v30  ;;  %v323_v55 = vld [vmem:[%s1685_s0 + $0x178] sm:$0xf]  ;;  %v325_v56 = vld [vmem:[%s1685_s0 + $0x180] sm:$0xf] }
  0x52   : > { %276 = vst [vmem:[%s1690_s6 + $0x5c] sm:$0xf] %v275_v31  ;;  %v327_v57 = vld [vmem:[%s1685_s0 + $0x188] sm:$0xf]  ;;  %v329_v58 = vld [vmem:[%s1685_s0 + $0x190] sm:$0xf] }
  0x53   : > { %278 = vst [vmem:[%s1690_s6 + $0x60] sm:$0xf] %v277_v32  ;;  %v331_v59 = vld [vmem:[%s1685_s0 + $0x198] sm:$0xf]  ;;  %v333_v60 = vld [vmem:[%s1685_s0 + $0x1a0] sm:$0xf] }
  0x54   : > { %280 = vst [vmem:[%s1690_s6 + $0x64] sm:$0xf] %v279_v33  ;;  %v335_v61 = vld [vmem:[%s1685_s0 + $0x1a8] sm:$0xf]  ;;  %v337_v62 = vld [vmem:[%s1685_s0 + $0x1b0] sm:$0xf] }
  0x55   : > { %282 = vst [vmem:[%s1690_s6 + $0x68] sm:$0xf] %v281_v34  ;;  %v339_v63 = vld [vmem:[%s1685_s0 + $0x1b8] sm:$0xf]  ;;  %v341_v0 = vld [vmem:[%s1685_s0 + $0x1c0] sm:$0xf] }
  0x56   : > { %284 = vst [vmem:[%s1690_s6 + $0x6c] sm:$0xf] %v283_v35  ;;  %v343_v1 = vld [vmem:[%s1685_s0 + $0x1c8] sm:$0xf]  ;;  %v345_v2 = vld [vmem:[%s1685_s0 + $0x1d0] sm:$0xf] }
  0x57   : > { %286 = vst [vmem:[%s1690_s6 + $0x70] sm:$0xf] %v285_v36  ;;  %v347_v3 = vld [vmem:[%s1685_s0 + $0x1d8] sm:$0xf]  ;;  %v349_v4 = vld [vmem:[%s1685_s0 + $0x1e0] sm:$0xf] }
  0x58   : > { %288 = vst [vmem:[%s1690_s6 + $0x74] sm:$0xf] %v287_v37  ;;  %v351_v5 = vld [vmem:[%s1685_s0 + $0x1e8] sm:$0xf]  ;;  %v353_v6 = vld [vmem:[%s1685_s0 + $0x1f0] sm:$0xf] }
  0x59   : > { %290 = vst [vmem:[%s1690_s6 + $0x78] sm:$0xf] %v289_v38  ;;  %v355_v7 = vld [vmem:[%s1685_s0 + $0x1f8] sm:$0xf] }
  0x5a   : > { %292 = vst [vmem:[%s1690_s6 + $0x7c] sm:$0xf] %v291_v39 }
  0x5b   : > { %294 = vst [vmem:[%s1690_s6 + $0x80] sm:$0xf] %v293_v40 }
  0x5c   : > { %296 = vst [vmem:[%s1690_s6 + $0x84] sm:$0xf] %v295_v41 }
  0x5d   : > { %298 = vst [vmem:[%s1690_s6 + $0x88] sm:$0xf] %v297_v42 }
  0x5e   : > { %300 = vst [vmem:[%s1690_s6 + $0x8c] sm:$0xf] %v299_v43 }
  0x5f   : > { %302 = vst [vmem:[%s1690_s6 + $0x90] sm:$0xf] %v301_v44 }
  0x60   : > { %304 = vst [vmem:[%s1690_s6 + $0x94] sm:$0xf] %v303_v45 }
  0x61   : > { %306 = vst [vmem:[%s1690_s6 + $0x98] sm:$0xf] %v305_v46 }
  0x62   : > { %308 = vst [vmem:[%s1690_s6 + $0x9c] sm:$0xf] %v307_v47 }
  0x63   : > { %310 = vst [vmem:[%s1690_s6 + $0xa0] sm:$0xf] %v309_v48 }
  0x64   : > { %312 = vst [vmem:[%s1690_s6 + $0xa4] sm:$0xf] %v311_v49 }
  0x65   : > { %314 = vst [vmem:[%s1690_s6 + $0xa8] sm:$0xf] %v313_v50 }
  0x66   : > { %316 = vst [vmem:[%s1690_s6 + $0xac] sm:$0xf] %v315_v51 }
  0x67   : > { %318 = vst [vmem:[%s1690_s6 + $0xb0] sm:$0xf] %v317_v52 }
  0x68   : > { %320 = vst [vmem:[%s1690_s6 + $0xb4] sm:$0xf] %v319_v53 }
  0x69   : > { %322 = vst [vmem:[%s1690_s6 + $0xb8] sm:$0xf] %v321_v54 }
  0x6a   : > { %324 = vst [vmem:[%s1690_s6 + $0xbc] sm:$0xf] %v323_v55 }
  0x6b   : > { %326 = vst [vmem:[%s1690_s6 + $0xc0] sm:$0xf] %v325_v56 }
  0x6c   : > { %328 = vst [vmem:[%s1690_s6 + $0xc4] sm:$0xf] %v327_v57 }
  0x6d   : > { %330 = vst [vmem:[%s1690_s6 + $0xc8] sm:$0xf] %v329_v58 }
  0x6e   : > { %332 = vst [vmem:[%s1690_s6 + $0xcc] sm:$0xf] %v331_v59 }
  0x6f   : > { %334 = vst [vmem:[%s1690_s6 + $0xd0] sm:$0xf] %v333_v60 }
  0x70   : > { %336 = vst [vmem:[%s1690_s6 + $0xd4] sm:$0xf] %v335_v61 }
  0x71   : > { %338 = vst [vmem:[%s1690_s6 + $0xd8] sm:$0xf] %v337_v62 }
  0x72   : > { %340 = vst [vmem:[%s1690_s6 + $0xdc] sm:$0xf] %v339_v63 }
  0x73   : > { %342 = vst [vmem:[%s1690_s6 + $0xe0] sm:$0xf] %v341_v0 }
  0x74   : > { %344 = vst [vmem:[%s1690_s6 + $0xe4] sm:$0xf] %v343_v1 }
  0x75   : > { %346 = vst [vmem:[%s1690_s6 + $0xe8] sm:$0xf] %v345_v2 }
  0x76   : > { %348 = vst [vmem:[%s1690_s6 + $0xec] sm:$0xf] %v347_v3 }
  0x77   : > { %350 = vst [vmem:[%s1690_s6 + $0xf0] sm:$0xf] %v349_v4 }
  0x78   : > { %352 = vst [vmem:[%s1690_s6 + $0xf4] sm:$0xf] %v351_v5 }
  0x79   : > { %354 = vst [vmem:[%s1690_s6 + $0xf8] sm:$0xf] %v353_v6 }
  0x7a   : > { %356 = vst [vmem:[%s1690_s6 + $0xfc] sm:$0xf] %v355_v7 }
  0x7b PF: > { %p1160_p0 = scmp.ge.s32.totalorder %s1548_s22, 1  ;;  %p513_p1 = scmp.lt.s32.totalorder %s1548_s22, 7 }
  0x7d   : > { %p514_p2 = pnand %p1160_p0, %p513_p1 }
  0x7e   : > { %s520_s5 = sand.u32 (!%p514_p2), 1, %s1524_s16   ;;  %s527_s23 = sand.u32 (!%p514_p2), 1, %s1516_s14  }
  0x7f   : > { %517 = sbr.rel (%p514_p2) target bundleno = 360 (0x168), region = 88  ;;  %s1161_s28 = sshll.u32 (!%p514_p2), %s520_s5, 6 }
  0x80   : > { %s1162_s0 = sshll.u32 (!%p514_p2), %s527_s23, 8  ;;  %s553_s7 = sand.u32 (!%p514_p2), 1, %s1508_s12  }
  0x81   : > { %p559_p3 = scmp.lt.s32.totalorder (!%p514_p2), %s1536_s19, 1  ;;  %s1163_s11 = sshll.u32 (!%p514_p2), %s553_s7, 5 }
  0x82   : > { %s1830_s6 = scalar_lea.vmem (!%p514_p2), [#allocation3], %s1161_s28  ;;  %s1832_s1 = scalar_lea.vmem (!%p514_p2), [#allocation4], %s1162_s0 }
  0x83   : > { %s1834_s25 = scalar_lea.vmem (!%p514_p2), [#allocation5], %s1163_s11  ;;  %p1164_p4 = scmp.ne.s32.totalorder (!%p514_p2), %s1532_s18, 0 }
  0x84   : > { %s1824_s26 = scalar_select %p559_p3, %s1536_s19, 1 }
  0x85   : > { %566 = sbr.rel (%p1164_p4) target bundleno = 143 (0x8f), region = 100 }
  0x86   : > { %s561_s4 = scalar_lea.vmem %s1940_s2, %s1824_s26 }
  0x8a   : > { %v1550_v8 = vmov 0.0  }
  0x8b   : > { %567 = vst [vmem:[#allocation2 + $0x10] sm:$0xff] %v1550_v8 }
  0x8c   : > { %568 = vst [vmem:[#allocation2] sm:$0xff] %v1550_v8 }
  0x8d   : > { %569 = vst [vmem:[#allocation2 + $0x18] sm:$0xff] %v1550_v8 }
  0x8e   : > { %570 = vst [vmem:[#allocation2 + $0x8] sm:$0xff] %v1550_v8 }
  0x8f PF: > { %v1347_v9 = vld [vmem:[%s1832_s1 + $0x38] sm:$0xff]  ;;  %v1346_v13 = vld [vmem:[%s1832_s1 + $0x30] sm:$0xff]  ;;  %v1345_v17 = vld [vmem:[%s1832_s1 + $0x28] sm:$0xff]  ;;  %p1325_p5 = scmp.ne.s32.totalorder %s1532_s18, 2 }
  0x90   : > { %v1355_v10 = vld [vmem:[%s1832_s1 + $0x78] sm:$0xff]  ;;  %879 = vmatpush.bf16.msra.mxu0 %v1347_v9  ;;  %v1354_v14 = vld [vmem:[%s1832_s1 + $0x70] sm:$0xff]  ;;  %v1353_v18 = vld [vmem:[%s1832_s1 + $0x68] sm:$0xff] }
  0x91   : > { %v1363_v11 = vld [vmem:[%s1832_s1 + $0xb8] sm:$0xff]  ;;  %898 = vmatpush.bf16.msra.mxu1 %v1355_v10  ;;  %v1362_v15 = vld [vmem:[%s1832_s1 + $0xb0] sm:$0xff]  ;;  %v1361_v19 = vld [vmem:[%s1832_s1 + $0xa8] sm:$0xff] }
  0x92   : > { %v1371_v12 = vld [vmem:[%s1832_s1 + $0xf8] sm:$0xff]  ;;  %917 = vmatpush.bf16.msra.mxu2 %v1363_v11  ;;  %v1370_v16 = vld [vmem:[%s1832_s1 + $0xf0] sm:$0xff]  ;;  %v1369_v20 = vld [vmem:[%s1832_s1 + $0xe8] sm:$0xff] }
  0x93   : > { %936 = vmatpush.bf16.msra.mxu3 %v1371_v12  ;;  %v1344_v21 = vld [vmem:[%s1832_s1 + $0x20] sm:$0xff]  ;;  %v1343_v25 = vld [vmem:[%s1832_s1 + $0x18] sm:$0xff]  ;;  %v1342_v29 = vld [vmem:[%s1832_s1 + $0x10] sm:$0xff] }
  0x94   : > { %880 = vmatpush.bf16.msra.mxu0 %v1346_v13  ;;  %v1352_v22 = vld [vmem:[%s1832_s1 + $0x60] sm:$0xff]  ;;  %v1351_v26 = vld [vmem:[%s1832_s1 + $0x58] sm:$0xff]  ;;  %v1350_v30 = vld [vmem:[%s1832_s1 + $0x50] sm:$0xff] }
  0x95   : > { %899 = vmatpush.bf16.msra.mxu1 %v1354_v14  ;;  %v1360_v23 = vld [vmem:[%s1832_s1 + $0xa0] sm:$0xff]  ;;  %v1359_v27 = vld [vmem:[%s1832_s1 + $0x98] sm:$0xff]  ;;  %v1358_v31 = vld [vmem:[%s1832_s1 + $0x90] sm:$0xff] }
  0x96   : > { %918 = vmatpush.bf16.msra.mxu2 %v1362_v15  ;;  %v1368_v24 = vld [vmem:[%s1832_s1 + $0xe0] sm:$0xff]  ;;  %v1367_v28 = vld [vmem:[%s1832_s1 + $0xd8] sm:$0xff]  ;;  %v1366_v32 = vld [vmem:[%s1832_s1 + $0xd0] sm:$0xff] }
  0x97   : > { %937 = vmatpush.bf16.msra.mxu3 %v1370_v16  ;;  %v1341_v33 = vld [vmem:[%s1832_s1 + $0x8] sm:$0xff]  ;;  %v1340_v37 = vld [vmem:[%s1832_s1] sm:$0xff]  ;;  %v1334_v42 = vld [vmem:[%s1830_s6 + $0xc] sm:$0xf0] }
  0x98   : > { %881 = vmatpush.bf16.msra.mxu0 %v1345_v17  ;;  %v1349_v34 = vld [vmem:[%s1832_s1 + $0x48] sm:$0xff]  ;;  %v1348_v38 = vld [vmem:[%s1832_s1 + $0x40] sm:$0xff]  ;;  %v1169_v44 = vld [vmem:[%s1830_s6 + $0x10] sm:$0xf0] }
  0x99   : > { %900 = vmatpush.bf16.msra.mxu1 %v1353_v18  ;;  %v1357_v35 = vld [vmem:[%s1832_s1 + $0x88] sm:$0xff]  ;;  %v1356_v39 = vld [vmem:[%s1832_s1 + $0x80] sm:$0xff]  ;;  %v1335_v46 = vld [vmem:[%s1830_s6 + $0x14] sm:$0xf0] }
  0x9a   : > { %919 = vmatpush.bf16.msra.mxu2 %v1361_v19  ;;  %v1365_v36 = vld [vmem:[%s1832_s1 + $0xc8] sm:$0xff]  ;;  %v1364_v40 = vld [vmem:[%s1832_s1 + $0xc0] sm:$0xff]  ;;  %v1177_v48 = vld [vmem:[%s1830_s6 + $0x18] sm:$0xf0] }
  0x9b   : > { %938 = vmatpush.bf16.msra.mxu3 %v1369_v20  ;;  %v1167_v41 = vld [vmem:[%s1830_s6] sm:$0xf]  ;;  %v1332_v43 = vld [vmem:[%s1830_s6 + $0x4] sm:$0xf]  ;;  %v1175_v45 = vld [vmem:[%s1830_s6 + $0x8] sm:$0xf] }
  0x9c   : > { %882 = vmatpush.bf16.msra.mxu0 %v1344_v21  ;;  %v1333_v47 = vld [vmem:[%s1830_s6 + $0xc] sm:$0xf]  ;;  %v1168_v49 = vor.u32 %v1334_v42, %v1167_v41  ;;  %v1172_v50 = vor.u32 %v1332_v43, %v1169_v44  ;;  %v1176_v51 = vor.u32 %v1335_v46, %v1175_v45  ;;  %v1183_v53 = vld [vmem:[%s1830_s6 + $0x20] sm:$0xf]  ;;  %v1338_v54 = vld [vmem:[%s1830_s6 + $0x2c] sm:$0xf0] }
  0x9d   : > { %901 = vmatpush.bf16.msra.mxu1 %v1352_v22  ;;  %v1180_v52 = vor.u32 %v1333_v47, %v1177_v48  ;;  %v1336_v55 = vld [vmem:[%s1830_s6 + $0x24] sm:$0xf]  ;;  %v1185_v56 = vld [vmem:[%s1830_s6 + $0x30] sm:$0xf0]  ;;  %v1191_v57 = vld [vmem:[%s1830_s6 + $0x28] sm:$0xf]  ;;  %v1184_v61 = vor.u32 %v1338_v54, %v1183_v53 }
  0x9e   : > { %920 = vmatpush.bf16.msra.mxu2 %v1360_v23  ;;  %v1339_v58 = vld [vmem:[%s1830_s6 + $0x34] sm:$0xf0]  ;;  %v1337_v59 = vld [vmem:[%s1830_s6 + $0x2c] sm:$0xf]  ;;  %v1193_v60 = vld [vmem:[%s1830_s6 + $0x38] sm:$0xf0]  ;;  %v1188_v62 = vor.u32 %v1336_v55, %v1185_v56 }
  0x9f   : > { %939 = vmatpush.bf16.msra.mxu3 %v1368_v24  ;;  %v1192_v63 = vor.u32 %v1339_v58, %v1191_v57  ;;  %v1196_v0 = vor.u32 %v1337_v59, %v1193_v60  ;;  %v571_v9 = vld [vmem:[#allocation2 + $0x10] sm:$0xff]  ;;  %v572_v16 = vld [vmem:[#allocation2] sm:$0xff] }
  0xa0   : > { %883 = vmatpush.bf16.msra.mxu0 %v1343_v25  ;;  %v573_v25 = vld [vmem:[#allocation2 + $0x18] sm:$0xff] }
  0xa1   : > { %902 = vmatpush.bf16.msra.mxu1 %v1351_v26 }
  0xa2   : > { %921 = vmatpush.bf16.msra.mxu2 %v1359_v27 }
  0xa3   : > { %940 = vmatpush.bf16.msra.mxu3 %v1367_v28 }
  0xa4   : > { %884 = vmatpush.bf16.msra.mxu0 %v1342_v29 }
  0xa5   : > { %903 = vmatpush.bf16.msra.mxu1 %v1350_v30 }
  0xa6   : > { %922 = vmatpush.bf16.msra.mxu2 %v1358_v31 }
  0xa7   : > { %941 = vmatpush.bf16.msra.mxu3 %v1366_v32 }
  0xa8   : > { %885 = vmatpush.bf16.msra.mxu0 %v1341_v33  ;;  %v574_v33 = vld [vmem:[#allocation2 + $0x8] sm:$0xff] }
  0xa9   : > { %904 = vmatpush.bf16.msra.mxu1 %v1349_v34 }
  0xaa   : > { %923 = vmatpush.bf16.msra.mxu2 %v1357_v35 }
  0xab   : > { %942 = vmatpush.bf16.msra.mxu3 %v1365_v36 }
  0xac   : > { %886 = vmatpush.bf16.msra.mxu0 %v1340_v37 }
  0xad   : > { %905 = vmatpush.bf16.msra.mxu1 %v1348_v38 }
  0xae   : > { %924 = vmatpush.bf16.msra.mxu2 %v1356_v39 }
  0xaf   : > { %943 = vmatpush.bf16.msra.mxu3 %v1364_v40  ;;  %887 = vmatmul.bf16.vlgmr.msra.gmra.mxu0 %v1168_v49 }
  0xb0   : > { %906 = vmatmul.bf16.vlgmr.msra.gmra.mxu1 %v1172_v50 }
  0xb1   : > { %925 = vmatmul.bf16.vlgmr.msra.gmra.mxu2 %v1176_v51 }
  0xb2   : > { %944 = vmatmul.bf16.vlgmr.msra.gmra.mxu3 %v1180_v52 }
  0xbf   : > { %892 = vmatmul.bf16.gmra.mxu0 %v1184_v61 }
  0xc0   : > { %911 = vmatmul.bf16.gmra.mxu1 %v1188_v62 }
  0xc1   : > { %930 = vmatmul.bf16.gmra.mxu2 %v1192_v63 }
  0xc2   : > { %949 = vmatmul.bf16.gmra.mxu3 %v1196_v0 }
 0x12c   : > { %v888_v1 = vpop.f32.mrf.mxu0 }
 0x12d   : > { %v907_v2 = vpop.f32.mrf.mxu1 }
 0x12e   : > { %v908_v3 = vadd.f32 %v907_v2, %v888_v1 }
 0x134   : > { %v926_v4 = vpop.f32.mrf.mxu2  ;;  %v890_v7 = vpop.f32.mrf.mxu0 }
 0x135   : > { %v945_v5 = vpop.f32.mrf.mxu3  ;;  %v927_v6 = vadd.f32 %v926_v4, %v908_v3  ;;  %v909_v8 = vpop.f32.mrf.mxu1 }
 0x136   : > { %v910_v12 = vadd.f32 %v909_v8, %v890_v7 }
 0x137   : > { %v946_v10 = vadd.f32 %v945_v5, %v927_v6 }
 0x139   : > { %v955_v11 = vadd.f32 %v946_v10, %v571_v9 }
 0x13b   : > { %959 = vst [vmem:[#allocation2 + $0x10] sm:$0xff] %v955_v11 }
 0x13c   : > { %v928_v13 = vpop.f32.mrf.mxu2  ;;  %v893_v17 = vpop.f32.mrf.mxu0 }
 0x13d   : > { %v947_v14 = vpop.f32.mrf.mxu3  ;;  %v929_v15 = vadd.f32 %v928_v13, %v910_v12  ;;  %v912_v18 = vpop.f32.mrf.mxu1 }
 0x13e   : > { %v913_v21 = vadd.f32 %v912_v18, %v893_v17 }
 0x13f   : > { %v948_v19 = vadd.f32 %v947_v14, %v929_v15 }
 0x141   : > { %v956_v20 = vadd.f32 %v948_v19, %v572_v16 }
 0x143   : > { %960 = vst [vmem:[#allocation2] sm:$0xff] %v956_v20 }
 0x144   : > { %v931_v22 = vpop.f32.mrf.mxu2  ;;  %v895_v27 = vpop.f32.mrf.mxu0 }
 0x145   : > { %v950_v23 = vpop.f32.mrf.mxu3  ;;  %v932_v24 = vadd.f32 %v931_v22, %v913_v21  ;;  %v914_v28 = vpop.f32.mrf.mxu1 }
 0x146   : > { %v915_v30 = vadd.f32 %v914_v28, %v895_v27 }
 0x147   : > { %v951_v26 = vadd.f32 %v950_v23, %v932_v24 }
 0x149   : > { %v957_v29 = vadd.f32 %v951_v26, %v573_v25 }
 0x14b   : > { %961 = vst [vmem:[#allocation2 + $0x18] sm:$0xff] %v957_v29 }
 0x14c   : > { %v933_v31 = vpop.f32.mrf.mxu2 }
 0x14d   : > { %v934_v32 = vadd.f32 %v933_v31, %v915_v30  ;;  %v952_v34 = vpop.f32.mrf.mxu3 }
 0x14f   : > { %v953_v35 = vadd.f32 %v952_v34, %v934_v32  ;;  %966 = sbr.rel (%p1325_p5) target bundleno = 352 (0x160), region = 104 }
 0x151   : > { %v958_v36 = vadd.f32 %v953_v35, %v574_v33 }
 0x153   : > { %962 = vst [vmem:[#allocation2 + $0x8] sm:$0xff] %v958_v36 }
 0x154   : > { %v967_v37 = vld [vmem:[#allocation2 + $0x10] sm:$0xff]  ;;  %v1461_v38 = vld [vmem:[%s561_s4] ss:$0 sm:$0xff]  ;;  %v969_v40 = vld [vmem:[#allocation2 + $0x18] sm:$0xff] }
 0x155   : > { %v968_v39 = vld [vmem:[#allocation2] sm:$0xff]  ;;  %v975_v42 = vadd.f32 %v1461_v38, %v967_v37  ;;  %v977_v44 = vadd.f32 %v1461_v38, %v969_v40 }
 0x156   : > { %v976_v43 = vadd.f32 %v1461_v38, %v968_v39 }
 0x157   : > { %v979_v46 = vmax.f32 %v975_v42, 0.0  ;;  %v981_v48 = vmax.f32 %v977_v44, 0.0 }
 0x158   : > { %v980_v47 = vmax.f32 %v976_v43, 0.0 }
 0x159   : > { %983 = vst [vmem:[%s1834_s25] sm:$0xff] %v979_v46 }
 0x15a   : > { %v970_v41 = vld [vmem:[#allocation2 + $0x8] sm:$0xff]  ;;  %984 = vst [vmem:[%s1834_s25 + $0x8] sm:$0xff] %v980_v47 }
 0x15b   : > { %v978_v45 = vadd.f32 %v1461_v38, %v970_v41  ;;  %985 = vst [vmem:[%s1834_s25 + $0x10] sm:$0xff] %v981_v48 }
 0x15d   : > { %v982_v49 = vmax.f32 %v978_v45, 0.0 }
 0x15f   : > { %986 = vst [vmem:[%s1834_s25 + $0x18] sm:$0xff] %v982_v49 }
 0x160 PF: > { %993 = sbr.rel (!%p1665_p12) target bundleno = 360 (0x168), region = 108  ;;  %s1327_s14 = sshll.u32 (%p1665_p12), %s1536_s19, 3  ;;  %v1033_v50 = vld [vmem:[%s1834_s25] sm:$0xff] (%p1665_p12) }
 0x161   : > { %v1035_v51 = vld [vmem:[%s1834_s25 + $0x8] sm:$0xff] (%p1665_p12)  ;;  %s998_s5 = scalar_lea.vmem (%p1665_p12), %s1941_s3, %s1327_s14 }
 0x162   : > { %v1037_v52 = vld [vmem:[%s1834_s25 + $0x10] sm:$0xff] (%p1665_p12)  ;;  %1034 = vst [vmem:[%s998_s5] sm:$0xff] (%p1665_p12), %v1033_v50 }
 0x163   : > { %1036 = vst [vmem:[%s998_s5 + $0x10] sm:$0xff] (%p1665_p12), %v1035_v51 }
 0x164   : > { %1038 = vst [vmem:[%s998_s5 + $0x20] sm:$0xff] (%p1665_p12), %v1037_v52 }
 0x166   : > { %v1039_v53 = vld [vmem:[%s1834_s25 + $0x18] sm:$0xff] }
 0x167   : > { %1040 = vst [vmem:[%s998_s5 + $0x30] sm:$0xff] %v1039_v53 }
 0x168 PF: > { %s13_s22 = sadd.s32 1, %s1548_s22   ;;  %s1951_s10 = sld [smem:[#allocation6_spill]] }
 0x169   : > { %p10_p6 = scmp.ge.s32.totalorder %s13_s22, 8   ;;  %s1952_s12 = smov %s1512_s13 }
 0x16a   : > { %s1953_s13 = smov %s1663_s9  ;;  %s1954_s14 = smov %s1520_s15 }
 0x16b   : > { %s1955_s15 = smov %s1660_s8  ;;  %s1956_s16 = smov %s1528_s17 }
 0x16c   : > { %s1957_s17 = smov %s1646_s30  ;;  %s1958_s18 = smov %s1540_s20 }
 0x16d   : > { %s1959_s19 = smov %s1544_s21  ;;  %s1960_s20 = smov %s1963_s24 }
 0x16e   : > { %s1961_s21 = smov %s1951_s10  ;;  %12 = sbr.rel (!%p10_p6) target bundleno = 9 (0x9), region = 188 }

// kernel: improved_ffdnet_forward.29
= control target key start
LH: loop header
LB: loop body
LE: loop exit
PB: predicated region body
PF: predicated region fallthrough
CT: control target
= control target key end

     0   :  { %s1938_s0 = inlined_call_operand.vmem [shape: bf16[32,2560], index: 0, kind: input, shape index: {}]   ;;  %s1939_s1 = inlined_call_operand.vmem [shape: bf16[2560,256], index: 1, kind: input, shape index: {}]   ;;  %s1940_s2 = inlined_call_operand.vmem [shape: f32[1,256], index: 2, kind: input, shape index: {}]   ;;  %s1941_s3 = inlined_call_operand.vmem [shape: f32[32,256], index: 3, kind: output, shape index: {}]  }
   0x1   :  { %1943 = sst [smem:[#allocation7_spill]] %s1938_s0 }
   0x2   :  { %1944 = sst [smem:[#allocation8_spill]] %s1939_s1 }
   0x3   :  { %s1571_s12 = smov 0   ;;  %s1573_s13 = smov 0  }
   0x4   :  { %s1575_s14 = smov 0   ;;  %s1577_s15 = smov 0  }
   0x5   :  { %s1579_s16 = smov 0   ;;  %s1581_s17 = smov 0  }
   0x6   :  { %s1583_s18 = smov 0   ;;  %s1585_s19 = smov 0  }
   0x7   :  { %s1587_s20 = smov 0   ;;  %s1589_s21 = smov 0  }
   0x8   :  { %s1591_s22 = smov 0  }
   0x9 LB: > { %s1149_s23 = sadd.s32 4294967295, %s1548_s22   ;;  %s25_s24 = sadd.s32 1, %s1540_s20  ;;  %s1548_s22 = sphi %s1591_s22, %s13_s22   ;;  %s1544_s21 = sphi %s1589_s21, %s1961_s21   ;;  %s1540_s20 = sphi %s1587_s20, %s1960_s20   ;;  %s1536_s19 = sphi %s1585_s19, %s1959_s19   ;;  %s1532_s18 = sphi %s1583_s18, %s1958_s18   ;;  %s1528_s17 = sphi %s1581_s17, %s1957_s17   ;;  %s1524_s16 = sphi %s1579_s16, %s1956_s16   ;;  %s1520_s15 = sphi %s1577_s15, %s1955_s15   ;;  %s1516_s14 = sphi %s1575_s14, %s1954_s14   ;;  %s1512_s13 = sphi %s1573_s13, %s1953_s13   ;;  %s1508_s12 = sphi %s1571_s12, %s1952_s12  }
   0xa   : > { %p26_p0 = scmp.ge.s32.totalorder %s25_s24, 5  ;;  %s28_s25 = sadd.s32 1, %s1544_s21 }
   0xb   : > { %s41_s26 = sadd.s32 1, %s1528_s17  ;;  %p48_p1 = scmp.ne.s32.totalorder %s1528_s17, %s1524_s16 }
   0xc   : > { %s1963_s24 = smov (%p26_p0, %s25_s24), 0  ;;  %s1965_s25 = smov (!%p26_p0, %s28_s25), %s1544_s21 }
   0xd   : > { %s37_s27 = ssub.s32 %s1540_s20, %s1963_s24  ;;  %p49_p2 = scmp.eq.s32.totalorder %s1548_s22, 0 }
   0xe   : > { %p30_p3 = scmp.ge.s32.totalorder %s1965_s25, 2  ;;  %p39_p4 = scmp.eq.s32.totalorder %s37_s27, 0 }
   0xf   : > { %p1638_p5 = por %p49_p2, %p48_p1  ;;  %s69_s29 = sadd.s32 1, %s1520_s15 }
  0x10   : > { %s1967_s25 = smov (%p30_p3, %s1965_s25), 0  ;;  %p76_p6 = scmp.ne.s32.totalorder %s1520_s15, %s1516_s14 }
  0x11   : > { %1946 = sst [smem:[#allocation6_spill]] %s1967_s25  ;;  %s65_s4 = ssub.s32 %s1544_s21, %s1967_s25 }
  0x12   : > { %s1646_s30 = scalar_select %p39_p4, %s1528_s17, %s41_s26  }
  0x13   : > { %s66_s5 = sor.u32 %s65_s4, %s37_s27  ;;  %p121_p7 = scmp.eq.s32.totalorder %s65_s4, 0 }
  0x14   : > { %p67_p8 = scmp.eq.s32.totalorder %s66_s5, 0  ;;  %p1652_p9 = por %p76_p6, %p49_p2 }
  0x15   : > { %s123_s7 = sadd.s32 1, %s1512_s13  ;;  %p133_p10 = scmp.ne.s32.totalorder %s1512_s13, %s1508_s12 }
  0x16   : > { %s1660_s8 = scalar_select %p67_p8, %s1520_s15, %s69_s29  }
  0x17   : > { %s1663_s9 = scalar_select %p121_p7, %s1512_s13, %s123_s7  }
  0x18   : > { %p134_p11 = scmp.eq.s32.totalorder %s1149_s23, 9  ;;  %p1152_p13 = scmp.ge.s32.totalorder %s1548_s22, 10 }
  0x1a   : > { %p1665_p12 = por %p134_p11, %p133_p10  ;;  %156 = sbr.rel (%p1152_p13) target bundleno = 123 (0x7b), region = 16 }
  0x1f   : > { %159 = sbr.rel (!%p1638_p5) target bundleno = 49 (0x31), region = 20  ;;  %s161_s11 = sand.u32 (%p1638_p5), 1, %s1528_s17  }
  0x20   : > { %s1330_s26 = sshll.u32 (%p1638_p5), %s1540_s20, 4  ;;  %s1153_s27 = sshll.u32 (%p1638_p5), %s161_s11, 6 }
  0x21   : > { %s1949_s0 = sld [smem:[#allocation7_spill]] (%p1638_p5)  ;;  %s163_s23 = scalar_lea.vmem (%p1638_p5), [#allocation3], %s1153_s27 }
  0x27   : > { %s169_s5 = scalar_lea.vmem %s1949_s0, %s1330_s26 }
  0x28   : > { %v182_v0 = vld [vmem:[%s169_s5] sm:$0xff]  ;;  %v184_v1 = vld [vmem:[%s169_s5 + $0x8] sm:$0xff]  ;;  %v186_v2 = vld [vmem:[%s169_s5 + $0x50] sm:$0xff] }
  0x29   : > { %183 = vst [vmem:[%s163_s23] sm:$0xff] %v182_v0  ;;  %v188_v3 = vld [vmem:[%s169_s5 + $0x58] sm:$0xff]  ;;  %v190_v4 = vld [vmem:[%s169_s5 + $0xa0] sm:$0xff]  ;;  %v192_v5 = vld [vmem:[%s169_s5 + $0xa8] sm:$0xff] }
  0x2a   : > { %185 = vst [vmem:[%s163_s23 + $0x8] sm:$0xff] %v184_v1  ;;  %v194_v6 = vld [vmem:[%s169_s5 + $0xf0] sm:$0xff]  ;;  %v196_v7 = vld [vmem:[%s169_s5 + $0xf8] sm:$0xff] }
  0x2b   : > { %187 = vst [vmem:[%s163_s23 + $0x10] sm:$0xff] %v186_v2 }
  0x2c   : > { %189 = vst [vmem:[%s163_s23 + $0x18] sm:$0xff] %v188_v3 }
  0x2d   : > { %191 = vst [vmem:[%s163_s23 + $0x20] sm:$0xff] %v190_v4 }
  0x2e   : > { %193 = vst [vmem:[%s163_s23 + $0x28] sm:$0xff] %v192_v5 }
  0x2f   : > { %195 = vst [vmem:[%s163_s23 + $0x30] sm:$0xff] %v194_v6 }
  0x30   : > { %197 = vst [vmem:[%s163_s23 + $0x38] sm:$0xff] %v196_v7 }
  0x31 PF: > { %203 = sbr.rel (!%p1652_p9) target bundleno = 123 (0x7b), region = 43  ;;  %s205_s28 = sand.u32 (%p1652_p9), 1, %s1520_s15  }
  0x32   : > { %s1331_s7 = sshll.u32 (%p1652_p9), %s1540_s20, 7  ;;  %s1156_s11 = sshll.u32 (%p1652_p9), %s205_s28, 8 }
  0x33   : > { %s210_s26 = sadd.s32 (%p1652_p9), %s1544_s21, %s1331_s7  ;;  %s1950_s1 = sld [smem:[#allocation8_spill]] (%p1652_p9) }
  0x34   : > { %s1159_s27 = sshll.u32 (%p1652_p9), %s210_s26, 2  ;;  %s1690_s6 = scalar_lea.vmem (%p1652_p9), [#allocation4], %s1156_s11 }
  0x39   : > { %s1685_s0 = scalar_lea.vmem %s1950_s1, %s1159_s27 }
  0x3a   : > { %v229_v8 = vld [vmem:[%s1685_s0] sm:$0xf]  ;;  %v231_v9 = vld [vmem:[%s1685_s0 + $0x8] sm:$0xf]  ;;  %v233_v10 = vld [vmem:[%s1685_s0 + $0x10] sm:$0xf] }
  0x3b   : > { %230 = vst [vmem:[%s1690_s6] sm:$0xf] %v229_v8  ;;  %v235_v11 = vld [vmem:[%s1685_s0 + $0x18] sm:$0xf]  ;;  %v237_v12 = vld [vmem:[%s1685_s0 + $0x20] sm:$0xf] }
  0x3c   : > { %232 = vst [vmem:[%s1690_s6 + $0x4] sm:$0xf] %v231_v9  ;;  %v239_v13 = vld [vmem:[%s1685_s0 + $0x28] sm:$0xf]  ;;  %v241_v14 = vld [vmem:[%s1685_s0 + $0x30] sm:$0xf] }
  0x3d   : > { %234 = vst [vmem:[%s1690_s6 + $0x8] sm:$0xf] %v233_v10  ;;  %v243_v15 = vld [vmem:[%s1685_s0 + $0x38] sm:$0xf]  ;;  %v245_v16 = vld [vmem:[%s1685_s0 + $0x40] sm:$0xf] }
  0x3e   : > { %236 = vst [vmem:[%s1690_s6 + $0xc] sm:$0xf] %v235_v11  ;;  %v247_v17 = vld [vmem:[%s1685_s0 + $0x48] sm:$0xf]  ;;  %v249_v18 = vld [vmem:[%s1685_s0 + $0x50] sm:$0xf] }
  0x3f   : > { %238 = vst [vmem:[%s1690_s6 + $0x10] sm:$0xf] %v237_v12  ;;  %v251_v19 = vld [vmem:[%s1685_s0 + $0x58] sm:$0xf]  ;;  %v253_v20 = vld [vmem:[%s1685_s0 + $0x60] sm:$0xf] }
  0x40   : > { %240 = vst [vmem:[%s1690_s6 + $0x14] sm:$0xf] %v239_v13  ;;  %v255_v21 = vld [vmem:[%s1685_s0 + $0x68] sm:$0xf]  ;;  %v257_v22 = vld [vmem:[%s1685_s0 + $0x70] sm:$0xf] }
  0x41   : > { %242 = vst [vmem:[%s1690_s6 + $0x18] sm:$0xf] %v241_v14  ;;  %v259_v23 = vld [vmem:[%s1685_s0 + $0x78] sm:$0xf]  ;;  %v261_v24 = vld [vmem:[%s1685_s0 + $0x80] sm:$0xf] }
  0x42   : > { %244 = vst [vmem:[%s1690_s6 + $0x1c] sm:$0xf] %v243_v15  ;;  %v263_v25 = vld [vmem:[%s1685_s0 + $0x88] sm:$0xf]  ;;  %v265_v26 = vld [vmem:[%s1685_s0 + $0x90] sm:$0xf] }
  0x43   : > { %246 = vst [vmem:[%s1690_s6 + $0x20] sm:$0xf] %v245_v16  ;;  %v267_v27 = vld [vmem:[%s1685_s0 + $0x98] sm:$0xf]  ;;  %v269_v28 = vld [vmem:[%s1685_s0 + $0xa0] sm:$0xf] }
  0x44   : > { %248 = vst [vmem:[%s1690_s6 + $0x24] sm:$0xf] %v247_v17  ;;  %v271_v29 = vld [vmem:[%s1685_s0 + $0xa8] sm:$0xf]  ;;  %v273_v30 = vld [vmem:[%s1685_s0 + $0xb0] sm:$0xf] }
  0x45   : > { %250 = vst [vmem:[%s1690_s6 + $0x28] sm:$0xf] %v249_v18  ;;  %v275_v31 = vld [vmem:[%s1685_s0 + $0xb8] sm:$0xf]  ;;  %v277_v32 = vld [vmem:[%s1685_s0 + $0xc0] sm:$0xf] }
  0x46   : > { %252 = vst [vmem:[%s1690_s6 + $0x2c] sm:$0xf] %v251_v19  ;;  %v279_v33 = vld [vmem:[%s1685_s0 + $0xc8] sm:$0xf]  ;;  %v281_v34 = vld [vmem:[%s1685_s0 + $0xd0] sm:$0xf] }
  0x47   : > { %254 = vst [vmem:[%s1690_s6 + $0x30] sm:$0xf] %v253_v20  ;;  %v283_v35 = vld [vmem:[%s1685_s0 + $0xd8] sm:$0xf]  ;;  %v285_v36 = vld [vmem:[%s1685_s0 + $0xe0] sm:$0xf] }
  0x48   : > { %256 = vst [vmem:[%s1690_s6 + $0x34] sm:$0xf] %v255_v21  ;;  %v287_v37 = vld [vmem:[%s1685_s0 + $0xe8] sm:$0xf]  ;;  %v289_v38 = vld [vmem:[%s1685_s0 + $0xf0] sm:$0xf] }
  0x49   : > { %258 = vst [vmem:[%s1690_s6 + $0x38] sm:$0xf] %v257_v22  ;;  %v291_v39 = vld [vmem:[%s1685_s0 + $0xf8] sm:$0xf]  ;;  %v293_v40 = vld [vmem:[%s1685_s0 + $0x100] sm:$0xf] }
  0x4a   : > { %260 = vst [vmem:[%s1690_s6 + $0x3c] sm:$0xf] %v259_v23  ;;  %v295_v41 = vld [vmem:[%s1685_s0 + $0x108] sm:$0xf]  ;;  %v297_v42 = vld [vmem:[%s1685_s0 + $0x110] sm:$0xf] }
  0x4b   : > { %262 = vst [vmem:[%s1690_s6 + $0x40] sm:$0xf] %v261_v24  ;;  %v299_v43 = vld [vmem:[%s1685_s0 + $0x118] sm:$0xf]  ;;  %v301_v44 = vld [vmem:[%s1685_s0 + $0x120] sm:$0xf] }
  0x4c   : > { %264 = vst [vmem:[%s1690_s6 + $0x44] sm:$0xf] %v263_v25  ;;  %v303_v45 = vld [vmem:[%s1685_s0 + $0x128] sm:$0xf]  ;;  %v305_v46 = vld [vmem:[%s1685_s0 + $0x130] sm:$0xf] }
  0x4d   : > { %266 = vst [vmem:[%s1690_s6 + $0x48] sm:$0xf] %v265_v26  ;;  %v307_v47 = vld [vmem:[%s1685_s0 + $0x138] sm:$0xf]  ;;  %v309_v48 = vld [vmem:[%s1685_s0 + $0x140] sm:$0xf] }
  0x4e   : > { %268 = vst [vmem:[%s1690_s6 + $0x4c] sm:$0xf] %v267_v27  ;;  %v311_v49 = vld [vmem:[%s1685_s0 + $0x148] sm:$0xf]  ;;  %v313_v50 = vld [vmem:[%s1685_s0 + $0x150] sm:$0xf] }
  0x4f   : > { %270 = vst [vmem:[%s1690_s6 + $0x50] sm:$0xf] %v269_v28  ;;  %v315_v51 = vld [vmem:[%s1685_s0 + $0x158] sm:$0xf]  ;;  %v317_v52 = vld [vmem:[%s1685_s0 + $0x160] sm:$0xf] }
  0x50   : > { %272 = vst [vmem:[%s1690_s6 + $0x54] sm:$0xf] %v271_v29  ;;  %v319_v53 = vld [vmem:[%s1685_s0 + $0x168] sm:$0xf]  ;;  %v321_v54 = vld [vmem:[%s1685_s0 + $0x170] sm:$0xf] }
  0x51   : > { %274 = vst [vmem:[%s1690_s6 + $0x58] sm:$0xf] %v273_v30  ;;  %v323_v55 = vld [vmem:[%s1685_s0 + $0x178] sm:$0xf]  ;;  %v325_v56 = vld [vmem:[%s1685_s0 + $0x180] sm:$0xf] }
  0x52   : > { %276 = vst [vmem:[%s1690_s6 + $0x5c] sm:$0xf] %v275_v31  ;;  %v327_v57 = vld [vmem:[%s1685_s0 + $0x188] sm:$0xf]  ;;  %v329_v58 = vld [vmem:[%s1685_s0 + $0x190] sm:$0xf] }
  0x53   : > { %278 = vst [vmem:[%s1690_s6 + $0x60] sm:$0xf] %v277_v32  ;;  %v331_v59 = vld [vmem:[%s1685_s0 + $0x198] sm:$0xf]  ;;  %v333_v60 = vld [vmem:[%s1685_s0 + $0x1a0] sm:$0xf] }
  0x54   : > { %280 = vst [vmem:[%s1690_s6 + $0x64] sm:$0xf] %v279_v33  ;;  %v335_v61 = vld [vmem:[%s1685_s0 + $0x1a8] sm:$0xf]  ;;  %v337_v62 = vld [vmem:[%s1685_s0 + $0x1b0] sm:$0xf] }
  0x55   : > { %282 = vst [vmem:[%s1690_s6 + $0x68] sm:$0xf] %v281_v34  ;;  %v339_v63 = vld [vmem:[%s1685_s0 + $0x1b8] sm:$0xf]  ;;  %v341_v0 = vld [vmem:[%s1685_s0 + $0x1c0] sm:$0xf] }
  0x56   : > { %284 = vst [vmem:[%s1690_s6 + $0x6c] sm:$0xf] %v283_v35  ;;  %v343_v1 = vld [vmem:[%s1685_s0 + $0x1c8] sm:$0xf]  ;;  %v345_v2 = vld [vmem:[%s1685_s0 + $0x1d0] sm:$0xf] }
  0x57   : > { %286 = vst [vmem:[%s1690_s6 + $0x70] sm:$0xf] %v285_v36  ;;  %v347_v3 = vld [vmem:[%s1685_s0 + $0x1d8] sm:$0xf]  ;;  %v349_v4 = vld [vmem:[%s1685_s0 + $0x1e0] sm:$0xf] }
  0x58   : > { %288 = vst [vmem:[%s1690_s6 + $0x74] sm:$0xf] %v287_v37  ;;  %v351_v5 = vld [vmem:[%s1685_s0 + $0x1e8] sm:$0xf]  ;;  %v353_v6 = vld [vmem:[%s1685_s0 + $0x1f0] sm:$0xf] }
  0x59   : > { %290 = vst [vmem:[%s1690_s6 + $0x78] sm:$0xf] %v289_v38  ;;  %v355_v7 = vld [vmem:[%s1685_s0 + $0x1f8] sm:$0xf] }
  0x5a   : > { %292 = vst [vmem:[%s1690_s6 + $0x7c] sm:$0xf] %v291_v39 }
  0x5b   : > { %294 = vst [vmem:[%s1690_s6 + $0x80] sm:$0xf] %v293_v40 }
  0x5c   : > { %296 = vst [vmem:[%s1690_s6 + $0x84] sm:$0xf] %v295_v41 }
  0x5d   : > { %298 = vst [vmem:[%s1690_s6 + $0x88] sm:$0xf] %v297_v42 }
  0x5e   : > { %300 = vst [vmem:[%s1690_s6 + $0x8c] sm:$0xf] %v299_v43 }
  0x5f   : > { %302 = vst [vmem:[%s1690_s6 + $0x90] sm:$0xf] %v301_v44 }
  0x60   : > { %304 = vst [vmem:[%s1690_s6 + $0x94] sm:$0xf] %v303_v45 }
  0x61   : > { %306 = vst [vmem:[%s1690_s6 + $0x98] sm:$0xf] %v305_v46 }
  0x62   : > { %308 = vst [vmem:[%s1690_s6 + $0x9c] sm:$0xf] %v307_v47 }
  0x63   : > { %310 = vst [vmem:[%s1690_s6 + $0xa0] sm:$0xf] %v309_v48 }
  0x64   : > { %312 = vst [vmem:[%s1690_s6 + $0xa4] sm:$0xf] %v311_v49 }
  0x65   : > { %314 = vst [vmem:[%s1690_s6 + $0xa8] sm:$0xf] %v313_v50 }
  0x66   : > { %316 = vst [vmem:[%s1690_s6 + $0xac] sm:$0xf] %v315_v51 }
  0x67   : > { %318 = vst [vmem:[%s1690_s6 + $0xb0] sm:$0xf] %v317_v52 }
  0x68   : > { %320 = vst [vmem:[%s1690_s6 + $0xb4] sm:$0xf] %v319_v53 }
  0x69   : > { %322 = vst [vmem:[%s1690_s6 + $0xb8] sm:$0xf] %v321_v54 }
  0x6a   : > { %324 = vst [vmem:[%s1690_s6 + $0xbc] sm:$0xf] %v323_v55 }
  0x6b   : > { %326 = vst [vmem:[%s1690_s6 + $0xc0] sm:$0xf] %v325_v56 }
  0x6c   : > { %328 = vst [vmem:[%s1690_s6 + $0xc4] sm:$0xf] %v327_v57 }
  0x6d   : > { %330 = vst [vmem:[%s1690_s6 + $0xc8] sm:$0xf] %v329_v58 }
  0x6e   : > { %332 = vst [vmem:[%s1690_s6 + $0xcc] sm:$0xf] %v331_v59 }
  0x6f   : > { %334 = vst [vmem:[%s1690_s6 + $0xd0] sm:$0xf] %v333_v60 }
  0x70   : > { %336 = vst [vmem:[%s1690_s6 + $0xd4] sm:$0xf] %v335_v61 }
  0x71   : > { %338 = vst [vmem:[%s1690_s6 + $0xd8] sm:$0xf] %v337_v62 }
  0x72   : > { %340 = vst [vmem:[%s1690_s6 + $0xdc] sm:$0xf] %v339_v63 }
  0x73   : > { %342 = vst [vmem:[%s1690_s6 + $0xe0] sm:$0xf] %v341_v0 }
  0x74   : > { %344 = vst [vmem:[%s1690_s6 + $0xe4] sm:$0xf] %v343_v1 }
  0x75   : > { %346 = vst [vmem:[%s1690_s6 + $0xe8] sm:$0xf] %v345_v2 }
  0x76   : > { %348 = vst [vmem:[%s1690_s6 + $0xec] sm:$0xf] %v347_v3 }
  0x77   : > { %350 = vst [vmem:[%s1690_s6 + $0xf0] sm:$0xf] %v349_v4 }
  0x78   : > { %352 = vst [vmem:[%s1690_s6 + $0xf4] sm:$0xf] %v351_v5 }
  0x79   : > { %354 = vst [vmem:[%s1690_s6 + $0xf8] sm:$0xf] %v353_v6 }
  0x7a   : > { %356 = vst [vmem:[%s1690_s6 + $0xfc] sm:$0xf] %v355_v7 }
  0x7b PF: > { %p1160_p0 = scmp.ge.s32.totalorder %s1548_s22, 1  ;;  %p513_p1 = scmp.lt.s32.totalorder %s1548_s22, 11 }
  0x7d   : > { %p514_p2 = pnand %p1160_p0, %p513_p1 }
  0x7e   : > { %s520_s5 = sand.u32 (!%p514_p2), 1, %s1524_s16   ;;  %s527_s23 = sand.u32 (!%p514_p2), 1, %s1516_s14  }
  0x7f   : > { %517 = sbr.rel (%p514_p2) target bundleno = 360 (0x168), region = 88  ;;  %s1161_s28 = sshll.u32 (!%p514_p2), %s520_s5, 6 }
  0x80   : > { %s1162_s0 = sshll.u32 (!%p514_p2), %s527_s23, 8  ;;  %s553_s7 = sand.u32 (!%p514_p2), 1, %s1508_s12  }
  0x81   : > { %p559_p3 = scmp.lt.s32.totalorder (!%p514_p2), %s1536_s19, 1  ;;  %s1163_s11 = sshll.u32 (!%p514_p2), %s553_s7, 5 }
  0x82   : > { %s1830_s6 = scalar_lea.vmem (!%p514_p2), [#allocation3], %s1161_s28  ;;  %s1832_s1 = scalar_lea.vmem (!%p514_p2), [#allocation4], %s1162_s0 }
  0x83   : > { %s1834_s25 = scalar_lea.vmem (!%p514_p2), [#allocation5], %s1163_s11  ;;  %p1164_p4 = scmp.ne.s32.totalorder (!%p514_p2), %s1532_s18, 0 }
  0x84   : > { %s1824_s26 = scalar_select %p559_p3, %s1536_s19, 1 }
  0x85   : > { %566 = sbr.rel (%p1164_p4) target bundleno = 143 (0x8f), region = 100 }
  0x86   : > { %s561_s4 = scalar_lea.vmem %s1940_s2, %s1824_s26 }
  0x8a   : > { %v1550_v8 = vmov 0.0  }
  0x8b   : > { %567 = vst [vmem:[#allocation2 + $0x10] sm:$0xff] %v1550_v8 }
  0x8c   : > { %568 = vst [vmem:[#allocation2] sm:$0xff] %v1550_v8 }
  0x8d   : > { %569 = vst [vmem:[#allocation2 + $0x18] sm:$0xff] %v1550_v8 }
  0x8e   : > { %570 = vst [vmem:[#allocation2 + $0x8] sm:$0xff] %v1550_v8 }
  0x8f PF: > { %v1347_v9 = vld [vmem:[%s1832_s1 + $0x38] sm:$0xff]  ;;  %v1346_v13 = vld [vmem:[%s1832_s1 + $0x30] sm:$0xff]  ;;  %v1345_v17 = vld [vmem:[%s1832_s1 + $0x28] sm:$0xff]  ;;  %p1325_p5 = scmp.ne.s32.totalorder %s1532_s18, 4 }
  0x90   : > { %v1355_v10 = vld [vmem:[%s1832_s1 + $0x78] sm:$0xff]  ;;  %879 = vmatpush.bf16.msra.mxu0 %v1347_v9  ;;  %v1354_v14 = vld [vmem:[%s1832_s1 + $0x70] sm:$0xff]  ;;  %v1353_v18 = vld [vmem:[%s1832_s1 + $0x68] sm:$0xff] }
  0x91   : > { %v1363_v11 = vld [vmem:[%s1832_s1 + $0xb8] sm:$0xff]  ;;  %898 = vmatpush.bf16.msra.mxu1 %v1355_v10  ;;  %v1362_v15 = vld [vmem:[%s1832_s1 + $0xb0] sm:$0xff]  ;;  %v1361_v19 = vld [vmem:[%s1832_s1 + $0xa8] sm:$0xff] }
  0x92   : > { %v1371_v12 = vld [vmem:[%s1832_s1 + $0xf8] sm:$0xff]  ;;  %917 = vmatpush.bf16.msra.mxu2 %v1363_v11  ;;  %v1370_v16 = vld [vmem:[%s1832_s1 + $0xf0] sm:$0xff]  ;;  %v1369_v20 = vld [vmem:[%s1832_s1 + $0xe8] sm:$0xff] }
  0x93   : > { %936 = vmatpush.bf16.msra.mxu3 %v1371_v12  ;;  %v1344_v21 = vld [vmem:[%s1832_s1 + $0x20] sm:$0xff]  ;;  %v1343_v25 = vld [vmem:[%s1832_s1 + $0x18] sm:$0xff]  ;;  %v1342_v29 = vld [vmem:[%s1832_s1 + $0x10] sm:$0xff] }
  0x94   : > { %880 = vmatpush.bf16.msra.mxu0 %v1346_v13  ;;  %v1352_v22 = vld [vmem:[%s1832_s1 + $0x60] sm:$0xff]  ;;  %v1351_v26 = vld [vmem:[%s1832_s1 + $0x58] sm:$0xff]  ;;  %v1350_v30 = vld [vmem:[%s1832_s1 + $0x50] sm:$0xff] }
  0x95   : > { %899 = vmatpush.bf16.msra.mxu1 %v1354_v14  ;;  %v1360_v23 = vld [vmem:[%s1832_s1 + $0xa0] sm:$0xff]  ;;  %v1359_v27 = vld [vmem:[%s1832_s1 + $0x98] sm:$0xff]  ;;  %v1358_v31 = vld [vmem:[%s1832_s1 + $0x90] sm:$0xff] }
  0x96   : > { %918 = vmatpush.bf16.msra.mxu2 %v1362_v15  ;;  %v1368_v24 = vld [vmem:[%s1832_s1 + $0xe0] sm:$0xff]  ;;  %v1367_v28 = vld [vmem:[%s1832_s1 + $0xd8] sm:$0xff]  ;;  %v1366_v32 = vld [vmem:[%s1832_s1 + $0xd0] sm:$0xff] }
  0x97   : > { %937 = vmatpush.bf16.msra.mxu3 %v1370_v16  ;;  %v1341_v33 = vld [vmem:[%s1832_s1 + $0x8] sm:$0xff]  ;;  %v1340_v37 = vld [vmem:[%s1832_s1] sm:$0xff]  ;;  %v1334_v42 = vld [vmem:[%s1830_s6 + $0xc] sm:$0xf0] }
  0x98   : > { %881 = vmatpush.bf16.msra.mxu0 %v1345_v17  ;;  %v1349_v34 = vld [vmem:[%s1832_s1 + $0x48] sm:$0xff]  ;;  %v1348_v38 = vld [vmem:[%s1832_s1 + $0x40] sm:$0xff]  ;;  %v1169_v44 = vld [vmem:[%s1830_s6 + $0x10] sm:$0xf0] }
  0x99   : > { %900 = vmatpush.bf16.msra.mxu1 %v1353_v18  ;;  %v1357_v35 = vld [vmem:[%s1832_s1 + $0x88] sm:$0xff]  ;;  %v1356_v39 = vld [vmem:[%s1832_s1 + $0x80] sm:$0xff]  ;;  %v1335_v46 = vld [vmem:[%s1830_s6 + $0x14] sm:$0xf0] }
  0x9a   : > { %919 = vmatpush.bf16.msra.mxu2 %v1361_v19  ;;  %v1365_v36 = vld [vmem:[%s1832_s1 + $0xc8] sm:$0xff]  ;;  %v1364_v40 = vld [vmem:[%s1832_s1 + $0xc0] sm:$0xff]  ;;  %v1177_v48 = vld [vmem:[%s1830_s6 + $0x18] sm:$0xf0] }
  0x9b   : > { %938 = vmatpush.bf16.msra.mxu3 %v1369_v20  ;;  %v1167_v41 = vld [vmem:[%s1830_s6] sm:$0xf]  ;;  %v1332_v43 = vld [vmem:[%s1830_s6 + $0x4] sm:$0xf]  ;;  %v1175_v45 = vld [vmem:[%s1830_s6 + $0x8] sm:$0xf] }
  0x9c   : > { %882 = vmatpush.bf16.msra.mxu0 %v1344_v21  ;;  %v1333_v47 = vld [vmem:[%s1830_s6 + $0xc] sm:$0xf]  ;;  %v1168_v49 = vor.u32 %v1334_v42, %v1167_v41  ;;  %v1172_v50 = vor.u32 %v1332_v43, %v1169_v44  ;;  %v1176_v51 = vor.u32 %v1335_v46, %v1175_v45  ;;  %v1183_v53 = vld [vmem:[%s1830_s6 + $0x20] sm:$0xf]  ;;  %v1338_v54 = vld [vmem:[%s1830_s6 + $0x2c] sm:$0xf0] }
  0x9d   : > { %901 = vmatpush.bf16.msra.mxu1 %v1352_v22  ;;  %v1180_v52 = vor.u32 %v1333_v47, %v1177_v48  ;;  %v1336_v55 = vld [vmem:[%s1830_s6 + $0x24] sm:$0xf]  ;;  %v1185_v56 = vld [vmem:[%s1830_s6 + $0x30] sm:$0xf0]  ;;  %v1191_v57 = vld [vmem:[%s1830_s6 + $0x28] sm:$0xf]  ;;  %v1184_v61 = vor.u32 %v1338_v54, %v1183_v53 }
  0x9e   : > { %920 = vmatpush.bf16.msra.mxu2 %v1360_v23  ;;  %v1339_v58 = vld [vmem:[%s1830_s6 + $0x34] sm:$0xf0]  ;;  %v1337_v59 = vld [vmem:[%s1830_s6 + $0x2c] sm:$0xf]  ;;  %v1193_v60 = vld [vmem:[%s1830_s6 + $0x38] sm:$0xf0]  ;;  %v1188_v62 = vor.u32 %v1336_v55, %v1185_v56 }
  0x9f   : > { %939 = vmatpush.bf16.msra.mxu3 %v1368_v24  ;;  %v1192_v63 = vor.u32 %v1339_v58, %v1191_v57  ;;  %v1196_v0 = vor.u32 %v1337_v59, %v1193_v60  ;;  %v571_v9 = vld [vmem:[#allocation2 + $0x10] sm:$0xff]  ;;  %v572_v16 = vld [vmem:[#allocation2] sm:$0xff] }
  0xa0   : > { %883 = vmatpush.bf16.msra.mxu0 %v1343_v25  ;;  %v573_v25 = vld [vmem:[#allocation2 + $0x18] sm:$0xff] }
  0xa1   : > { %902 = vmatpush.bf16.msra.mxu1 %v1351_v26 }
  0xa2   : > { %921 = vmatpush.bf16.msra.mxu2 %v1359_v27 }
  0xa3   : > { %940 = vmatpush.bf16.msra.mxu3 %v1367_v28 }
  0xa4   : > { %884 = vmatpush.bf16.msra.mxu0 %v1342_v29 }
  0xa5   : > { %903 = vmatpush.bf16.msra.mxu1 %v1350_v30 }
  0xa6   : > { %922 = vmatpush.bf16.msra.mxu2 %v1358_v31 }
  0xa7   : > { %941 = vmatpush.bf16.msra.mxu3 %v1366_v32 }
  0xa8   : > { %885 = vmatpush.bf16.msra.mxu0 %v1341_v33  ;;  %v574_v33 = vld [vmem:[#allocation2 + $0x8] sm:$0xff] }
  0xa9   : > { %904 = vmatpush.bf16.msra.mxu1 %v1349_v34 }
  0xaa   : > { %923 = vmatpush.bf16.msra.mxu2 %v1357_v35 }
  0xab   : > { %942 = vmatpush.bf16.msra.mxu3 %v1365_v36 }
  0xac   : > { %886 = vmatpush.bf16.msra.mxu0 %v1340_v37 }
  0xad   : > { %905 = vmatpush.bf16.msra.mxu1 %v1348_v38 }
  0xae   : > { %924 = vmatpush.bf16.msra.mxu2 %v1356_v39 }
  0xaf   : > { %943 = vmatpush.bf16.msra.mxu3 %v1364_v40  ;;  %887 = vmatmul.bf16.vlgmr.msra.gmra.mxu0 %v1168_v49 }
  0xb0   : > { %906 = vmatmul.bf16.vlgmr.msra.gmra.mxu1 %v1172_v50 }
  0xb1   : > { %925 = vmatmul.bf16.vlgmr.msra.gmra.mxu2 %v1176_v51 }
  0xb2   : > { %944 = vmatmul.bf16.vlgmr.msra.gmra.mxu3 %v1180_v52 }
  0xbf   : > { %892 = vmatmul.bf16.gmra.mxu0 %v1184_v61 }
  0xc0   : > { %911 = vmatmul.bf16.gmra.mxu1 %v1188_v62 }
  0xc1   : > { %930 = vmatmul.bf16.gmra.mxu2 %v1192_v63 }
  0xc2   : > { %949 = vmatmul.bf16.gmra.mxu3 %v1196_v0 }
 0x12c   : > { %v888_v1 = vpop.f32.mrf.mxu0 }
 0x12d   : > { %v907_v2 = vpop.f32.mrf.mxu1 }
 0x12e   : > { %v908_v3 = vadd.f32 %v907_v2, %v888_v1 }
 0x134   : > { %v926_v4 = vpop.f32.mrf.mxu2  ;;  %v890_v7 = vpop.f32.mrf.mxu0 }
 0x135   : > { %v945_v5 = vpop.f32.mrf.mxu3  ;;  %v927_v6 = vadd.f32 %v926_v4, %v908_v3  ;;  %v909_v8 = vpop.f32.mrf.mxu1 }
 0x136   : > { %v910_v12 = vadd.f32 %v909_v8, %v890_v7 }
 0x137   : > { %v946_v10 = vadd.f32 %v945_v5, %v927_v6 }
 0x139   : > { %v955_v11 = vadd.f32 %v946_v10, %v571_v9 }
 0x13b   : > { %959 = vst [vmem:[#allocation2 + $0x10] sm:$0xff] %v955_v11 }
 0x13c   : > { %v928_v13 = vpop.f32.mrf.mxu2  ;;  %v893_v17 = vpop.f32.mrf.mxu0 }
 0x13d   : > { %v947_v14 = vpop.f32.mrf.mxu3  ;;  %v929_v15 = vadd.f32 %v928_v13, %v910_v12  ;;  %v912_v18 = vpop.f32.mrf.mxu1 }
 0x13e   : > { %v913_v21 = vadd.f32 %v912_v18, %v893_v17 }
 0x13f   : > { %v948_v19 = vadd.f32 %v947_v14, %v929_v15 }
 0x141   : > { %v956_v20 = vadd.f32 %v948_v19, %v572_v16 }
 0x143   : > { %960 = vst [vmem:[#allocation2] sm:$0xff] %v956_v20 }
 0x144   : > { %v931_v22 = vpop.f32.mrf.mxu2  ;;  %v895_v27 = vpop.f32.mrf.mxu0 }
 0x145   : > { %v950_v23 = vpop.f32.mrf.mxu3  ;;  %v932_v24 = vadd.f32 %v931_v22, %v913_v21  ;;  %v914_v28 = vpop.f32.mrf.mxu1 }
 0x146   : > { %v915_v30 = vadd.f32 %v914_v28, %v895_v27 }
 0x147   : > { %v951_v26 = vadd.f32 %v950_v23, %v932_v24 }
 0x149   : > { %v957_v29 = vadd.f32 %v951_v26, %v573_v25 }
 0x14b   : > { %961 = vst [vmem:[#allocation2 + $0x18] sm:$0xff] %v957_v29 }
 0x14c   : > { %v933_v31 = vpop.f32.mrf.mxu2 }
 0x14d   : > { %v934_v32 = vadd.f32 %v933_v31, %v915_v30  ;;  %v952_v34 = vpop.f32.mrf.mxu3 }
 0x14f   : > { %v953_v35 = vadd.f32 %v952_v34, %v934_v32  ;;  %966 = sbr.rel (%p1325_p5) target bundleno = 352 (0x160), region = 104 }
 0x151   : > { %v958_v36 = vadd.f32 %v953_v35, %v574_v33 }
 0x153   : > { %962 = vst [vmem:[#allocation2 + $0x8] sm:$0xff] %v958_v36 }
 0x154   : > { %v967_v37 = vld [vmem:[#allocation2 + $0x10] sm:$0xff]  ;;  %v1461_v38 = vld [vmem:[%s561_s4] ss:$0 sm:$0xff]  ;;  %v969_v40 = vld [vmem:[#allocation2 + $0x18] sm:$0xff] }
 0x155   : > { %v968_v39 = vld [vmem:[#allocation2] sm:$0xff]  ;;  %v975_v42 = vadd.f32 %v1461_v38, %v967_v37  ;;  %v977_v44 = vadd.f32 %v1461_v38, %v969_v40 }
 0x156   : > { %v976_v43 = vadd.f32 %v1461_v38, %v968_v39 }
 0x157   : > { %v979_v46 = vmax.f32 %v975_v42, 0.0  ;;  %v981_v48 = vmax.f32 %v977_v44, 0.0 }
 0x158   : > { %v980_v47 = vmax.f32 %v976_v43, 0.0 }
 0x159   : > { %983 = vst [vmem:[%s1834_s25] sm:$0xff] %v979_v46 }
 0x15a   : > { %v970_v41 = vld [vmem:[#allocation2 + $0x8] sm:$0xff]  ;;  %984 = vst [vmem:[%s1834_s25 + $0x8] sm:$0xff] %v980_v47 }
 0x15b   : > { %v978_v45 = vadd.f32 %v1461_v38, %v970_v41  ;;  %985 = vst [vmem:[%s1834_s25 + $0x10] sm:$0xff] %v981_v48 }
 0x15d   : > { %v982_v49 = vmax.f32 %v978_v45, 0.0 }
 0x15f   : > { %986 = vst [vmem:[%s1834_s25 + $0x18] sm:$0xff] %v982_v49 }
 0x160 PF: > { %993 = sbr.rel (!%p1665_p12) target bundleno = 360 (0x168), region = 108  ;;  %s1327_s14 = sshll.u32 (%p1665_p12), %s1536_s19, 3  ;;  %v1033_v50 = vld [vmem:[%s1834_s25] sm:$0xff] (%p1665_p12) }
 0x161   : > { %v1035_v51 = vld [vmem:[%s1834_s25 + $0x8] sm:$0xff] (%p1665_p12)  ;;  %s998_s5 = scalar_lea.vmem (%p1665_p12), %s1941_s3, %s1327_s14 }
 0x162   : > { %v1037_v52 = vld [vmem:[%s1834_s25 + $0x10] sm:$0xff] (%p1665_p12)  ;;  %1034 = vst [vmem:[%s998_s5] sm:$0xff] (%p1665_p12), %v1033_v50 }
 0x163   : > { %1036 = vst [vmem:[%s998_s5 + $0x10] sm:$0xff] (%p1665_p12), %v1035_v51 }
 0x164   : > { %1038 = vst [vmem:[%s998_s5 + $0x20] sm:$0xff] (%p1665_p12), %v1037_v52 }
 0x166   : > { %v1039_v53 = vld [vmem:[%s1834_s25 + $0x18] sm:$0xff] }
 0x167   : > { %1040 = vst [vmem:[%s998_s5 + $0x30] sm:$0xff] %v1039_v53 }
 0x168 PF: > { %s13_s22 = sadd.s32 1, %s1548_s22   ;;  %s1951_s10 = sld [smem:[#allocation6_spill]] }
 0x169   : > { %p10_p6 = scmp.ge.s32.totalorder %s13_s22, 12   ;;  %s1952_s12 = smov %s1512_s13 }
 0x16a   : > { %s1953_s13 = smov %s1663_s9  ;;  %s1954_s14 = smov %s1520_s15 }
 0x16b   : > { %s1955_s15 = smov %s1660_s8  ;;  %s1956_s16 = smov %s1528_s17 }
 0x16c   : > { %s1957_s17 = smov %s1646_s30  ;;  %s1958_s18 = smov %s1540_s20 }
 0x16d   : > { %s1959_s19 = smov %s1544_s21  ;;  %s1960_s20 = smov %s1963_s24 }
 0x16e   : > { %s1961_s21 = smov %s1951_s10  ;;  %12 = sbr.rel (!%p10_p6) target bundleno = 9 (0x9), region = 188 }

// kernel: improved_ffdnet_forward.30
= control target key start
LH: loop header
LB: loop body
LE: loop exit
PB: predicated region body
PF: predicated region fallthrough
CT: control target
= control target key end

     0   :  { %s2097_s0 = inlined_call_operand.vmem [shape: bf16[32,2560], index: 0, kind: input, shape index: {}]   ;;  %s2098_s1 = inlined_call_operand.vmem [shape: bf16[2560,256], index: 1, kind: input, shape index: {}]   ;;  %s2099_s2 = inlined_call_operand.vmem [shape: f32[1,256], index: 2, kind: input, shape index: {}]   ;;  %s2100_s3 = inlined_call_operand.vmem [shape: f32[32,256], index: 3, kind: input, shape index: {}]   ;;  %s2101_s4 = inlined_call_operand.vmem [shape: f32[32,256], index: 4, kind: output, shape index: {}]  }
   0x1   :  { %2104 = sst [smem:[#allocation9_spill]] %s2097_s0 }
   0x2   :  { %2105 = sst [smem:[#allocation10_spill]] %s2098_s1 }
   0x3   :  { %s1707_s15 = smov 0   ;;  %s1709_s16 = smov 0  }
   0x4   :  { %s1711_s17 = smov 0   ;;  %s1713_s18 = smov 0  }
   0x5   :  { %s1715_s19 = smov 0   ;;  %s1717_s20 = smov 0  }
   0x6   :  { %s1719_s21 = smov 0   ;;  %s1721_s22 = smov 0  }
   0x7   :  { %s1723_s23 = smov 0   ;;  %s1725_s24 = smov 0  }
   0x8   :  { %s1727_s25 = smov 0  }
   0x9 LB: > { %s1277_s26 = sadd.s32 4294967295, %s1679_s25   ;;  %s26_s27 = sadd.s32 1, %s1671_s23  ;;  %s1679_s25 = sphi %s1727_s25, %s14_s25   ;;  %s1675_s24 = sphi %s1725_s24, %s2125_s24   ;;  %s1671_s23 = sphi %s1723_s23, %s2124_s23   ;;  %s1667_s22 = sphi %s1721_s22, %s2123_s22   ;;  %s1663_s21 = sphi %s1719_s21, %s2122_s21   ;;  %s1659_s20 = sphi %s1717_s20, %s2121_s20   ;;  %s1655_s19 = sphi %s1715_s19, %s2120_s19   ;;  %s1651_s18 = sphi %s1713_s18, %s2119_s18   ;;  %s1647_s17 = sphi %s1711_s17, %s2118_s17   ;;  %s1643_s16 = sphi %s1709_s16, %s2117_s16   ;;  %s1639_s15 = sphi %s1707_s15, %s2116_s15  }
   0xa   : > { %p27_p0 = scmp.ge.s32.totalorder %s26_s27, 5  ;;  %s29_s28 = sadd.s32 1, %s1675_s24 }
   0xb   : > { %s42_s29 = sadd.s32 1, %s1659_s20  ;;  %p49_p1 = scmp.ne.s32.totalorder %s1659_s20, %s1655_s19 }
   0xc   : > { %s2127_s27 = smov (%p27_p0, %s26_s27), 0  ;;  %s2129_s28 = smov (!%p27_p0, %s29_s28), %s1675_s24 }
   0xd   : > { %2106 = sst [smem:[#allocation7_spill]] %s2127_s27  ;;  %s38_s30 = ssub.s32 %s1671_s23, %s2127_s27 }
   0xe   : > { %p50_p2 = scmp.eq.s32.totalorder %s1679_s25, 0  ;;  %p31_p3 = scmp.ge.s32.totalorder %s2129_s28, 2 }
   0xf   : > { %p40_p4 = scmp.eq.s32.totalorder %s38_s30, 0  ;;  %s70_s6 = sadd.s32 1, %s1651_s18 }
  0x10   : > { %p1776_p5 = por %p50_p2, %p49_p1  ;;  %s2131_s28 = smov (%p31_p3, %s2129_s28), 0 }
  0x11   : > { %2108 = sst [smem:[#allocation8_spill]] %s2131_s28  ;;  %s66_s8 = ssub.s32 %s1675_s24, %s2131_s28 }
  0x12   : > { %s1784_s7 = scalar_select %p40_p4, %s1659_s20, %s42_s29  }
  0x13   : > { %p77_p6 = scmp.ne.s32.totalorder %s1651_s18, %s1647_s17  ;;  %s67_s9 = sor.u32 %s66_s8, %s38_s30 }
  0x14   : > { %p122_p7 = scmp.eq.s32.totalorder %s66_s8, 0  ;;  %p68_p8 = scmp.eq.s32.totalorder %s67_s9, 0 }
  0x15   : > { %p1792_p9 = por %p77_p6, %p50_p2  ;;  %s124_s11 = sadd.s32 1, %s1643_s16 }
  0x16   : > { %p131_p10 = scmp.ne.s32.totalorder %s1643_s16, %s1639_s15  ;;  %p163_p12 = scmp.eq.s32.totalorder %s1277_s26, 9 }
  0x17   : > { %s1800_s12 = scalar_select %p68_p8, %s1651_s18, %s70_s6  }
  0x18   : > { %s1803_s13 = scalar_select %p122_p7, %s1643_s16, %s124_s11  }
  0x19   : > { %p1807_p11 = por %p131_p10, %p50_p2  ;;  %p1811_p13 = por %p163_p12, %p131_p10 }
  0x1a   : > { %p1280_p0 = scmp.ge.s32.totalorder %s1679_s25, 10 }
  0x1c   : > { %185 = sbr.rel (%p1280_p0) target bundleno = 133 (0x85), region = 16 }
  0x21   : > { %188 = sbr.rel (!%p1776_p5) target bundleno = 51 (0x33), region = 20  ;;  %s190_s30 = sand.u32 (%p1776_p5), 1, %s1659_s20  }
  0x22   : > { %s1461_s6 = sshll.u32 (%p1776_p5), %s1671_s23, 4  ;;  %s1281_s8 = sshll.u32 (%p1776_p5), %s190_s30, 6 }
  0x23   : > { %s2112_s0 = sld [smem:[#allocation9_spill]] (%p1776_p5)  ;;  %s192_s26 = scalar_lea.vmem (%p1776_p5), [#allocation3], %s1281_s8 }
  0x29   : > { %s198_s28 = scalar_lea.vmem %s2112_s0, %s1461_s6 }
  0x2a   : > { %v211_v0 = vld [vmem:[%s198_s28] sm:$0xff]  ;;  %v213_v1 = vld [vmem:[%s198_s28 + $0x8] sm:$0xff]  ;;  %v215_v2 = vld [vmem:[%s198_s28 + $0x50] sm:$0xff] }
  0x2b   : > { %212 = vst [vmem:[%s192_s26] sm:$0xff] %v211_v0  ;;  %v217_v3 = vld [vmem:[%s198_s28 + $0x58] sm:$0xff]  ;;  %v219_v4 = vld [vmem:[%s198_s28 + $0xa0] sm:$0xff]  ;;  %v221_v5 = vld [vmem:[%s198_s28 + $0xa8] sm:$0xff] }
  0x2c   : > { %214 = vst [vmem:[%s192_s26 + $0x8] sm:$0xff] %v213_v1  ;;  %v223_v6 = vld [vmem:[%s198_s28 + $0xf0] sm:$0xff]  ;;  %v225_v7 = vld [vmem:[%s198_s28 + $0xf8] sm:$0xff] }
  0x2d   : > { %216 = vst [vmem:[%s192_s26 + $0x10] sm:$0xff] %v215_v2 }
  0x2e   : > { %218 = vst [vmem:[%s192_s26 + $0x18] sm:$0xff] %v217_v3 }
  0x2f   : > { %220 = vst [vmem:[%s192_s26 + $0x20] sm:$0xff] %v219_v4 }
  0x30   : > { %222 = vst [vmem:[%s192_s26 + $0x28] sm:$0xff] %v221_v5 }
  0x31   : > { %224 = vst [vmem:[%s192_s26 + $0x30] sm:$0xff] %v223_v6 }
  0x32   : > { %226 = vst [vmem:[%s192_s26 + $0x38] sm:$0xff] %v225_v7 }
  0x33 PF: > { %232 = sbr.rel (!%p1792_p9) target bundleno = 125 (0x7d), region = 43  ;;  %s234_s5 = sand.u32 (%p1792_p9), 1, %s1651_s18  }
  0x34   : > { %s1462_s30 = sshll.u32 (%p1792_p9), %s1671_s23, 7  ;;  %s1284_s6 = sshll.u32 (%p1792_p9), %s234_s5, 8 }
  0x35   : > { %s239_s8 = sadd.s32 (%p1792_p9), %s1675_s24, %s1462_s30  ;;  %s2113_s1 = sld [smem:[#allocation10_spill]] (%p1792_p9) }
  0x36   : > { %s1287_s9 = sshll.u32 (%p1792_p9), %s239_s8, 2  ;;  %s1836_s28 = scalar_lea.vmem (%p1792_p9), [#allocation4], %s1284_s6 }
  0x3b   : > { %s1831_s27 = scalar_lea.vmem %s2113_s1, %s1287_s9 }
  0x3c   : > { %v258_v8 = vld [vmem:[%s1831_s27] sm:$0xf]  ;;  %v260_v9 = vld [vmem:[%s1831_s27 + $0x8] sm:$0xf]  ;;  %v262_v10 = vld [vmem:[%s1831_s27 + $0x10] sm:$0xf] }
  0x3d   : > { %259 = vst [vmem:[%s1836_s28] sm:$0xf] %v258_v8  ;;  %v264_v11 = vld [vmem:[%s1831_s27 + $0x18] sm:$0xf]  ;;  %v266_v12 = vld [vmem:[%s1831_s27 + $0x20] sm:$0xf] }
  0x3e   : > { %261 = vst [vmem:[%s1836_s28 + $0x4] sm:$0xf] %v260_v9  ;;  %v268_v13 = vld [vmem:[%s1831_s27 + $0x28] sm:$0xf]  ;;  %v270_v14 = vld [vmem:[%s1831_s27 + $0x30] sm:$0xf] }
  0x3f   : > { %263 = vst [vmem:[%s1836_s28 + $0x8] sm:$0xf] %v262_v10  ;;  %v272_v15 = vld [vmem:[%s1831_s27 + $0x38] sm:$0xf]  ;;  %v274_v16 = vld [vmem:[%s1831_s27 + $0x40] sm:$0xf] }
  0x40   : > { %265 = vst [vmem:[%s1836_s28 + $0xc] sm:$0xf] %v264_v11  ;;  %v276_v17 = vld [vmem:[%s1831_s27 + $0x48] sm:$0xf]  ;;  %v278_v18 = vld [vmem:[%s1831_s27 + $0x50] sm:$0xf] }
  0x41   : > { %267 = vst [vmem:[%s1836_s28 + $0x10] sm:$0xf] %v266_v12  ;;  %v280_v19 = vld [vmem:[%s1831_s27 + $0x58] sm:$0xf]  ;;  %v282_v20 = vld [vmem:[%s1831_s27 + $0x60] sm:$0xf] }
  0x42   : > { %269 = vst [vmem:[%s1836_s28 + $0x14] sm:$0xf] %v268_v13  ;;  %v284_v21 = vld [vmem:[%s1831_s27 + $0x68] sm:$0xf]  ;;  %v286_v22 = vld [vmem:[%s1831_s27 + $0x70] sm:$0xf] }
  0x43   : > { %271 = vst [vmem:[%s1836_s28 + $0x18] sm:$0xf] %v270_v14  ;;  %v288_v23 = vld [vmem:[%s1831_s27 + $0x78] sm:$0xf]  ;;  %v290_v24 = vld [vmem:[%s1831_s27 + $0x80] sm:$0xf] }
  0x44   : > { %273 = vst [vmem:[%s1836_s28 + $0x1c] sm:$0xf] %v272_v15  ;;  %v292_v25 = vld [vmem:[%s1831_s27 + $0x88] sm:$0xf]  ;;  %v294_v26 = vld [vmem:[%s1831_s27 + $0x90] sm:$0xf] }
  0x45   : > { %275 = vst [vmem:[%s1836_s28 + $0x20] sm:$0xf] %v274_v16  ;;  %v296_v27 = vld [vmem:[%s1831_s27 + $0x98] sm:$0xf]  ;;  %v298_v28 = vld [vmem:[%s1831_s27 + $0xa0] sm:$0xf] }
  0x46   : > { %277 = vst [vmem:[%s1836_s28 + $0x24] sm:$0xf] %v276_v17  ;;  %v300_v29 = vld [vmem:[%s1831_s27 + $0xa8] sm:$0xf]  ;;  %v302_v30 = vld [vmem:[%s1831_s27 + $0xb0] sm:$0xf] }
  0x47   : > { %279 = vst [vmem:[%s1836_s28 + $0x28] sm:$0xf] %v278_v18  ;;  %v304_v31 = vld [vmem:[%s1831_s27 + $0xb8] sm:$0xf]  ;;  %v306_v32 = vld [vmem:[%s1831_s27 + $0xc0] sm:$0xf] }
  0x48   : > { %281 = vst [vmem:[%s1836_s28 + $0x2c] sm:$0xf] %v280_v19  ;;  %v308_v33 = vld [vmem:[%s1831_s27 + $0xc8] sm:$0xf]  ;;  %v310_v34 = vld [vmem:[%s1831_s27 + $0xd0] sm:$0xf] }
  0x49   : > { %283 = vst [vmem:[%s1836_s28 + $0x30] sm:$0xf] %v282_v20  ;;  %v312_v35 = vld [vmem:[%s1831_s27 + $0xd8] sm:$0xf]  ;;  %v314_v36 = vld [vmem:[%s1831_s27 + $0xe0] sm:$0xf] }
  0x4a   : > { %285 = vst [vmem:[%s1836_s28 + $0x34] sm:$0xf] %v284_v21  ;;  %v316_v37 = vld [vmem:[%s1831_s27 + $0xe8] sm:$0xf]  ;;  %v318_v38 = vld [vmem:[%s1831_s27 + $0xf0] sm:$0xf] }
  0x4b   : > { %287 = vst [vmem:[%s1836_s28 + $0x38] sm:$0xf] %v286_v22  ;;  %v320_v39 = vld [vmem:[%s1831_s27 + $0xf8] sm:$0xf]  ;;  %v322_v40 = vld [vmem:[%s1831_s27 + $0x100] sm:$0xf] }
  0x4c   : > { %289 = vst [vmem:[%s1836_s28 + $0x3c] sm:$0xf] %v288_v23  ;;  %v324_v41 = vld [vmem:[%s1831_s27 + $0x108] sm:$0xf]  ;;  %v326_v42 = vld [vmem:[%s1831_s27 + $0x110] sm:$0xf] }
  0x4d   : > { %291 = vst [vmem:[%s1836_s28 + $0x40] sm:$0xf] %v290_v24  ;;  %v328_v43 = vld [vmem:[%s1831_s27 + $0x118] sm:$0xf]  ;;  %v330_v44 = vld [vmem:[%s1831_s27 + $0x120] sm:$0xf] }
  0x4e   : > { %293 = vst [vmem:[%s1836_s28 + $0x44] sm:$0xf] %v292_v25  ;;  %v332_v45 = vld [vmem:[%s1831_s27 + $0x128] sm:$0xf]  ;;  %v334_v46 = vld [vmem:[%s1831_s27 + $0x130] sm:$0xf] }
  0x4f   : > { %295 = vst [vmem:[%s1836_s28 + $0x48] sm:$0xf] %v294_v26  ;;  %v336_v47 = vld [vmem:[%s1831_s27 + $0x138] sm:$0xf]  ;;  %v338_v48 = vld [vmem:[%s1831_s27 + $0x140] sm:$0xf] }
  0x50   : > { %297 = vst [vmem:[%s1836_s28 + $0x4c] sm:$0xf] %v296_v27  ;;  %v340_v49 = vld [vmem:[%s1831_s27 + $0x148] sm:$0xf]  ;;  %v342_v50 = vld [vmem:[%s1831_s27 + $0x150] sm:$0xf] }
  0x51   : > { %299 = vst [vmem:[%s1836_s28 + $0x50] sm:$0xf] %v298_v28  ;;  %v344_v51 = vld [vmem:[%s1831_s27 + $0x158] sm:$0xf]  ;;  %v346_v52 = vld [vmem:[%s1831_s27 + $0x160] sm:$0xf] }
  0x52   : > { %301 = vst [vmem:[%s1836_s28 + $0x54] sm:$0xf] %v300_v29  ;;  %v348_v53 = vld [vmem:[%s1831_s27 + $0x168] sm:$0xf]  ;;  %v350_v54 = vld [vmem:[%s1831_s27 + $0x170] sm:$0xf] }
  0x53   : > { %303 = vst [vmem:[%s1836_s28 + $0x58] sm:$0xf] %v302_v30  ;;  %v352_v55 = vld [vmem:[%s1831_s27 + $0x178] sm:$0xf]  ;;  %v354_v56 = vld [vmem:[%s1831_s27 + $0x180] sm:$0xf] }
  0x54   : > { %305 = vst [vmem:[%s1836_s28 + $0x5c] sm:$0xf] %v304_v31  ;;  %v356_v57 = vld [vmem:[%s1831_s27 + $0x188] sm:$0xf]  ;;  %v358_v58 = vld [vmem:[%s1831_s27 + $0x190] sm:$0xf] }
  0x55   : > { %307 = vst [vmem:[%s1836_s28 + $0x60] sm:$0xf] %v306_v32  ;;  %v360_v59 = vld [vmem:[%s1831_s27 + $0x198] sm:$0xf]  ;;  %v362_v60 = vld [vmem:[%s1831_s27 + $0x1a0] sm:$0xf] }
  0x56   : > { %309 = vst [vmem:[%s1836_s28 + $0x64] sm:$0xf] %v308_v33  ;;  %v364_v61 = vld [vmem:[%s1831_s27 + $0x1a8] sm:$0xf]  ;;  %v366_v62 = vld [vmem:[%s1831_s27 + $0x1b0] sm:$0xf] }
  0x57   : > { %311 = vst [vmem:[%s1836_s28 + $0x68] sm:$0xf] %v310_v34  ;;  %v368_v63 = vld [vmem:[%s1831_s27 + $0x1b8] sm:$0xf]  ;;  %v370_v0 = vld [vmem:[%s1831_s27 + $0x1c0] sm:$0xf] }
  0x58   : > { %313 = vst [vmem:[%s1836_s28 + $0x6c] sm:$0xf] %v312_v35  ;;  %v372_v1 = vld [vmem:[%s1831_s27 + $0x1c8] sm:$0xf]  ;;  %v374_v2 = vld [vmem:[%s1831_s27 + $0x1d0] sm:$0xf] }
  0x59   : > { %315 = vst [vmem:[%s1836_s28 + $0x70] sm:$0xf] %v314_v36  ;;  %v376_v3 = vld [vmem:[%s1831_s27 + $0x1d8] sm:$0xf]  ;;  %v378_v4 = vld [vmem:[%s1831_s27 + $0x1e0] sm:$0xf] }
  0x5a   : > { %317 = vst [vmem:[%s1836_s28 + $0x74] sm:$0xf] %v316_v37  ;;  %v380_v5 = vld [vmem:[%s1831_s27 + $0x1e8] sm:$0xf]  ;;  %v382_v6 = vld [vmem:[%s1831_s27 + $0x1f0] sm:$0xf] }
  0x5b   : > { %319 = vst [vmem:[%s1836_s28 + $0x78] sm:$0xf] %v318_v38  ;;  %v384_v7 = vld [vmem:[%s1831_s27 + $0x1f8] sm:$0xf] }
  0x5c   : > { %321 = vst [vmem:[%s1836_s28 + $0x7c] sm:$0xf] %v320_v39 }
  0x5d   : > { %323 = vst [vmem:[%s1836_s28 + $0x80] sm:$0xf] %v322_v40 }
  0x5e   : > { %325 = vst [vmem:[%s1836_s28 + $0x84] sm:$0xf] %v324_v41 }
  0x5f   : > { %327 = vst [vmem:[%s1836_s28 + $0x88] sm:$0xf] %v326_v42 }
  0x60   : > { %329 = vst [vmem:[%s1836_s28 + $0x8c] sm:$0xf] %v328_v43 }
  0x61   : > { %331 = vst [vmem:[%s1836_s28 + $0x90] sm:$0xf] %v330_v44 }
  0x62   : > { %333 = vst [vmem:[%s1836_s28 + $0x94] sm:$0xf] %v332_v45 }
  0x63   : > { %335 = vst [vmem:[%s1836_s28 + $0x98] sm:$0xf] %v334_v46 }
  0x64   : > { %337 = vst [vmem:[%s1836_s28 + $0x9c] sm:$0xf] %v336_v47 }
  0x65   : > { %339 = vst [vmem:[%s1836_s28 + $0xa0] sm:$0xf] %v338_v48 }
  0x66   : > { %341 = vst [vmem:[%s1836_s28 + $0xa4] sm:$0xf] %v340_v49 }
  0x67   : > { %343 = vst [vmem:[%s1836_s28 + $0xa8] sm:$0xf] %v342_v50 }
  0x68   : > { %345 = vst [vmem:[%s1836_s28 + $0xac] sm:$0xf] %v344_v51 }
  0x69   : > { %347 = vst [vmem:[%s1836_s28 + $0xb0] sm:$0xf] %v346_v52 }
  0x6a   : > { %349 = vst [vmem:[%s1836_s28 + $0xb4] sm:$0xf] %v348_v53 }
  0x6b   : > { %351 = vst [vmem:[%s1836_s28 + $0xb8] sm:$0xf] %v350_v54 }
  0x6c   : > { %353 = vst [vmem:[%s1836_s28 + $0xbc] sm:$0xf] %v352_v55 }
  0x6d   : > { %355 = vst [vmem:[%s1836_s28 + $0xc0] sm:$0xf] %v354_v56 }
  0x6e   : > { %357 = vst [vmem:[%s1836_s28 + $0xc4] sm:$0xf] %v356_v57 }
  0x6f   : > { %359 = vst [vmem:[%s1836_s28 + $0xc8] sm:$0xf] %v358_v58 }
  0x70   : > { %361 = vst [vmem:[%s1836_s28 + $0xcc] sm:$0xf] %v360_v59 }
  0x71   : > { %363 = vst [vmem:[%s1836_s28 + $0xd0] sm:$0xf] %v362_v60 }
  0x72   : > { %365 = vst [vmem:[%s1836_s28 + $0xd4] sm:$0xf] %v364_v61 }
  0x73   : > { %367 = vst [vmem:[%s1836_s28 + $0xd8] sm:$0xf] %v366_v62 }
  0x74   : > { %369 = vst [vmem:[%s1836_s28 + $0xdc] sm:$0xf] %v368_v63 }
  0x75   : > { %371 = vst [vmem:[%s1836_s28 + $0xe0] sm:$0xf] %v370_v0 }
  0x76   : > { %373 = vst [vmem:[%s1836_s28 + $0xe4] sm:$0xf] %v372_v1 }
  0x77   : > { %375 = vst [vmem:[%s1836_s28 + $0xe8] sm:$0xf] %v374_v2 }
  0x78   : > { %377 = vst [vmem:[%s1836_s28 + $0xec] sm:$0xf] %v376_v3 }
  0x79   : > { %379 = vst [vmem:[%s1836_s28 + $0xf0] sm:$0xf] %v378_v4 }
  0x7a   : > { %381 = vst [vmem:[%s1836_s28 + $0xf4] sm:$0xf] %v380_v5 }
  0x7b   : > { %383 = vst [vmem:[%s1836_s28 + $0xf8] sm:$0xf] %v382_v6 }
  0x7c   : > { %385 = vst [vmem:[%s1836_s28 + $0xfc] sm:$0xf] %v384_v7 }
  0x7d PF: > { %543 = sbr.rel (!%p1807_p11) target bundleno = 133 (0x85), region = 88  ;;  %s545_s0 = sand.u32 (%p1807_p11), 1, %s1643_s16  }
  0x7e   : > { %s1289_s10 = sshll.u32 (%p1807_p11), %s1675_s24, 3  ;;  %s1288_s26 = sshll.u32 (%p1807_p11), %s545_s0, 5 }
  0x7f   : > { %s552_s6 = scalar_lea.vmem (%p1807_p11), %s2100_s3, %s1289_s10  ;;  %s547_s27 = scalar_lea.vmem (%p1807_p11), [#allocation5], %s1288_s26 }
  0x80   : > { %v587_v8 = vld [vmem:[%s552_s6] sm:$0xff] (%p1807_p11)  ;;  %v589_v9 = vld [vmem:[%s552_s6 + $0x10] sm:$0xff] (%p1807_p11) }
  0x81   : > { %v591_v10 = vld [vmem:[%s552_s6 + $0x20] sm:$0xff] (%p1807_p11)  ;;  %588 = vst [vmem:[%s547_s27] sm:$0xff] (%p1807_p11), %v587_v8  ;;  %v593_v11 = vld [vmem:[%s552_s6 + $0x30] sm:$0xff] (%p1807_p11) }
  0x82   : > { %590 = vst [vmem:[%s547_s27 + $0x8] sm:$0xff] %v589_v9 }
  0x83   : > { %592 = vst [vmem:[%s547_s27 + $0x10] sm:$0xff] %v591_v10 }
  0x84   : > { %594 = vst [vmem:[%s547_s27 + $0x18] sm:$0xff] %v593_v11 }
  0x85 PF: > { %p1290_p1 = scmp.ge.s32.totalorder %s1679_s25, 1  ;;  %p599_p2 = scmp.lt.s32.totalorder %s1679_s25, 11 }
  0x87   : > { %p600_p3 = pnand %p1290_p1, %p599_p2 }
  0x88   : > { %s606_s14 = sand.u32 (!%p600_p3), 1, %s1655_s19   ;;  %s613_s8 = sand.u32 (!%p600_p3), 1, %s1647_s17  }
  0x89   : > { %603 = sbr.rel (%p600_p3) target bundleno = 374 (0x176), region = 126  ;;  %s1291_s9 = sshll.u32 (!%p600_p3), %s606_s14, 6 }
  0x8a   : > { %s1292_s11 = sshll.u32 (!%p600_p3), %s613_s8, 8  ;;  %s620_s28 = sand.u32 (!%p600_p3), 1, %s1639_s15  }
  0x8b   : > { %p658_p4 = scmp.lt.s32.totalorder (!%p600_p3), %s1667_s22, 1  ;;  %s1293_s0 = sshll.u32 (!%p600_p3), %s620_s28, 5 }
  0x8c   : > { %s1983_s6 = scalar_lea.vmem (!%p600_p3), [#allocation3], %s1291_s9  ;;  %s1985_s27 = scalar_lea.vmem (!%p600_p3), [#allocation4], %s1292_s11 }
  0x8d   : > { %s1987_s1 = scalar_lea.vmem (!%p600_p3), [#allocation5], %s1293_s0  ;;  %s1989_s19 = scalar_lea.vmem (!%p600_p3), [#allocation6], %s1293_s0 }
  0x8e   : > { %s1977_s10 = scalar_select %p658_p4, %s1667_s22, 1 }
  0x8f   : > { %p1295_p5 = scmp.ne.s32.totalorder %s1663_s21, 0 }
  0x90   : > { %s660_s30 = scalar_lea.vmem %s2099_s2, %s1977_s10 }
  0x91   : > { %666 = sbr.rel (%p1295_p5) target bundleno = 155 (0x9b), region = 142 }
  0x96   : > { %v1681_v12 = vmov 0.0  }
  0x97   : > { %667 = vst [vmem:[#allocation2 + $0x10] sm:$0xff] %v1681_v12 }
  0x98   : > { %668 = vst [vmem:[#allocation2] sm:$0xff] %v1681_v12 }
  0x99   : > { %669 = vst [vmem:[#allocation2 + $0x18] sm:$0xff] %v1681_v12 }
  0x9a   : > { %670 = vst [vmem:[#allocation2 + $0x8] sm:$0xff] %v1681_v12 }
  0x9b PF: > { %v1478_v13 = vld [vmem:[%s1985_s27 + $0x38] sm:$0xff]  ;;  %v1477_v17 = vld [vmem:[%s1985_s27 + $0x30] sm:$0xff]  ;;  %v1476_v21 = vld [vmem:[%s1985_s27 + $0x28] sm:$0xff]  ;;  %p1456_p6 = scmp.ne.s32.totalorder %s1663_s21, 4 }
  0x9c   : > { %v1486_v14 = vld [vmem:[%s1985_s27 + $0x78] sm:$0xff]  ;;  %979 = vmatpush.bf16.msra.mxu0 %v1478_v13  ;;  %v1485_v18 = vld [vmem:[%s1985_s27 + $0x70] sm:$0xff]  ;;  %v1484_v22 = vld [vmem:[%s1985_s27 + $0x68] sm:$0xff] }
  0x9d   : > { %v1494_v15 = vld [vmem:[%s1985_s27 + $0xb8] sm:$0xff]  ;;  %998 = vmatpush.bf16.msra.mxu1 %v1486_v14  ;;  %v1493_v19 = vld [vmem:[%s1985_s27 + $0xb0] sm:$0xff]  ;;  %v1492_v23 = vld [vmem:[%s1985_s27 + $0xa8] sm:$0xff] }
  0x9e   : > { %v1502_v16 = vld [vmem:[%s1985_s27 + $0xf8] sm:$0xff]  ;;  %1017 = vmatpush.bf16.msra.mxu2 %v1494_v15  ;;  %v1501_v20 = vld [vmem:[%s1985_s27 + $0xf0] sm:$0xff]  ;;  %v1500_v24 = vld [vmem:[%s1985_s27 + $0xe8] sm:$0xff] }
  0x9f   : > { %1036 = vmatpush.bf16.msra.mxu3 %v1502_v16  ;;  %v1475_v25 = vld [vmem:[%s1985_s27 + $0x20] sm:$0xff]  ;;  %v1474_v29 = vld [vmem:[%s1985_s27 + $0x18] sm:$0xff]  ;;  %v1473_v33 = vld [vmem:[%s1985_s27 + $0x10] sm:$0xff] }
  0xa0   : > { %980 = vmatpush.bf16.msra.mxu0 %v1477_v17  ;;  %v1483_v26 = vld [vmem:[%s1985_s27 + $0x60] sm:$0xff]  ;;  %v1482_v30 = vld [vmem:[%s1985_s27 + $0x58] sm:$0xff]  ;;  %v1481_v34 = vld [vmem:[%s1985_s27 + $0x50] sm:$0xff] }
  0xa1   : > { %999 = vmatpush.bf16.msra.mxu1 %v1485_v18  ;;  %v1491_v27 = vld [vmem:[%s1985_s27 + $0xa0] sm:$0xff]  ;;  %v1490_v31 = vld [vmem:[%s1985_s27 + $0x98] sm:$0xff]  ;;  %v1489_v35 = vld [vmem:[%s1985_s27 + $0x90] sm:$0xff] }
  0xa2   : > { %1018 = vmatpush.bf16.msra.mxu2 %v1493_v19  ;;  %v1499_v28 = vld [vmem:[%s1985_s27 + $0xe0] sm:$0xff]  ;;  %v1498_v32 = vld [vmem:[%s1985_s27 + $0xd8] sm:$0xff]  ;;  %v1497_v36 = vld [vmem:[%s1985_s27 + $0xd0] sm:$0xff] }
  0xa3   : > { %1037 = vmatpush.bf16.msra.mxu3 %v1501_v20  ;;  %v1472_v37 = vld [vmem:[%s1985_s27 + $0x8] sm:$0xff]  ;;  %v1471_v41 = vld [vmem:[%s1985_s27] sm:$0xff]  ;;  %v1465_v46 = vld [vmem:[%s1983_s6 + $0xc] sm:$0xf0] }
  0xa4   : > { %981 = vmatpush.bf16.msra.mxu0 %v1476_v21  ;;  %v1480_v38 = vld [vmem:[%s1985_s27 + $0x48] sm:$0xff]  ;;  %v1479_v42 = vld [vmem:[%s1985_s27 + $0x40] sm:$0xff]  ;;  %v1300_v48 = vld [vmem:[%s1983_s6 + $0x10] sm:$0xf0] }
  0xa5   : > { %1000 = vmatpush.bf16.msra.mxu1 %v1484_v22  ;;  %v1488_v39 = vld [vmem:[%s1985_s27 + $0x88] sm:$0xff]  ;;  %v1487_v43 = vld [vmem:[%s1985_s27 + $0x80] sm:$0xff]  ;;  %v1466_v50 = vld [vmem:[%s1983_s6 + $0x14] sm:$0xf0] }
  0xa6   : > { %1019 = vmatpush.bf16.msra.mxu2 %v1492_v23  ;;  %v1496_v40 = vld [vmem:[%s1985_s27 + $0xc8] sm:$0xff]  ;;  %v1495_v44 = vld [vmem:[%s1985_s27 + $0xc0] sm:$0xff]  ;;  %v1308_v52 = vld [vmem:[%s1983_s6 + $0x18] sm:$0xf0] }
  0xa7   : > { %1038 = vmatpush.bf16.msra.mxu3 %v1500_v24  ;;  %v1298_v45 = vld [vmem:[%s1983_s6] sm:$0xf]  ;;  %v1463_v47 = vld [vmem:[%s1983_s6 + $0x4] sm:$0xf]  ;;  %v1306_v49 = vld [vmem:[%s1983_s6 + $0x8] sm:$0xf] }
  0xa8   : > { %982 = vmatpush.bf16.msra.mxu0 %v1475_v25  ;;  %v1464_v51 = vld [vmem:[%s1983_s6 + $0xc] sm:$0xf]  ;;  %v1299_v53 = vor.u32 %v1465_v46, %v1298_v45  ;;  %v1303_v54 = vor.u32 %v1463_v47, %v1300_v48  ;;  %v1307_v55 = vor.u32 %v1466_v50, %v1306_v49  ;;  %v1314_v57 = vld [vmem:[%s1983_s6 + $0x20] sm:$0xf]  ;;  %v1469_v58 = vld [vmem:[%s1983_s6 + $0x2c] sm:$0xf0] }
  0xa9   : > { %1001 = vmatpush.bf16.msra.mxu1 %v1483_v26  ;;  %v1311_v56 = vor.u32 %v1464_v51, %v1308_v52  ;;  %v1467_v59 = vld [vmem:[%s1983_s6 + $0x24] sm:$0xf]  ;;  %v1316_v60 = vld [vmem:[%s1983_s6 + $0x30] sm:$0xf0]  ;;  %v1322_v61 = vld [vmem:[%s1983_s6 + $0x28] sm:$0xf]  ;;  %v1315_v1 = vor.u32 %v1469_v58, %v1314_v57 }
  0xaa   : > { %1020 = vmatpush.bf16.msra.mxu2 %v1491_v27  ;;  %v1470_v62 = vld [vmem:[%s1983_s6 + $0x34] sm:$0xf0]  ;;  %v1468_v63 = vld [vmem:[%s1983_s6 + $0x2c] sm:$0xf]  ;;  %v1324_v0 = vld [vmem:[%s1983_s6 + $0x38] sm:$0xf0]  ;;  %v1319_v2 = vor.u32 %v1467_v59, %v1316_v60 }
  0xab   : > { %1039 = vmatpush.bf16.msra.mxu3 %v1499_v28  ;;  %v1323_v3 = vor.u32 %v1470_v62, %v1322_v61  ;;  %v1327_v4 = vor.u32 %v1468_v63, %v1324_v0  ;;  %v671_v13 = vld [vmem:[#allocation2 + $0x10] sm:$0xff]  ;;  %v672_v20 = vld [vmem:[#allocation2] sm:$0xff] }
  0xac   : > { %983 = vmatpush.bf16.msra.mxu0 %v1474_v29  ;;  %v673_v29 = vld [vmem:[#allocation2 + $0x18] sm:$0xff] }
  0xad   : > { %1002 = vmatpush.bf16.msra.mxu1 %v1482_v30 }
  0xae   : > { %1021 = vmatpush.bf16.msra.mxu2 %v1490_v31 }
  0xaf   : > { %1040 = vmatpush.bf16.msra.mxu3 %v1498_v32 }
  0xb0   : > { %984 = vmatpush.bf16.msra.mxu0 %v1473_v33 }
  0xb1   : > { %1003 = vmatpush.bf16.msra.mxu1 %v1481_v34 }
  0xb2   : > { %1022 = vmatpush.bf16.msra.mxu2 %v1489_v35 }
  0xb3   : > { %1041 = vmatpush.bf16.msra.mxu3 %v1497_v36 }
  0xb4   : > { %985 = vmatpush.bf16.msra.mxu0 %v1472_v37  ;;  %v674_v37 = vld [vmem:[#allocation2 + $0x8] sm:$0xff] }
  0xb5   : > { %1004 = vmatpush.bf16.msra.mxu1 %v1480_v38 }
  0xb6   : > { %1023 = vmatpush.bf16.msra.mxu2 %v1488_v39 }
  0xb7   : > { %1042 = vmatpush.bf16.msra.mxu3 %v1496_v40 }
  0xb8   : > { %986 = vmatpush.bf16.msra.mxu0 %v1471_v41 }
  0xb9   : > { %1005 = vmatpush.bf16.msra.mxu1 %v1479_v42 }
  0xba   : > { %1024 = vmatpush.bf16.msra.mxu2 %v1487_v43 }
  0xbb   : > { %1043 = vmatpush.bf16.msra.mxu3 %v1495_v44  ;;  %987 = vmatmul.bf16.vlgmr.msra.gmra.mxu0 %v1299_v53 }
  0xbc   : > { %1006 = vmatmul.bf16.vlgmr.msra.gmra.mxu1 %v1303_v54 }
  0xbd   : > { %1025 = vmatmul.bf16.vlgmr.msra.gmra.mxu2 %v1307_v55 }
  0xbe   : > { %1044 = vmatmul.bf16.vlgmr.msra.gmra.mxu3 %v1311_v56 }
  0xcb   : > { %992 = vmatmul.bf16.gmra.mxu0 %v1315_v1 }
  0xcc   : > { %1011 = vmatmul.bf16.gmra.mxu1 %v1319_v2 }
  0xcd   : > { %1030 = vmatmul.bf16.gmra.mxu2 %v1323_v3 }
  0xce   : > { %1049 = vmatmul.bf16.gmra.mxu3 %v1327_v4 }
 0x138   : > { %v988_v5 = vpop.f32.mrf.mxu0 }
 0x139   : > { %v1007_v6 = vpop.f32.mrf.mxu1 }
 0x13a   : > { %v1008_v7 = vadd.f32 %v1007_v6, %v988_v5 }
 0x140   : > { %v1026_v8 = vpop.f32.mrf.mxu2  ;;  %v990_v11 = vpop.f32.mrf.mxu0 }
 0x141   : > { %v1045_v9 = vpop.f32.mrf.mxu3  ;;  %v1027_v10 = vadd.f32 %v1026_v8, %v1008_v7  ;;  %v1009_v12 = vpop.f32.mrf.mxu1 }
 0x142   : > { %v1010_v16 = vadd.f32 %v1009_v12, %v990_v11 }
 0x143   : > { %v1046_v14 = vadd.f32 %v1045_v9, %v1027_v10 }
 0x145   : > { %v1055_v15 = vadd.f32 %v1046_v14, %v671_v13 }
 0x147   : > { %1059 = vst [vmem:[#allocation2 + $0x10] sm:$0xff] %v1055_v15 }
 0x148   : > { %v1028_v17 = vpop.f32.mrf.mxu2  ;;  %v993_v21 = vpop.f32.mrf.mxu0 }
 0x149   : > { %v1047_v18 = vpop.f32.mrf.mxu3  ;;  %v1029_v19 = vadd.f32 %v1028_v17, %v1010_v16  ;;  %v1012_v22 = vpop.f32.mrf.mxu1 }
 0x14a   : > { %v1013_v25 = vadd.f32 %v1012_v22, %v993_v21 }
 0x14b   : > { %v1048_v23 = vadd.f32 %v1047_v18, %v1029_v19 }
 0x14d   : > { %v1056_v24 = vadd.f32 %v1048_v23, %v672_v20 }
 0x14f   : > { %1060 = vst [vmem:[#allocation2] sm:$0xff] %v1056_v24 }
 0x150   : > { %v1031_v26 = vpop.f32.mrf.mxu2  ;;  %v995_v31 = vpop.f32.mrf.mxu0 }
 0x151   : > { %v1050_v27 = vpop.f32.mrf.mxu3  ;;  %v1032_v28 = vadd.f32 %v1031_v26, %v1013_v25  ;;  %v1014_v32 = vpop.f32.mrf.mxu1 }
 0x152   : > { %v1015_v34 = vadd.f32 %v1014_v32, %v995_v31 }
 0x153   : > { %v1051_v30 = vadd.f32 %v1050_v27, %v1032_v28 }
 0x155   : > { %v1057_v33 = vadd.f32 %v1051_v30, %v673_v29 }
 0x157   : > { %1061 = vst [vmem:[#allocation2 + $0x18] sm:$0xff] %v1057_v33 }
 0x158   : > { %v1033_v35 = vpop.f32.mrf.mxu2 }
 0x159   : > { %v1034_v36 = vadd.f32 %v1033_v35, %v1015_v34  ;;  %v1052_v38 = vpop.f32.mrf.mxu3 }
 0x15b   : > { %v1053_v39 = vadd.f32 %v1052_v38, %v1034_v36  ;;  %1066 = sbr.rel (%p1456_p6) target bundleno = 366 (0x16e), region = 146 }
 0x15d   : > { %v1058_v40 = vadd.f32 %v1053_v39, %v674_v37 }
 0x15f   : > { %1062 = vst [vmem:[#allocation2 + $0x8] sm:$0xff] %v1058_v40 }
 0x160   : > { %v1067_v41 = vld [vmem:[#allocation2 + $0x10] sm:$0xff]  ;;  %v1592_v42 = vld [vmem:[%s660_s30] ss:$0 sm:$0xff]  ;;  %v1080_v45 = vld [vmem:[%s1987_s1 + $0x8] sm:$0xff] }
 0x161   : > { %v1079_v43 = vld [vmem:[%s1987_s1] sm:$0xff]  ;;  %v1075_v46 = vadd.f32 %v1592_v42, %v1067_v41  ;;  %v1069_v48 = vld [vmem:[#allocation2 + $0x18] sm:$0xff]  ;;  %v1081_v49 = vld [vmem:[%s1987_s1 + $0x10] sm:$0xff] }
 0x162   : > { %v1068_v44 = vld [vmem:[#allocation2] sm:$0xff]  ;;  %v1077_v51 = vadd.f32 %v1592_v42, %v1069_v48  ;;  %v1082_v53 = vld [vmem:[%s1987_s1 + $0x18] sm:$0xff] }
 0x163   : > { %v1076_v47 = vadd.f32 %v1592_v42, %v1068_v44  ;;  %v1083_v54 = vadd.f32 %v1079_v43, %v1075_v46 }
 0x164   : > { %v1085_v56 = vadd.f32 %v1081_v49, %v1077_v51 }
 0x165   : > { %v1084_v55 = vadd.f32 %v1080_v45, %v1076_v47  ;;  %v1087_v58 = vmax.f32 %v1083_v54, 0.0 }
 0x166   : > { %v1070_v50 = vld [vmem:[#allocation2 + $0x8] sm:$0xff]  ;;  %v1089_v60 = vmax.f32 %v1085_v56, 0.0 }
 0x167   : > { %v1078_v52 = vadd.f32 %v1592_v42, %v1070_v50  ;;  %v1088_v59 = vmax.f32 %v1084_v55, 0.0  ;;  %1091 = vst [vmem:[%s1989_s19] sm:$0xff] %v1087_v58 }
 0x168   : > { %1093 = vst [vmem:[%s1989_s19 + $0x10] sm:$0xff] %v1089_v60 }
 0x169   : > { %v1086_v57 = vadd.f32 %v1082_v53, %v1078_v52  ;;  %1092 = vst [vmem:[%s1989_s19 + $0x8] sm:$0xff] %v1088_v59 }
 0x16b   : > { %v1090_v61 = vmax.f32 %v1086_v57, 0.0 }
 0x16d   : > { %1094 = vst [vmem:[%s1989_s19 + $0x18] sm:$0xff] %v1090_v61 }
 0x16e PF: > { %1101 = sbr.rel (!%p1811_p13) target bundleno = 374 (0x176), region = 150  ;;  %s1458_s1 = sshll.u32 (%p1811_p13), %s1667_s22, 3  ;;  %v1141_v62 = vld [vmem:[%s1989_s19] sm:$0xff] (%p1811_p13) }
 0x16f   : > { %s1106_s8 = scalar_lea.vmem (%p1811_p13), %s2101_s4, %s1458_s1  ;;  %v1145_v0 = vld [vmem:[%s1989_s19 + $0x10] sm:$0xff] (%p1811_p13) }
 0x170   : > { %v1143_v63 = vld [vmem:[%s1989_s19 + $0x8] sm:$0xff] (%p1811_p13)  ;;  %1142 = vst [vmem:[%s1106_s8] sm:$0xff] (%p1811_p13), %v1141_v62 }
 0x171   : > { %1144 = vst [vmem:[%s1106_s8 + $0x10] sm:$0xff] (%p1811_p13), %v1143_v63 }
 0x172   : > { %1146 = vst [vmem:[%s1106_s8 + $0x20] sm:$0xff] (%p1811_p13), %v1145_v0 }
 0x174   : > { %v1147_v1 = vld [vmem:[%s1989_s19 + $0x18] sm:$0xff] }
 0x175   : > { %1148 = vst [vmem:[%s1106_s8 + $0x30] sm:$0xff] %v1147_v1 }
 0x176 PF: > { %s14_s25 = sadd.s32 1, %s1679_s25   ;;  %s2114_s29 = sld [smem:[#allocation7_spill]] }
 0x177   : > { %p11_p7 = scmp.ge.s32.totalorder %s14_s25, 12   ;;  %s2115_s9 = sld [smem:[#allocation8_spill]] }
 0x178   : > { %s2116_s15 = smov %s1643_s16  ;;  %s2117_s16 = smov %s1803_s13 }
 0x179   : > { %s2118_s17 = smov %s1651_s18  ;;  %s2119_s18 = smov %s1800_s12 }
 0x17a   : > { %s2120_s19 = smov %s1659_s20  ;;  %s2121_s20 = smov %s1784_s7 }
 0x17b   : > { %s2122_s21 = smov %s1671_s23  ;;  %s2123_s22 = smov %s1675_s24 }
 0x17c   : > { %s2124_s23 = smov %s2114_s29  ;;  %13 = sbr.rel (!%p11_p7) target bundleno = 9 (0x9), region = 238 }
 0x17d   : > { %s2125_s24 = smov %s2115_s9 }

// kernel: improved_ffdnet_forward.41
= control target key start
LH: loop header
LB: loop body
LE: loop exit
PB: predicated region body
PF: predicated region fallthrough
CT: control target
= control target key end

     0   :  { %s1034_s12 = smov 0   ;;  %s1036_s13 = smov 0   ;;  %s1225_s0 = inlined_call_operand.vmem [shape: bf16[32,256], index: 0, kind: input, shape index: {}]   ;;  %s1226_s1 = inlined_call_operand.vmem [shape: bf16[256,512], index: 1, kind: input, shape index: {}]   ;;  %s1227_s2 = inlined_call_operand.vmem [shape: f32[1,512], index: 2, kind: input, shape index: {}]   ;;  %s1228_s3 = inlined_call_operand.vmem [shape: f32[32,512], index: 3, kind: output, shape index: {}]  }
   0x1   :  { %s1038_s14 = smov 0   ;;  %s1040_s15 = smov 0  }
   0x2   :  { %s1042_s16 = smov 0  }
   0x3 LB: > { %s28_s17 = sadd.s32 1, %s1008_s15  ;;  %s803_s18 = sadd.s32 4294967295, %s1012_s16   ;;  %s1012_s16 = sphi %s1042_s16, %s13_s16   ;;  %s1008_s15 = sphi %s1040_s15, %s1233_s15   ;;  %s1004_s14 = sphi %s1038_s14, %s1232_s14   ;;  %s1000_s13 = sphi %s1036_s13, %s1231_s13   ;;  %s996_s12 = sphi %s1034_s12, %s1230_s12  }
   0x4   : > { %p30_p0 = scmp.ge.s32.totalorder %s28_s17, 4  ;;  %p76_p1 = scmp.ne.s32.totalorder %s1000_s13, %s996_s12 }
   0x5   : > { %p77_p2 = scmp.eq.s32.totalorder %s1012_s16, 0  ;;  %p134_p4 = scmp.eq.s32.totalorder %s803_s18, 3 }
   0x6   : > { %s1235_s17 = smov (%p30_p0, %s28_s17), 0  ;;  %s69_s20 = sadd.s32 1, %s1000_s13 }
   0x7   : > { %p78_p3 = por %p77_p2, %p76_p1  ;;  %s65_s19 = ssub.s32 %s1008_s15, %s1235_s17 }
   0x8   : > { %p67_p5 = scmp.eq.s32.totalorder %s65_s19, 0  ;;  %p1069_p6 = por %p134_p4, %p76_p1 }
   0x9   : > { %p807_p7 = scmp.ge.s32.totalorder %s1012_s16, 4 }
   0xa   : > { %s1074_s22 = scalar_select %p67_p5, %s1000_s13, %s69_s20  }
   0xb   : > { %171 = sbr.rel (%p807_p7) target bundleno = 52 (0x34), region = 20 }
  0x10   : > { %174 = sbr.rel (!%p78_p3) target bundleno = 52 (0x34), region = 24  ;;  %s176_s23 = sand.u32 (%p78_p3), 1, %s1000_s13  }
  0x11   : > { %s809_s24 = sshll.u32 (%p78_p3), %s1008_s15, 2  ;;  %s808_s25 = sshll.u32 (%p78_p3), %s176_s23, 7 }
  0x12   : > { %s1082_s28 = scalar_lea.vmem (%p78_p3), %s1226_s1, %s809_s24  ;;  %s1086_s29 = scalar_lea.vmem (%p78_p3), [#allocation3], %s808_s25 }
  0x13   : > { %v200_v0 = vld [vmem:[%s1082_s28] sm:$0xf] (%p78_p3)  ;;  %v202_v1 = vld [vmem:[%s1082_s28 + $0x10] sm:$0xf] (%p78_p3) }
  0x14   : > { %201 = vst [vmem:[%s1086_s29] sm:$0xf] (%p78_p3), %v200_v0  ;;  %v204_v2 = vld [vmem:[%s1082_s28 + $0x20] sm:$0xf] (%p78_p3)  ;;  %v206_v3 = vld [vmem:[%s1082_s28 + $0x30] sm:$0xf] (%p78_p3) }
  0x15   : > { %203 = vst [vmem:[%s1086_s29 + $0x4] sm:$0xf] %v202_v1  ;;  %v208_v4 = vld [vmem:[%s1082_s28 + $0x40] sm:$0xf]  ;;  %v210_v5 = vld [vmem:[%s1082_s28 + $0x50] sm:$0xf] }
  0x16   : > { %205 = vst [vmem:[%s1086_s29 + $0x8] sm:$0xf] %v204_v2  ;;  %v212_v6 = vld [vmem:[%s1082_s28 + $0x60] sm:$0xf]  ;;  %v214_v7 = vld [vmem:[%s1082_s28 + $0x70] sm:$0xf] }
  0x17   : > { %207 = vst [vmem:[%s1086_s29 + $0xc] sm:$0xf] %v206_v3  ;;  %v216_v8 = vld [vmem:[%s1082_s28 + $0x80] sm:$0xf]  ;;  %v218_v9 = vld [vmem:[%s1082_s28 + $0x90] sm:$0xf] }
  0x18   : > { %209 = vst [vmem:[%s1086_s29 + $0x10] sm:$0xf] %v208_v4  ;;  %v220_v10 = vld [vmem:[%s1082_s28 + $0xa0] sm:$0xf]  ;;  %v222_v11 = vld [vmem:[%s1082_s28 + $0xb0] sm:$0xf] }
  0x19   : > { %211 = vst [vmem:[%s1086_s29 + $0x14] sm:$0xf] %v210_v5  ;;  %v224_v12 = vld [vmem:[%s1082_s28 + $0xc0] sm:$0xf]  ;;  %v226_v13 = vld [vmem:[%s1082_s28 + $0xd0] sm:$0xf] }
  0x1a   : > { %213 = vst [vmem:[%s1086_s29 + $0x18] sm:$0xf] %v212_v6  ;;  %v228_v14 = vld [vmem:[%s1082_s28 + $0xe0] sm:$0xf]  ;;  %v230_v15 = vld [vmem:[%s1082_s28 + $0xf0] sm:$0xf] }
  0x1b   : > { %215 = vst [vmem:[%s1086_s29 + $0x1c] sm:$0xf] %v214_v7  ;;  %v232_v16 = vld [vmem:[%s1082_s28 + $0x100] sm:$0xf]  ;;  %v234_v17 = vld [vmem:[%s1082_s28 + $0x110] sm:$0xf] }
  0x1c   : > { %217 = vst [vmem:[%s1086_s29 + $0x20] sm:$0xf] %v216_v8  ;;  %v236_v18 = vld [vmem:[%s1082_s28 + $0x120] sm:$0xf]  ;;  %v238_v19 = vld [vmem:[%s1082_s28 + $0x130] sm:$0xf] }
  0x1d   : > { %219 = vst [vmem:[%s1086_s29 + $0x24] sm:$0xf] %v218_v9  ;;  %v240_v20 = vld [vmem:[%s1082_s28 + $0x140] sm:$0xf]  ;;  %v242_v21 = vld [vmem:[%s1082_s28 + $0x150] sm:$0xf] }
  0x1e   : > { %221 = vst [vmem:[%s1086_s29 + $0x28] sm:$0xf] %v220_v10  ;;  %v244_v22 = vld [vmem:[%s1082_s28 + $0x160] sm:$0xf]  ;;  %v246_v23 = vld [vmem:[%s1082_s28 + $0x170] sm:$0xf] }
  0x1f   : > { %223 = vst [vmem:[%s1086_s29 + $0x2c] sm:$0xf] %v222_v11  ;;  %v248_v24 = vld [vmem:[%s1082_s28 + $0x180] sm:$0xf]  ;;  %v250_v25 = vld [vmem:[%s1082_s28 + $0x190] sm:$0xf] }
  0x20   : > { %225 = vst [vmem:[%s1086_s29 + $0x30] sm:$0xf] %v224_v12  ;;  %v252_v26 = vld [vmem:[%s1082_s28 + $0x1a0] sm:$0xf]  ;;  %v254_v27 = vld [vmem:[%s1082_s28 + $0x1b0] sm:$0xf] }
  0x21   : > { %227 = vst [vmem:[%s1086_s29 + $0x34] sm:$0xf] %v226_v13  ;;  %v256_v28 = vld [vmem:[%s1082_s28 + $0x1c0] sm:$0xf]  ;;  %v258_v29 = vld [vmem:[%s1082_s28 + $0x1d0] sm:$0xf] }
  0x22   : > { %229 = vst [vmem:[%s1086_s29 + $0x38] sm:$0xf] %v228_v14  ;;  %v260_v30 = vld [vmem:[%s1082_s28 + $0x1e0] sm:$0xf]  ;;  %v262_v31 = vld [vmem:[%s1082_s28 + $0x1f0] sm:$0xf] }
  0x23   : > { %231 = vst [vmem:[%s1086_s29 + $0x3c] sm:$0xf] %v230_v15 }
  0x24   : > { %233 = vst [vmem:[%s1086_s29 + $0x40] sm:$0xf] %v232_v16 }
  0x25   : > { %235 = vst [vmem:[%s1086_s29 + $0x44] sm:$0xf] %v234_v17 }
  0x26   : > { %237 = vst [vmem:[%s1086_s29 + $0x48] sm:$0xf] %v236_v18 }
  0x27   : > { %239 = vst [vmem:[%s1086_s29 + $0x4c] sm:$0xf] %v238_v19 }
  0x28   : > { %241 = vst [vmem:[%s1086_s29 + $0x50] sm:$0xf] %v240_v20 }
  0x29   : > { %243 = vst [vmem:[%s1086_s29 + $0x54] sm:$0xf] %v242_v21 }
  0x2a   : > { %245 = vst [vmem:[%s1086_s29 + $0x58] sm:$0xf] %v244_v22 }
  0x2b   : > { %247 = vst [vmem:[%s1086_s29 + $0x5c] sm:$0xf] %v246_v23 }
  0x2c   : > { %249 = vst [vmem:[%s1086_s29 + $0x60] sm:$0xf] %v248_v24 }
  0x2d   : > { %251 = vst [vmem:[%s1086_s29 + $0x64] sm:$0xf] %v250_v25 }
  0x2e   : > { %253 = vst [vmem:[%s1086_s29 + $0x68] sm:$0xf] %v252_v26 }
  0x2f   : > { %255 = vst [vmem:[%s1086_s29 + $0x6c] sm:$0xf] %v254_v27 }
  0x30   : > { %257 = vst [vmem:[%s1086_s29 + $0x70] sm:$0xf] %v256_v28 }
  0x31   : > { %259 = vst [vmem:[%s1086_s29 + $0x74] sm:$0xf] %v258_v29 }
  0x32   : > { %261 = vst [vmem:[%s1086_s29 + $0x78] sm:$0xf] %v260_v30 }
  0x33   : > { %263 = vst [vmem:[%s1086_s29 + $0x7c] sm:$0xf] %v262_v31 }
  0x34 PF: > { %p810_p8 = scmp.ge.s32.totalorder %s1012_s16, 1  ;;  %p356_p9 = scmp.lt.s32.totalorder %s1012_s16, 5 }
  0x36   : > { %p357_p10 = pnand %p810_p8, %p356_p9 }
  0x37   : > { %s363_s30 = sand.u32 (!%p357_p10), 1, %s996_s12   ;;  %p411_p11 = scmp.lt.s32.totalorder (!%p357_p10), %s1004_s14, 3 }
  0x38   : > { %360 = sbr.rel (%p357_p10) target bundleno = 247 (0xf7), region = 69  ;;  %s811_s4 = sshll.u32 (!%p357_p10), %s363_s30, 7 }
  0x39   : > { %s1155_s5 = scalar_lea.vmem (!%p357_p10), [#allocation3], %s811_s4  ;;  %s812_s8 = sshll.u32 (!%p357_p10), %s363_s30, 5 }
  0x3a   : > { %s397_s9 = scalar_lea.vmem (!%p357_p10), [#allocation4], %s812_s8 }
  0x3d   : > { %v908_v32 = vld [vmem:[%s1155_s5 + $0x38] sm:$0xff]  ;;  %v907_v34 = vld [vmem:[%s1155_s5 + $0x30] sm:$0xff]  ;;  %v906_v36 = vld [vmem:[%s1155_s5 + $0x28] sm:$0xff]  ;;  %s412_s4 = scalar_select %p411_p11, %s1004_s14, 3 }
  0x3e   : > { %v916_v33 = vld [vmem:[%s1155_s5 + $0x78] sm:$0xff]  ;;  %579 = vmatpush.bf16.msra.mxu0 %v908_v32  ;;  %917 = vmatpush.bf16.msra.mxu2 %v908_v32  ;;  %v915_v35 = vld [vmem:[%s1155_s5 + $0x70] sm:$0xff]  ;;  %v914_v37 = vld [vmem:[%s1155_s5 + $0x68] sm:$0xff]  ;;  %s894_s12 = sshll.u32 (%p1069_p6), %s1004_s14, 3 }
  0x3f   : > { %598 = vmatpush.bf16.msra.mxu1 %v916_v33  ;;  %925 = vmatpush.bf16.msra.mxu3 %v916_v33  ;;  %v905_v38 = vld [vmem:[%s1155_s5 + $0x20] sm:$0xff]  ;;  %v904_v40 = vld [vmem:[%s1155_s5 + $0x18] sm:$0xff]  ;;  %v903_v42 = vld [vmem:[%s1155_s5 + $0x10] sm:$0xff]  ;;  %s413_s7 = scalar_lea.vmem %s1227_s2, %s412_s4  ;;  %s655_s11 = scalar_lea.vmem (%p1069_p6), %s1228_s3, %s894_s12 }
  0x40   : > { %v913_v39 = vld [vmem:[%s1155_s5 + $0x60] sm:$0xff]  ;;  %v912_v41 = vld [vmem:[%s1155_s5 + $0x58] sm:$0xff]  ;;  %v911_v43 = vld [vmem:[%s1155_s5 + $0x50] sm:$0xff] }
  0x41   : > { %v902_v44 = vld [vmem:[%s1155_s5 + $0x8] sm:$0xff]  ;;  %v815_v46 = vld [vmem:[%s1225_s0] sm:$0xf]  ;;  %v823_v50 = vld [vmem:[%s1225_s0 + $0x10] sm:$0xf] }
  0x42   : > { %580 = vmatpush.bf16.msra.mxu0 %v907_v34  ;;  %918 = vmatpush.bf16.msra.mxu2 %v907_v34  ;;  %v910_v45 = vld [vmem:[%s1155_s5 + $0x48] sm:$0xff]  ;;  %v901_v47 = vld [vmem:[%s1155_s5] sm:$0xff]  ;;  %v900_v51 = vld [vmem:[%s1225_s0 + $0x14] sm:$0xf0] }
  0x43   : > { %599 = vmatpush.bf16.msra.mxu1 %v915_v35  ;;  %926 = vmatpush.bf16.msra.mxu3 %v915_v35  ;;  %v909_v48 = vld [vmem:[%s1155_s5 + $0x40] sm:$0xff]  ;;  %v898_v49 = vld [vmem:[%s1225_s0 + $0x4] sm:$0xf0]  ;;  %v817_v53 = vld [vmem:[%s1225_s0 + $0x8] sm:$0xf0]  ;;  %v824_v57 = vor.u32 %v900_v51, %v823_v50 }
  0x44   : > { %v897_v52 = vld [vmem:[%s1225_s0 + $0x4] sm:$0xf]  ;;  %v899_v54 = vld [vmem:[%s1225_s0 + $0x14] sm:$0xf]  ;;  %v825_v55 = vld [vmem:[%s1225_s0 + $0x18] sm:$0xf0]  ;;  %v816_v56 = vor.u32 %v898_v49, %v815_v46 }
  0x45   : > { %v820_v58 = vor.u32 %v897_v52, %v817_v53  ;;  %v828_v59 = vor.u32 %v899_v54, %v825_v55  ;;  %v973_v61 = vld [vmem:[%s413_s7] ss:$0 sm:$0xff] }
  0x46   : > { %581 = vmatpush.bf16.msra.mxu0 %v906_v36  ;;  %919 = vmatpush.bf16.msra.mxu2 %v906_v36 }
  0x47   : > { %600 = vmatpush.bf16.msra.mxu1 %v914_v37  ;;  %927 = vmatpush.bf16.msra.mxu3 %v914_v37 }
  0x4a   : > { %582 = vmatpush.bf16.msra.mxu0 %v905_v38  ;;  %920 = vmatpush.bf16.msra.mxu2 %v905_v38 }
  0x4b   : > { %601 = vmatpush.bf16.msra.mxu1 %v913_v39  ;;  %928 = vmatpush.bf16.msra.mxu3 %v913_v39 }
  0x4e   : > { %583 = vmatpush.bf16.msra.mxu0 %v904_v40  ;;  %921 = vmatpush.bf16.msra.mxu2 %v904_v40 }
  0x4f   : > { %602 = vmatpush.bf16.msra.mxu1 %v912_v41  ;;  %929 = vmatpush.bf16.msra.mxu3 %v912_v41 }
  0x52   : > { %584 = vmatpush.bf16.msra.mxu0 %v903_v42  ;;  %922 = vmatpush.bf16.msra.mxu2 %v903_v42 }
  0x53   : > { %603 = vmatpush.bf16.msra.mxu1 %v911_v43  ;;  %930 = vmatpush.bf16.msra.mxu3 %v911_v43 }
  0x56   : > { %585 = vmatpush.bf16.msra.mxu0 %v902_v44  ;;  %923 = vmatpush.bf16.msra.mxu2 %v902_v44 }
  0x57   : > { %604 = vmatpush.bf16.msra.mxu1 %v910_v45  ;;  %931 = vmatpush.bf16.msra.mxu3 %v910_v45 }
  0x5a   : > { %586 = vmatpush.bf16.msra.mxu0 %v901_v47  ;;  %924 = vmatpush.bf16.msra.mxu2 %v901_v47 }
  0x5b   : > { %605 = vmatpush.bf16.msra.mxu1 %v909_v48  ;;  %932 = vmatpush.bf16.msra.mxu3 %v909_v48 }
  0x5d   : > { %587 = vmatmul.bf16.vlgmr.msra.gmra.mxu0 %v816_v56  ;;  %592 = vmatmul.bf16.vlgmr.msra.gmra.mxu2 %v824_v57 }
  0x5e   : > { %606 = vmatmul.bf16.vlgmr.msra.gmra.mxu1 %v820_v58  ;;  %611 = vmatmul.bf16.vlgmr.msra.gmra.mxu3 %v828_v59 }
  0xda   : > { %v588_v60 = vpop.f32.mrf.mxu0 }
  0xdb   : > { %v607_v62 = vpop.f32.mrf.mxu1 }
  0xdc   : > { %v608_v63 = vadd.f32 %v607_v62, %v588_v60 }
  0xde   : > { %v636_v0 = vadd.f32 %v973_v61, %v608_v63 }
  0xe0   : > { %640 = vst [vmem:[%s397_s9] sm:$0xff] %v636_v0  ;;  %v593_v1 = vpop.f32.mrf.mxu2 }
  0xe1   : > { %v612_v2 = vpop.f32.mrf.mxu3 }
  0xe2   : > { %v613_v3 = vadd.f32 %v612_v2, %v593_v1  ;;  %v590_v4 = vpop.f32.mrf.mxu0 }
  0xe3   : > { %v609_v5 = vpop.f32.mrf.mxu1 }
  0xe4   : > { %v638_v6 = vadd.f32 %v973_v61, %v613_v3  ;;  %v610_v7 = vadd.f32 %v609_v5, %v590_v4 }
  0xe6   : > { %642 = vst [vmem:[%s397_s9 + $0x10] sm:$0xff] %v638_v6  ;;  %v637_v8 = vadd.f32 %v973_v61, %v610_v7 }
  0xe7   : > { %v690_v13 = vld [vmem:[%s397_s9] sm:$0xff] (%p1069_p6) }
  0xe8   : > { %641 = vst [vmem:[%s397_s9 + $0x8] sm:$0xff] %v637_v8  ;;  %v595_v9 = vpop.f32.mrf.mxu2 }
  0xe9   : > { %v614_v10 = vpop.f32.mrf.mxu3  ;;  %691 = vst [vmem:[%s655_s11] sm:$0xff] (%p1069_p6), %v690_v13 }
  0xea   : > { %v615_v11 = vadd.f32 %v614_v10, %v595_v9  ;;  %650 = sbr.rel (!%p1069_p6) target bundleno = 247 (0xf7), region = 85 }
  0xec   : > { %v639_v12 = vadd.f32 %v973_v61, %v615_v11 }
  0xed   : > { %v694_v15 = vld [vmem:[%s397_s9 + $0x10] sm:$0xff] (%p1069_p6) }
  0xee   : > { %643 = vst [vmem:[%s397_s9 + $0x18] sm:$0xff] %v639_v12 }
  0xef   : > { %v692_v14 = vld [vmem:[%s397_s9 + $0x8] sm:$0xff]  ;;  %695 = vst [vmem:[%s655_s11 + $0x40] sm:$0xff] %v694_v15 }
  0xf0   : > { %693 = vst [vmem:[%s655_s11 + $0x20] sm:$0xff] %v692_v14 }
  0xf5   : > { %v696_v16 = vld [vmem:[%s397_s9 + $0x18] sm:$0xff] }
  0xf6   : > { %697 = vst [vmem:[%s655_s11 + $0x60] sm:$0xff] %v696_v16 }
  0xf7 PF: > { %s13_s16 = sadd.s32 1, %s1012_s16   ;;  %s1230_s12 = smov %s1000_s13 }
  0xf8   : > { %p10_p12 = scmp.ge.s32.totalorder %s13_s16, 6   ;;  %s1231_s13 = smov %s1074_s22 }
  0xf9   : > { %s1232_s14 = smov %s1008_s15  ;;  %s1233_s15 = smov %s1235_s17 }
  0xfa   :  { %12 = sbr.rel (!%p10_p12) target bundleno = 3 (0x3), region = 160 }

// kernel: improved_ffdnet_forward.42
= control target key start
LH: loop header
LB: loop body
LE: loop exit
PB: predicated region body
PF: predicated region fallthrough
CT: control target
= control target key end

     0   :  { %s378_s9 = smov 0   ;;  %s418_s0 = inlined_call_operand.vmem [shape: f32[2,16,512], index: 0, kind: input, shape index: {}]   ;;  %s419_s1 = inlined_call_operand.vmem [shape: f32[2,16,256], index: 1, kind: input, shape index: {}]   ;;  %s420_s2 = inlined_call_operand.vmem [shape: f32[2,16,256], index: 2, kind: output, shape index: {}]  }
   0x1 LB: > { %s321_s10 = sadd.s32 4294967295, %s361_s9   ;;  %p325_p0 = scmp.ge.s32.totalorder %s361_s9, 1  ;;  %s361_s9 = sphi %s378_s9, %s12_s9  }
   0x2   : > { %p122_p1 = scmp.lt.s32.totalorder %s361_s9, 3 }
   0x4   : > { %p123_p2 = pnand %p325_p0, %p122_p1 }
   0x5   : > { %p149_p3 = scmp.lt.s32.totalorder (!%p123_p2), %s321_s10, 1 }
   0x6   : > { %126 = sbr.rel (%p123_p2) target bundleno = 558 (0x22e), region = 28 }
   0xb   : > { %s422_s10 = smov (!%p149_p3, %s321_s10), 1  ;;  %vm195_vm0 = vcmask 130048  }
   0xc   : > { %s336_s11 = sshll.u32 %s422_s10, 6  ;;  %s337_s15 = sshll.u32 %s422_s10, 5 }
   0xd   : > { %s392_s14 = scalar_lea.vmem %s418_s0, %s336_s11  ;;  %s158_s18 = scalar_lea.vmem %s419_s1, %s337_s15 }
   0xe   : > { %v166_v0 = vld [vmem:[%s392_s14 + $0x8] sm:$0xff]  ;;  %v165_v3 = vld [vmem:[%s392_s14] sm:$0xff]  ;;  %v167_v20 = vld [vmem:[%s392_s14 + $0x10] sm:$0xff]  ;;  %s163_s21 = scalar_lea.vmem %s420_s2, %s337_s15 }
   0xf   : > { %v170_v1 = vld [vmem:[%s392_s14 + $0x28] sm:$0xff]  ;;  %v169_v4 = vld [vmem:[%s392_s14 + $0x20] sm:$0xff]  ;;  %v171_v21 = vld [vmem:[%s392_s14 + $0x30] sm:$0xff] }
  0x10   : > { %v174_v2 = vpack.c.bf16 %v170_v1, %v166_v0  ;;  %v173_v5 = vpack.c.bf16 %v169_v4, %v165_v3  ;;  %v168_v22 = vld [vmem:[%s392_s14 + $0x18] sm:$0xff]  ;;  %v175_v23 = vpack.c.bf16 %v171_v21, %v167_v20  ;;  %v177_v33 = vld [vmem:[%s158_s18] sm:$0xff]  ;;  %v178_v36 = vld [vmem:[%s158_s18 + $0x8] sm:$0xff] }
  0x11   : > { %v172_v24 = vld [vmem:[%s392_s14 + $0x38] sm:$0xff]  ;;  %v179_v38 = vld [vmem:[%s158_s18 + $0x10] sm:$0xff] }
  0x12   : > { %188 = vmatpush.bf16.xpose.msra.mxu0 %v174_v2  ;;  %v176_v25 = vpack.c.bf16 %v172_v24, %v168_v22  ;;  %229 = vmatpush.bf16.msra.mxu1 %v175_v23  ;;  %v180_v42 = vld [vmem:[%s158_s18 + $0x18] sm:$0xff] }
  0x14   : > { %243 = vmatpush.bf16.msra.mxu2 %v176_v25 }
  0x19   : > { %189 = vmatmul.bf16.vlgmr.msra.gmra.mxu0 %v173_v5 }
  0x96   : > { %v190_v6 = vpop.f32.mrf.mxu0 }
  0x97   : > { %v196_v7 = vsel %vm195_vm0, %v190_v6, -inf }
  0x98   : > { %197 = vmax.xlane.f32.xlu0 %v196_v7 }
  0x9e   : > { %v192_v8 = vpop.f32.mrf.mxu0 }
  0x9f   : > { %v199_v9 = vsel %vm195_vm0, %v192_v8, -inf }
  0xa0   : > { %200 = vmax.xlane.f32.xlu0 %v199_v9 }
 0x10b   : > { %v198_v10 = vpop.xlane.xlu0 %197 }
 0x10c   : > { %v202_v11 = vsub.f32 %v190_v6, %v198_v10 }
 0x10e   : > { %v204_v12 = vmul.f32 1.442695, %v202_v11 }
 0x110   : > { %347 = vpow2.f32 %v204_v12 }
 0x113   : > { %v201_v13 = vpop.xlane.xlu0 %200 }
 0x114   : > { %v203_v14 = vsub.f32 %v192_v8, %v201_v13 }
 0x116   : > { %v348_v15 = vpop.eup %347  ;;  %v206_v16 = vmul.f32 1.442695, %v203_v14 }
 0x117   : > { %v208_v17 = vsel %vm195_vm0, %v348_v15, 0.0 }
 0x118   : > { %349 = vpow2.f32 %v206_v16  ;;  %209 = vadd.xlane.f32.xlu1 %v208_v17 }
 0x11e   : > { %v350_v18 = vpop.eup %349 }
 0x11f   : > { %v211_v19 = vsel %vm195_vm0, %v350_v18, 0.0 }
 0x120   : > { %212 = vadd.xlane.f32.xlu1 %v211_v19 }
 0x18b   : > { %v210_v26 = vpop.xlane.xlu1 %209 }
 0x18c   : > { %351 = vrcp.f32 %v210_v26 }
 0x192   : > { %v352_v28 = vpop.eup %351 }
 0x193   : > { %v213_v27 = vpop.xlane.xlu1 %212  ;;  %v216_v30 = vmul.f32 %v352_v28, %v348_v15 }
 0x194   : > { %353 = vrcp.f32 %v213_v27 }
 0x19a   : > { %v354_v29 = vpop.eup %353 }
 0x19b   : > { %v217_v31 = vmul.f32 %v354_v29, %v350_v18 }
 0x19d   : > { %v218_v32 = vpack.c.bf16 %v217_v31, %v216_v30 }
 0x19f   : > { %332 = vmatmul.msk.bf16.vlgmr.msra.gmra.mxu1 %vm195_vm0, %v218_v32  ;;  %333 = vmatmul.msk.bf16.vlgmr.msra.gmra.mxu2 %vm195_vm0, %v218_v32 }
 0x21c   : > { %v231_v34 = vpop.f32.mrf.mxu1 }
 0x21d   : > { %v232_v35 = vadd.f32 %v231_v34, %v177_v33 }
 0x21f   : > { %250 = vst [vmem:[%s163_s21] sm:$0xff] %v232_v35 }
 0x222   : > { %v245_v37 = vpop.f32.mrf.mxu2 }
 0x223   : > { %v246_v39 = vadd.f32 %v245_v37, %v178_v36 }
 0x224   : > { %v233_v40 = vpop.f32.mrf.mxu1 }
 0x225   : > { %251 = vst [vmem:[%s163_s21 + $0x8] sm:$0xff] %v246_v39  ;;  %v234_v41 = vadd.f32 %v233_v40, %v179_v38 }
 0x227   : > { %252 = vst [vmem:[%s163_s21 + $0x10] sm:$0xff] %v234_v41 }
 0x22a   : > { %v247_v43 = vpop.f32.mrf.mxu2 }
 0x22b   : > { %v248_v44 = vadd.f32 %v247_v43, %v180_v42 }
 0x22d   : > { %253 = vst [vmem:[%s163_s21 + $0x18] sm:$0xff] %v248_v44 }
 0x22e PF: > { %s12_s9 = sadd.s32 1, %s361_s9  }
 0x22f   : > { %p9_p4 = scmp.ge.s32.totalorder %s12_s9, 4  }
 0x231   :  { %11 = sbr.rel (!%p9_p4) target bundleno = 1 (0x1), region = 61 }

// kernel: improved_ffdnet_forward.43
= control target key start
LH: loop header
LB: loop body
LE: loop exit
PB: predicated region body
PF: predicated region fallthrough
CT: control target
= control target key end

     0   :  { %s1143_s12 = smov 0   ;;  %s1145_s13 = smov 0   ;;  %s1277_s0 = inlined_call_operand.vmem [shape: bf16[32,1024], index: 0, kind: input, shape index: {}]   ;;  %s1278_s1 = inlined_call_operand.vmem [shape: bf16[1024,128], index: 1, kind: input, shape index: {}]   ;;  %s1279_s2 = inlined_call_operand.vmem [shape: f32[1,128], index: 2, kind: input, shape index: {}]   ;;  %s1280_s3 = inlined_call_operand.vmem [shape: f32[32,128], index: 3, kind: output, shape index: {}]  }
   0x1   :  { %s1147_s14 = smov 0   ;;  %s1149_s15 = smov 0  }
   0x2   :  { %s1151_s16 = smov 0  }
   0x3 LB: > { %s25_s17 = sadd.s32 1, %s1116_s15  ;;  %p48_p1 = scmp.ne.s32.totalorder %s1108_s13, %s1104_s12  ;;  %s1120_s16 = sphi %s1151_s16, %s13_s16   ;;  %s1116_s15 = sphi %s1149_s15, %s1284_s15   ;;  %s1112_s14 = sphi %s1147_s14, %s1283_s14   ;;  %s1108_s13 = sphi %s1145_s13, %s1282_s13   ;;  %s1104_s12 = sphi %s1143_s12, %s1281_s12  }
   0x4   : > { %p26_p0 = scmp.ge.s32.totalorder %s25_s17, 2  ;;  %p49_p2 = scmp.eq.s32.totalorder %s1120_s16, 0 }
   0x5   : > { %s41_s19 = sadd.s32 1, %s1108_s13  ;;  %p825_p5 = scmp.ge.s32.totalorder %s1120_s16, 2 }
   0x6   : > { %s1286_s17 = smov (%p26_p0, %s25_s17), 0  ;;  %p50_p3 = por %p49_p2, %p48_p1 }
   0x7   : > { %s37_s18 = ssub.s32 %s1116_s15, %s1286_s17  ;;  %162 = sbr.rel (%p825_p5) target bundleno = 24 (0x18), region = 20 }
   0x8   : > { %p39_p4 = scmp.eq.s32.totalorder %s37_s18, 0 }
   0xa   : > { %s1178_s20 = scalar_select %p39_p4, %s1108_s13, %s41_s19  }
   0xc   : > { %165 = sbr.rel (!%p50_p3) target bundleno = 24 (0x18), region = 24  ;;  %s167_s21 = sand.u32 (%p50_p3), 1, %s1108_s13  }
   0xd   : > { %s999_s22 = sshll.u32 (%p50_p3), %s1116_s15, 4  ;;  %s826_s23 = sshll.u32 (%p50_p3), %s167_s21, 6 }
   0xe   : > { %s175_s26 = scalar_lea.vmem (%p50_p3), %s1277_s0, %s999_s22  ;;  %s169_s27 = scalar_lea.vmem (%p50_p3), [#allocation3], %s826_s23 }
   0xf   : > { %v188_v0 = vld [vmem:[%s175_s26] sm:$0xff] (%p50_p3)  ;;  %v190_v1 = vld [vmem:[%s175_s26 + $0x8] sm:$0xff] (%p50_p3) }
  0x10   : > { %v192_v2 = vld [vmem:[%s175_s26 + $0x20] sm:$0xff] (%p50_p3)  ;;  %189 = vst [vmem:[%s169_s27] sm:$0xff] (%p50_p3), %v188_v0  ;;  %v194_v3 = vld [vmem:[%s175_s26 + $0x28] sm:$0xff] (%p50_p3) }
  0x11   : > { %191 = vst [vmem:[%s169_s27 + $0x8] sm:$0xff] %v190_v1  ;;  %v196_v4 = vld [vmem:[%s175_s26 + $0x40] sm:$0xff]  ;;  %v198_v5 = vld [vmem:[%s175_s26 + $0x48] sm:$0xff] }
  0x12   : > { %193 = vst [vmem:[%s169_s27 + $0x10] sm:$0xff] %v192_v2  ;;  %v200_v6 = vld [vmem:[%s175_s26 + $0x60] sm:$0xff]  ;;  %v202_v7 = vld [vmem:[%s175_s26 + $0x68] sm:$0xff] }
  0x13   : > { %195 = vst [vmem:[%s169_s27 + $0x18] sm:$0xff] %v194_v3 }
  0x14   : > { %197 = vst [vmem:[%s169_s27 + $0x20] sm:$0xff] %v196_v4 }
  0x15   : > { %199 = vst [vmem:[%s169_s27 + $0x28] sm:$0xff] %v198_v5 }
  0x16   : > { %201 = vst [vmem:[%s169_s27 + $0x30] sm:$0xff] %v200_v6 }
  0x17   : > { %203 = vst [vmem:[%s169_s27 + $0x38] sm:$0xff] %v202_v7 }
  0x18 PF: > { %p829_p6 = scmp.ge.s32.totalorder %s1120_s16, 1  ;;  %p220_p7 = scmp.lt.s32.totalorder %s1120_s16, 3 }
  0x1a   : > { %p221_p8 = pnand %p829_p6, %p220_p7 }
  0x1b   : > { %s227_s28 = sand.u32 (!%p221_p8), 1, %s1104_s12   ;;  %s831_s29 = sshll.u32 (!%p221_p8), %s1112_s14, 6 }
  0x1c   : > { %224 = sbr.rel (%p221_p8) target bundleno = 252 (0xfc), region = 51  ;;  %s830_s30 = sshll.u32 (!%p221_p8), %s227_s28, 6 }
  0x1d   : > { %p267_p9 = scmp.lt.s32.totalorder (!%p221_p8), %s831_s29, 127  ;;  %s1195_s8 = scalar_lea.vmem (!%p221_p8), [#allocation3], %s830_s30 }
  0x1e   : > { %p833_p10 = scmp.ne.s32.totalorder (!%p221_p8), %s1112_s14, 0 }
  0x21   : > { %s1288_s29 = smov (!%p267_p9, %s831_s29), 127  ;;  %290 = sbr.rel (%p833_p10) target bundleno = 43 (0x2b), region = 59 }
  0x22   : > { %s832_s4 = sshll.u32 %s1288_s29, 2 }
  0x23   : > { %s1193_s7 = scalar_lea.vmem %s1278_s1, %s832_s4 }
  0x26   : > { %v1122_v8 = vmov 0.0  }
  0x27   : > { %291 = vst [vmem:[#allocation2 + $0x10] sm:$0xff] %v1122_v8 }
  0x28   : > { %292 = vst [vmem:[#allocation2] sm:$0xff] %v1122_v8 }
  0x29   : > { %293 = vst [vmem:[#allocation2 + $0x18] sm:$0xff] %v1122_v8 }
  0x2a   : > { %294 = vst [vmem:[#allocation2 + $0x8] sm:$0xff] %v1122_v8 }
  0x2b PF: > { %v1015_v9 = vld [vmem:[%s1193_s7 + $0x38] sm:$0xff]  ;;  %v1014_v13 = vld [vmem:[%s1193_s7 + $0x30] sm:$0xff]  ;;  %v1013_v17 = vld [vmem:[%s1193_s7 + $0x28] sm:$0xff]  ;;  %p994_p11 = scmp.ne.s32.totalorder %s1112_s14, 1 }
  0x2c   : > { %v1023_v10 = vld [vmem:[%s1193_s7 + $0x78] sm:$0xff]  ;;  %603 = vmatpush.bf16.msra.mxu0 %v1015_v9  ;;  %v1022_v14 = vld [vmem:[%s1193_s7 + $0x70] sm:$0xff]  ;;  %v1021_v18 = vld [vmem:[%s1193_s7 + $0x68] sm:$0xff] }
  0x2d   : > { %v1031_v11 = vld [vmem:[%s1193_s7 + $0xb8] sm:$0xff]  ;;  %622 = vmatpush.bf16.msra.mxu1 %v1023_v10  ;;  %v1030_v15 = vld [vmem:[%s1193_s7 + $0xb0] sm:$0xff]  ;;  %v1029_v19 = vld [vmem:[%s1193_s7 + $0xa8] sm:$0xff] }
  0x2e   : > { %v1039_v12 = vld [vmem:[%s1193_s7 + $0xf8] sm:$0xff]  ;;  %641 = vmatpush.bf16.msra.mxu2 %v1031_v11  ;;  %v1038_v16 = vld [vmem:[%s1193_s7 + $0xf0] sm:$0xff]  ;;  %v1037_v20 = vld [vmem:[%s1193_s7 + $0xe8] sm:$0xff] }
  0x2f   : > { %660 = vmatpush.bf16.msra.mxu3 %v1039_v12  ;;  %v1012_v21 = vld [vmem:[%s1193_s7 + $0x20] sm:$0xff]  ;;  %v1011_v25 = vld [vmem:[%s1193_s7 + $0x18] sm:$0xff]  ;;  %v1010_v29 = vld [vmem:[%s1193_s7 + $0x10] sm:$0xff] }
  0x30   : > { %604 = vmatpush.bf16.msra.mxu0 %v1014_v13  ;;  %v1020_v22 = vld [vmem:[%s1193_s7 + $0x60] sm:$0xff]  ;;  %v1019_v26 = vld [vmem:[%s1193_s7 + $0x58] sm:$0xff]  ;;  %v1018_v30 = vld [vmem:[%s1193_s7 + $0x50] sm:$0xff] }
  0x31   : > { %623 = vmatpush.bf16.msra.mxu1 %v1022_v14  ;;  %v1028_v23 = vld [vmem:[%s1193_s7 + $0xa0] sm:$0xff]  ;;  %v1027_v27 = vld [vmem:[%s1193_s7 + $0x98] sm:$0xff]  ;;  %v1026_v31 = vld [vmem:[%s1193_s7 + $0x90] sm:$0xff] }
  0x32   : > { %642 = vmatpush.bf16.msra.mxu2 %v1030_v15  ;;  %v1036_v24 = vld [vmem:[%s1193_s7 + $0xe0] sm:$0xff]  ;;  %v1035_v28 = vld [vmem:[%s1193_s7 + $0xd8] sm:$0xff]  ;;  %v1034_v32 = vld [vmem:[%s1193_s7 + $0xd0] sm:$0xff] }
  0x33   : > { %661 = vmatpush.bf16.msra.mxu3 %v1038_v16  ;;  %v1009_v33 = vld [vmem:[%s1193_s7 + $0x8] sm:$0xff]  ;;  %v1008_v37 = vld [vmem:[%s1193_s7] sm:$0xff]  ;;  %v1002_v42 = vld [vmem:[%s1195_s8 + $0xc] sm:$0xf0] }
  0x34   : > { %605 = vmatpush.bf16.msra.mxu0 %v1013_v17  ;;  %v1017_v34 = vld [vmem:[%s1193_s7 + $0x48] sm:$0xff]  ;;  %v1016_v38 = vld [vmem:[%s1193_s7 + $0x40] sm:$0xff]  ;;  %v838_v44 = vld [vmem:[%s1195_s8 + $0x10] sm:$0xf0] }
  0x35   : > { %624 = vmatpush.bf16.msra.mxu1 %v1021_v18  ;;  %v1025_v35 = vld [vmem:[%s1193_s7 + $0x88] sm:$0xff]  ;;  %v1024_v39 = vld [vmem:[%s1193_s7 + $0x80] sm:$0xff]  ;;  %v1003_v46 = vld [vmem:[%s1195_s8 + $0x14] sm:$0xf0] }
  0x36   : > { %643 = vmatpush.bf16.msra.mxu2 %v1029_v19  ;;  %v1033_v36 = vld [vmem:[%s1193_s7 + $0xc8] sm:$0xff]  ;;  %v1032_v40 = vld [vmem:[%s1193_s7 + $0xc0] sm:$0xff]  ;;  %v846_v48 = vld [vmem:[%s1195_s8 + $0x18] sm:$0xf0] }
  0x37   : > { %662 = vmatpush.bf16.msra.mxu3 %v1037_v20  ;;  %v836_v41 = vld [vmem:[%s1195_s8] sm:$0xf]  ;;  %v1000_v43 = vld [vmem:[%s1195_s8 + $0x4] sm:$0xf]  ;;  %v844_v45 = vld [vmem:[%s1195_s8 + $0x8] sm:$0xf] }
  0x38   : > { %606 = vmatpush.bf16.msra.mxu0 %v1012_v21  ;;  %v1001_v47 = vld [vmem:[%s1195_s8 + $0xc] sm:$0xf]  ;;  %v837_v49 = vor.u32 %v1002_v42, %v836_v41  ;;  %v841_v50 = vor.u32 %v1000_v43, %v838_v44  ;;  %v845_v51 = vor.u32 %v1003_v46, %v844_v45  ;;  %v852_v53 = vld [vmem:[%s1195_s8 + $0x20] sm:$0xf]  ;;  %v1006_v54 = vld [vmem:[%s1195_s8 + $0x2c] sm:$0xf0] }
  0x39   : > { %625 = vmatpush.bf16.msra.mxu1 %v1020_v22  ;;  %v849_v52 = vor.u32 %v1001_v47, %v846_v48  ;;  %v1004_v55 = vld [vmem:[%s1195_s8 + $0x24] sm:$0xf]  ;;  %v854_v56 = vld [vmem:[%s1195_s8 + $0x30] sm:$0xf0]  ;;  %v860_v57 = vld [vmem:[%s1195_s8 + $0x28] sm:$0xf]  ;;  %v853_v61 = vor.u32 %v1006_v54, %v852_v53 }
  0x3a   : > { %644 = vmatpush.bf16.msra.mxu2 %v1028_v23  ;;  %v1007_v58 = vld [vmem:[%s1195_s8 + $0x34] sm:$0xf0]  ;;  %v1005_v59 = vld [vmem:[%s1195_s8 + $0x2c] sm:$0xf]  ;;  %v862_v60 = vld [vmem:[%s1195_s8 + $0x38] sm:$0xf0]  ;;  %v857_v62 = vor.u32 %v1004_v55, %v854_v56 }
  0x3b   : > { %663 = vmatpush.bf16.msra.mxu3 %v1036_v24  ;;  %v861_v63 = vor.u32 %v1007_v58, %v860_v57  ;;  %v865_v0 = vor.u32 %v1005_v59, %v862_v60  ;;  %v295_v9 = vld [vmem:[#allocation2 + $0x10] sm:$0xff]  ;;  %v296_v16 = vld [vmem:[#allocation2] sm:$0xff] }
  0x3c   : > { %607 = vmatpush.bf16.msra.mxu0 %v1011_v25  ;;  %v297_v25 = vld [vmem:[#allocation2 + $0x18] sm:$0xff] }
  0x3d   : > { %626 = vmatpush.bf16.msra.mxu1 %v1019_v26 }
  0x3e   : > { %645 = vmatpush.bf16.msra.mxu2 %v1027_v27 }
  0x3f   : > { %664 = vmatpush.bf16.msra.mxu3 %v1035_v28 }
  0x40   : > { %608 = vmatpush.bf16.msra.mxu0 %v1010_v29 }
  0x41   : > { %627 = vmatpush.bf16.msra.mxu1 %v1018_v30 }
  0x42   : > { %646 = vmatpush.bf16.msra.mxu2 %v1026_v31 }
  0x43   : > { %665 = vmatpush.bf16.msra.mxu3 %v1034_v32 }
  0x44   : > { %609 = vmatpush.bf16.msra.mxu0 %v1009_v33  ;;  %v298_v33 = vld [vmem:[#allocation2 + $0x8] sm:$0xff] }
  0x45   : > { %628 = vmatpush.bf16.msra.mxu1 %v1017_v34 }
  0x46   : > { %647 = vmatpush.bf16.msra.mxu2 %v1025_v35 }
  0x47   : > { %666 = vmatpush.bf16.msra.mxu3 %v1033_v36 }
  0x48   : > { %610 = vmatpush.bf16.msra.mxu0 %v1008_v37 }
  0x49   : > { %629 = vmatpush.bf16.msra.mxu1 %v1016_v38 }
  0x4a   : > { %648 = vmatpush.bf16.msra.mxu2 %v1024_v39 }
  0x4b   : > { %667 = vmatpush.bf16.msra.mxu3 %v1032_v40  ;;  %611 = vmatmul.bf16.vlgmr.msra.gmra.mxu0 %v837_v49 }
  0x4c   : > { %630 = vmatmul.bf16.vlgmr.msra.gmra.mxu1 %v841_v50 }
  0x4d   : > { %649 = vmatmul.bf16.vlgmr.msra.gmra.mxu2 %v845_v51 }
  0x4e   : > { %668 = vmatmul.bf16.vlgmr.msra.gmra.mxu3 %v849_v52 }
  0x5b   : > { %616 = vmatmul.bf16.gmra.mxu0 %v853_v61 }
  0x5c   : > { %635 = vmatmul.bf16.gmra.mxu1 %v857_v62 }
  0x5d   : > { %654 = vmatmul.bf16.gmra.mxu2 %v861_v63 }
  0x5e   : > { %673 = vmatmul.bf16.gmra.mxu3 %v865_v0 }
  0xc8   : > { %v612_v1 = vpop.f32.mrf.mxu0 }
  0xc9   : > { %v631_v2 = vpop.f32.mrf.mxu1 }
  0xca   : > { %v632_v3 = vadd.f32 %v631_v2, %v612_v1 }
  0xd0   : > { %v650_v4 = vpop.f32.mrf.mxu2  ;;  %v614_v7 = vpop.f32.mrf.mxu0 }
  0xd1   : > { %v669_v5 = vpop.f32.mrf.mxu3  ;;  %v651_v6 = vadd.f32 %v650_v4, %v632_v3  ;;  %v633_v8 = vpop.f32.mrf.mxu1 }
  0xd2   : > { %v634_v12 = vadd.f32 %v633_v8, %v614_v7 }
  0xd3   : > { %v670_v10 = vadd.f32 %v669_v5, %v651_v6 }
  0xd5   : > { %v679_v11 = vadd.f32 %v670_v10, %v295_v9 }
  0xd7   : > { %683 = vst [vmem:[#allocation2 + $0x10] sm:$0xff] %v679_v11 }
  0xd8   : > { %v652_v13 = vpop.f32.mrf.mxu2  ;;  %v617_v17 = vpop.f32.mrf.mxu0 }
  0xd9   : > { %v671_v14 = vpop.f32.mrf.mxu3  ;;  %v653_v15 = vadd.f32 %v652_v13, %v634_v12  ;;  %v636_v18 = vpop.f32.mrf.mxu1 }
  0xda   : > { %v637_v21 = vadd.f32 %v636_v18, %v617_v17 }
  0xdb   : > { %v672_v19 = vadd.f32 %v671_v14, %v653_v15 }
  0xdd   : > { %v680_v20 = vadd.f32 %v672_v19, %v296_v16 }
  0xdf   : > { %684 = vst [vmem:[#allocation2] sm:$0xff] %v680_v20 }
  0xe0   : > { %v655_v22 = vpop.f32.mrf.mxu2  ;;  %v619_v27 = vpop.f32.mrf.mxu0 }
  0xe1   : > { %v674_v23 = vpop.f32.mrf.mxu3  ;;  %v656_v24 = vadd.f32 %v655_v22, %v637_v21  ;;  %v638_v28 = vpop.f32.mrf.mxu1 }
  0xe2   : > { %v639_v30 = vadd.f32 %v638_v28, %v619_v27 }
  0xe3   : > { %v675_v26 = vadd.f32 %v674_v23, %v656_v24 }
  0xe5   : > { %v681_v29 = vadd.f32 %v675_v26, %v297_v25 }
  0xe7   : > { %685 = vst [vmem:[#allocation2 + $0x18] sm:$0xff] %v681_v29 }
  0xe8   : > { %v657_v31 = vpop.f32.mrf.mxu2 }
  0xe9   : > { %v658_v32 = vadd.f32 %v657_v31, %v639_v30  ;;  %v676_v34 = vpop.f32.mrf.mxu3 }
  0xeb   : > { %v677_v35 = vadd.f32 %v676_v34, %v658_v32  ;;  %690 = sbr.rel (%p994_p11) target bundleno = 252 (0xfc), region = 63 }
  0xed   : > { %v682_v36 = vadd.f32 %v677_v35, %v298_v33 }
  0xef   : > { %686 = vst [vmem:[#allocation2 + $0x8] sm:$0xff] %v682_v36 }
  0xf0   : > { %v691_v37 = vld [vmem:[#allocation2 + $0x10] sm:$0xff]  ;;  %v1081_v38 = vld [vmem:[%s1279_s2] ss:$0 sm:$0xff]  ;;  %v693_v40 = vld [vmem:[#allocation2 + $0x18] sm:$0xff] }
  0xf1   : > { %v692_v39 = vld [vmem:[#allocation2] sm:$0xff]  ;;  %v699_v42 = vadd.f32 %v1081_v38, %v691_v37  ;;  %v701_v44 = vadd.f32 %v1081_v38, %v693_v40 }
  0xf2   : > { %v700_v43 = vadd.f32 %v1081_v38, %v692_v39 }
  0xf3   : > { %v703_v46 = vmax.f32 %v699_v42, 0.0  ;;  %v705_v48 = vmax.f32 %v701_v44, 0.0 }
  0xf4   : > { %v704_v47 = vmax.f32 %v700_v43, 0.0 }
  0xf5   : > { %707 = vst [vmem:[%s1280_s3] sm:$0xff] %v703_v46 }
  0xf6   : > { %v694_v41 = vld [vmem:[#allocation2 + $0x8] sm:$0xff]  ;;  %708 = vst [vmem:[%s1280_s3 + $0x8] sm:$0xff] %v704_v47 }
  0xf7   : > { %v702_v45 = vadd.f32 %v1081_v38, %v694_v41  ;;  %709 = vst [vmem:[%s1280_s3 + $0x10] sm:$0xff] %v705_v48 }
  0xf9   : > { %v706_v49 = vmax.f32 %v702_v45, 0.0 }
  0xfb   : > { %710 = vst [vmem:[%s1280_s3 + $0x18] sm:$0xff] %v706_v49 }
  0xfc PF: > { %s13_s16 = sadd.s32 1, %s1120_s16   ;;  %s1281_s12 = smov %s1108_s13 }
  0xfd   : > { %p10_p12 = scmp.ge.s32.totalorder %s13_s16, 4   ;;  %s1282_s13 = smov %s1178_s20 }
  0xfe   : > { %s1283_s14 = smov %s1116_s15  ;;  %s1284_s15 = smov %s1286_s17 }
  0xff   :  { %12 = sbr.rel (!%p10_p12) target bundleno = 3 (0x3), region = 104 }

// kernel: improved_ffdnet_forward.47
= control target key start
LH: loop header
LB: loop body
LE: loop exit
PB: predicated region body
PF: predicated region fallthrough
CT: control target
= control target key end

     0   :  { %s1499_s1 = inlined_call_operand.vmem [shape: bf16[512,128], index: 1, kind: input, shape index: {}]   ;;  %s1500_s0 = inlined_call_operand.vmem [shape: bf16[128,512], index: 0, kind: input, shape index: {}]   ;;  %s1501_s2 = inlined_call_operand.vmem [shape: f32[1,128], index: 2, kind: input, shape index: {}]   ;;  %s1502_s3 = inlined_call_operand.vmem [shape: f32[128,128], index: 3, kind: output, shape index: {}]  }
   0x1   :  { %v1096_v0 = vld [vmem:[%s1499_s1 + $0x38] sm:$0xff]  ;;  %v1095_v4 = vld [vmem:[%s1499_s1 + $0x30] sm:$0xff]  ;;  %v1094_v8 = vld [vmem:[%s1499_s1 + $0x28] sm:$0xff] }
   0x2   :  { %v1104_v1 = vld [vmem:[%s1499_s1 + $0x78] sm:$0xff]  ;;  %498 = vmatpush.bf16.msra.mxu0 %v1096_v0  ;;  %v1103_v5 = vld [vmem:[%s1499_s1 + $0x70] sm:$0xff]  ;;  %v1102_v9 = vld [vmem:[%s1499_s1 + $0x68] sm:$0xff] }
   0x3   :  { %v1112_v2 = vld [vmem:[%s1499_s1 + $0xb8] sm:$0xff]  ;;  %547 = vmatpush.bf16.msra.mxu1 %v1104_v1  ;;  %v1111_v6 = vld [vmem:[%s1499_s1 + $0xb0] sm:$0xff]  ;;  %v1110_v10 = vld [vmem:[%s1499_s1 + $0xa8] sm:$0xff] }
   0x4   :  { %v1120_v3 = vld [vmem:[%s1499_s1 + $0xf8] sm:$0xff]  ;;  %596 = vmatpush.bf16.msra.mxu2 %v1112_v2  ;;  %v1119_v7 = vld [vmem:[%s1499_s1 + $0xf0] sm:$0xff]  ;;  %v1118_v11 = vld [vmem:[%s1499_s1 + $0xe8] sm:$0xff] }
   0x5   :  { %645 = vmatpush.bf16.msra.mxu3 %v1120_v3  ;;  %v1093_v12 = vld [vmem:[%s1499_s1 + $0x20] sm:$0xff]  ;;  %v1092_v16 = vld [vmem:[%s1499_s1 + $0x18] sm:$0xff]  ;;  %v1091_v20 = vld [vmem:[%s1499_s1 + $0x10] sm:$0xff] }
   0x6   :  { %499 = vmatpush.bf16.msra.mxu0 %v1095_v4  ;;  %v1101_v13 = vld [vmem:[%s1499_s1 + $0x60] sm:$0xff]  ;;  %v1100_v17 = vld [vmem:[%s1499_s1 + $0x58] sm:$0xff]  ;;  %v1099_v21 = vld [vmem:[%s1499_s1 + $0x50] sm:$0xff] }
   0x7   :  { %548 = vmatpush.bf16.msra.mxu1 %v1103_v5  ;;  %v1109_v14 = vld [vmem:[%s1499_s1 + $0xa0] sm:$0xff]  ;;  %v1108_v18 = vld [vmem:[%s1499_s1 + $0x98] sm:$0xff]  ;;  %v1107_v22 = vld [vmem:[%s1499_s1 + $0x90] sm:$0xff] }
   0x8   :  { %597 = vmatpush.bf16.msra.mxu2 %v1111_v6  ;;  %v1117_v15 = vld [vmem:[%s1499_s1 + $0xe0] sm:$0xff]  ;;  %v1116_v19 = vld [vmem:[%s1499_s1 + $0xd8] sm:$0xff]  ;;  %v1115_v23 = vld [vmem:[%s1499_s1 + $0xd0] sm:$0xff] }
   0x9   :  { %646 = vmatpush.bf16.msra.mxu3 %v1119_v7  ;;  %v1090_v24 = vld [vmem:[%s1499_s1 + $0x8] sm:$0xff]  ;;  %v1089_v28 = vld [vmem:[%s1499_s1] sm:$0xff]  ;;  %v1059_v33 = vld [vmem:[%s1500_s0 + $0xc] sm:$0xf0] }
   0xa   :  { %500 = vmatpush.bf16.msra.mxu0 %v1094_v8  ;;  %v1098_v25 = vld [vmem:[%s1499_s1 + $0x48] sm:$0xff]  ;;  %v1097_v29 = vld [vmem:[%s1499_s1 + $0x40] sm:$0xff]  ;;  %v805_v35 = vld [vmem:[%s1500_s0 + $0x10] sm:$0xf0] }
   0xb   :  { %549 = vmatpush.bf16.msra.mxu1 %v1102_v9  ;;  %v1106_v26 = vld [vmem:[%s1499_s1 + $0x88] sm:$0xff]  ;;  %v1105_v30 = vld [vmem:[%s1499_s1 + $0x80] sm:$0xff]  ;;  %v1060_v37 = vld [vmem:[%s1500_s0 + $0x14] sm:$0xf0] }
   0xc   :  { %598 = vmatpush.bf16.msra.mxu2 %v1110_v10  ;;  %v1114_v27 = vld [vmem:[%s1499_s1 + $0xc8] sm:$0xff]  ;;  %v1113_v31 = vld [vmem:[%s1499_s1 + $0xc0] sm:$0xff]  ;;  %v813_v39 = vld [vmem:[%s1500_s0 + $0x18] sm:$0xf0] }
   0xd   :  { %647 = vmatpush.bf16.msra.mxu3 %v1118_v11  ;;  %v803_v32 = vld [vmem:[%s1500_s0] sm:$0xf]  ;;  %v1057_v34 = vld [vmem:[%s1500_s0 + $0x4] sm:$0xf]  ;;  %v811_v36 = vld [vmem:[%s1500_s0 + $0x8] sm:$0xf] }
   0xe   :  { %501 = vmatpush.bf16.msra.mxu0 %v1093_v12  ;;  %v1058_v38 = vld [vmem:[%s1500_s0 + $0xc] sm:$0xf]  ;;  %v804_v40 = vor.u32 %v1059_v33, %v803_v32  ;;  %v808_v41 = vor.u32 %v1057_v34, %v805_v35  ;;  %v812_v42 = vor.u32 %v1060_v37, %v811_v36  ;;  %v819_v44 = vld [vmem:[%s1500_s0 + $0x20] sm:$0xf]  ;;  %v1063_v45 = vld [vmem:[%s1500_s0 + $0x2c] sm:$0xf0] }
   0xf   :  { %550 = vmatpush.bf16.msra.mxu1 %v1101_v13  ;;  %v816_v43 = vor.u32 %v1058_v38, %v813_v39  ;;  %v1061_v46 = vld [vmem:[%s1500_s0 + $0x24] sm:$0xf]  ;;  %v821_v47 = vld [vmem:[%s1500_s0 + $0x30] sm:$0xf0]  ;;  %v827_v48 = vld [vmem:[%s1500_s0 + $0x28] sm:$0xf]  ;;  %v820_v52 = vor.u32 %v1063_v45, %v819_v44 }
  0x10   :  { %599 = vmatpush.bf16.msra.mxu2 %v1109_v14  ;;  %v1064_v49 = vld [vmem:[%s1500_s0 + $0x34] sm:$0xf0]  ;;  %v1062_v50 = vld [vmem:[%s1500_s0 + $0x2c] sm:$0xf]  ;;  %v829_v51 = vld [vmem:[%s1500_s0 + $0x38] sm:$0xf0]  ;;  %v824_v53 = vor.u32 %v1061_v46, %v821_v47 }
  0x11   :  { %648 = vmatpush.bf16.msra.mxu3 %v1117_v15  ;;  %v828_v54 = vor.u32 %v1064_v49, %v827_v48  ;;  %v832_v55 = vor.u32 %v1062_v50, %v829_v51  ;;  %v835_v56 = vld [vmem:[%s1500_s0 + $0x40] sm:$0xf]  ;;  %v1067_v57 = vld [vmem:[%s1500_s0 + $0x4c] sm:$0xf0]  ;;  %v1065_v58 = vld [vmem:[%s1500_s0 + $0x44] sm:$0xf] }
  0x12   :  { %502 = vmatpush.bf16.msra.mxu0 %v1092_v16  ;;  %v837_v59 = vld [vmem:[%s1500_s0 + $0x50] sm:$0xf0]  ;;  %v843_v60 = vld [vmem:[%s1500_s0 + $0x48] sm:$0xf]  ;;  %v1068_v61 = vld [vmem:[%s1500_s0 + $0x54] sm:$0xf0]  ;;  %v836_v0 = vor.u32 %v1067_v57, %v835_v56 }
  0x13   :  { %551 = vmatpush.bf16.msra.mxu1 %v1100_v17  ;;  %v1066_v62 = vld [vmem:[%s1500_s0 + $0x4c] sm:$0xf]  ;;  %v845_v63 = vld [vmem:[%s1500_s0 + $0x58] sm:$0xf0]  ;;  %v840_v1 = vor.u32 %v1065_v58, %v837_v59  ;;  %v844_v2 = vor.u32 %v1068_v61, %v843_v60  ;;  %v851_v4 = vld [vmem:[%s1500_s0 + $0x60] sm:$0xf] }
  0x14   :  { %600 = vmatpush.bf16.msra.mxu2 %v1108_v18  ;;  %v848_v3 = vor.u32 %v1066_v62, %v845_v63  ;;  %v1071_v5 = vld [vmem:[%s1500_s0 + $0x6c] sm:$0xf0]  ;;  %v1069_v6 = vld [vmem:[%s1500_s0 + $0x64] sm:$0xf]  ;;  %v853_v7 = vld [vmem:[%s1500_s0 + $0x70] sm:$0xf0] }
  0x15   :  { %649 = vmatpush.bf16.msra.mxu3 %v1116_v19  ;;  %v859_v8 = vld [vmem:[%s1500_s0 + $0x68] sm:$0xf]  ;;  %v1072_v9 = vld [vmem:[%s1500_s0 + $0x74] sm:$0xf0]  ;;  %v1070_v10 = vld [vmem:[%s1500_s0 + $0x6c] sm:$0xf]  ;;  %v852_v12 = vor.u32 %v1071_v5, %v851_v4  ;;  %v856_v13 = vor.u32 %v1069_v6, %v853_v7 }
  0x16   :  { %503 = vmatpush.bf16.msra.mxu0 %v1091_v20  ;;  %v861_v11 = vld [vmem:[%s1500_s0 + $0x78] sm:$0xf0]  ;;  %v860_v14 = vor.u32 %v1072_v9, %v859_v8  ;;  %v867_v16 = vld [vmem:[%s1500_s0 + $0x80] sm:$0xf]  ;;  %v1075_v17 = vld [vmem:[%s1500_s0 + $0x8c] sm:$0xf0] }
  0x17   :  { %552 = vmatpush.bf16.msra.mxu1 %v1099_v21  ;;  %v864_v15 = vor.u32 %v1070_v10, %v861_v11  ;;  %v1073_v18 = vld [vmem:[%s1500_s0 + $0x84] sm:$0xf]  ;;  %v869_v19 = vld [vmem:[%s1500_s0 + $0x90] sm:$0xf0]  ;;  %v875_v20 = vld [vmem:[%s1500_s0 + $0x88] sm:$0xf] }
  0x18   :  { %601 = vmatpush.bf16.msra.mxu2 %v1107_v22  ;;  %v1076_v21 = vld [vmem:[%s1500_s0 + $0x94] sm:$0xf0]  ;;  %v1074_v22 = vld [vmem:[%s1500_s0 + $0x8c] sm:$0xf]  ;;  %v891_v32 = vld [vmem:[%s1500_s0 + $0xa8] sm:$0xf] }
  0x19   :  { %650 = vmatpush.bf16.msra.mxu3 %v1115_v23  ;;  %v877_v23 = vld [vmem:[%s1500_s0 + $0x98] sm:$0xf0]  ;;  %v1080_v33 = vld [vmem:[%s1500_s0 + $0xb4] sm:$0xf0]  ;;  %v1078_v34 = vld [vmem:[%s1500_s0 + $0xac] sm:$0xf] }
  0x1a   :  { %504 = vmatpush.bf16.msra.mxu0 %v1090_v24  ;;  %v868_v24 = vor.u32 %v1075_v17, %v867_v16  ;;  %v893_v35 = vld [vmem:[%s1500_s0 + $0xb8] sm:$0xf0]  ;;  %v892_v38 = vor.u32 %v1080_v33, %v891_v32  ;;  %v907_v44 = vld [vmem:[%s1500_s0 + $0xc8] sm:$0xf]  ;;  %v1084_v45 = vld [vmem:[%s1500_s0 + $0xd4] sm:$0xf0] }
  0x1b   :  { %553 = vmatpush.bf16.msra.mxu1 %v1098_v25  ;;  %v872_v25 = vor.u32 %v1073_v18, %v869_v19  ;;  %v896_v39 = vor.u32 %v1078_v34, %v893_v35  ;;  %v1082_v46 = vld [vmem:[%s1500_s0 + $0xcc] sm:$0xf]  ;;  %v909_v47 = vld [vmem:[%s1500_s0 + $0xd8] sm:$0xf0]  ;;  %v908_v50 = vor.u32 %v1084_v45, %v907_v44  ;;  %v923_v56 = vld [vmem:[%s1500_s0 + $0xe8] sm:$0xf] }
  0x1c   :  { %602 = vmatpush.bf16.msra.mxu2 %v1106_v26  ;;  %v876_v26 = vor.u32 %v1076_v21, %v875_v20  ;;  %v912_v51 = vor.u32 %v1082_v46, %v909_v47  ;;  %v1088_v57 = vld [vmem:[%s1500_s0 + $0xf4] sm:$0xf0]  ;;  %v1086_v58 = vld [vmem:[%s1500_s0 + $0xec] sm:$0xf]  ;;  %v925_v59 = vld [vmem:[%s1500_s0 + $0xf8] sm:$0xf0] }
  0x1d   :  { %651 = vmatpush.bf16.msra.mxu3 %v1114_v27  ;;  %v880_v27 = vor.u32 %v1074_v22, %v877_v23  ;;  %v924_v62 = vor.u32 %v1088_v57, %v923_v56  ;;  %v928_v63 = vor.u32 %v1086_v58, %v925_v59  ;;  %v1433_v6 = vld [vmem:[%s1501_s2] ss:$0 sm:$0xff] }
  0x1e   :  { %505 = vmatpush.bf16.msra.mxu0 %v1089_v28  ;;  %v883_v28 = vld [vmem:[%s1500_s0 + $0xa0] sm:$0xf] }
  0x1f   :  { %554 = vmatpush.bf16.msra.mxu1 %v1097_v29  ;;  %v1079_v29 = vld [vmem:[%s1500_s0 + $0xac] sm:$0xf0] }
  0x20   :  { %603 = vmatpush.bf16.msra.mxu2 %v1105_v30  ;;  %v1077_v30 = vld [vmem:[%s1500_s0 + $0xa4] sm:$0xf]  ;;  %v884_v36 = vor.u32 %v1079_v29, %v883_v28 }
  0x21   :  { %652 = vmatpush.bf16.msra.mxu3 %v1113_v31  ;;  %506 = vmatmul.bf16.vlgmr.msra.gmra.mxu0 %v804_v40  ;;  %v885_v31 = vld [vmem:[%s1500_s0 + $0xb0] sm:$0xf0]  ;;  %v899_v40 = vld [vmem:[%s1500_s0 + $0xc0] sm:$0xf] }
  0x22   :  { %555 = vmatmul.bf16.vlgmr.msra.gmra.mxu1 %v808_v41  ;;  %v888_v37 = vor.u32 %v1077_v30, %v885_v31  ;;  %v1083_v41 = vld [vmem:[%s1500_s0 + $0xcc] sm:$0xf0] }
  0x23   :  { %604 = vmatmul.bf16.vlgmr.msra.gmra.mxu2 %v812_v42  ;;  %v1081_v42 = vld [vmem:[%s1500_s0 + $0xc4] sm:$0xf]  ;;  %v900_v48 = vor.u32 %v1083_v41, %v899_v40 }
  0x24   :  { %653 = vmatmul.bf16.vlgmr.msra.gmra.mxu3 %v816_v43  ;;  %v901_v43 = vld [vmem:[%s1500_s0 + $0xd0] sm:$0xf0] }
  0x25   :  { %v904_v49 = vor.u32 %v1081_v42, %v901_v43 }
  0x31   :  { %511 = vmatmul.bf16.gmra.mxu0 %v820_v52  ;;  %v915_v52 = vld [vmem:[%s1500_s0 + $0xe0] sm:$0xf] }
  0x32   :  { %560 = vmatmul.bf16.gmra.mxu1 %v824_v53  ;;  %v1087_v53 = vld [vmem:[%s1500_s0 + $0xec] sm:$0xf0] }
  0x33   :  { %609 = vmatmul.bf16.gmra.mxu2 %v828_v54  ;;  %v1085_v54 = vld [vmem:[%s1500_s0 + $0xe4] sm:$0xf]  ;;  %v916_v60 = vor.u32 %v1087_v53, %v915_v52 }
  0x34   :  { %658 = vmatmul.bf16.gmra.mxu3 %v832_v55  ;;  %v917_v55 = vld [vmem:[%s1500_s0 + $0xf0] sm:$0xf0] }
  0x35   :  { %v920_v61 = vor.u32 %v1085_v54, %v917_v55 }
  0x41   :  { %516 = vmatmul.bf16.gmra.mxu0 %v836_v0 }
  0x42   :  { %565 = vmatmul.bf16.gmra.mxu1 %v840_v1 }
  0x43   :  { %614 = vmatmul.bf16.gmra.mxu2 %v844_v2 }
  0x44   :  { %663 = vmatmul.bf16.gmra.mxu3 %v848_v3 }
  0x51   :  { %521 = vmatmul.bf16.gmra.mxu0 %v852_v12 }
  0x52   :  { %570 = vmatmul.bf16.gmra.mxu1 %v856_v13 }
  0x53   :  { %619 = vmatmul.bf16.gmra.mxu2 %v860_v14 }
  0x54   :  { %668 = vmatmul.bf16.gmra.mxu3 %v864_v15 }
  0x61   :  { %526 = vmatmul.bf16.gmra.mxu0 %v868_v24 }
  0x62   :  { %575 = vmatmul.bf16.gmra.mxu1 %v872_v25 }
  0x63   :  { %624 = vmatmul.bf16.gmra.mxu2 %v876_v26 }
  0x64   :  { %673 = vmatmul.bf16.gmra.mxu3 %v880_v27 }
  0x71   :  { %531 = vmatmul.bf16.gmra.mxu0 %v884_v36 }
  0x72   :  { %580 = vmatmul.bf16.gmra.mxu1 %v888_v37 }
  0x73   :  { %629 = vmatmul.bf16.gmra.mxu2 %v892_v38 }
  0x74   :  { %678 = vmatmul.bf16.gmra.mxu3 %v896_v39 }
  0x81   :  { %536 = vmatmul.bf16.gmra.mxu0 %v900_v48 }
  0x82   :  { %585 = vmatmul.bf16.gmra.mxu1 %v904_v49 }
  0x83   :  { %634 = vmatmul.bf16.gmra.mxu2 %v908_v50 }
  0x84   :  { %683 = vmatmul.bf16.gmra.mxu3 %v912_v51 }
  0x91   :  { %541 = vmatmul.bf16.gmra.mxu0 %v916_v60 }
  0x92   :  { %590 = vmatmul.bf16.gmra.mxu1 %v920_v61 }
  0x93   :  { %639 = vmatmul.bf16.gmra.mxu2 %v924_v62 }
  0x94   :  { %688 = vmatmul.bf16.gmra.mxu3 %v928_v63 }
  0x9e   :  { %v507_v0 = vpop.f32.mrf.mxu0 }
  0x9f   :  { %v556_v1 = vpop.f32.mrf.mxu1 }
  0xa0   :  { %v557_v2 = vadd.f32 %v556_v1, %v507_v0 }
  0xa6   :  { %v605_v3 = vpop.f32.mrf.mxu2  ;;  %v509_v7 = vpop.f32.mrf.mxu0 }
  0xa7   :  { %v654_v4 = vpop.f32.mrf.mxu3  ;;  %v606_v5 = vadd.f32 %v605_v3, %v557_v2  ;;  %v558_v8 = vpop.f32.mrf.mxu1 }
  0xa8   :  { %v559_v12 = vadd.f32 %v558_v8, %v509_v7 }
  0xa9   :  { %v655_v9 = vadd.f32 %v654_v4, %v606_v5 }
  0xab   :  { %v749_v10 = vadd.f32 %v1433_v6, %v655_v9 }
  0xad   :  { %v765_v11 = vmax.f32 %v749_v10, 0.0 }
  0xae   :  { %v607_v13 = vpop.f32.mrf.mxu2  ;;  %v512_v16 = vpop.f32.mrf.mxu0 }
  0xaf   :  { %v656_v14 = vpop.f32.mrf.mxu3  ;;  %781 = vst [vmem:[%s1502_s3] sm:$0xff] %v765_v11  ;;  %v608_v15 = vadd.f32 %v607_v13, %v559_v12  ;;  %v561_v17 = vpop.f32.mrf.mxu1 }
  0xb0   :  { %v562_v20 = vadd.f32 %v561_v17, %v512_v16 }
  0xb1   :  { %v657_v18 = vadd.f32 %v656_v14, %v608_v15 }
  0xb3   :  { %v750_v19 = vadd.f32 %v1433_v6, %v657_v18 }
  0xb5   :  { %v766_v21 = vmax.f32 %v750_v19, 0.0 }
  0xb6   :  { %v610_v22 = vpop.f32.mrf.mxu2  ;;  %v514_v25 = vpop.f32.mrf.mxu0 }
  0xb7   :  { %v659_v23 = vpop.f32.mrf.mxu3  ;;  %782 = vst [vmem:[%s1502_s3 + $0x8] sm:$0xff] %v766_v21  ;;  %v611_v24 = vadd.f32 %v610_v22, %v562_v20  ;;  %v563_v26 = vpop.f32.mrf.mxu1 }
  0xb8   :  { %v564_v30 = vadd.f32 %v563_v26, %v514_v25 }
  0xb9   :  { %v660_v27 = vadd.f32 %v659_v23, %v611_v24 }
  0xbb   :  { %v751_v28 = vadd.f32 %v1433_v6, %v660_v27 }
  0xbd   :  { %v767_v29 = vmax.f32 %v751_v28, 0.0 }
  0xbe   :  { %v612_v31 = vpop.f32.mrf.mxu2  ;;  %v517_v34 = vpop.f32.mrf.mxu0 }
  0xbf   :  { %v661_v32 = vpop.f32.mrf.mxu3  ;;  %783 = vst [vmem:[%s1502_s3 + $0x10] sm:$0xff] %v767_v29  ;;  %v613_v33 = vadd.f32 %v612_v31, %v564_v30  ;;  %v566_v35 = vpop.f32.mrf.mxu1 }
  0xc0   :  { %v567_v38 = vadd.f32 %v566_v35, %v517_v34 }
  0xc1   :  { %v662_v36 = vadd.f32 %v661_v32, %v613_v33 }
  0xc3   :  { %v752_v37 = vadd.f32 %v1433_v6, %v662_v36 }
  0xc5   :  { %v768_v39 = vmax.f32 %v752_v37, 0.0 }
  0xc6   :  { %v615_v40 = vpop.f32.mrf.mxu2  ;;  %v519_v43 = vpop.f32.mrf.mxu0 }
  0xc7   :  { %v664_v41 = vpop.f32.mrf.mxu3  ;;  %784 = vst [vmem:[%s1502_s3 + $0x18] sm:$0xff] %v768_v39  ;;  %v616_v42 = vadd.f32 %v615_v40, %v567_v38  ;;  %v568_v44 = vpop.f32.mrf.mxu1 }
  0xc8   :  { %v569_v48 = vadd.f32 %v568_v44, %v519_v43 }
  0xc9   :  { %v665_v45 = vadd.f32 %v664_v41, %v616_v42 }
  0xcb   :  { %v753_v46 = vadd.f32 %v1433_v6, %v665_v45 }
  0xcd   :  { %v769_v47 = vmax.f32 %v753_v46, 0.0 }
  0xce   :  { %v617_v49 = vpop.f32.mrf.mxu2  ;;  %v522_v52 = vpop.f32.mrf.mxu0 }
  0xcf   :  { %v666_v50 = vpop.f32.mrf.mxu3  ;;  %785 = vst [vmem:[%s1502_s3 + $0x20] sm:$0xff] %v769_v47  ;;  %v618_v51 = vadd.f32 %v617_v49, %v569_v48  ;;  %v571_v53 = vpop.f32.mrf.mxu1 }
  0xd0   :  { %v572_v56 = vadd.f32 %v571_v53, %v522_v52 }
  0xd1   :  { %v667_v54 = vadd.f32 %v666_v50, %v618_v51 }
  0xd3   :  { %v754_v55 = vadd.f32 %v1433_v6, %v667_v54 }
  0xd5   :  { %v770_v57 = vmax.f32 %v754_v55, 0.0 }
  0xd6   :  { %v620_v58 = vpop.f32.mrf.mxu2  ;;  %v524_v61 = vpop.f32.mrf.mxu0 }
  0xd7   :  { %v669_v59 = vpop.f32.mrf.mxu3  ;;  %786 = vst [vmem:[%s1502_s3 + $0x28] sm:$0xff] %v770_v57  ;;  %v621_v60 = vadd.f32 %v620_v58, %v572_v56  ;;  %v573_v62 = vpop.f32.mrf.mxu1 }
  0xd8   :  { %v574_v2 = vadd.f32 %v573_v62, %v524_v61 }
  0xd9   :  { %v670_v63 = vadd.f32 %v669_v59, %v621_v60 }
  0xdb   :  { %v755_v0 = vadd.f32 %v1433_v6, %v670_v63 }
  0xdd   :  { %v771_v1 = vmax.f32 %v755_v0, 0.0 }
  0xde   :  { %v622_v3 = vpop.f32.mrf.mxu2  ;;  %v527_v7 = vpop.f32.mrf.mxu0 }
  0xdf   :  { %v671_v4 = vpop.f32.mrf.mxu3  ;;  %787 = vst [vmem:[%s1502_s3 + $0x30] sm:$0xff] %v771_v1  ;;  %v623_v5 = vadd.f32 %v622_v3, %v574_v2  ;;  %v576_v8 = vpop.f32.mrf.mxu1 }
  0xe0   :  { %v577_v11 = vadd.f32 %v576_v8, %v527_v7 }
  0xe1   :  { %v672_v9 = vadd.f32 %v671_v4, %v623_v5 }
  0xe3   :  { %v756_v10 = vadd.f32 %v1433_v6, %v672_v9 }
  0xe5   :  { %v772_v12 = vmax.f32 %v756_v10, 0.0 }
  0xe6   :  { %v625_v13 = vpop.f32.mrf.mxu2  ;;  %v529_v16 = vpop.f32.mrf.mxu0 }
  0xe7   :  { %v674_v14 = vpop.f32.mrf.mxu3  ;;  %788 = vst [vmem:[%s1502_s3 + $0x38] sm:$0xff] %v772_v12  ;;  %v626_v15 = vadd.f32 %v625_v13, %v577_v11  ;;  %v578_v17 = vpop.f32.mrf.mxu1 }
  0xe8   :  { %v579_v21 = vadd.f32 %v578_v17, %v529_v16 }
  0xe9   :  { %v675_v18 = vadd.f32 %v674_v14, %v626_v15 }
  0xeb   :  { %v757_v19 = vadd.f32 %v1433_v6, %v675_v18 }
  0xed   :  { %v773_v20 = vmax.f32 %v757_v19, 0.0 }
  0xee   :  { %v627_v22 = vpop.f32.mrf.mxu2  ;;  %v532_v25 = vpop.f32.mrf.mxu0 }
  0xef   :  { %v676_v23 = vpop.f32.mrf.mxu3  ;;  %789 = vst [vmem:[%s1502_s3 + $0x40] sm:$0xff] %v773_v20  ;;  %v628_v24 = vadd.f32 %v627_v22, %v579_v21  ;;  %v581_v26 = vpop.f32.mrf.mxu1 }
  0xf0   :  { %v582_v29 = vadd.f32 %v581_v26, %v532_v25 }
  0xf1   :  { %v677_v27 = vadd.f32 %v676_v23, %v628_v24 }
  0xf3   :  { %v758_v28 = vadd.f32 %v1433_v6, %v677_v27 }
  0xf5   :  { %v774_v30 = vmax.f32 %v758_v28, 0.0 }
  0xf6   :  { %v630_v31 = vpop.f32.mrf.mxu2  ;;  %v534_v34 = vpop.f32.mrf.mxu0 }
  0xf7   :  { %v679_v32 = vpop.f32.mrf.mxu3  ;;  %790 = vst [vmem:[%s1502_s3 + $0x48] sm:$0xff] %v774_v30  ;;  %v631_v33 = vadd.f32 %v630_v31, %v582_v29  ;;  %v583_v35 = vpop.f32.mrf.mxu1 }
  0xf8   :  { %v584_v39 = vadd.f32 %v583_v35, %v534_v34 }
  0xf9   :  { %v680_v36 = vadd.f32 %v679_v32, %v631_v33 }
  0xfb   :  { %v759_v37 = vadd.f32 %v1433_v6, %v680_v36 }
  0xfd   :  { %v775_v38 = vmax.f32 %v759_v37, 0.0 }
  0xfe   :  { %v632_v40 = vpop.f32.mrf.mxu2  ;;  %v537_v43 = vpop.f32.mrf.mxu0 }
  0xff   :  { %v681_v41 = vpop.f32.mrf.mxu3  ;;  %791 = vst [vmem:[%s1502_s3 + $0x50] sm:$0xff] %v775_v38  ;;  %v633_v42 = vadd.f32 %v632_v40, %v584_v39  ;;  %v586_v44 = vpop.f32.mrf.mxu1 }
 0x100   :  { %v587_v47 = vadd.f32 %v586_v44, %v537_v43 }
 0x101   :  { %v682_v45 = vadd.f32 %v681_v41, %v633_v42 }
 0x103   :  { %v760_v46 = vadd.f32 %v1433_v6, %v682_v45 }
 0x105   :  { %v776_v48 = vmax.f32 %v760_v46, 0.0 }
 0x106   :  { %v635_v49 = vpop.f32.mrf.mxu2  ;;  %v539_v52 = vpop.f32.mrf.mxu0 }
 0x107   :  { %v684_v50 = vpop.f32.mrf.mxu3  ;;  %792 = vst [vmem:[%s1502_s3 + $0x58] sm:$0xff] %v776_v48  ;;  %v636_v51 = vadd.f32 %v635_v49, %v587_v47  ;;  %v588_v53 = vpop.f32.mrf.mxu1 }
 0x108   :  { %v589_v57 = vadd.f32 %v588_v53, %v539_v52 }
 0x109   :  { %v685_v54 = vadd.f32 %v684_v50, %v636_v51 }
 0x10b   :  { %v761_v55 = vadd.f32 %v1433_v6, %v685_v54 }
 0x10d   :  { %v777_v56 = vmax.f32 %v761_v55, 0.0 }
 0x10e   :  { %v637_v58 = vpop.f32.mrf.mxu2  ;;  %v542_v61 = vpop.f32.mrf.mxu0 }
 0x10f   :  { %v686_v59 = vpop.f32.mrf.mxu3  ;;  %793 = vst [vmem:[%s1502_s3 + $0x60] sm:$0xff] %v777_v56  ;;  %v638_v60 = vadd.f32 %v637_v58, %v589_v57  ;;  %v591_v62 = vpop.f32.mrf.mxu1 }
 0x110   :  { %v592_v1 = vadd.f32 %v591_v62, %v542_v61 }
 0x111   :  { %v687_v63 = vadd.f32 %v686_v59, %v638_v60 }
 0x113   :  { %v762_v0 = vadd.f32 %v1433_v6, %v687_v63 }
 0x115   :  { %v778_v2 = vmax.f32 %v762_v0, 0.0 }
 0x116   :  { %v640_v3 = vpop.f32.mrf.mxu2  ;;  %v544_v8 = vpop.f32.mrf.mxu0 }
 0x117   :  { %v689_v4 = vpop.f32.mrf.mxu3  ;;  %794 = vst [vmem:[%s1502_s3 + $0x68] sm:$0xff] %v778_v2  ;;  %v641_v5 = vadd.f32 %v640_v3, %v592_v1  ;;  %v593_v9 = vpop.f32.mrf.mxu1 }
 0x118   :  { %v594_v12 = vadd.f32 %v593_v9, %v544_v8 }
 0x119   :  { %v690_v7 = vadd.f32 %v689_v4, %v641_v5 }
 0x11b   :  { %v763_v10 = vadd.f32 %v1433_v6, %v690_v7 }
 0x11d   :  { %v779_v11 = vmax.f32 %v763_v10, 0.0 }
 0x11e   :  { %v642_v13 = vpop.f32.mrf.mxu2 }
 0x11f   :  { %795 = vst [vmem:[%s1502_s3 + $0x70] sm:$0xff] %v779_v11  ;;  %v643_v14 = vadd.f32 %v642_v13, %v594_v12  ;;  %v691_v15 = vpop.f32.mrf.mxu3 }
 0x121   :  { %v692_v16 = vadd.f32 %v691_v15, %v643_v14 }
 0x123   :  { %v764_v17 = vadd.f32 %v1433_v6, %v692_v16 }
 0x125   :  { %v780_v18 = vmax.f32 %v764_v17, 0.0 }
 0x127   :  { %796 = vst [vmem:[%s1502_s3 + $0x78] sm:$0xff] %v780_v18 }

// kernel: improved_ffdnet_forward.51
= control target key start
LH: loop header
LB: loop body
LE: loop exit
PB: predicated region body
PF: predicated region fallthrough
CT: control target
= control target key end

     0   :  { %s2672_s12 = smov 0   ;;  %s2674_s13 = smov 0   ;;  %s3133_s0 = inlined_call_operand.vmem [shape: bf16[512,1024], index: 0, kind: input, shape index: {}]   ;;  %s3134_s1 = inlined_call_operand.vmem [shape: bf16[1024,128], index: 1, kind: input, shape index: {}]   ;;  %s3135_s2 = inlined_call_operand.vmem [shape: f32[1,128], index: 2, kind: input, shape index: {}]   ;;  %s3136_s3 = inlined_call_operand.vmem [shape: f32[512,128], index: 3, kind: output, shape index: {}]  }
   0x1   :  { %s2676_s14 = smov 0   ;;  %s2678_s15 = smov 0  }
   0x2   :  { %s2680_s16 = smov 0   ;;  %s2682_s17 = smov 0  }
   0x3   :  { %s2684_s18 = smov 0  }
   0x4 LB: > { %s25_s19 = sadd.s32 1, %s2641_s16  ;;  %s32_s20 = sadd.s32 1, %s2645_s17  ;;  %s2649_s18 = sphi %s2684_s18, %s13_s18   ;;  %s2645_s17 = sphi %s2682_s17, %s3142_s17   ;;  %s2641_s16 = sphi %s2680_s16, %s3141_s16   ;;  %s2637_s15 = sphi %s2678_s15, %s3140_s15   ;;  %s2633_s14 = sphi %s2676_s14, %s3139_s14   ;;  %s2629_s13 = sphi %s2674_s13, %s3138_s13   ;;  %s2625_s12 = sphi %s2672_s12, %s3137_s12  }
   0x5   : > { %p26_p0 = scmp.ge.s32.totalorder %s25_s19, 2  ;;  %p48_p1 = scmp.ne.s32.totalorder %s2629_s13, %s2625_s12 }
   0x6   : > { %p49_p2 = scmp.eq.s32.totalorder %s2649_s18, 0  ;;  %s41_s24 = sadd.s32 1, %s2629_s13 }
   0x7   : > { %s3144_s19 = smov (%p26_p0, %s25_s19), 0  ;;  %s3146_s20 = smov (!%p26_p0, %s32_s20), %s2645_s17 }
   0x8   : > { %p50_p3 = por %p49_p2, %p48_p1  ;;  %p34_p4 = scmp.ge.s32.totalorder %s3146_s20, 2 }
   0x9   : > { %s37_s21 = ssub.s32 %s2641_s16, %s3144_s19  ;;  %p1912_p6 = scmp.ge.s32.totalorder %s2649_s18, 4 }
   0xa   : > { %s3148_s20 = smov (%p34_p4, %s3146_s20), 0 }
   0xb   : > { %s36_s22 = ssub.s32 %s2645_s17, %s3148_s20  ;;  %162 = sbr.rel (%p1912_p6) target bundleno = 87 (0x57), region = 20 }
   0xc   : > { %s38_s23 = sor.u32 %s37_s21, %s36_s22 }
   0xd   : > { %p39_p5 = scmp.eq.s32.totalorder %s38_s23, 0 }
   0xf   : > { %s2723_s25 = scalar_select %p39_p5, %s2629_s13, %s41_s24  }
  0x10   : > { %165 = sbr.rel (!%p50_p3) target bundleno = 87 (0x57), region = 24  ;;  %s167_s26 = sand.u32 (%p50_p3), 1, %s2629_s13  }
  0x11   : > { %s1915_s27 = sshll.u32 (%p50_p3), %s2641_s16, 2  ;;  %s1913_s28 = sshll.u32 (%p50_p3), %s167_s26, 9 }
  0x12   : > { %s2312_s29 = sshll.u32 (%p50_p3), %s2645_s17, 8  ;;  %s2737_s8 = scalar_lea.vmem (%p50_p3), [#allocation3], %s1913_s28 }
  0x13   : > { %s173_s30 = sadd.s32 (%p50_p3), %s2312_s29, %s1915_s27 }
  0x14   : > { %s1917_s4 = sshll.u32 (%p50_p3), %s173_s30, 2 }
  0x15   : > { %s2732_s7 = scalar_lea.vmem %s3133_s0, %s1917_s4 }
  0x16   : > { %v188_v0 = vld [vmem:[%s2732_s7] sm:$0xff]  ;;  %v190_v1 = vld [vmem:[%s2732_s7 + $0x8] sm:$0xff] }
  0x17   : > { %v192_v2 = vld [vmem:[%s2732_s7 + $0x20] sm:$0xff]  ;;  %189 = vst [vmem:[%s2737_s8] sm:$0xff] %v188_v0  ;;  %v194_v3 = vld [vmem:[%s2732_s7 + $0x28] sm:$0xff] }
  0x18   : > { %191 = vst [vmem:[%s2737_s8 + $0x8] sm:$0xff] %v190_v1  ;;  %v196_v4 = vld [vmem:[%s2732_s7 + $0x40] sm:$0xff]  ;;  %v198_v5 = vld [vmem:[%s2732_s7 + $0x48] sm:$0xff] }
  0x19   : > { %193 = vst [vmem:[%s2737_s8 + $0x10] sm:$0xff] %v192_v2  ;;  %v200_v6 = vld [vmem:[%s2732_s7 + $0x60] sm:$0xff]  ;;  %v202_v7 = vld [vmem:[%s2732_s7 + $0x68] sm:$0xff] }
  0x1a   : > { %195 = vst [vmem:[%s2737_s8 + $0x18] sm:$0xff] %v194_v3  ;;  %v204_v8 = vld [vmem:[%s2732_s7 + $0x80] sm:$0xff]  ;;  %v206_v9 = vld [vmem:[%s2732_s7 + $0x88] sm:$0xff] }
  0x1b   : > { %197 = vst [vmem:[%s2737_s8 + $0x20] sm:$0xff] %v196_v4  ;;  %v208_v10 = vld [vmem:[%s2732_s7 + $0xa0] sm:$0xff]  ;;  %v210_v11 = vld [vmem:[%s2732_s7 + $0xa8] sm:$0xff] }
  0x1c   : > { %199 = vst [vmem:[%s2737_s8 + $0x28] sm:$0xff] %v198_v5  ;;  %v212_v12 = vld [vmem:[%s2732_s7 + $0xc0] sm:$0xff]  ;;  %v214_v13 = vld [vmem:[%s2732_s7 + $0xc8] sm:$0xff] }
  0x1d   : > { %201 = vst [vmem:[%s2737_s8 + $0x30] sm:$0xff] %v200_v6  ;;  %v216_v14 = vld [vmem:[%s2732_s7 + $0xe0] sm:$0xff]  ;;  %v218_v15 = vld [vmem:[%s2732_s7 + $0xe8] sm:$0xff] }
  0x1e   : > { %203 = vst [vmem:[%s2737_s8 + $0x38] sm:$0xff] %v202_v7  ;;  %v220_v16 = vld [vmem:[%s2732_s7 + $0x100] sm:$0xff]  ;;  %v222_v17 = vld [vmem:[%s2732_s7 + $0x108] sm:$0xff] }
  0x1f   : > { %205 = vst [vmem:[%s2737_s8 + $0x40] sm:$0xff] %v204_v8  ;;  %v224_v18 = vld [vmem:[%s2732_s7 + $0x120] sm:$0xff]  ;;  %v226_v19 = vld [vmem:[%s2732_s7 + $0x128] sm:$0xff] }
  0x20   : > { %207 = vst [vmem:[%s2737_s8 + $0x48] sm:$0xff] %v206_v9  ;;  %v228_v20 = vld [vmem:[%s2732_s7 + $0x140] sm:$0xff]  ;;  %v230_v21 = vld [vmem:[%s2732_s7 + $0x148] sm:$0xff] }
  0x21   : > { %209 = vst [vmem:[%s2737_s8 + $0x50] sm:$0xff] %v208_v10  ;;  %v232_v22 = vld [vmem:[%s2732_s7 + $0x160] sm:$0xff]  ;;  %v234_v23 = vld [vmem:[%s2732_s7 + $0x168] sm:$0xff] }
  0x22   : > { %211 = vst [vmem:[%s2737_s8 + $0x58] sm:$0xff] %v210_v11  ;;  %v236_v24 = vld [vmem:[%s2732_s7 + $0x180] sm:$0xff]  ;;  %v238_v25 = vld [vmem:[%s2732_s7 + $0x188] sm:$0xff] }
  0x23   : > { %213 = vst [vmem:[%s2737_s8 + $0x60] sm:$0xff] %v212_v12  ;;  %v240_v26 = vld [vmem:[%s2732_s7 + $0x1a0] sm:$0xff]  ;;  %v242_v27 = vld [vmem:[%s2732_s7 + $0x1a8] sm:$0xff] }
  0x24   : > { %215 = vst [vmem:[%s2737_s8 + $0x68] sm:$0xff] %v214_v13  ;;  %v244_v28 = vld [vmem:[%s2732_s7 + $0x1c0] sm:$0xff]  ;;  %v246_v29 = vld [vmem:[%s2732_s7 + $0x1c8] sm:$0xff] }
  0x25   : > { %217 = vst [vmem:[%s2737_s8 + $0x70] sm:$0xff] %v216_v14  ;;  %v248_v30 = vld [vmem:[%s2732_s7 + $0x1e0] sm:$0xff]  ;;  %v250_v31 = vld [vmem:[%s2732_s7 + $0x1e8] sm:$0xff] }
  0x26   : > { %219 = vst [vmem:[%s2737_s8 + $0x78] sm:$0xff] %v218_v15  ;;  %v252_v32 = vld [vmem:[%s2732_s7 + $0x200] sm:$0xff]  ;;  %v254_v33 = vld [vmem:[%s2732_s7 + $0x208] sm:$0xff] }
  0x27   : > { %221 = vst [vmem:[%s2737_s8 + $0x80] sm:$0xff] %v220_v16  ;;  %v256_v34 = vld [vmem:[%s2732_s7 + $0x220] sm:$0xff]  ;;  %v258_v35 = vld [vmem:[%s2732_s7 + $0x228] sm:$0xff] }
  0x28   : > { %223 = vst [vmem:[%s2737_s8 + $0x88] sm:$0xff] %v222_v17  ;;  %v260_v36 = vld [vmem:[%s2732_s7 + $0x240] sm:$0xff]  ;;  %v262_v37 = vld [vmem:[%s2732_s7 + $0x248] sm:$0xff] }
  0x29   : > { %225 = vst [vmem:[%s2737_s8 + $0x90] sm:$0xff] %v224_v18  ;;  %v264_v38 = vld [vmem:[%s2732_s7 + $0x260] sm:$0xff]  ;;  %v266_v39 = vld [vmem:[%s2732_s7 + $0x268] sm:$0xff] }
  0x2a   : > { %227 = vst [vmem:[%s2737_s8 + $0x98] sm:$0xff] %v226_v19  ;;  %v268_v40 = vld [vmem:[%s2732_s7 + $0x280] sm:$0xff]  ;;  %v270_v41 = vld [vmem:[%s2732_s7 + $0x288] sm:$0xff] }
  0x2b   : > { %229 = vst [vmem:[%s2737_s8 + $0xa0] sm:$0xff] %v228_v20  ;;  %v272_v42 = vld [vmem:[%s2732_s7 + $0x2a0] sm:$0xff]  ;;  %v274_v43 = vld [vmem:[%s2732_s7 + $0x2a8] sm:$0xff] }
  0x2c   : > { %231 = vst [vmem:[%s2737_s8 + $0xa8] sm:$0xff] %v230_v21  ;;  %v276_v44 = vld [vmem:[%s2732_s7 + $0x2c0] sm:$0xff]  ;;  %v278_v45 = vld [vmem:[%s2732_s7 + $0x2c8] sm:$0xff] }
  0x2d   : > { %233 = vst [vmem:[%s2737_s8 + $0xb0] sm:$0xff] %v232_v22  ;;  %v280_v46 = vld [vmem:[%s2732_s7 + $0x2e0] sm:$0xff]  ;;  %v282_v47 = vld [vmem:[%s2732_s7 + $0x2e8] sm:$0xff] }
  0x2e   : > { %235 = vst [vmem:[%s2737_s8 + $0xb8] sm:$0xff] %v234_v23  ;;  %v284_v48 = vld [vmem:[%s2732_s7 + $0x300] sm:$0xff]  ;;  %v286_v49 = vld [vmem:[%s2732_s7 + $0x308] sm:$0xff] }
  0x2f   : > { %237 = vst [vmem:[%s2737_s8 + $0xc0] sm:$0xff] %v236_v24  ;;  %v288_v50 = vld [vmem:[%s2732_s7 + $0x320] sm:$0xff]  ;;  %v290_v51 = vld [vmem:[%s2732_s7 + $0x328] sm:$0xff] }
  0x30   : > { %239 = vst [vmem:[%s2737_s8 + $0xc8] sm:$0xff] %v238_v25  ;;  %v292_v52 = vld [vmem:[%s2732_s7 + $0x340] sm:$0xff]  ;;  %v294_v53 = vld [vmem:[%s2732_s7 + $0x348] sm:$0xff] }
  0x31   : > { %241 = vst [vmem:[%s2737_s8 + $0xd0] sm:$0xff] %v240_v26  ;;  %v296_v54 = vld [vmem:[%s2732_s7 + $0x360] sm:$0xff]  ;;  %v298_v55 = vld [vmem:[%s2732_s7 + $0x368] sm:$0xff] }
  0x32   : > { %243 = vst [vmem:[%s2737_s8 + $0xd8] sm:$0xff] %v242_v27  ;;  %v300_v56 = vld [vmem:[%s2732_s7 + $0x380] sm:$0xff]  ;;  %v302_v57 = vld [vmem:[%s2732_s7 + $0x388] sm:$0xff] }
  0x33   : > { %245 = vst [vmem:[%s2737_s8 + $0xe0] sm:$0xff] %v244_v28  ;;  %v304_v58 = vld [vmem:[%s2732_s7 + $0x3a0] sm:$0xff]  ;;  %v306_v59 = vld [vmem:[%s2732_s7 + $0x3a8] sm:$0xff] }
  0x34   : > { %247 = vst [vmem:[%s2737_s8 + $0xe8] sm:$0xff] %v246_v29  ;;  %v308_v60 = vld [vmem:[%s2732_s7 + $0x3c0] sm:$0xff]  ;;  %v310_v61 = vld [vmem:[%s2732_s7 + $0x3c8] sm:$0xff] }
  0x35   : > { %249 = vst [vmem:[%s2737_s8 + $0xf0] sm:$0xff] %v248_v30  ;;  %v312_v62 = vld [vmem:[%s2732_s7 + $0x3e0] sm:$0xff]  ;;  %v314_v63 = vld [vmem:[%s2732_s7 + $0x3e8] sm:$0xff] }
  0x36   : > { %251 = vst [vmem:[%s2737_s8 + $0xf8] sm:$0xff] %v250_v31 }
  0x37   : > { %253 = vst [vmem:[%s2737_s8 + $0x100] sm:$0xff] %v252_v32 }
  0x38   : > { %255 = vst [vmem:[%s2737_s8 + $0x108] sm:$0xff] %v254_v33 }
  0x39   : > { %257 = vst [vmem:[%s2737_s8 + $0x110] sm:$0xff] %v256_v34 }
  0x3a   : > { %259 = vst [vmem:[%s2737_s8 + $0x118] sm:$0xff] %v258_v35 }
  0x3b   : > { %261 = vst [vmem:[%s2737_s8 + $0x120] sm:$0xff] %v260_v36 }
  0x3c   : > { %263 = vst [vmem:[%s2737_s8 + $0x128] sm:$0xff] %v262_v37 }
  0x3d   : > { %265 = vst [vmem:[%s2737_s8 + $0x130] sm:$0xff] %v264_v38 }
  0x3e   : > { %267 = vst [vmem:[%s2737_s8 + $0x138] sm:$0xff] %v266_v39 }
  0x3f   : > { %269 = vst [vmem:[%s2737_s8 + $0x140] sm:$0xff] %v268_v40 }
  0x40   : > { %271 = vst [vmem:[%s2737_s8 + $0x148] sm:$0xff] %v270_v41 }
  0x41   : > { %273 = vst [vmem:[%s2737_s8 + $0x150] sm:$0xff] %v272_v42 }
  0x42   : > { %275 = vst [vmem:[%s2737_s8 + $0x158] sm:$0xff] %v274_v43 }
  0x43   : > { %277 = vst [vmem:[%s2737_s8 + $0x160] sm:$0xff] %v276_v44 }
  0x44   : > { %279 = vst [vmem:[%s2737_s8 + $0x168] sm:$0xff] %v278_v45 }
  0x45   : > { %281 = vst [vmem:[%s2737_s8 + $0x170] sm:$0xff] %v280_v46 }
  0x46   : > { %283 = vst [vmem:[%s2737_s8 + $0x178] sm:$0xff] %v282_v47 }
  0x47   : > { %285 = vst [vmem:[%s2737_s8 + $0x180] sm:$0xff] %v284_v48 }
  0x48   : > { %287 = vst [vmem:[%s2737_s8 + $0x188] sm:$0xff] %v286_v49 }
  0x49   : > { %289 = vst [vmem:[%s2737_s8 + $0x190] sm:$0xff] %v288_v50 }
  0x4a   : > { %291 = vst [vmem:[%s2737_s8 + $0x198] sm:$0xff] %v290_v51 }
  0x4b   : > { %293 = vst [vmem:[%s2737_s8 + $0x1a0] sm:$0xff] %v292_v52 }
  0x4c   : > { %295 = vst [vmem:[%s2737_s8 + $0x1a8] sm:$0xff] %v294_v53 }
  0x4d   : > { %297 = vst [vmem:[%s2737_s8 + $0x1b0] sm:$0xff] %v296_v54 }
  0x4e   : > { %299 = vst [vmem:[%s2737_s8 + $0x1b8] sm:$0xff] %v298_v55 }
  0x4f   : > { %301 = vst [vmem:[%s2737_s8 + $0x1c0] sm:$0xff] %v300_v56 }
  0x50   : > { %303 = vst [vmem:[%s2737_s8 + $0x1c8] sm:$0xff] %v302_v57 }
  0x51   : > { %305 = vst [vmem:[%s2737_s8 + $0x1d0] sm:$0xff] %v304_v58 }
  0x52   : > { %307 = vst [vmem:[%s2737_s8 + $0x1d8] sm:$0xff] %v306_v59 }
  0x53   : > { %309 = vst [vmem:[%s2737_s8 + $0x1e0] sm:$0xff] %v308_v60 }
  0x54   : > { %311 = vst [vmem:[%s2737_s8 + $0x1e8] sm:$0xff] %v310_v61 }
  0x55   : > { %313 = vst [vmem:[%s2737_s8 + $0x1f0] sm:$0xff] %v312_v62 }
  0x56   : > { %315 = vst [vmem:[%s2737_s8 + $0x1f8] sm:$0xff] %v314_v63 }
  0x57 PF: > { %p1918_p7 = scmp.ge.s32.totalorder %s2649_s18, 1  ;;  %p332_p8 = scmp.lt.s32.totalorder %s2649_s18, 5 }
  0x59   : > { %p333_p9 = pnand %p1918_p7, %p332_p8 }
  0x5a   : > { %s339_s9 = sand.u32 (!%p333_p9), 1, %s2625_s12   ;;  %s1920_s10 = sshll.u32 (!%p333_p9), %s2633_s14, 6 }
  0x5b   : > { %336 = sbr.rel (%p333_p9) target bundleno = 640 (0x280), region = 51  ;;  %s1919_s11 = sshll.u32 (!%p333_p9), %s339_s9, 9 }
  0x5c   : > { %p379_p10 = scmp.lt.s32.totalorder (!%p333_p9), %s1920_s10, 127  ;;  %s1922_s21 = sshll.u32 (!%p333_p9), %s2637_s15, 5 }
  0x5d   : > { %p391_p11 = scmp.lt.s32.totalorder (!%p333_p9), %s1922_s21, 63  ;;  %s2879_s12 = scalar_lea.vmem (!%p333_p9), [#allocation3], %s1919_s11 }
  0x5e   : > { %p1924_p12 = scmp.ne.s32.totalorder (!%p333_p9), %s2633_s14, 0 }
  0x60   : > { %s3150_s10 = smov (!%p379_p10, %s1920_s10), 127  ;;  %s3152_s21 = smov (!%p391_p11, %s1922_s21), 63 }
  0x61   : > { %s1921_s22 = sshll.u32 %s3150_s10, 2  ;;  %s1923_s27 = sshll.u32 %s3152_s21, 3 }
  0x62   : > { %s2872_s26 = scalar_lea.vmem %s3134_s1, %s1921_s22  ;;  %s2877_s30 = scalar_lea.vmem %s3136_s3, %s1923_s27 }
  0x63   : > { %402 = sbr.rel (%p1924_p12) target bundleno = 137 (0x89), region = 59 }
  0x68   : > { %v2651_v0 = vmov 0.0  }
  0x69   : > { %403 = vst [vmem:[#allocation2 + $0xb0] sm:$0xff] %v2651_v0 }
  0x6a   : > { %404 = vst [vmem:[#allocation2] sm:$0xff] %v2651_v0 }
  0x6b   : > { %405 = vst [vmem:[#allocation2 + $0xd8] sm:$0xff] %v2651_v0 }
  0x6c   : > { %406 = vst [vmem:[#allocation2 + $0x18] sm:$0xff] %v2651_v0 }
  0x6d   : > { %407 = vst [vmem:[#allocation2 + $0x50] sm:$0xff] %v2651_v0 }
  0x6e   : > { %408 = vst [vmem:[#allocation2 + $0x68] sm:$0xff] %v2651_v0 }
  0x6f   : > { %409 = vst [vmem:[#allocation2 + $0x30] sm:$0xff] %v2651_v0 }
  0x70   : > { %410 = vst [vmem:[#allocation2 + $0x48] sm:$0xff] %v2651_v0 }
  0x71   : > { %411 = vst [vmem:[#allocation2 + $0x80] sm:$0xff] %v2651_v0 }
  0x72   : > { %412 = vst [vmem:[#allocation2 + $0x88] sm:$0xff] %v2651_v0 }
  0x73   : > { %413 = vst [vmem:[#allocation2 + $0xe8] sm:$0xff] %v2651_v0 }
  0x74   : > { %414 = vst [vmem:[#allocation2 + $0xb8] sm:$0xff] %v2651_v0 }
  0x75   : > { %415 = vst [vmem:[#allocation2 + $0x60] sm:$0xff] %v2651_v0 }
  0x76   : > { %416 = vst [vmem:[#allocation2 + $0xf0] sm:$0xff] %v2651_v0 }
  0x77   : > { %417 = vst [vmem:[#allocation2 + $0x8] sm:$0xff] %v2651_v0 }
  0x78   : > { %418 = vst [vmem:[#allocation2 + $0x78] sm:$0xff] %v2651_v0 }
  0x79   : > { %419 = vst [vmem:[#allocation2 + $0x38] sm:$0xff] %v2651_v0 }
  0x7a   : > { %420 = vst [vmem:[#allocation2 + $0x58] sm:$0xff] %v2651_v0 }
  0x7b   : > { %421 = vst [vmem:[#allocation2 + $0x40] sm:$0xff] %v2651_v0 }
  0x7c   : > { %422 = vst [vmem:[#allocation2 + $0xc8] sm:$0xff] %v2651_v0 }
  0x7d   : > { %423 = vst [vmem:[#allocation2 + $0xe0] sm:$0xff] %v2651_v0 }
  0x7e   : > { %424 = vst [vmem:[#allocation2 + $0x90] sm:$0xff] %v2651_v0 }
  0x7f   : > { %425 = vst [vmem:[#allocation2 + $0x70] sm:$0xff] %v2651_v0 }
  0x80   : > { %426 = vst [vmem:[#allocation2 + $0xc0] sm:$0xff] %v2651_v0 }
  0x81   : > { %427 = vst [vmem:[#allocation2 + $0xa8] sm:$0xff] %v2651_v0 }
  0x82   : > { %428 = vst [vmem:[#allocation2 + $0xd0] sm:$0xff] %v2651_v0 }
  0x83   : > { %429 = vst [vmem:[#allocation2 + $0x10] sm:$0xff] %v2651_v0 }
  0x84   : > { %430 = vst [vmem:[#allocation2 + $0x28] sm:$0xff] %v2651_v0 }
  0x85   : > { %431 = vst [vmem:[#allocation2 + $0xa0] sm:$0xff] %v2651_v0 }
  0x86   : > { %432 = vst [vmem:[#allocation2 + $0xf8] sm:$0xff] %v2651_v0 }
  0x87   : > { %433 = vst [vmem:[#allocation2 + $0x20] sm:$0xff] %v2651_v0 }
  0x88   : > { %434 = vst [vmem:[#allocation2 + $0x98] sm:$0xff] %v2651_v0 }
  0x89 PF: > { %v2384_v1 = vld [vmem:[%s2872_s26 + $0x38] sm:$0xff]  ;;  %v2383_v5 = vld [vmem:[%s2872_s26 + $0x30] sm:$0xff]  ;;  %v2382_v9 = vld [vmem:[%s2872_s26 + $0x28] sm:$0xff]  ;;  %p2309_p13 = scmp.ne.s32.totalorder %s2633_s14, 1 }
  0x8a   : > { %v2392_v2 = vld [vmem:[%s2872_s26 + $0x78] sm:$0xff]  ;;  %1107 = vmatpush.bf16.msra.mxu0 %v2384_v1  ;;  %v2391_v6 = vld [vmem:[%s2872_s26 + $0x70] sm:$0xff]  ;;  %v2390_v10 = vld [vmem:[%s2872_s26 + $0x68] sm:$0xff] }
  0x8b   : > { %v2400_v3 = vld [vmem:[%s2872_s26 + $0xb8] sm:$0xff]  ;;  %1196 = vmatpush.bf16.msra.mxu1 %v2392_v2  ;;  %v2399_v7 = vld [vmem:[%s2872_s26 + $0xb0] sm:$0xff]  ;;  %v2398_v11 = vld [vmem:[%s2872_s26 + $0xa8] sm:$0xff] }
  0x8c   : > { %v2408_v4 = vld [vmem:[%s2872_s26 + $0xf8] sm:$0xff]  ;;  %1285 = vmatpush.bf16.msra.mxu2 %v2400_v3  ;;  %v2407_v8 = vld [vmem:[%s2872_s26 + $0xf0] sm:$0xff]  ;;  %v2406_v12 = vld [vmem:[%s2872_s26 + $0xe8] sm:$0xff] }
  0x8d   : > { %1374 = vmatpush.bf16.msra.mxu3 %v2408_v4  ;;  %v2381_v13 = vld [vmem:[%s2872_s26 + $0x20] sm:$0xff]  ;;  %v2380_v17 = vld [vmem:[%s2872_s26 + $0x18] sm:$0xff]  ;;  %v2379_v21 = vld [vmem:[%s2872_s26 + $0x10] sm:$0xff] }
  0x8e   : > { %1108 = vmatpush.bf16.msra.mxu0 %v2383_v5  ;;  %v2389_v14 = vld [vmem:[%s2872_s26 + $0x60] sm:$0xff]  ;;  %v2388_v18 = vld [vmem:[%s2872_s26 + $0x58] sm:$0xff]  ;;  %v2387_v22 = vld [vmem:[%s2872_s26 + $0x50] sm:$0xff] }
  0x8f   : > { %1197 = vmatpush.bf16.msra.mxu1 %v2391_v6  ;;  %v2397_v15 = vld [vmem:[%s2872_s26 + $0xa0] sm:$0xff]  ;;  %v2396_v19 = vld [vmem:[%s2872_s26 + $0x98] sm:$0xff]  ;;  %v2395_v23 = vld [vmem:[%s2872_s26 + $0x90] sm:$0xff] }
  0x90   : > { %1286 = vmatpush.bf16.msra.mxu2 %v2399_v7  ;;  %v2405_v16 = vld [vmem:[%s2872_s26 + $0xe0] sm:$0xff]  ;;  %v2404_v20 = vld [vmem:[%s2872_s26 + $0xd8] sm:$0xff]  ;;  %v2403_v24 = vld [vmem:[%s2872_s26 + $0xd0] sm:$0xff] }
  0x91   : > { %1375 = vmatpush.bf16.msra.mxu3 %v2407_v8  ;;  %v2378_v25 = vld [vmem:[%s2872_s26 + $0x8] sm:$0xff]  ;;  %v2377_v29 = vld [vmem:[%s2872_s26] sm:$0xff]  ;;  %v2315_v34 = vld [vmem:[%s2879_s12 + $0xc] sm:$0xf0] }
  0x92   : > { %1109 = vmatpush.bf16.msra.mxu0 %v2382_v9  ;;  %v2386_v26 = vld [vmem:[%s2872_s26 + $0x48] sm:$0xff]  ;;  %v2385_v30 = vld [vmem:[%s2872_s26 + $0x40] sm:$0xff]  ;;  %v1929_v36 = vld [vmem:[%s2879_s12 + $0x10] sm:$0xf0] }
  0x93   : > { %1198 = vmatpush.bf16.msra.mxu1 %v2390_v10  ;;  %v2394_v27 = vld [vmem:[%s2872_s26 + $0x88] sm:$0xff]  ;;  %v2393_v31 = vld [vmem:[%s2872_s26 + $0x80] sm:$0xff]  ;;  %v2316_v38 = vld [vmem:[%s2879_s12 + $0x14] sm:$0xf0] }
  0x94   : > { %1287 = vmatpush.bf16.msra.mxu2 %v2398_v11  ;;  %v2402_v28 = vld [vmem:[%s2872_s26 + $0xc8] sm:$0xff]  ;;  %v2401_v32 = vld [vmem:[%s2872_s26 + $0xc0] sm:$0xff]  ;;  %v1937_v40 = vld [vmem:[%s2879_s12 + $0x18] sm:$0xf0] }
  0x95   : > { %1376 = vmatpush.bf16.msra.mxu3 %v2406_v12  ;;  %v1927_v33 = vld [vmem:[%s2879_s12] sm:$0xf]  ;;  %v2313_v35 = vld [vmem:[%s2879_s12 + $0x4] sm:$0xf]  ;;  %v1935_v37 = vld [vmem:[%s2879_s12 + $0x8] sm:$0xf] }
  0x96   : > { %1110 = vmatpush.bf16.msra.mxu0 %v2381_v13  ;;  %v2314_v39 = vld [vmem:[%s2879_s12 + $0xc] sm:$0xf]  ;;  %v1928_v41 = vor.u32 %v2315_v34, %v1927_v33  ;;  %v1932_v42 = vor.u32 %v2313_v35, %v1929_v36  ;;  %v1936_v43 = vor.u32 %v2316_v38, %v1935_v37  ;;  %v1943_v45 = vld [vmem:[%s2879_s12 + $0x20] sm:$0xf]  ;;  %v2319_v46 = vld [vmem:[%s2879_s12 + $0x2c] sm:$0xf0] }
  0x97   : > { %1199 = vmatpush.bf16.msra.mxu1 %v2389_v14  ;;  %v1940_v44 = vor.u32 %v2314_v39, %v1937_v40  ;;  %v2317_v47 = vld [vmem:[%s2879_s12 + $0x24] sm:$0xf]  ;;  %v1945_v48 = vld [vmem:[%s2879_s12 + $0x30] sm:$0xf0]  ;;  %v1951_v49 = vld [vmem:[%s2879_s12 + $0x28] sm:$0xf]  ;;  %v1944_v53 = vor.u32 %v2319_v46, %v1943_v45 }
  0x98   : > { %1288 = vmatpush.bf16.msra.mxu2 %v2397_v15  ;;  %v2320_v50 = vld [vmem:[%s2879_s12 + $0x34] sm:$0xf0]  ;;  %v2318_v51 = vld [vmem:[%s2879_s12 + $0x2c] sm:$0xf]  ;;  %v1953_v52 = vld [vmem:[%s2879_s12 + $0x38] sm:$0xf0]  ;;  %v1948_v54 = vor.u32 %v2317_v47, %v1945_v48 }
  0x99   : > { %1377 = vmatpush.bf16.msra.mxu3 %v2405_v16  ;;  %v1952_v55 = vor.u32 %v2320_v50, %v1951_v49  ;;  %v1956_v56 = vor.u32 %v2318_v51, %v1953_v52  ;;  %v1959_v57 = vld [vmem:[%s2879_s12 + $0x40] sm:$0xf]  ;;  %v2323_v58 = vld [vmem:[%s2879_s12 + $0x4c] sm:$0xf0]  ;;  %v2321_v59 = vld [vmem:[%s2879_s12 + $0x44] sm:$0xf] }
  0x9a   : > { %1111 = vmatpush.bf16.msra.mxu0 %v2380_v17  ;;  %v1961_v60 = vld [vmem:[%s2879_s12 + $0x50] sm:$0xf0]  ;;  %v1967_v61 = vld [vmem:[%s2879_s12 + $0x48] sm:$0xf]  ;;  %v2324_v62 = vld [vmem:[%s2879_s12 + $0x54] sm:$0xf0]  ;;  %v1960_v1 = vor.u32 %v2323_v58, %v1959_v57 }
  0x9b   : > { %1200 = vmatpush.bf16.msra.mxu1 %v2388_v18  ;;  %v2322_v63 = vld [vmem:[%s2879_s12 + $0x4c] sm:$0xf]  ;;  %v1969_v0 = vld [vmem:[%s2879_s12 + $0x58] sm:$0xf0]  ;;  %v1964_v2 = vor.u32 %v2321_v59, %v1961_v60  ;;  %v1968_v3 = vor.u32 %v2324_v62, %v1967_v61  ;;  %v1975_v5 = vld [vmem:[%s2879_s12 + $0x60] sm:$0xf] }
  0x9c   : > { %1289 = vmatpush.bf16.msra.mxu2 %v2396_v19  ;;  %v1972_v4 = vor.u32 %v2322_v63, %v1969_v0  ;;  %v2327_v6 = vld [vmem:[%s2879_s12 + $0x6c] sm:$0xf0]  ;;  %v2325_v7 = vld [vmem:[%s2879_s12 + $0x64] sm:$0xf]  ;;  %v1977_v8 = vld [vmem:[%s2879_s12 + $0x70] sm:$0xf0] }
  0x9d   : > { %1378 = vmatpush.bf16.msra.mxu3 %v2404_v20  ;;  %v1983_v9 = vld [vmem:[%s2879_s12 + $0x68] sm:$0xf]  ;;  %v2328_v10 = vld [vmem:[%s2879_s12 + $0x74] sm:$0xf0]  ;;  %v2326_v11 = vld [vmem:[%s2879_s12 + $0x6c] sm:$0xf]  ;;  %v1976_v13 = vor.u32 %v2327_v6, %v1975_v5  ;;  %v1980_v14 = vor.u32 %v2325_v7, %v1977_v8 }
  0x9e   : > { %1112 = vmatpush.bf16.msra.mxu0 %v2379_v21  ;;  %v1985_v12 = vld [vmem:[%s2879_s12 + $0x78] sm:$0xf0]  ;;  %v1984_v15 = vor.u32 %v2328_v10, %v1983_v9  ;;  %v1991_v17 = vld [vmem:[%s2879_s12 + $0x80] sm:$0xf]  ;;  %v2331_v18 = vld [vmem:[%s2879_s12 + $0x8c] sm:$0xf0] }
  0x9f   : > { %1201 = vmatpush.bf16.msra.mxu1 %v2387_v22  ;;  %v1988_v16 = vor.u32 %v2326_v11, %v1985_v12  ;;  %v2329_v19 = vld [vmem:[%s2879_s12 + $0x84] sm:$0xf]  ;;  %v1993_v20 = vld [vmem:[%s2879_s12 + $0x90] sm:$0xf0]  ;;  %v1999_v21 = vld [vmem:[%s2879_s12 + $0x88] sm:$0xf] }
  0xa0   : > { %1290 = vmatpush.bf16.msra.mxu2 %v2395_v23  ;;  %v2332_v22 = vld [vmem:[%s2879_s12 + $0x94] sm:$0xf0]  ;;  %v2330_v23 = vld [vmem:[%s2879_s12 + $0x8c] sm:$0xf]  ;;  %v2015_v33 = vld [vmem:[%s2879_s12 + $0xa8] sm:$0xf] }
  0xa1   : > { %1379 = vmatpush.bf16.msra.mxu3 %v2403_v24  ;;  %v2001_v24 = vld [vmem:[%s2879_s12 + $0x98] sm:$0xf0]  ;;  %v2336_v34 = vld [vmem:[%s2879_s12 + $0xb4] sm:$0xf0]  ;;  %v2334_v35 = vld [vmem:[%s2879_s12 + $0xac] sm:$0xf] }
  0xa2   : > { %1113 = vmatpush.bf16.msra.mxu0 %v2378_v25  ;;  %v1992_v25 = vor.u32 %v2331_v18, %v1991_v17  ;;  %v2017_v36 = vld [vmem:[%s2879_s12 + $0xb8] sm:$0xf0]  ;;  %v2016_v39 = vor.u32 %v2336_v34, %v2015_v33  ;;  %v2031_v45 = vld [vmem:[%s2879_s12 + $0xc8] sm:$0xf]  ;;  %v2340_v46 = vld [vmem:[%s2879_s12 + $0xd4] sm:$0xf0] }
  0xa3   : > { %1202 = vmatpush.bf16.msra.mxu1 %v2386_v26  ;;  %v1996_v26 = vor.u32 %v2329_v19, %v1993_v20  ;;  %v2020_v40 = vor.u32 %v2334_v35, %v2017_v36  ;;  %v2338_v47 = vld [vmem:[%s2879_s12 + $0xcc] sm:$0xf]  ;;  %v2033_v48 = vld [vmem:[%s2879_s12 + $0xd8] sm:$0xf0]  ;;  %v2032_v51 = vor.u32 %v2340_v46, %v2031_v45  ;;  %v2047_v57 = vld [vmem:[%s2879_s12 + $0xe8] sm:$0xf] }
  0xa4   : > { %1291 = vmatpush.bf16.msra.mxu2 %v2394_v27  ;;  %v2000_v27 = vor.u32 %v2332_v22, %v1999_v21  ;;  %v2036_v52 = vor.u32 %v2338_v47, %v2033_v48  ;;  %v2344_v58 = vld [vmem:[%s2879_s12 + $0xf4] sm:$0xf0]  ;;  %v2342_v59 = vld [vmem:[%s2879_s12 + $0xec] sm:$0xf]  ;;  %v2049_v60 = vld [vmem:[%s2879_s12 + $0xf8] sm:$0xf0] }
  0xa5   : > { %1380 = vmatpush.bf16.msra.mxu3 %v2402_v28  ;;  %v2004_v28 = vor.u32 %v2330_v23, %v2001_v24  ;;  %v2048_v63 = vor.u32 %v2344_v58, %v2047_v57  ;;  %v2052_v0 = vor.u32 %v2342_v59, %v2049_v60  ;;  %v2063_v5 = vld [vmem:[%s2879_s12 + $0x108] sm:$0xf]  ;;  %v2348_v6 = vld [vmem:[%s2879_s12 + $0x114] sm:$0xf0]  ;;  %v2346_v7 = vld [vmem:[%s2879_s12 + $0x10c] sm:$0xf] }
  0xa6   : > { %1114 = vmatpush.bf16.msra.mxu0 %v2377_v29  ;;  %v2007_v29 = vld [vmem:[%s2879_s12 + $0xa0] sm:$0xf]  ;;  %v2065_v8 = vld [vmem:[%s2879_s12 + $0x118] sm:$0xf0]  ;;  %v435_v21 = vld [vmem:[#allocation2 + $0xb0] sm:$0xff] }
  0xa7   : > { %1203 = vmatpush.bf16.msra.mxu1 %v2385_v30  ;;  %v2335_v30 = vld [vmem:[%s2879_s12 + $0xac] sm:$0xf0]  ;;  %v2071_v23 = vld [vmem:[%s2879_s12 + $0x120] sm:$0xf]  ;;  %v2089_v57 = vld [vmem:[%s2879_s12 + $0x150] sm:$0xf0] }
  0xa8   : > { %1292 = vmatpush.bf16.msra.mxu2 %v2393_v31  ;;  %v2333_v31 = vld [vmem:[%s2879_s12 + $0xa4] sm:$0xf]  ;;  %v2008_v37 = vor.u32 %v2335_v30, %v2007_v29  ;;  %v2351_v24 = vld [vmem:[%s2879_s12 + $0x12c] sm:$0xf0]  ;;  %v2352_v29 = vld [vmem:[%s2879_s12 + $0x134] sm:$0xf0] }
  0xa9   : > { %1381 = vmatpush.bf16.msra.mxu3 %v2401_v32  ;;  %1115 = vmatmul.bf16.vlgmr.msra.gmra.mxu0 %v1928_v41  ;;  %v2009_v32 = vld [vmem:[%s2879_s12 + $0xb0] sm:$0xf0]  ;;  %v2023_v41 = vld [vmem:[%s2879_s12 + $0xc0] sm:$0xf]  ;;  %v2350_v30 = vld [vmem:[%s2879_s12 + $0x12c] sm:$0xf]  ;;  %v2072_v35 = vor.u32 %v2351_v24, %v2071_v23 }
  0xaa   : > { %1204 = vmatmul.bf16.vlgmr.msra.gmra.mxu1 %v1932_v42  ;;  %v2012_v38 = vor.u32 %v2333_v31, %v2009_v32  ;;  %v2339_v42 = vld [vmem:[%s2879_s12 + $0xcc] sm:$0xf0]  ;;  %v2081_v31 = vld [vmem:[%s2879_s12 + $0x138] sm:$0xf0]  ;;  %v2095_v58 = vld [vmem:[%s2879_s12 + $0x148] sm:$0xf] }
  0xab   : > { %1293 = vmatmul.bf16.vlgmr.msra.gmra.mxu2 %v1936_v43  ;;  %v2337_v43 = vld [vmem:[%s2879_s12 + $0xc4] sm:$0xf]  ;;  %v2024_v49 = vor.u32 %v2339_v42, %v2023_v41  ;;  %v2084_v41 = vor.u32 %v2350_v30, %v2081_v31  ;;  %v2356_v59 = vld [vmem:[%s2879_s12 + $0x154] sm:$0xf0]  ;;  %v2354_v60 = vld [vmem:[%s2879_s12 + $0x14c] sm:$0xf] }
  0xac   : > { %1382 = vmatmul.bf16.vlgmr.msra.gmra.mxu3 %v1940_v44  ;;  %v2025_v44 = vld [vmem:[%s2879_s12 + $0xd0] sm:$0xf0]  ;;  %v436_v42 = vld [vmem:[#allocation2] sm:$0xff]  ;;  %v2111_v24 = vld [vmem:[%s2879_s12 + $0x168] sm:$0xf] }
  0xad   : > { %v2028_v50 = vor.u32 %v2337_v43, %v2025_v44  ;;  %v2105_v23 = vld [vmem:[%s2879_s12 + $0x170] sm:$0xf0] }
  0xb9   : > { %1120 = vmatmul.bf16.gmra.mxu0 %v1944_v53  ;;  %v2039_v53 = vld [vmem:[%s2879_s12 + $0xe0] sm:$0xf] }
  0xba   : > { %1209 = vmatmul.bf16.gmra.mxu1 %v1948_v54  ;;  %v2343_v54 = vld [vmem:[%s2879_s12 + $0xec] sm:$0xf0] }
  0xbb   : > { %1298 = vmatmul.bf16.gmra.mxu2 %v1952_v55  ;;  %v2341_v55 = vld [vmem:[%s2879_s12 + $0xe4] sm:$0xf]  ;;  %v2040_v61 = vor.u32 %v2343_v54, %v2039_v53  ;;  %v2087_v53 = vld [vmem:[%s2879_s12 + $0x140] sm:$0xf]  ;;  %v2355_v54 = vld [vmem:[%s2879_s12 + $0x14c] sm:$0xf0] }
  0xbc   : > { %1387 = vmatmul.bf16.gmra.mxu3 %v1956_v56  ;;  %v2041_v56 = vld [vmem:[%s2879_s12 + $0xf0] sm:$0xf0] }
  0xbd   : > { %v2044_v62 = vor.u32 %v2341_v55, %v2041_v56  ;;  %v2353_v56 = vld [vmem:[%s2879_s12 + $0x144] sm:$0xf] }
  0xc9   : > { %1125 = vmatmul.bf16.gmra.mxu0 %v1960_v1  ;;  %v2055_v1 = vld [vmem:[%s2879_s12 + $0x100] sm:$0xf] }
  0xca   : > { %1214 = vmatmul.bf16.gmra.mxu1 %v1964_v2  ;;  %v2347_v2 = vld [vmem:[%s2879_s12 + $0x10c] sm:$0xf0] }
  0xcb   : > { %1303 = vmatmul.bf16.gmra.mxu2 %v1968_v3  ;;  %v2345_v3 = vld [vmem:[%s2879_s12 + $0x104] sm:$0xf]  ;;  %v2056_v9 = vor.u32 %v2347_v2, %v2055_v1  ;;  %v2088_v1 = vor.u32 %v2355_v54, %v2087_v53  ;;  %v2092_v2 = vor.u32 %v2353_v56, %v2089_v57  ;;  %v2121_v53 = vld [vmem:[%s2879_s12 + $0x190] sm:$0xf0]  ;;  %v2127_v54 = vld [vmem:[%s2879_s12 + $0x188] sm:$0xf] }
  0xcc   : > { %1392 = vmatmul.bf16.gmra.mxu3 %v1972_v4  ;;  %v2057_v4 = vld [vmem:[%s2879_s12 + $0x110] sm:$0xf0]  ;;  %v2362_v56 = vld [vmem:[%s2879_s12 + $0x18c] sm:$0xf]  ;;  %v2129_v57 = vld [vmem:[%s2879_s12 + $0x198] sm:$0xf0] }
  0xcd   : > { %v2060_v10 = vor.u32 %v2345_v3, %v2057_v4 }
  0xd9   : > { %1130 = vmatmul.bf16.gmra.mxu0 %v1976_v13  ;;  %v2064_v13 = vor.u32 %v2348_v6, %v2063_v5  ;;  %v2096_v6 = vor.u32 %v2356_v59, %v2095_v58 }
  0xda   : > { %1219 = vmatmul.bf16.gmra.mxu1 %v1980_v14  ;;  %v2068_v14 = vor.u32 %v2346_v7, %v2065_v8  ;;  %v438_v8 = vld [vmem:[#allocation2 + $0x18] sm:$0xff] }
  0xdb   : > { %1308 = vmatmul.bf16.gmra.mxu2 %v1984_v15 }
  0xdc   : > { %1397 = vmatmul.bf16.gmra.mxu3 %v1988_v16 }
  0xe9   : > { %1135 = vmatmul.bf16.gmra.mxu0 %v1992_v25 }
  0xea   : > { %1224 = vmatmul.bf16.gmra.mxu1 %v1996_v26  ;;  %v2349_v26 = vld [vmem:[%s2879_s12 + $0x124] sm:$0xf] }
  0xeb   : > { %1313 = vmatmul.bf16.gmra.mxu2 %v2000_v27  ;;  %v2073_v27 = vld [vmem:[%s2879_s12 + $0x130] sm:$0xf0] }
  0xec   : > { %1402 = vmatmul.bf16.gmra.mxu3 %v2004_v28  ;;  %v2079_v28 = vld [vmem:[%s2879_s12 + $0x128] sm:$0xf]  ;;  %v2076_v36 = vor.u32 %v2349_v26, %v2073_v27  ;;  %v2358_v26 = vld [vmem:[%s2879_s12 + $0x16c] sm:$0xf]  ;;  %v2113_v27 = vld [vmem:[%s2879_s12 + $0x178] sm:$0xf0] }
  0xf9   : > { %1140 = vmatmul.bf16.gmra.mxu0 %v2008_v37 }
  0xfa   : > { %1229 = vmatmul.bf16.gmra.mxu1 %v2012_v38 }
  0xfb   : > { %1318 = vmatmul.bf16.gmra.mxu2 %v2016_v39 }
  0xfc   : > { %1407 = vmatmul.bf16.gmra.mxu3 %v2020_v40  ;;  %v2080_v40 = vor.u32 %v2352_v29, %v2079_v28 }
 0x109   : > { %1145 = vmatmul.bf16.gmra.mxu0 %v2024_v49 }
 0x10a   : > { %1234 = vmatmul.bf16.gmra.mxu1 %v2028_v50 }
 0x10b   : > { %1323 = vmatmul.bf16.gmra.mxu2 %v2032_v51  ;;  %v437_v51 = vld [vmem:[#allocation2 + $0xd8] sm:$0xff] }
 0x10c   : > { %1412 = vmatmul.bf16.gmra.mxu3 %v2036_v52 }
 0x119   : > { %1150 = vmatmul.bf16.gmra.mxu0 %v2040_v61  ;;  %v2097_v61 = vld [vmem:[%s2879_s12 + $0x158] sm:$0xf0] }
 0x11a   : > { %1239 = vmatmul.bf16.gmra.mxu1 %v2044_v62  ;;  %v2100_v7 = vor.u32 %v2354_v60, %v2097_v61 }
 0x11b   : > { %1328 = vmatmul.bf16.gmra.mxu2 %v2048_v63 }
 0x11c   : > { %1417 = vmatmul.bf16.gmra.mxu3 %v2052_v0 }
 0x126   : > { %v1116_v11 = vpop.f32.mrf.mxu0 }
 0x127   : > { %v1205_v12 = vpop.f32.mrf.mxu1 }
 0x128   : > { %v1206_v15 = vadd.f32 %v1205_v12, %v1116_v11 }
 0x129   : > { %1155 = vmatmul.bf16.gmra.mxu0 %v2056_v9 }
 0x12a   : > { %1244 = vmatmul.bf16.gmra.mxu1 %v2060_v10 }
 0x12b   : > { %1333 = vmatmul.bf16.gmra.mxu2 %v2064_v13 }
 0x12c   : > { %1422 = vmatmul.bf16.gmra.mxu3 %v2068_v14 }
 0x12e   : > { %v1294_v16 = vpop.f32.mrf.mxu2  ;;  %v1118_v19 = vpop.f32.mrf.mxu0 }
 0x12f   : > { %v1383_v17 = vpop.f32.mrf.mxu3  ;;  %v1295_v18 = vadd.f32 %v1294_v16, %v1206_v15  ;;  %v1207_v20 = vpop.f32.mrf.mxu1 }
 0x130   : > { %v1208_v32 = vadd.f32 %v1207_v20, %v1118_v19  ;;  %v2103_v19 = vld [vmem:[%s2879_s12 + $0x160] sm:$0xf]  ;;  %v2359_v20 = vld [vmem:[%s2879_s12 + $0x16c] sm:$0xf0] }
 0x131   : > { %v1384_v22 = vadd.f32 %v1383_v17, %v1295_v18  ;;  %v439_v17 = vld [vmem:[#allocation2 + $0x50] sm:$0xff]  ;;  %v2104_v31 = vor.u32 %v2359_v20, %v2103_v19  ;;  %v2143_v20 = vld [vmem:[%s2879_s12 + $0x1a8] sm:$0xf] }
 0x132   : > { %v2137_v19 = vld [vmem:[%s2879_s12 + $0x1b0] sm:$0xf0] }
 0x133   : > { %v1463_v25 = vadd.f32 %v1384_v22, %v435_v21  ;;  %v2357_v22 = vld [vmem:[%s2879_s12 + $0x164] sm:$0xf] }
 0x135   : > { %1495 = vst [vmem:[#allocation2 + $0xb0] sm:$0xff] %v1463_v25  ;;  %v2360_v25 = vld [vmem:[%s2879_s12 + $0x174] sm:$0xf0] }
 0x136   : > { %v1296_v33 = vpop.f32.mrf.mxu2  ;;  %v1121_v38 = vpop.f32.mrf.mxu0 }
 0x137   : > { %v1385_v34 = vpop.f32.mrf.mxu3  ;;  %v1297_v37 = vadd.f32 %v1296_v33, %v1208_v32  ;;  %v1210_v39 = vpop.f32.mrf.mxu1  ;;  %v2108_v32 = vor.u32 %v2357_v22, %v2105_v23  ;;  %v2366_v22 = vld [vmem:[%s2879_s12 + $0x1ac] sm:$0xf]  ;;  %v2145_v23 = vld [vmem:[%s2879_s12 + $0x1b8] sm:$0xf0] }
 0x138   : > { %v1211_v45 = vadd.f32 %v1210_v39, %v1121_v38  ;;  %v440_v38 = vld [vmem:[#allocation2 + $0x68] sm:$0xff] }
 0x139   : > { %v1386_v43 = vadd.f32 %v1385_v34, %v1297_v37  ;;  %1160 = vmatmul.bf16.gmra.mxu0 %v2072_v35  ;;  %v2116_v37 = vor.u32 %v2358_v26, %v2113_v27 }
 0x13a   : > { %1249 = vmatmul.bf16.gmra.mxu1 %v2076_v36  ;;  %v2112_v36 = vor.u32 %v2360_v25, %v2111_v24 }
 0x13b   : > { %v1464_v44 = vadd.f32 %v1386_v43, %v436_v42  ;;  %1338 = vmatmul.bf16.gmra.mxu2 %v2080_v40 }
 0x13c   : > { %1427 = vmatmul.bf16.gmra.mxu3 %v2084_v41 }
 0x13d   : > { %1496 = vst [vmem:[#allocation2] sm:$0xff] %v1464_v44 }
 0x13e   : > { %v1299_v46 = vpop.f32.mrf.mxu2  ;;  %v1123_v49 = vpop.f32.mrf.mxu0 }
 0x13f   : > { %v1388_v47 = vpop.f32.mrf.mxu3  ;;  %v1300_v48 = vadd.f32 %v1299_v46, %v1211_v45  ;;  %v1212_v50 = vpop.f32.mrf.mxu1 }
 0x140   : > { %v1213_v62 = vadd.f32 %v1212_v50, %v1123_v49  ;;  %v2119_v49 = vld [vmem:[%s2879_s12 + $0x180] sm:$0xf]  ;;  %v2363_v50 = vld [vmem:[%s2879_s12 + $0x18c] sm:$0xf0] }
 0x141   : > { %v1389_v52 = vadd.f32 %v1388_v47, %v1300_v48  ;;  %v441_v47 = vld [vmem:[#allocation2 + $0x30] sm:$0xff]  ;;  %v2120_v61 = vor.u32 %v2363_v50, %v2119_v49  ;;  %v2159_v50 = vld [vmem:[%s2879_s12 + $0x1c8] sm:$0xf] }
 0x142   : > { %v2153_v49 = vld [vmem:[%s2879_s12 + $0x1d0] sm:$0xf0] }
 0x143   : > { %v1465_v55 = vadd.f32 %v1389_v52, %v437_v51  ;;  %v2361_v52 = vld [vmem:[%s2879_s12 + $0x184] sm:$0xf] }
 0x145   : > { %1497 = vst [vmem:[#allocation2 + $0xd8] sm:$0xff] %v1465_v55  ;;  %v2364_v55 = vld [vmem:[%s2879_s12 + $0x194] sm:$0xf0] }
 0x146   : > { %v1301_v63 = vpop.f32.mrf.mxu2  ;;  %v1126_v4 = vpop.f32.mrf.mxu0 }
 0x147   : > { %v1390_v0 = vpop.f32.mrf.mxu3  ;;  %v1302_v3 = vadd.f32 %v1301_v63, %v1213_v62  ;;  %v1215_v5 = vpop.f32.mrf.mxu1  ;;  %v2124_v62 = vor.u32 %v2361_v52, %v2121_v53  ;;  %v2370_v52 = vld [vmem:[%s2879_s12 + $0x1cc] sm:$0xf]  ;;  %v2161_v53 = vld [vmem:[%s2879_s12 + $0x1d8] sm:$0xf0] }
 0x148   : > { %v1216_v11 = vadd.f32 %v1215_v5, %v1126_v4  ;;  %v442_v4 = vld [vmem:[#allocation2 + $0x48] sm:$0xff] }
 0x149   : > { %v1391_v9 = vadd.f32 %v1390_v0, %v1302_v3  ;;  %1165 = vmatmul.bf16.gmra.mxu0 %v2088_v1  ;;  %v2132_v3 = vor.u32 %v2362_v56, %v2129_v57 }
 0x14a   : > { %1254 = vmatmul.bf16.gmra.mxu1 %v2092_v2  ;;  %v2128_v2 = vor.u32 %v2364_v55, %v2127_v54 }
 0x14b   : > { %v1466_v10 = vadd.f32 %v1391_v9, %v438_v8  ;;  %1343 = vmatmul.bf16.gmra.mxu2 %v2096_v6 }
 0x14c   : > { %1432 = vmatmul.bf16.gmra.mxu3 %v2100_v7 }
 0x14d   : > { %1498 = vst [vmem:[#allocation2 + $0x18] sm:$0xff] %v1466_v10 }
 0x14e   : > { %v1304_v12 = vpop.f32.mrf.mxu2  ;;  %v1128_v15 = vpop.f32.mrf.mxu0 }
 0x14f   : > { %v1393_v13 = vpop.f32.mrf.mxu3  ;;  %v1305_v14 = vadd.f32 %v1304_v12, %v1216_v11  ;;  %v1217_v16 = vpop.f32.mrf.mxu1 }
 0x150   : > { %v1218_v28 = vadd.f32 %v1217_v16, %v1128_v15  ;;  %v2135_v15 = vld [vmem:[%s2879_s12 + $0x1a0] sm:$0xf]  ;;  %v2367_v16 = vld [vmem:[%s2879_s12 + $0x1ac] sm:$0xf0] }
 0x151   : > { %v1394_v18 = vadd.f32 %v1393_v13, %v1305_v14  ;;  %v443_v13 = vld [vmem:[#allocation2 + $0x80] sm:$0xff]  ;;  %v2136_v27 = vor.u32 %v2367_v16, %v2135_v15  ;;  %v2169_v15 = vld [vmem:[%s2879_s12 + $0x1f0] sm:$0xf0]  ;;  %v2175_v16 = vld [vmem:[%s2879_s12 + $0x1e8] sm:$0xf] }
 0x153   : > { %v1467_v21 = vadd.f32 %v1394_v18, %v439_v17  ;;  %v2365_v18 = vld [vmem:[%s2879_s12 + $0x1a4] sm:$0xf] }
 0x155   : > { %1499 = vst [vmem:[#allocation2 + $0x50] sm:$0xff] %v1467_v21  ;;  %v2368_v21 = vld [vmem:[%s2879_s12 + $0x1b4] sm:$0xf0] }
 0x156   : > { %v1306_v29 = vpop.f32.mrf.mxu2  ;;  %v1131_v34 = vpop.f32.mrf.mxu0 }
 0x157   : > { %v1395_v30 = vpop.f32.mrf.mxu3  ;;  %v1307_v33 = vadd.f32 %v1306_v29, %v1218_v28  ;;  %v1220_v35 = vpop.f32.mrf.mxu1  ;;  %v2140_v28 = vor.u32 %v2365_v18, %v2137_v19  ;;  %v2374_v18 = vld [vmem:[%s2879_s12 + $0x1ec] sm:$0xf]  ;;  %v2177_v19 = vld [vmem:[%s2879_s12 + $0x1f8] sm:$0xf0] }
 0x158   : > { %v1221_v41 = vadd.f32 %v1220_v35, %v1131_v34  ;;  %v444_v34 = vld [vmem:[#allocation2 + $0x88] sm:$0xff] }
 0x159   : > { %v1396_v39 = vadd.f32 %v1395_v30, %v1307_v33  ;;  %1170 = vmatmul.bf16.gmra.mxu0 %v2104_v31  ;;  %v2148_v33 = vor.u32 %v2366_v22, %v2145_v23 }
 0x15a   : > { %1259 = vmatmul.bf16.gmra.mxu1 %v2108_v32  ;;  %v2144_v32 = vor.u32 %v2368_v21, %v2143_v20 }
 0x15b   : > { %v1468_v40 = vadd.f32 %v1396_v39, %v440_v38  ;;  %1348 = vmatmul.bf16.gmra.mxu2 %v2112_v36 }
 0x15c   : > { %1437 = vmatmul.bf16.gmra.mxu3 %v2116_v37 }
 0x15d   : > { %1500 = vst [vmem:[#allocation2 + $0x68] sm:$0xff] %v1468_v40 }
 0x15e   : > { %v1309_v42 = vpop.f32.mrf.mxu2  ;;  %v1133_v45 = vpop.f32.mrf.mxu0 }
 0x15f   : > { %v1398_v43 = vpop.f32.mrf.mxu3  ;;  %v1310_v44 = vadd.f32 %v1309_v42, %v1221_v41  ;;  %v1222_v46 = vpop.f32.mrf.mxu1 }
 0x160   : > { %v1223_v58 = vadd.f32 %v1222_v46, %v1133_v45  ;;  %v2151_v45 = vld [vmem:[%s2879_s12 + $0x1c0] sm:$0xf]  ;;  %v2371_v46 = vld [vmem:[%s2879_s12 + $0x1cc] sm:$0xf0] }
 0x161   : > { %v1399_v48 = vadd.f32 %v1398_v43, %v1310_v44  ;;  %v445_v43 = vld [vmem:[#allocation2 + $0xe8] sm:$0xff]  ;;  %v2152_v57 = vor.u32 %v2371_v46, %v2151_v45 }
 0x163   : > { %v1469_v51 = vadd.f32 %v1399_v48, %v441_v47  ;;  %v2369_v48 = vld [vmem:[%s2879_s12 + $0x1c4] sm:$0xf] }
 0x165   : > { %1501 = vst [vmem:[#allocation2 + $0x30] sm:$0xff] %v1469_v51  ;;  %v2372_v51 = vld [vmem:[%s2879_s12 + $0x1d4] sm:$0xf0] }
 0x166   : > { %v1311_v59 = vpop.f32.mrf.mxu2  ;;  %v1136_v0 = vpop.f32.mrf.mxu0 }
 0x167   : > { %v1400_v60 = vpop.f32.mrf.mxu3  ;;  %v1312_v63 = vadd.f32 %v1311_v59, %v1223_v58  ;;  %v1225_v1 = vpop.f32.mrf.mxu1  ;;  %v2156_v58 = vor.u32 %v2369_v48, %v2153_v49  ;;  %v450_v48 = vld [vmem:[#allocation2 + $0x78] sm:$0xff] }
 0x168   : > { %v1226_v7 = vadd.f32 %v1225_v1, %v1136_v0  ;;  %v446_v0 = vld [vmem:[#allocation2 + $0xb8] sm:$0xff] }
 0x169   : > { %v1401_v5 = vadd.f32 %v1400_v60, %v1312_v63  ;;  %1175 = vmatmul.bf16.gmra.mxu0 %v2120_v61  ;;  %v2164_v63 = vor.u32 %v2370_v52, %v2161_v53 }
 0x16a   : > { %1264 = vmatmul.bf16.gmra.mxu1 %v2124_v62  ;;  %v2160_v62 = vor.u32 %v2372_v51, %v2159_v50 }
 0x16b   : > { %v1470_v6 = vadd.f32 %v1401_v5, %v442_v4  ;;  %1353 = vmatmul.bf16.gmra.mxu2 %v2128_v2 }
 0x16c   : > { %1442 = vmatmul.bf16.gmra.mxu3 %v2132_v3 }
 0x16d   : > { %1502 = vst [vmem:[#allocation2 + $0x48] sm:$0xff] %v1470_v6 }
 0x16e   : > { %v1314_v8 = vpop.f32.mrf.mxu2  ;;  %v1138_v11 = vpop.f32.mrf.mxu0 }
 0x16f   : > { %v1403_v9 = vpop.f32.mrf.mxu3  ;;  %v1315_v10 = vadd.f32 %v1314_v8, %v1226_v7  ;;  %v1227_v12 = vpop.f32.mrf.mxu1 }
 0x170   : > { %v1228_v24 = vadd.f32 %v1227_v12, %v1138_v11  ;;  %v2167_v11 = vld [vmem:[%s2879_s12 + $0x1e0] sm:$0xf]  ;;  %v2375_v12 = vld [vmem:[%s2879_s12 + $0x1ec] sm:$0xf0] }
 0x171   : > { %v1404_v14 = vadd.f32 %v1403_v9, %v1315_v10  ;;  %v447_v9 = vld [vmem:[#allocation2 + $0x60] sm:$0xff]  ;;  %v2168_v23 = vor.u32 %v2375_v12, %v2167_v11 }
 0x172   : > { %v453_v11 = vld [vmem:[#allocation2 + $0x40] sm:$0xff] }
 0x173   : > { %v1471_v17 = vadd.f32 %v1404_v14, %v443_v13  ;;  %v2373_v14 = vld [vmem:[%s2879_s12 + $0x1e4] sm:$0xf] }
 0x175   : > { %1503 = vst [vmem:[#allocation2 + $0x80] sm:$0xff] %v1471_v17  ;;  %v2376_v17 = vld [vmem:[%s2879_s12 + $0x1f4] sm:$0xf0] }
 0x176   : > { %v1316_v25 = vpop.f32.mrf.mxu2  ;;  %v1141_v30 = vpop.f32.mrf.mxu0 }
 0x177   : > { %v1405_v26 = vpop.f32.mrf.mxu3  ;;  %v1317_v29 = vadd.f32 %v1316_v25, %v1228_v24  ;;  %v1230_v31 = vpop.f32.mrf.mxu1  ;;  %v2172_v24 = vor.u32 %v2373_v14, %v2169_v15 }
 0x178   : > { %v1231_v37 = vadd.f32 %v1230_v31, %v1141_v30  ;;  %v448_v30 = vld [vmem:[#allocation2 + $0xf0] sm:$0xff] }
 0x179   : > { %v1406_v35 = vadd.f32 %v1405_v26, %v1317_v29  ;;  %1180 = vmatmul.bf16.gmra.mxu0 %v2136_v27  ;;  %v2180_v29 = vor.u32 %v2374_v18, %v2177_v19 }
 0x17a   : > { %1269 = vmatmul.bf16.gmra.mxu1 %v2140_v28  ;;  %v2176_v28 = vor.u32 %v2376_v17, %v2175_v16 }
 0x17b   : > { %v1472_v36 = vadd.f32 %v1406_v35, %v444_v34  ;;  %1358 = vmatmul.bf16.gmra.mxu2 %v2144_v32 }
 0x17c   : > { %1447 = vmatmul.bf16.gmra.mxu3 %v2148_v33 }
 0x17d   : > { %1504 = vst [vmem:[#allocation2 + $0x88] sm:$0xff] %v1472_v36 }
 0x17e   : > { %v1319_v38 = vpop.f32.mrf.mxu2  ;;  %v1143_v41 = vpop.f32.mrf.mxu0 }
 0x17f   : > { %v1408_v39 = vpop.f32.mrf.mxu3  ;;  %v1320_v40 = vadd.f32 %v1319_v38, %v1231_v37  ;;  %v1232_v42 = vpop.f32.mrf.mxu1 }
 0x180   : > { %v1233_v54 = vadd.f32 %v1232_v42, %v1143_v41 }
 0x181   : > { %v1409_v44 = vadd.f32 %v1408_v39, %v1320_v40  ;;  %v449_v39 = vld [vmem:[#allocation2 + $0x8] sm:$0xff] }
 0x183   : > { %v1473_v47 = vadd.f32 %v1409_v44, %v445_v43 }
 0x185   : > { %1505 = vst [vmem:[#allocation2 + $0xe8] sm:$0xff] %v1473_v47 }
 0x186   : > { %v1321_v55 = vpop.f32.mrf.mxu2  ;;  %v1146_v60 = vpop.f32.mrf.mxu0 }
 0x187   : > { %v1410_v56 = vpop.f32.mrf.mxu3  ;;  %v1322_v59 = vadd.f32 %v1321_v55, %v1233_v54  ;;  %v1235_v61 = vpop.f32.mrf.mxu1 }
 0x188   : > { %v1236_v3 = vadd.f32 %v1235_v61, %v1146_v60 }
 0x189   : > { %v1411_v1 = vadd.f32 %v1410_v56, %v1322_v59  ;;  %1185 = vmatmul.bf16.gmra.mxu0 %v2152_v57  ;;  %v451_v57 = vld [vmem:[#allocation2 + $0x38] sm:$0xff] }
 0x18a   : > { %1274 = vmatmul.bf16.gmra.mxu1 %v2156_v58 }
 0x18b   : > { %v1474_v2 = vadd.f32 %v1411_v1, %v446_v0  ;;  %1363 = vmatmul.bf16.gmra.mxu2 %v2160_v62 }
 0x18c   : > { %1452 = vmatmul.bf16.gmra.mxu3 %v2164_v63 }
 0x18d   : > { %1506 = vst [vmem:[#allocation2 + $0xb8] sm:$0xff] %v1474_v2  ;;  %v452_v2 = vld [vmem:[#allocation2 + $0x58] sm:$0xff] }
 0x18e   : > { %v1324_v4 = vpop.f32.mrf.mxu2  ;;  %v1148_v7 = vpop.f32.mrf.mxu0 }
 0x18f   : > { %v1413_v5 = vpop.f32.mrf.mxu3  ;;  %v1325_v6 = vadd.f32 %v1324_v4, %v1236_v3  ;;  %v1237_v8 = vpop.f32.mrf.mxu1 }
 0x190   : > { %v1238_v20 = vadd.f32 %v1237_v8, %v1148_v7 }
 0x191   : > { %v1414_v10 = vadd.f32 %v1413_v5, %v1325_v6 }
 0x193   : > { %v1475_v13 = vadd.f32 %v1414_v10, %v447_v9 }
 0x195   : > { %1507 = vst [vmem:[#allocation2 + $0x60] sm:$0xff] %v1475_v13 }
 0x196   : > { %v1326_v21 = vpop.f32.mrf.mxu2  ;;  %v1151_v26 = vpop.f32.mrf.mxu0 }
 0x197   : > { %v1415_v22 = vpop.f32.mrf.mxu3  ;;  %v1327_v25 = vadd.f32 %v1326_v21, %v1238_v20  ;;  %v1240_v27 = vpop.f32.mrf.mxu1  ;;  %v454_v20 = vld [vmem:[#allocation2 + $0xc8] sm:$0xff] }
 0x198   : > { %v1241_v33 = vadd.f32 %v1240_v27, %v1151_v26 }
 0x199   : > { %v1416_v31 = vadd.f32 %v1415_v22, %v1327_v25  ;;  %1190 = vmatmul.bf16.gmra.mxu0 %v2168_v23 }
 0x19a   : > { %1279 = vmatmul.bf16.gmra.mxu1 %v2172_v24 }
 0x19b   : > { %v1476_v32 = vadd.f32 %v1416_v31, %v448_v30  ;;  %1368 = vmatmul.bf16.gmra.mxu2 %v2176_v28 }
 0x19c   : > { %1457 = vmatmul.bf16.gmra.mxu3 %v2180_v29  ;;  %v455_v29 = vld [vmem:[#allocation2 + $0xe0] sm:$0xff] }
 0x19d   : > { %1508 = vst [vmem:[#allocation2 + $0xf0] sm:$0xff] %v1476_v32 }
 0x19e   : > { %v1329_v34 = vpop.f32.mrf.mxu2  ;;  %v1153_v37 = vpop.f32.mrf.mxu0 }
 0x19f   : > { %v1418_v35 = vpop.f32.mrf.mxu3  ;;  %v1330_v36 = vadd.f32 %v1329_v34, %v1241_v33  ;;  %v1242_v38 = vpop.f32.mrf.mxu1 }
 0x1a0   : > { %v1243_v42 = vadd.f32 %v1242_v38, %v1153_v37  ;;  %v456_v38 = vld [vmem:[#allocation2 + $0x90] sm:$0xff] }
 0x1a1   : > { %v1419_v40 = vadd.f32 %v1418_v35, %v1330_v36 }
 0x1a3   : > { %v1477_v41 = vadd.f32 %v1419_v40, %v449_v39 }
 0x1a5   : > { %1509 = vst [vmem:[#allocation2 + $0x8] sm:$0xff] %v1477_v41 }
 0x1a6   : > { %v1331_v43 = vpop.f32.mrf.mxu2  ;;  %v1156_v46 = vpop.f32.mrf.mxu0 }
 0x1a7   : > { %v1420_v44 = vpop.f32.mrf.mxu3  ;;  %v1332_v45 = vadd.f32 %v1331_v43, %v1243_v42  ;;  %v1245_v47 = vpop.f32.mrf.mxu1 }
 0x1a8   : > { %v1246_v51 = vadd.f32 %v1245_v47, %v1156_v46  ;;  %v457_v47 = vld [vmem:[#allocation2 + $0x70] sm:$0xff] }
 0x1a9   : > { %v1421_v49 = vadd.f32 %v1420_v44, %v1332_v45 }
 0x1ab   : > { %v1478_v50 = vadd.f32 %v1421_v49, %v450_v48 }
 0x1ad   : > { %1510 = vst [vmem:[#allocation2 + $0x78] sm:$0xff] %v1478_v50 }
 0x1ae   : > { %v1334_v52 = vpop.f32.mrf.mxu2  ;;  %v1158_v55 = vpop.f32.mrf.mxu0 }
 0x1af   : > { %v1423_v53 = vpop.f32.mrf.mxu3  ;;  %v1335_v54 = vadd.f32 %v1334_v52, %v1246_v51  ;;  %v1247_v56 = vpop.f32.mrf.mxu1 }
 0x1b0   : > { %v1248_v60 = vadd.f32 %v1247_v56, %v1158_v55  ;;  %v458_v56 = vld [vmem:[#allocation2 + $0xc0] sm:$0xff] }
 0x1b1   : > { %v1424_v58 = vadd.f32 %v1423_v53, %v1335_v54 }
 0x1b3   : > { %v1479_v59 = vadd.f32 %v1424_v58, %v451_v57 }
 0x1b5   : > { %1511 = vst [vmem:[#allocation2 + $0x38] sm:$0xff] %v1479_v59 }
 0x1b6   : > { %v1336_v61 = vpop.f32.mrf.mxu2  ;;  %v1161_v0 = vpop.f32.mrf.mxu0 }
 0x1b7   : > { %v1425_v62 = vpop.f32.mrf.mxu3  ;;  %v1337_v63 = vadd.f32 %v1336_v61, %v1248_v60  ;;  %v1250_v1 = vpop.f32.mrf.mxu1 }
 0x1b8   : > { %v1251_v5 = vadd.f32 %v1250_v1, %v1161_v0  ;;  %v459_v1 = vld [vmem:[#allocation2 + $0xa8] sm:$0xff] }
 0x1b9   : > { %v1426_v3 = vadd.f32 %v1425_v62, %v1337_v63 }
 0x1bb   : > { %v1480_v4 = vadd.f32 %v1426_v3, %v452_v2 }
 0x1bd   : > { %1512 = vst [vmem:[#allocation2 + $0x58] sm:$0xff] %v1480_v4 }
 0x1be   : > { %v1339_v6 = vpop.f32.mrf.mxu2  ;;  %v1163_v9 = vpop.f32.mrf.mxu0 }
 0x1bf   : > { %v1428_v7 = vpop.f32.mrf.mxu3  ;;  %v1340_v8 = vadd.f32 %v1339_v6, %v1251_v5  ;;  %v1252_v10 = vpop.f32.mrf.mxu1 }
 0x1c0   : > { %v1253_v14 = vadd.f32 %v1252_v10, %v1163_v9  ;;  %v460_v10 = vld [vmem:[#allocation2 + $0xd0] sm:$0xff] }
 0x1c1   : > { %v1429_v12 = vadd.f32 %v1428_v7, %v1340_v8 }
 0x1c3   : > { %v1481_v13 = vadd.f32 %v1429_v12, %v453_v11 }
 0x1c5   : > { %1513 = vst [vmem:[#allocation2 + $0x40] sm:$0xff] %v1481_v13 }
 0x1c6   : > { %v1341_v15 = vpop.f32.mrf.mxu2  ;;  %v1166_v18 = vpop.f32.mrf.mxu0 }
 0x1c7   : > { %v1430_v16 = vpop.f32.mrf.mxu3  ;;  %v1342_v17 = vadd.f32 %v1341_v15, %v1253_v14  ;;  %v1255_v19 = vpop.f32.mrf.mxu1 }
 0x1c8   : > { %v1256_v23 = vadd.f32 %v1255_v19, %v1166_v18  ;;  %v461_v19 = vld [vmem:[#allocation2 + $0x10] sm:$0xff] }
 0x1c9   : > { %v1431_v21 = vadd.f32 %v1430_v16, %v1342_v17 }
 0x1cb   : > { %v1482_v22 = vadd.f32 %v1431_v21, %v454_v20 }
 0x1cd   : > { %1514 = vst [vmem:[#allocation2 + $0xc8] sm:$0xff] %v1482_v22 }
 0x1ce   : > { %v1344_v24 = vpop.f32.mrf.mxu2  ;;  %v1168_v27 = vpop.f32.mrf.mxu0 }
 0x1cf   : > { %v1433_v25 = vpop.f32.mrf.mxu3  ;;  %v1345_v26 = vadd.f32 %v1344_v24, %v1256_v23  ;;  %v1257_v28 = vpop.f32.mrf.mxu1 }
 0x1d0   : > { %v1258_v32 = vadd.f32 %v1257_v28, %v1168_v27  ;;  %v462_v28 = vld [vmem:[#allocation2 + $0x28] sm:$0xff] }
 0x1d1   : > { %v1434_v30 = vadd.f32 %v1433_v25, %v1345_v26 }
 0x1d3   : > { %v1483_v31 = vadd.f32 %v1434_v30, %v455_v29 }
 0x1d5   : > { %1515 = vst [vmem:[#allocation2 + $0xe0] sm:$0xff] %v1483_v31 }
 0x1d6   : > { %v1346_v33 = vpop.f32.mrf.mxu2  ;;  %v1171_v36 = vpop.f32.mrf.mxu0 }
 0x1d7   : > { %v1435_v34 = vpop.f32.mrf.mxu3  ;;  %v1347_v35 = vadd.f32 %v1346_v33, %v1258_v32  ;;  %v1260_v37 = vpop.f32.mrf.mxu1 }
 0x1d8   : > { %v1261_v41 = vadd.f32 %v1260_v37, %v1171_v36  ;;  %v463_v37 = vld [vmem:[#allocation2 + $0xa0] sm:$0xff] }
 0x1d9   : > { %v1436_v39 = vadd.f32 %v1435_v34, %v1347_v35 }
 0x1db   : > { %v1484_v40 = vadd.f32 %v1436_v39, %v456_v38 }
 0x1dd   : > { %1516 = vst [vmem:[#allocation2 + $0x90] sm:$0xff] %v1484_v40 }
 0x1de   : > { %v1349_v42 = vpop.f32.mrf.mxu2  ;;  %v1173_v45 = vpop.f32.mrf.mxu0 }
 0x1df   : > { %v1438_v43 = vpop.f32.mrf.mxu3  ;;  %v1350_v44 = vadd.f32 %v1349_v42, %v1261_v41  ;;  %v1262_v46 = vpop.f32.mrf.mxu1 }
 0x1e0   : > { %v1263_v50 = vadd.f32 %v1262_v46, %v1173_v45 }
 0x1e1   : > { %v1439_v48 = vadd.f32 %v1438_v43, %v1350_v44  ;;  %v464_v44 = vld [vmem:[#allocation2 + $0xf8] sm:$0xff] }
 0x1e3   : > { %v1485_v49 = vadd.f32 %v1439_v48, %v457_v47 }
 0x1e5   : > { %1517 = vst [vmem:[#allocation2 + $0x70] sm:$0xff] %v1485_v49 }
 0x1e6   : > { %v1351_v51 = vpop.f32.mrf.mxu2  ;;  %v1176_v54 = vpop.f32.mrf.mxu0 }
 0x1e7   : > { %v1440_v52 = vpop.f32.mrf.mxu3  ;;  %v1352_v53 = vadd.f32 %v1351_v51, %v1263_v50  ;;  %v1265_v55 = vpop.f32.mrf.mxu1 }
 0x1e8   : > { %v1266_v59 = vadd.f32 %v1265_v55, %v1176_v54 }
 0x1e9   : > { %v1441_v57 = vadd.f32 %v1440_v52, %v1352_v53  ;;  %v465_v53 = vld [vmem:[#allocation2 + $0x20] sm:$0xff] }
 0x1eb   : > { %v1486_v58 = vadd.f32 %v1441_v57, %v458_v56 }
 0x1ed   : > { %1518 = vst [vmem:[#allocation2 + $0xc0] sm:$0xff] %v1486_v58 }
 0x1ee   : > { %v1354_v60 = vpop.f32.mrf.mxu2  ;;  %v1178_v63 = vpop.f32.mrf.mxu0 }
 0x1ef   : > { %v1443_v61 = vpop.f32.mrf.mxu3  ;;  %v1355_v62 = vadd.f32 %v1354_v60, %v1266_v59  ;;  %v1267_v0 = vpop.f32.mrf.mxu1 }
 0x1f0   : > { %v1268_v4 = vadd.f32 %v1267_v0, %v1178_v63 }
 0x1f1   : > { %v1444_v2 = vadd.f32 %v1443_v61, %v1355_v62  ;;  %v466_v61 = vld [vmem:[#allocation2 + $0x98] sm:$0xff] }
 0x1f3   : > { %v1487_v3 = vadd.f32 %v1444_v2, %v459_v1 }
 0x1f5   : > { %1519 = vst [vmem:[#allocation2 + $0xa8] sm:$0xff] %v1487_v3 }
 0x1f6   : > { %v1356_v5 = vpop.f32.mrf.mxu2  ;;  %v1181_v8 = vpop.f32.mrf.mxu0 }
 0x1f7   : > { %v1445_v6 = vpop.f32.mrf.mxu3  ;;  %v1357_v7 = vadd.f32 %v1356_v5, %v1268_v4  ;;  %v1270_v9 = vpop.f32.mrf.mxu1 }
 0x1f8   : > { %v1271_v13 = vadd.f32 %v1270_v9, %v1181_v8 }
 0x1f9   : > { %v1446_v11 = vadd.f32 %v1445_v6, %v1357_v7 }
 0x1fb   : > { %v1488_v12 = vadd.f32 %v1446_v11, %v460_v10 }
 0x1fd   : > { %1520 = vst [vmem:[#allocation2 + $0xd0] sm:$0xff] %v1488_v12 }
 0x1fe   : > { %v1359_v14 = vpop.f32.mrf.mxu2  ;;  %v1183_v17 = vpop.f32.mrf.mxu0 }
 0x1ff   : > { %v1448_v15 = vpop.f32.mrf.mxu3  ;;  %v1360_v16 = vadd.f32 %v1359_v14, %v1271_v13  ;;  %v1272_v18 = vpop.f32.mrf.mxu1 }
 0x200   : > { %v1273_v22 = vadd.f32 %v1272_v18, %v1183_v17 }
 0x201   : > { %v1449_v20 = vadd.f32 %v1448_v15, %v1360_v16 }
 0x203   : > { %v1489_v21 = vadd.f32 %v1449_v20, %v461_v19 }
 0x205   : > { %1521 = vst [vmem:[#allocation2 + $0x10] sm:$0xff] %v1489_v21 }
 0x206   : > { %v1361_v23 = vpop.f32.mrf.mxu2  ;;  %v1186_v26 = vpop.f32.mrf.mxu0 }
 0x207   : > { %v1450_v24 = vpop.f32.mrf.mxu3  ;;  %v1362_v25 = vadd.f32 %v1361_v23, %v1273_v22  ;;  %v1275_v27 = vpop.f32.mrf.mxu1 }
 0x208   : > { %v1276_v31 = vadd.f32 %v1275_v27, %v1186_v26 }
 0x209   : > { %v1451_v29 = vadd.f32 %v1450_v24, %v1362_v25 }
 0x20b   : > { %v1490_v30 = vadd.f32 %v1451_v29, %v462_v28 }
 0x20d   : > { %1522 = vst [vmem:[#allocation2 + $0x28] sm:$0xff] %v1490_v30 }
 0x20e   : > { %v1364_v32 = vpop.f32.mrf.mxu2  ;;  %v1188_v35 = vpop.f32.mrf.mxu0 }
 0x20f   : > { %v1453_v33 = vpop.f32.mrf.mxu3  ;;  %v1365_v34 = vadd.f32 %v1364_v32, %v1276_v31  ;;  %v1277_v36 = vpop.f32.mrf.mxu1 }
 0x210   : > { %v1278_v40 = vadd.f32 %v1277_v36, %v1188_v35 }
 0x211   : > { %v1454_v38 = vadd.f32 %v1453_v33, %v1365_v34 }
 0x213   : > { %v1491_v39 = vadd.f32 %v1454_v38, %v463_v37 }
 0x215   : > { %1523 = vst [vmem:[#allocation2 + $0xa0] sm:$0xff] %v1491_v39 }
 0x216   : > { %v1366_v41 = vpop.f32.mrf.mxu2  ;;  %v1191_v45 = vpop.f32.mrf.mxu0 }
 0x217   : > { %v1455_v42 = vpop.f32.mrf.mxu3  ;;  %v1367_v43 = vadd.f32 %v1366_v41, %v1278_v40  ;;  %v1280_v46 = vpop.f32.mrf.mxu1 }
 0x218   : > { %v1281_v49 = vadd.f32 %v1280_v46, %v1191_v45 }
 0x219   : > { %v1456_v47 = vadd.f32 %v1455_v42, %v1367_v43 }
 0x21b   : > { %v1492_v48 = vadd.f32 %v1456_v47, %v464_v44 }
 0x21d   : > { %1524 = vst [vmem:[#allocation2 + $0xf8] sm:$0xff] %v1492_v48 }
 0x21e   : > { %v1369_v50 = vpop.f32.mrf.mxu2  ;;  %v1193_v55 = vpop.f32.mrf.mxu0 }
 0x21f   : > { %v1458_v51 = vpop.f32.mrf.mxu3  ;;  %v1370_v52 = vadd.f32 %v1369_v50, %v1281_v49  ;;  %v1282_v56 = vpop.f32.mrf.mxu1 }
 0x220   : > { %v1283_v58 = vadd.f32 %v1282_v56, %v1193_v55 }
 0x221   : > { %v1459_v54 = vadd.f32 %v1458_v51, %v1370_v52 }
 0x223   : > { %v1493_v57 = vadd.f32 %v1459_v54, %v465_v53 }
 0x225   : > { %1525 = vst [vmem:[#allocation2 + $0x20] sm:$0xff] %v1493_v57 }
 0x226   : > { %v1371_v59 = vpop.f32.mrf.mxu2 }
 0x227   : > { %v1372_v60 = vadd.f32 %v1371_v59, %v1283_v58  ;;  %v1460_v62 = vpop.f32.mrf.mxu3 }
 0x229   : > { %v1461_v63 = vadd.f32 %v1460_v62, %v1372_v60  ;;  %1530 = sbr.rel (%p2309_p13) target bundleno = 640 (0x280), region = 63 }
 0x22b   : > { %v1494_v0 = vadd.f32 %v1461_v63, %v466_v61 }
 0x22d   : > { %1526 = vst [vmem:[#allocation2 + $0x98] sm:$0xff] %v1494_v0 }
 0x22e   : > { %v1531_v1 = vld [vmem:[#allocation2 + $0xb0] sm:$0xff]  ;;  %v3046_v2 = vld [vmem:[%s3135_s2] ss:$0 sm:$0xff]  ;;  %v1533_v4 = vld [vmem:[#allocation2 + $0xd8] sm:$0xff] }
 0x22f   : > { %v1532_v3 = vld [vmem:[#allocation2] sm:$0xff]  ;;  %v1534_v5 = vld [vmem:[#allocation2 + $0x18] sm:$0xff]  ;;  %v1567_v6 = vadd.f32 %v3046_v2, %v1531_v1  ;;  %v1569_v8 = vadd.f32 %v3046_v2, %v1533_v4  ;;  %v1535_v10 = vld [vmem:[#allocation2 + $0x50] sm:$0xff] }
 0x230   : > { %v1568_v7 = vadd.f32 %v3046_v2, %v1532_v3  ;;  %v1570_v9 = vadd.f32 %v3046_v2, %v1534_v5  ;;  %v1536_v11 = vld [vmem:[#allocation2 + $0x68] sm:$0xff]  ;;  %v1537_v12 = vld [vmem:[#allocation2 + $0x30] sm:$0xff]  ;;  %v1571_v13 = vadd.f32 %v3046_v2, %v1535_v10  ;;  %v1539_v17 = vld [vmem:[#allocation2 + $0x80] sm:$0xff] }
 0x231   : > { %v1572_v14 = vadd.f32 %v3046_v2, %v1536_v11  ;;  %v1573_v15 = vadd.f32 %v3046_v2, %v1537_v12  ;;  %v1538_v16 = vld [vmem:[#allocation2 + $0x48] sm:$0xff]  ;;  %v1599_v18 = vsub.f32 0.0, %v1567_v6  ;;  %v1601_v20 = vsub.f32 0.0, %v1569_v8  ;;  %v1542_v41 = vld [vmem:[#allocation2 + $0xb8] sm:$0xff]  ;;  %v1543_v44 = vld [vmem:[#allocation2 + $0x60] sm:$0xff] }
 0x232   : > { %v1600_v19 = vsub.f32 0.0, %v1568_v7  ;;  %v1602_v21 = vsub.f32 0.0, %v1570_v9  ;;  %v1603_v22 = vsub.f32 0.0, %v1571_v13  ;;  %v1574_v25 = vadd.f32 %v3046_v2, %v1538_v16  ;;  %v1540_v31 = vld [vmem:[#allocation2 + $0x88] sm:$0xff]  ;;  %v1544_v48 = vld [vmem:[#allocation2 + $0xf0] sm:$0xff]  ;;  %v1546_v56 = vld [vmem:[#allocation2 + $0x78] sm:$0xff] }
 0x233   : > { %v1604_v23 = vsub.f32 0.0, %v1572_v14  ;;  %v1605_v24 = vsub.f32 0.0, %v1573_v15  ;;  %v1631_v26 = vmul.f32 1.442695, %v1599_v18  ;;  %v1635_v28 = vmul.f32 1.442695, %v1601_v20 }
 0x234   : > { %v1633_v27 = vmul.f32 1.442695, %v1600_v19  ;;  %v1575_v29 = vadd.f32 %v3046_v2, %v1539_v17  ;;  %v1637_v30 = vmul.f32 1.442695, %v1602_v21  ;;  %v1639_v32 = vmul.f32 1.442695, %v1603_v22 }
 0x235   : > { %2467 = vpow2.f32 %v1631_v26  ;;  %v1606_v33 = vsub.f32 0.0, %v1574_v25  ;;  %v1641_v35 = vmul.f32 1.442695, %v1604_v23  ;;  %v1643_v36 = vmul.f32 1.442695, %v1605_v24  ;;  %v1541_v40 = vld [vmem:[#allocation2 + $0xe8] sm:$0xff] }
 0x236   : > { %v1607_v34 = vsub.f32 0.0, %v1575_v29  ;;  %2469 = vpow2.f32 %v1633_v27  ;;  %v1576_v37 = vadd.f32 %v3046_v2, %v1540_v31  ;;  %v1577_v47 = vadd.f32 %v3046_v2, %v1541_v40  ;;  %v1545_v52 = vld [vmem:[#allocation2 + $0x8] sm:$0xff]  ;;  %v1547_v61 = vld [vmem:[#allocation2 + $0x38] sm:$0xff]  ;;  %v1549_v29 = vld [vmem:[#allocation2 + $0x40] sm:$0xff] }
 0x237   : > { %2471 = vpow2.f32 %v1635_v28  ;;  %v1645_v38 = vmul.f32 1.442695, %v1606_v33  ;;  %v1578_v51 = vadd.f32 %v3046_v2, %v1542_v41  ;;  %v1579_v55 = vadd.f32 %v3046_v2, %v1543_v44  ;;  %v1548_v3 = vld [vmem:[#allocation2 + $0x58] sm:$0xff]  ;;  %v1551_v41 = vld [vmem:[#allocation2 + $0xe0] sm:$0xff]  ;;  %v1552_v44 = vld [vmem:[#allocation2 + $0x90] sm:$0xff] }
 0x238   : > { %2473 = vpow2.f32 %v1637_v30  ;;  %v1647_v39 = vmul.f32 1.442695, %v1607_v34  ;;  %v1608_v43 = vsub.f32 0.0, %v1576_v37  ;;  %v1580_v60 = vadd.f32 %v3046_v2, %v1544_v48  ;;  %v1550_v37 = vld [vmem:[#allocation2 + $0xc8] sm:$0xff]  ;;  %v1553_v48 = vld [vmem:[#allocation2 + $0x70] sm:$0xff] }
 0x239   : > { %2475 = vpow2.f32 %v1639_v32  ;;  %v1609_v0 = vsub.f32 0.0, %v1577_v47  ;;  %v1581_v1 = vadd.f32 %v3046_v2, %v1545_v52  ;;  %v1610_v6 = vsub.f32 0.0, %v1578_v51  ;;  %v1554_v52 = vld [vmem:[#allocation2 + $0xc0] sm:$0xff] }
 0x23a   : > { %2477 = vpow2.f32 %v1641_v35  ;;  %v1649_v59 = vmul.f32 1.442695, %v1608_v43  ;;  %v1582_v7 = vadd.f32 %v3046_v2, %v1546_v56  ;;  %v1611_v10 = vsub.f32 0.0, %v1579_v55  ;;  %v1555_v56 = vld [vmem:[#allocation2 + $0xa8] sm:$0xff] }
 0x23b   : > { %v2468_v42 = vpop.eup %2467  ;;  %2479 = vpow2.f32 %v1643_v36  ;;  %v1583_v11 = vadd.f32 %v3046_v2, %v1547_v61  ;;  %v1612_v14 = vsub.f32 0.0, %v1580_v60  ;;  %v1584_v15 = vadd.f32 %v3046_v2, %v1548_v3  ;;  %v1556_v61 = vld [vmem:[#allocation2 + $0xd0] sm:$0xff] }
 0x23c   : > { %v2470_v45 = vpop.eup %2469  ;;  %v1695_v46 = vadd.f32 1.0, %v2468_v42  ;;  %2481 = vpow2.f32 %v1645_v38  ;;  %v1651_v18 = vmul.f32 1.442695, %v1609_v0  ;;  %v1613_v19 = vsub.f32 0.0, %v1581_v1  ;;  %v1557_v3 = vld [vmem:[#allocation2 + $0x10] sm:$0xff] }
 0x23d   : > { %v2472_v49 = vpop.eup %2471  ;;  %v1696_v50 = vadd.f32 1.0, %v2470_v45  ;;  %2483 = vpow2.f32 %v1647_v39  ;;  %v1653_v21 = vmul.f32 1.442695, %v1610_v6  ;;  %v1614_v22 = vsub.f32 0.0, %v1582_v7 }
 0x23e   : > { %v2474_v53 = vpop.eup %2473  ;;  %2485 = vrcp.f32 %v1695_v46  ;;  %v1697_v54 = vadd.f32 1.0, %v2472_v49  ;;  %v1655_v24 = vmul.f32 1.442695, %v1611_v10  ;;  %v1615_v25 = vsub.f32 0.0, %v1583_v11 }
 0x23f   : > { %v2476_v57 = vpop.eup %2475  ;;  %2487 = vrcp.f32 %v1696_v50  ;;  %v1698_v58 = vadd.f32 1.0, %v2474_v53  ;;  %v1657_v27 = vmul.f32 1.442695, %v1612_v14  ;;  %v1616_v28 = vsub.f32 0.0, %v1584_v15 }
 0x240   : > { %v2478_v62 = vpop.eup %2477  ;;  %2489 = vrcp.f32 %v1697_v54  ;;  %v1699_v63 = vadd.f32 1.0, %v2476_v57  ;;  %v1659_v31 = vmul.f32 1.442695, %v1613_v19  ;;  %v1661_v33 = vmul.f32 1.442695, %v1614_v22 }
 0x241   : > { %v2480_v4 = vpop.eup %2479  ;;  %2491 = vrcp.f32 %v1698_v58  ;;  %v1700_v5 = vadd.f32 1.0, %v2478_v62  ;;  %v1663_v35 = vmul.f32 1.442695, %v1615_v25  ;;  %v1585_v36 = vadd.f32 %v3046_v2, %v1549_v29 }
 0x242   : > { %v2482_v8 = vpop.eup %2481  ;;  %2493 = vrcp.f32 %v1699_v63  ;;  %v1701_v9 = vadd.f32 1.0, %v2480_v4  ;;  %v1665_v39 = vmul.f32 1.442695, %v1616_v28  ;;  %v1586_v43 = vadd.f32 %v3046_v2, %v1550_v37 }
 0x243   : > { %v2484_v12 = vpop.eup %2483  ;;  %2495 = vrcp.f32 %v1700_v5  ;;  %v1702_v13 = vadd.f32 1.0, %v2482_v8  ;;  %v1617_v47 = vsub.f32 0.0, %v1585_v36  ;;  %v1587_v51 = vadd.f32 %v3046_v2, %v1551_v41 }
 0x244   : > { %v2486_v16 = vpop.eup %2485  ;;  %2497 = vrcp.f32 %v1701_v9  ;;  %v1703_v17 = vadd.f32 1.0, %v2484_v12  ;;  %v1588_v55 = vadd.f32 %v3046_v2, %v1552_v44  ;;  %v1589_v60 = vadd.f32 %v3046_v2, %v1553_v48 }
 0x245   : > { %v2488_v20 = vpop.eup %2487  ;;  %1759 = vst [vmem:[%s2877_s30] sm:$0xff] %v2486_v16  ;;  %2499 = vrcp.f32 %v1702_v13  ;;  %v1667_v0 = vmul.f32 1.442695, %v1617_v47  ;;  %v1590_v1 = vadd.f32 %v3046_v2, %v1554_v52  ;;  %v1619_v6 = vsub.f32 0.0, %v1587_v51  ;;  %v1562_v47 = vld [vmem:[#allocation2 + $0x98] sm:$0xff] }
 0x246   : > { %v2490_v23 = vpop.eup %2489  ;;  %1760 = vst [vmem:[%s2877_s30 + $0x8] sm:$0xff] %v2488_v20  ;;  %2501 = vrcp.f32 %v1703_v17  ;;  %v1591_v7 = vadd.f32 %v3046_v2, %v1555_v56  ;;  %v1620_v10 = vsub.f32 0.0, %v1588_v55  ;;  %v1592_v11 = vadd.f32 %v3046_v2, %v1556_v61 }
 0x247   : > { %v2492_v26 = vpop.eup %2491  ;;  %1761 = vst [vmem:[%s2877_s30 + $0x10] sm:$0xff] %v2490_v23  ;;  %2503 = vpow2.f32 %v1649_v59  ;;  %v1618_v59 = vsub.f32 0.0, %v1586_v43  ;;  %v1621_v14 = vsub.f32 0.0, %v1589_v60  ;;  %v1593_v15 = vadd.f32 %v3046_v2, %v1557_v3  ;;  %v1561_v43 = vld [vmem:[#allocation2 + $0x20] sm:$0xff] }
 0x248   : > { %v2494_v30 = vpop.eup %2493  ;;  %1762 = vst [vmem:[%s2877_s30 + $0x18] sm:$0xff] %v2492_v26  ;;  %2505 = vpow2.f32 %v1651_v18  ;;  %v1622_v19 = vsub.f32 0.0, %v1590_v1  ;;  %v1623_v22 = vsub.f32 0.0, %v1591_v7  ;;  %v1624_v25 = vsub.f32 0.0, %v1592_v11 }
 0x249   : > { %v2496_v32 = vpop.eup %2495  ;;  %1763 = vst [vmem:[%s2877_s30 + $0x20] sm:$0xff] %v2494_v30  ;;  %2507 = vpow2.f32 %v1653_v21  ;;  %v1669_v18 = vmul.f32 1.442695, %v1618_v59  ;;  %v1671_v21 = vmul.f32 1.442695, %v1619_v6  ;;  %v1625_v28 = vsub.f32 0.0, %v1593_v15 }
 0x24a   : > { %v2498_v34 = vpop.eup %2497  ;;  %1764 = vst [vmem:[%s2877_s30 + $0x28] sm:$0xff] %v2496_v32  ;;  %2509 = vpow2.f32 %v1655_v24  ;;  %v1673_v24 = vmul.f32 1.442695, %v1620_v10  ;;  %v1677_v30 = vmul.f32 1.442695, %v1622_v19 }
 0x24b   : > { %v2500_v38 = vpop.eup %2499  ;;  %1765 = vst [vmem:[%s2877_s30 + $0x30] sm:$0xff] %v2498_v34  ;;  %2511 = vpow2.f32 %v1657_v27  ;;  %v1675_v27 = vmul.f32 1.442695, %v1621_v14  ;;  %v1679_v32 = vmul.f32 1.442695, %v1623_v22 }
 0x24c   : > { %v2502_v40 = vpop.eup %2501  ;;  %1766 = vst [vmem:[%s2877_s30 + $0x38] sm:$0xff] %v2500_v38  ;;  %2513 = vpow2.f32 %v1659_v31  ;;  %v1681_v34 = vmul.f32 1.442695, %v1624_v25  ;;  %v1683_v37 = vmul.f32 1.442695, %v1625_v28  ;;  %v1559_v38 = vld [vmem:[#allocation2 + $0xa0] sm:$0xff] }
 0x24d   : > { %v2504_v42 = vpop.eup %2503  ;;  %1767 = vst [vmem:[%s2877_s30 + $0x40] sm:$0xff] %v2502_v40  ;;  %2515 = vpow2.f32 %v1661_v33  ;;  %v1560_v40 = vld [vmem:[#allocation2 + $0xf8] sm:$0xff] }
 0x24e   : > { %v2506_v45 = vpop.eup %2505  ;;  %v1704_v46 = vadd.f32 1.0, %v2504_v42  ;;  %2517 = vpow2.f32 %v1663_v35  ;;  %v1558_v35 = vld [vmem:[#allocation2 + $0x28] sm:$0xff] }
 0x24f   : > { %v2508_v49 = vpop.eup %2507  ;;  %v1705_v50 = vadd.f32 1.0, %v2506_v45  ;;  %2519 = vpow2.f32 %v1665_v39  ;;  %v1594_v42 = vadd.f32 %v3046_v2, %v1558_v35 }
 0x250   : > { %v2510_v53 = vpop.eup %2509  ;;  %2521 = vrcp.f32 %v1704_v46  ;;  %v1706_v54 = vadd.f32 1.0, %v2508_v49  ;;  %v1595_v46 = vadd.f32 %v3046_v2, %v1559_v38 }
 0x251   : > { %v2512_v57 = vpop.eup %2511  ;;  %2523 = vrcp.f32 %v1705_v50  ;;  %v1707_v58 = vadd.f32 1.0, %v2510_v53  ;;  %v1596_v50 = vadd.f32 %v3046_v2, %v1560_v40  ;;  %v1597_v53 = vadd.f32 %v3046_v2, %v1561_v43 }
 0x252   : > { %v2514_v62 = vpop.eup %2513  ;;  %2525 = vrcp.f32 %v1706_v54  ;;  %v1708_v63 = vadd.f32 1.0, %v2512_v57  ;;  %v1626_v56 = vsub.f32 0.0, %v1594_v42  ;;  %v1598_v57 = vadd.f32 %v3046_v2, %v1562_v47 }
 0x253   : > { %v2516_v4 = vpop.eup %2515  ;;  %2527 = vrcp.f32 %v1707_v58  ;;  %v1709_v5 = vadd.f32 1.0, %v2514_v62  ;;  %v1627_v60 = vsub.f32 0.0, %v1595_v46  ;;  %v1629_v3 = vsub.f32 0.0, %v1597_v53 }
 0x254   : > { %v2518_v8 = vpop.eup %2517  ;;  %2529 = vrcp.f32 %v1708_v63  ;;  %v1710_v9 = vadd.f32 1.0, %v2516_v4  ;;  %v1628_v63 = vsub.f32 0.0, %v1596_v50  ;;  %v1685_v6 = vmul.f32 1.442695, %v1626_v56 }
 0x255   : > { %v2520_v12 = vpop.eup %2519  ;;  %2531 = vrcp.f32 %v1709_v5  ;;  %v1711_v13 = vadd.f32 1.0, %v2518_v8  ;;  %v1630_v2 = vsub.f32 0.0, %v1598_v57 }
 0x256   : > { %v2522_v16 = vpop.eup %2521  ;;  %2533 = vrcp.f32 %v1710_v9  ;;  %v1712_v17 = vadd.f32 1.0, %v2520_v12  ;;  %v1687_v9 = vmul.f32 1.442695, %v1627_v60  ;;  %v1689_v11 = vmul.f32 1.442695, %v1628_v63 }
 0x257   : > { %v2524_v20 = vpop.eup %2523  ;;  %1768 = vst [vmem:[%s2877_s30 + $0x48] sm:$0xff] %v2522_v16  ;;  %2535 = vrcp.f32 %v1711_v13  ;;  %v1691_v13 = vmul.f32 1.442695, %v1629_v3  ;;  %v1693_v15 = vmul.f32 1.442695, %v1630_v2 }
 0x258   : > { %v2526_v23 = vpop.eup %2525  ;;  %1769 = vst [vmem:[%s2877_s30 + $0x50] sm:$0xff] %v2524_v20  ;;  %2537 = vrcp.f32 %v1712_v17 }
 0x259   : > { %v2528_v26 = vpop.eup %2527  ;;  %1770 = vst [vmem:[%s2877_s30 + $0x58] sm:$0xff] %v2526_v23  ;;  %2539 = vpow2.f32 %v1667_v0 }
 0x25a   : > { %v2530_v29 = vpop.eup %2529  ;;  %1771 = vst [vmem:[%s2877_s30 + $0x60] sm:$0xff] %v2528_v26  ;;  %2541 = vpow2.f32 %v1669_v18 }
 0x25b   : > { %v2532_v31 = vpop.eup %2531  ;;  %1772 = vst [vmem:[%s2877_s30 + $0x68] sm:$0xff] %v2530_v29  ;;  %2543 = vpow2.f32 %v1671_v21 }
 0x25c   : > { %v2534_v33 = vpop.eup %2533  ;;  %1773 = vst [vmem:[%s2877_s30 + $0x70] sm:$0xff] %v2532_v31  ;;  %2545 = vpow2.f32 %v1673_v24 }
 0x25d   : > { %v2536_v36 = vpop.eup %2535  ;;  %1774 = vst [vmem:[%s2877_s30 + $0x78] sm:$0xff] %v2534_v33  ;;  %2547 = vpow2.f32 %v1675_v27 }
 0x25e   : > { %v2538_v39 = vpop.eup %2537  ;;  %1775 = vst [vmem:[%s2877_s30 + $0x80] sm:$0xff] %v2536_v36  ;;  %2549 = vpow2.f32 %v1677_v30 }
 0x25f   : > { %v2540_v41 = vpop.eup %2539  ;;  %1776 = vst [vmem:[%s2877_s30 + $0x88] sm:$0xff] %v2538_v39  ;;  %2551 = vpow2.f32 %v1679_v32 }
 0x260   : > { %v2542_v44 = vpop.eup %2541  ;;  %v1713_v45 = vadd.f32 1.0, %v2540_v41  ;;  %2553 = vpow2.f32 %v1681_v34 }
 0x261   : > { %v2544_v48 = vpop.eup %2543  ;;  %v1714_v49 = vadd.f32 1.0, %v2542_v44  ;;  %2555 = vpow2.f32 %v1683_v37 }
 0x262   : > { %v2546_v51 = vpop.eup %2545  ;;  %2557 = vrcp.f32 %v1713_v45  ;;  %v1715_v52 = vadd.f32 1.0, %v2544_v48 }
 0x263   : > { %v2548_v54 = vpop.eup %2547  ;;  %2559 = vrcp.f32 %v1714_v49  ;;  %v1716_v55 = vadd.f32 1.0, %v2546_v51 }
 0x264   : > { %v2550_v58 = vpop.eup %2549  ;;  %2561 = vrcp.f32 %v1715_v52  ;;  %v1717_v59 = vadd.f32 1.0, %v2548_v54 }
 0x265   : > { %v2552_v61 = vpop.eup %2551  ;;  %2563 = vrcp.f32 %v1716_v55  ;;  %v1718_v62 = vadd.f32 1.0, %v2550_v58 }
 0x266   : > { %v2554_v0 = vpop.eup %2553  ;;  %2565 = vrcp.f32 %v1717_v59  ;;  %v1719_v1 = vadd.f32 1.0, %v2552_v61 }
 0x267   : > { %v2556_v4 = vpop.eup %2555  ;;  %2567 = vrcp.f32 %v1718_v62  ;;  %v1720_v5 = vadd.f32 1.0, %v2554_v0 }
 0x268   : > { %v2558_v7 = vpop.eup %2557  ;;  %2569 = vrcp.f32 %v1719_v1  ;;  %v1721_v8 = vadd.f32 1.0, %v2556_v4 }
 0x269   : > { %v2560_v10 = vpop.eup %2559  ;;  %1777 = vst [vmem:[%s2877_s30 + $0x90] sm:$0xff] %v2558_v7  ;;  %2571 = vrcp.f32 %v1720_v5 }
 0x26a   : > { %v2562_v12 = vpop.eup %2561  ;;  %1778 = vst [vmem:[%s2877_s30 + $0x98] sm:$0xff] %v2560_v10  ;;  %2573 = vrcp.f32 %v1721_v8 }
 0x26b   : > { %v2564_v14 = vpop.eup %2563  ;;  %1779 = vst [vmem:[%s2877_s30 + $0xa0] sm:$0xff] %v2562_v12  ;;  %2575 = vpow2.f32 %v1685_v6 }
 0x26c   : > { %v2566_v16 = vpop.eup %2565  ;;  %1780 = vst [vmem:[%s2877_s30 + $0xa8] sm:$0xff] %v2564_v14  ;;  %2577 = vpow2.f32 %v1687_v9 }
 0x26d   : > { %v2568_v17 = vpop.eup %2567  ;;  %1781 = vst [vmem:[%s2877_s30 + $0xb0] sm:$0xff] %v2566_v16  ;;  %2579 = vpow2.f32 %v1689_v11 }
 0x26e   : > { %v2570_v18 = vpop.eup %2569  ;;  %1782 = vst [vmem:[%s2877_s30 + $0xb8] sm:$0xff] %v2568_v17  ;;  %2581 = vpow2.f32 %v1691_v13 }
 0x26f   : > { %v2572_v19 = vpop.eup %2571  ;;  %1783 = vst [vmem:[%s2877_s30 + $0xc0] sm:$0xff] %v2570_v18  ;;  %2583 = vpow2.f32 %v1693_v15 }
 0x270   : > { %v2574_v20 = vpop.eup %2573  ;;  %1784 = vst [vmem:[%s2877_s30 + $0xc8] sm:$0xff] %v2572_v19 }
 0x271   : > { %v2576_v21 = vpop.eup %2575  ;;  %1785 = vst [vmem:[%s2877_s30 + $0xd0] sm:$0xff] %v2574_v20 }
 0x272   : > { %v2578_v22 = vpop.eup %2577  ;;  %v1722_v23 = vadd.f32 1.0, %v2576_v21 }
 0x273   : > { %v2580_v24 = vpop.eup %2579  ;;  %v1723_v25 = vadd.f32 1.0, %v2578_v22 }
 0x274   : > { %v2582_v26 = vpop.eup %2581  ;;  %2585 = vrcp.f32 %v1722_v23  ;;  %v1724_v27 = vadd.f32 1.0, %v2580_v24 }
 0x275   : > { %v2584_v28 = vpop.eup %2583  ;;  %2587 = vrcp.f32 %v1723_v25  ;;  %v1725_v29 = vadd.f32 1.0, %v2582_v26 }
 0x276   : > { %2589 = vrcp.f32 %v1724_v27  ;;  %v1726_v30 = vadd.f32 1.0, %v2584_v28 }
 0x277   : > { %2591 = vrcp.f32 %v1725_v29 }
 0x278   : > { %2593 = vrcp.f32 %v1726_v30 }
 0x27a   : > { %v2586_v31 = vpop.eup %2585 }
 0x27b   : > { %v2588_v32 = vpop.eup %2587  ;;  %1786 = vst [vmem:[%s2877_s30 + $0xd8] sm:$0xff] %v2586_v31 }
 0x27c   : > { %v2590_v33 = vpop.eup %2589  ;;  %1787 = vst [vmem:[%s2877_s30 + $0xe0] sm:$0xff] %v2588_v32 }
 0x27d   : > { %v2592_v34 = vpop.eup %2591  ;;  %1788 = vst [vmem:[%s2877_s30 + $0xe8] sm:$0xff] %v2590_v33 }
 0x27e   : > { %v2594_v35 = vpop.eup %2593  ;;  %1789 = vst [vmem:[%s2877_s30 + $0xf0] sm:$0xff] %v2592_v34 }
 0x27f   : > { %1790 = vst [vmem:[%s2877_s30 + $0xf8] sm:$0xff] %v2594_v35 }
 0x280 PF: > { %s13_s18 = sadd.s32 1, %s2649_s18   ;;  %s3137_s12 = smov %s2629_s13 }
 0x281   : > { %p10_p0 = scmp.ge.s32.totalorder %s13_s18, 6   ;;  %s3138_s13 = smov %s2723_s25 }
 0x282   : > { %s3139_s14 = smov %s2641_s16  ;;  %s3140_s15 = smov %s2645_s17 }
 0x283   : > { %s3141_s16 = smov %s3144_s19  ;;  %s3142_s17 = smov %s3148_s20 }
 0x284   :  { %12 = sbr.rel (!%p10_p0) target bundleno = 4 (0x4), region = 104 }

</bundles_post_ra>
